<compile_context>
chip_gen: v7x
topology: tpu7x:2x2x1
jax: 0.10.0
libtpu: 0.0.40
codegen_flags: <defaults>
</compile_context>

<pallas_src>
import functools

import jax
import jax.numpy as jnp
from jax import lax
from jax.experimental import pallas as pl
from jax.experimental.pallas import tpu as pltpu


DILATIONS = (1, 2, 4, 8)
PAD = max(DILATIONS)          # one shared halo covers every dilation
LANE = 128


def _round_up(x, m):
    return ((x + m - 1) // m) * m


# ----------------------------------------------------------------------------
# Trace-time hardware / feature probes (cached; safe fallbacks)
# ----------------------------------------------------------------------------
@functools.lru_cache(maxsize=None)
def _physical_vmem_bytes() -> int:
    """Per-core VMEM bytes, or 0 if the query is unavailable."""
    try:
        return int(pltpu.get_tpu_info().vmem_capacity_bytes)
    except Exception:
        return 0


@functools.lru_cache(maxsize=None)
def _buffered_1_supported() -> bool:
    """Does this build accept + correctly run BlockSpec(pipeline_mode=Buffered(1))?"""
    try:
        def _probe_kernel(x_ref, w_ref, o_ref):
            o_ref[...] = x_ref[...] + w_ref[...]

        gs = pltpu.PrefetchScalarGridSpec(
            num_scalar_prefetch=0,
            grid=(2,),
            in_specs=[
                pl.BlockSpec((8, 128), lambda i: (i, 0)),
                pl.BlockSpec((8, 128), lambda i: (0, 0),        # grid-invariant
                             pipeline_mode=pl.Buffered(1)),
            ],
            out_specs=pl.BlockSpec((8, 128), lambda i: (i, 0)),
        )
        probe = pl.pallas_call(
            _probe_kernel,
            out_shape=jax.ShapeDtypeStruct((16, 128), jnp.float32),
            grid_spec=gs,
            compiler_params=pltpu.CompilerParams(
                dimension_semantics=("parallel",)),
        )
        res = jax.block_until_ready(
            probe(jnp.ones((16, 128), jnp.float32),
                  jnp.full((8, 128), 2.0, jnp.float32)))
        return bool(jnp.all(res == 3.0))
    except Exception:
        return False


def _vmem_limit_bytes(H: int, W: int, Cp: int, w_bufs: int) -> int:
    """Shape- and generation-aware VMEM limit for the fused Dblock kernel."""
    Hp, Wp = H + 2 * PAD, W + 2 * PAD
    F32, BF16 = 4, 2
    io_block = H * W * Cp * F32                       # one (1,H,W,Cp) f32 block
    weights = 4 * 3 * (3 * Cp) * Cp * BF16            # four bf16 weight blocks
    biases = 4 * Cp * F32
    scratch = (Hp * Wp * Cp * F32                     # pad_ref (f32)
               + Hp * W * (3 * Cp) * BF16             # cols_ref (bf16)
               + H * W * Cp * F32)                    # acc_ref (f32)
    needed = (2 * io_block                            # x, double-buffered
              + 2 * io_block                          # out, double-buffered
              + w_bufs * (weights + biases)
              + scratch)
    needed = int(needed * 1.25) + (4 << 20)           # compiler-temp headroom

    phys = _physical_vmem_bytes()
    if phys > 0:
        cap = (phys * 7) // 8      # ~112 MiB on v5e/v6e, ~56 MiB on v7x
    else:
        cap = 32 << 20             # unknown HW: previously proven-safe limit
    return min(cap, max(32 << 20, needed))


# ----------------------------------------------------------------------------
# Fused Pallas kernel: 4 dilated convs + ReLUs + residual sum, one image/step
# ----------------------------------------------------------------------------
def _make_fused_dblock_kernel(H: int, W: int, Cp: int):
    HW = H * W
    Hp, Wp = H + 2 * PAD, W + 2 * PAD

    def kernel(x_ref,
               w1_ref, b1_ref, w2_ref, b2_ref, w3_ref, b3_ref, w4_ref, b4_ref,
               out_ref, pad_ref, cols_ref, acc_ref):
        # ---- Zero ONLY the halo strips of the padded activation scratch. ----
        # The interior [PAD:PAD+H, PAD:PAD+W] is fully rewritten before every
        # conv, so zeroing it is wasted vst traffic. Zero-once under
        # pl.when(program_id==0) is unsafe with a "parallel" batch axis on
        # multi-TensorCore parts (private per-core scratch, only one core runs
        # step 0), so the strips are re-zeroed every step (core-safe).
        zero_tb = jnp.zeros((PAD, Wp, Cp), jnp.float32)
        pad_ref[0:PAD] = zero_tb                         # top halo rows
        pad_ref[PAD + H:Hp] = zero_tb                    # bottom halo rows
        zero_lr = jnp.zeros((H, PAD, Cp), jnp.float32)
        pad_ref[PAD:PAD + H, 0:PAD, :] = zero_lr         # left halo cols
        pad_ref[PAD:PAD + H, PAD + W:Wp, :] = zero_lr    # right halo cols

        x = x_ref[0]                       # (H, W, Cp), lane-dense, f32
        out_ref[0] = x                     # residual sum starts at x
        cur = x

        w_refs = (w1_ref, w2_ref, w3_ref, w4_ref)
        b_refs = (b1_ref, b2_ref, b3_ref, b4_ref)

        for w_ref, b_ref, d in zip(w_refs, b_refs, DILATIONS):
            # Current activation into the interior of the padded buffer
            # (offset PAD=8 is sublane-aligned for f32 -> plain store).
            pad_ref[PAD:PAD + H, PAD:PAD + W, :] = cur

            # Partial im2col over kw, cast to bf16 (MXU operand).
            # Only the rows actually read by the kh-shifted slices below,
            # [PAD-d, PAD+H+d), are written (row-limited copies).
            r0, r1 = PAD - d, PAD + H + d
            for kw in range(3):
                w0 = PAD + (kw - 1) * d
                cols_ref[r0:r1, :, kw * Cp:(kw + 1) * Cp] = (
                    pad_ref[r0:r1, w0:w0 + W, :].astype(jnp.bfloat16))

            # 3 MXU matmuls, each with a 3*Cp-deep contraction; bf16 operands,
            # f32 accumulation. kh==0 overwrites the accumulator directly
            # (no bias-broadcast init).
            for kh in range(3):
                h0 = PAD + (kh - 1) * d
                lhs = cols_ref[h0:h0 + H].reshape(HW, 3 * Cp)     # bf16
                part = jnp.dot(lhs, w_ref[kh],
                               preferred_element_type=jnp.float32)
                if kh == 0:
                    acc_ref[...] = part
                else:
                    acc_ref[...] += part

            # Bias folded into the ReLU epilogue (free in the VPU max).
            cur = jnp.maximum(acc_ref[...] + b_ref[...], 0.0).reshape(H, W, Cp)
            out_ref[0] += cur              # fused residual accumulation

    return kernel


# ----------------------------------------------------------------------------
# Pallas wrapper
# ----------------------------------------------------------------------------
def _dblock_pallas(x_nhwc_p, ws, bs):
    N, H, W, Cp = x_nhwc_p.shape
    Hp, Wp = H + 2 * PAD, W + 2 * PAD
    HW = H * W

    kernel = _make_fused_dblock_kernel(H, W, Cp)

    # Weights/biases are grid-invariant -> single-buffer them when supported
    # (mandatory at real D-LinkNet widths to fit v7x's 64 MiB VMEM).
    if _buffered_1_supported():
        w_bufs = 1
        w_spec = pl.BlockSpec((3, 3 * Cp, Cp), lambda n: (0, 0, 0),
                              pipeline_mode=pl.Buffered(1))
        b_spec = pl.BlockSpec((1, Cp), lambda n: (0, 0),
                              pipeline_mode=pl.Buffered(1))
    else:
        w_bufs = 2
        w_spec = pl.BlockSpec((3, 3 * Cp, Cp), lambda n: (0, 0, 0))
        b_spec = pl.BlockSpec((1, Cp), lambda n: (0, 0))

    in_specs = [pl.BlockSpec((1, H, W, Cp), lambda n: (n, 0, 0, 0))]
    for _ in range(4):
        in_specs += [w_spec, b_spec]

    grid_spec = pltpu.PrefetchScalarGridSpec(
        num_scalar_prefetch=0,
        grid=(N,),
        in_specs=in_specs,
        out_specs=pl.BlockSpec((1, H, W, Cp), lambda n: (n, 0, 0, 0)),
        scratch_shapes=[
            pltpu.VMEM((Hp, Wp, Cp), jnp.float32),       # halo'd activation
            pltpu.VMEM((Hp, W, 3 * Cp), jnp.bfloat16),   # kw-im2col operand
            pltpu.VMEM((HW, Cp), jnp.float32),           # f32 accumulator
        ],
    )

    return pl.pallas_call(
        kernel,
        out_shape=jax.ShapeDtypeStruct((N, H, W, Cp), jnp.float32),
        grid_spec=grid_spec,
        compiler_params=pltpu.CompilerParams(
            dimension_semantics=("parallel",),
            vmem_limit_bytes=_vmem_limit_bytes(H, W, Cp, w_bufs),
        ),
    )(x_nhwc_p, ws[0], bs[0], ws[1], bs[1], ws[2], bs[2], ws[3], bs[3])


@jax.jit
def dblock_forward(x_nchw, params):
    """Dblock forward. x_nchw: (N, C, H, W) f32 (PyTorch convention)."""
    N, C, H, W = x_nchw.shape
    Cp = _round_up(C, LANE)

    # Layout requirements for the layout-preserving (H,W,3Cp)->(HW,3Cp)
    # reshape and aligned halo/interior stores (W % 16 == 0 is ideal for the
    # bf16 im2col operand; W % 8 == 0 is required for the f32 path).
    assert W % 8 == 0, f"W={W} must be a multiple of 8"
    assert Cp % LANE == 0

    # Small-C deployments (like this C=4 demo) pay ~(128/C)x redundant MACs on
    # the MXU due to the lane pad; accepted knowingly -- at real D-LinkNet
    # width (C=512) the pad is a no-op.
    x = jnp.transpose(x_nchw, (0, 2, 3, 1))                  # NCHW -> NHWC
    if Cp != C:                                              # lane-dense pad
        x = jnp.pad(x, ((0, 0), (0, 0), (0, 0), (0, Cp - C)))

    def prep_w(w):   # HWIO (3,3,C,C) -> bf16 (3, 3*Cp, Cp), [kh, kw*Cp+ci, co]
        if Cp != C:
            w = jnp.pad(w, ((0, 0), (0, 0), (0, Cp - C), (0, Cp - C)))
        return w.reshape(3, 3 * Cp, Cp).astype(jnp.bfloat16)

    def prep_b(b):
        if Cp != C:
            b = jnp.pad(b, ((0, Cp - C),))
        return b.reshape(1, Cp)

    ws = [prep_w(params[f"w{i}"]) for i in (1, 2, 3, 4)]
    bs = [prep_b(params[f"b{i}"]) for i in (1, 2, 3, 4)]

    out = _dblock_pallas(x, ws, bs)
    out = out[..., :C]
    return jnp.transpose(out, (0, 3, 1, 2))                  # NHWC -> NCHW


# ----------------------------------------------------------------------------
# Pure-JAX references (for verification)
# ----------------------------------------------------------------------------
def _ref_conv_relu(x_nhwc, w_hwio, bias, dilation, operand_dtype):
    y = lax.conv_general_dilated(
        x_nhwc.astype(operand_dtype), w_hwio.astype(operand_dtype),
        window_strides=(1, 1),
        padding=((dilation, dilation), (dilation, dilation)),
        rhs_dilation=(dilation, dilation),
        dimension_numbers=("NHWC", "HWIO", "NHWC"),
        preferred_element_type=jnp.float32,
    )
    return jax.nn.relu(y + bias)


def dblock_reference(x_nchw, params, operand_dtype=jnp.float32):
    """operand_dtype=bfloat16 mirrors the kernel's MXU precision
    (bf16 operands, f32 accumulation, f32 bias/ReLU/residual)."""
    x = jnp.transpose(x_nchw, (0, 2, 3, 1))
    d1 = _ref_conv_relu(x,  params["w1"], params["b1"], 1, operand_dtype)
    d2 = _ref_conv_relu(d1, params["w2"], params["b2"], 2, operand_dtype)
    d3 = _ref_conv_relu(d2, params["w3"], params["b3"], 4, operand_dtype)
    d4 = _ref_conv_relu(d3, params["w4"], params["b4"], 8, operand_dtype)
    out = x + d1 + d2 + d3 + d4
    return jnp.transpose(out, (0, 3, 1, 2))


# ----------------------------------------------------------------------------
# Main
# ----------------------------------------------------------------------------
if __name__ == "__main__":
    # Warm the trace-time probes before jit tracing.
    _ = _physical_vmem_bytes()
    _ = _buffered_1_supported()

    N, C, H, W = 2, 4, 16, 16
    key = jax.random.PRNGKey(0)
    kx, k1, k2, k3, k4 = jax.random.split(key, 5)

    x = jax.random.normal(kx, (N, C, H, W), dtype=jnp.float32)

    # Conv2d weights: PyTorch (Cout, Cin, 3, 3) -> HWIO (3, 3, Cin, Cout).
    # Biases are zero-initialized per the module's __init__.
    def make_w(k):
        w_oihw = jax.random.normal(k, (C, C, 3, 3), dtype=jnp.float32) * 0.1
        return jnp.transpose(w_oihw, (2, 3, 1, 0))

    params = {
        "w1": make_w(k1), "b1": jnp.zeros((C,), jnp.float32),
        "w2": make_w(k2), "b2": jnp.zeros((C,), jnp.float32),
        "w3": make_w(k3), "b3": jnp.zeros((C,), jnp.float32),
        "w4": make_w(k4), "b4": jnp.zeros((C,), jnp.float32),
    }

    out = jax.block_until_ready(dblock_forward(x, params))

    # Tight check against the precision-matched reference (bf16 MXU operands,
    # f32 accumulation), loose check against pure-f32 math.
    ref_matched = jax.block_until_ready(
        dblock_reference(x, params, operand_dtype=jnp.bfloat16))
    ref_f32 = jax.block_until_ready(dblock_reference(x, params))

    assert out.shape == (N, C, H, W), out.shape
    assert jnp.allclose(out, ref_matched, atol=2e-3, rtol=2e-3), (
        float(jnp.max(jnp.abs(out - ref_matched))))
    assert jnp.allclose(out, ref_f32, atol=5e-2, rtol=5e-2), (
        float(jnp.max(jnp.abs(out - ref_f32))))

    print("KERNEL_OK")
</pallas_src>

<mosaic_0001>
module attributes {stable_mosaic.version = 11 : i64} {
  func.func @_probe_kernel(%arg0: i32, %arg1: memref<8x128xf32, #tpu.memory_space<vmem>>, %arg2: memref<8x128xf32, #tpu.memory_space<vmem>>, %arg3: memref<8x128xf32, #tpu.memory_space<vmem>>) attributes {dimension_semantics = [#tpu.dimension_semantics<parallel>], iteration_bounds = array<i64: 2>, scalar_prefetch = 0 : i64, scratch_operands = 0 : i64, tpu.core_type = #tpu.core_type<tc>, window_params = [{transform_indices = @transform_0, window_bounds = array<i64: 8, 128>}, {pipeline_mode = #tpu.pipeline_mode<synchronous>, transform_indices = @transform_1, window_bounds = array<i64: 8, 128>}, {transform_indices = @transform_2, window_bounds = array<i64: 8, 128>}]} {
    %c0 = arith.constant 0 : index
    %c0_0 = arith.constant 0 : index
    %0 = vector.load %arg1[%c0, %c0_0] : memref<8x128xf32, #tpu.memory_space<vmem>>, vector<8x128xf32>
    %c0_1 = arith.constant 0 : index
    %c0_2 = arith.constant 0 : index
    %1 = vector.load %arg2[%c0_1, %c0_2] : memref<8x128xf32, #tpu.memory_space<vmem>>, vector<8x128xf32>
    %2 = arith.addf %0, %1 : vector<8x128xf32>
    %c0_3 = arith.constant 0 : index
    %c0_4 = arith.constant 0 : index
    %3 = vector.load %arg3[%c0_3, %c0_4] : memref<8x128xf32, #tpu.memory_space<vmem>>, vector<8x128xf32>
    tpu.vector_store %arg3[%c0_3, %c0_4], %2 {strides = array<i32>} : memref<8x128xf32, #tpu.memory_space<vmem>>, vector<8x128xf32>,
    return
  }
  func.func @transform_0(%arg0: i32) -> (i32, i32) {
    %c0_i32 = arith.constant 0 : i32
    %c0_i32_0 = arith.constant 0 : i32
    return %arg0, %c0_i32 : i32, i32
  }
  func.func @transform_1(%arg0: i32) -> (i32, i32) {
    %c0_i32 = arith.constant 0 : i32
    %c0_i32_0 = arith.constant 0 : i32
    %c0_i32_1 = arith.constant 0 : i32
    return %c0_i32, %c0_i32_0 : i32, i32
  }
  func.func @transform_2(%arg0: i32) -> (i32, i32) {
    %c0_i32 = arith.constant 0 : i32
    %c0_i32_0 = arith.constant 0 : i32
    return %arg0, %c0_i32 : i32, i32
  }
}

module attributes {stable_mosaic.version = 11 : i64} {
  func.func @kernel(%arg0: i32, %arg1: memref<1x16x16x128xf32, #tpu.memory_space<vmem>>, %arg2: memref<3x384x128xbf16, #tpu.memory_space<vmem>>, %arg3: memref<1x128xf32, #tpu.memory_space<vmem>>, %arg4: memref<3x384x128xbf16, #tpu.memory_space<vmem>>, %arg5: memref<1x128xf32, #tpu.memory_space<vmem>>, %arg6: memref<3x384x128xbf16, #tpu.memory_space<vmem>>, %arg7: memref<1x128xf32, #tpu.memory_space<vmem>>, %arg8: memref<3x384x128xbf16, #tpu.memory_space<vmem>>, %arg9: memref<1x128xf32, #tpu.memory_space<vmem>>, %arg10: memref<1x16x16x128xf32, #tpu.memory_space<vmem>>, %arg11: memref<32x32x128xf32, #tpu.memory_space<vmem>>, %arg12: memref<32x16x384xbf16, #tpu.memory_space<vmem>>, %arg13: memref<256x128xf32, #tpu.memory_space<vmem>>) attributes {dimension_semantics = [#tpu.dimension_semantics<parallel>], iteration_bounds = array<i64: 2>, scalar_prefetch = 0 : i64, scratch_operands = 3 : i64, tpu.core_type = #tpu.core_type<tc>, window_params = [{transform_indices = @transform_0, window_bounds = array<i64: 1, 16, 16, 128>}, {pipeline_mode = #tpu.pipeline_mode<synchronous>, transform_indices = @transform_1, window_bounds = array<i64: 3, 384, 128>}, {pipeline_mode = #tpu.pipeline_mode<synchronous>, transform_indices = @transform_2, window_bounds = array<i64: 1, 128>}, {pipeline_mode = #tpu.pipeline_mode<synchronous>, transform_indices = @transform_3, window_bounds = array<i64: 3, 384, 128>}, {pipeline_mode = #tpu.pipeline_mode<synchronous>, transform_indices = @transform_4, window_bounds = array<i64: 1, 128>}, {pipeline_mode = #tpu.pipeline_mode<synchronous>, transform_indices = @transform_5, window_bounds = array<i64: 3, 384, 128>}, {pipeline_mode = #tpu.pipeline_mode<synchronous>, transform_indices = @transform_6, window_bounds = array<i64: 1, 128>}, {pipeline_mode = #tpu.pipeline_mode<synchronous>, transform_indices = @transform_7, window_bounds = array<i64: 3, 384, 128>}, {pipeline_mode = #tpu.pipeline_mode<synchronous>, transform_indices = @transform_8, window_bounds = array<i64: 1, 128>}, {transform_indices = @transform_9, window_bounds = array<i64: 1, 16, 16, 128>}]} {
    %cst = arith.constant 0.000000e+00 : f32
    %0 = vector.broadcast %cst : f32 to vector<8x32x128xf32>
    %c0 = arith.constant 0 : index
    %c0_0 = arith.constant 0 : index
    %c0_1 = arith.constant 0 : index
    %1 = vector.load %arg11[%c0, %c0_0, %c0_1] : memref<32x32x128xf32, #tpu.memory_space<vmem>>, vector<8x32x128xf32>
    tpu.vector_store %arg11[%c0, %c0_0, %c0_1], %0 {strides = array<i32>} : memref<32x32x128xf32, #tpu.memory_space<vmem>>, vector<8x32x128xf32>,
    %c24 = arith.constant 24 : index
    %c0_2 = arith.constant 0 : index
    %c0_3 = arith.constant 0 : index
    %2 = vector.load %arg11[%c24, %c0_2, %c0_3] : memref<32x32x128xf32, #tpu.memory_space<vmem>>, vector<8x32x128xf32>
    tpu.vector_store %arg11[%c24, %c0_2, %c0_3], %0 {strides = array<i32>} : memref<32x32x128xf32, #tpu.memory_space<vmem>>, vector<8x32x128xf32>,
    %cst_4 = arith.constant 0.000000e+00 : f32
    %3 = vector.broadcast %cst_4 : f32 to vector<16x8x128xf32>
    %c8 = arith.constant 8 : index
    %c0_5 = arith.constant 0 : index
    %c0_6 = arith.constant 0 : index
    %4 = vector.load %arg11[%c8, %c0_5, %c0_6] : memref<32x32x128xf32, #tpu.memory_space<vmem>>, vector<16x8x128xf32>
    tpu.vector_store %arg11[%c8, %c0_5, %c0_6], %3 {strides = array<i32>} : memref<32x32x128xf32, #tpu.memory_space<vmem>>, vector<16x8x128xf32>,
    %c8_7 = arith.constant 8 : index
    %c24_8 = arith.constant 24 : index
    %c0_9 = arith.constant 0 : index
    %5 = vector.load %arg11[%c8_7, %c24_8, %c0_9] : memref<32x32x128xf32, #tpu.memory_space<vmem>>, vector<16x8x128xf32>
    tpu.vector_store %arg11[%c8_7, %c24_8, %c0_9], %3 {strides = array<i32>} : memref<32x32x128xf32, #tpu.memory_space<vmem>>, vector<16x8x128xf32>,
    %c0_10 = arith.constant 0 : index
    %c0_11 = arith.constant 0 : index
    %c0_12 = arith.constant 0 : index
    %c0_13 = arith.constant 0 : index
    %6 = vector.load %arg1[%c0_10, %c0_11, %c0_12, %c0_13] : memref<1x16x16x128xf32, #tpu.memory_space<vmem>>, vector<1x16x16x128xf32>
    %7 = vector.shape_cast %6 : vector<1x16x16x128xf32> to vector<16x16x128xf32>
    %c0_14 = arith.constant 0 : index
    %c0_15 = arith.constant 0 : index
    %c0_16 = arith.constant 0 : index
    %c0_17 = arith.constant 0 : index
    %8 = vector.load %arg10[%c0_14, %c0_15, %c0_16, %c0_17] : memref<1x16x16x128xf32, #tpu.memory_space<vmem>>, vector<1x16x16x128xf32>
    %9 = vector.shape_cast %8 : vector<1x16x16x128xf32> to vector<16x16x128xf32>
    %10 = vector.shape_cast %7 : vector<16x16x128xf32> to vector<1x16x16x128xf32>
    tpu.vector_store %arg10[%c0_14, %c0_15, %c0_16, %c0_17], %10 {strides = array<i32>} : memref<1x16x16x128xf32, #tpu.memory_space<vmem>>, vector<1x16x16x128xf32>,
    %c8_18 = arith.constant 8 : index
    %c8_19 = arith.constant 8 : index
    %c0_20 = arith.constant 0 : index
    %11 = vector.load %arg11[%c8_18, %c8_19, %c0_20] : memref<32x32x128xf32, #tpu.memory_space<vmem>>, vector<16x16x128xf32>
    tpu.vector_store %arg11[%c8_18, %c8_19, %c0_20], %7 {strides = array<i32>} : memref<32x32x128xf32, #tpu.memory_space<vmem>>, vector<16x16x128xf32>,
    %c7 = arith.constant 7 : index
    %c7_21 = arith.constant 7 : index
    %c0_22 = arith.constant 0 : index
    %12 = vector.load %arg11[%c7, %c7_21, %c0_22] : memref<32x32x128xf32, #tpu.memory_space<vmem>>, vector<18x16x128xf32>
    %13 = arith.truncf %12 : vector<18x16x128xf32> to vector<18x16x128xbf16>
    %c7_23 = arith.constant 7 : index
    %c0_24 = arith.constant 0 : index
    %c0_25 = arith.constant 0 : index
    %14 = vector.load %arg12[%c7_23, %c0_24, %c0_25] : memref<32x16x384xbf16, #tpu.memory_space<vmem>>, vector<18x16x128xbf16>
    tpu.vector_store %arg12[%c7_23, %c0_24, %c0_25], %13 {strides = array<i32>} : memref<32x16x384xbf16, #tpu.memory_space<vmem>>, vector<18x16x128xbf16>,
    %c7_26 = arith.constant 7 : index
    %c8_27 = arith.constant 8 : index
    %c0_28 = arith.constant 0 : index
    %15 = vector.load %arg11[%c7_26, %c8_27, %c0_28] : memref<32x32x128xf32, #tpu.memory_space<vmem>>, vector<18x16x128xf32>
    %16 = arith.truncf %15 : vector<18x16x128xf32> to vector<18x16x128xbf16>
    %c7_29 = arith.constant 7 : index
    %c0_30 = arith.constant 0 : index
    %c128 = arith.constant 128 : index
    %17 = vector.load %arg12[%c7_29, %c0_30, %c128] : memref<32x16x384xbf16, #tpu.memory_space<vmem>>, vector<18x16x128xbf16>
    tpu.vector_store %arg12[%c7_29, %c0_30, %c128], %16 {strides = array<i32>} : memref<32x16x384xbf16, #tpu.memory_space<vmem>>, vector<18x16x128xbf16>,
    %c7_31 = arith.constant 7 : index
    %c9 = arith.constant 9 : index
    %c0_32 = arith.constant 0 : index
    %18 = vector.load %arg11[%c7_31, %c9, %c0_32] : memref<32x32x128xf32, #tpu.memory_space<vmem>>, vector<18x16x128xf32>
    %19 = arith.truncf %18 : vector<18x16x128xf32> to vector<18x16x128xbf16>
    %c7_33 = arith.constant 7 : index
    %c0_34 = arith.constant 0 : index
    %c256 = arith.constant 256 : index
    %20 = vector.load %arg12[%c7_33, %c0_34, %c256] : memref<32x16x384xbf16, #tpu.memory_space<vmem>>, vector<18x16x128xbf16>
    tpu.vector_store %arg12[%c7_33, %c0_34, %c256], %19 {strides = array<i32>} : memref<32x16x384xbf16, #tpu.memory_space<vmem>>, vector<18x16x128xbf16>,
    %c7_35 = arith.constant 7 : index
    %c0_36 = arith.constant 0 : index
    %c0_37 = arith.constant 0 : index
    %21 = vector.load %arg12[%c7_35, %c0_36, %c0_37] : memref<32x16x384xbf16, #tpu.memory_space<vmem>>, vector<16x16x384xbf16>
    %22 = vector.shape_cast %21 : vector<16x16x384xbf16> to vector<256x384xbf16>
    %c0_38 = arith.constant 0 : index
    %c0_39 = arith.constant 0 : index
    %c0_40 = arith.constant 0 : index
    %23 = vector.load %arg2[%c0_38, %c0_39, %c0_40] : memref<3x384x128xbf16, #tpu.memory_space<vmem>>, vector<1x384x128xbf16>
    %24 = vector.shape_cast %23 : vector<1x384x128xbf16> to vector<384x128xbf16>
    %cst_41 = arith.constant dense<0.000000e+00> : vector<256x128xf32>
    %25 = tpu.matmul %22, %24, %cst_41 {dimension_numbers = #tpu.dot_dimension_numbers<[1], [0], [0], [1], [0, 0, 1, 1], [], []>} : vector<256x384xbf16>, vector<384x128xbf16>, vector<256x128xf32> -> vector<256x128xf32>
    %c0_42 = arith.constant 0 : index
    %c0_43 = arith.constant 0 : index
    %26 = vector.load %arg13[%c0_42, %c0_43] : memref<256x128xf32, #tpu.memory_space<vmem>>, vector<256x128xf32>
    tpu.vector_store %arg13[%c0_42, %c0_43], %25 {strides = array<i32>} : memref<256x128xf32, #tpu.memory_space<vmem>>, vector<256x128xf32>,
    %c8_44 = arith.constant 8 : index
    %c0_45 = arith.constant 0 : index
    %c0_46 = arith.constant 0 : index
    %27 = vector.load %arg12[%c8_44, %c0_45, %c0_46] : memref<32x16x384xbf16, #tpu.memory_space<vmem>>, vector<16x16x384xbf16>
    %28 = vector.shape_cast %27 : vector<16x16x384xbf16> to vector<256x384xbf16>
    %c1 = arith.constant 1 : index
    %c0_47 = arith.constant 0 : index
    %c0_48 = arith.constant 0 : index
    %29 = vector.load %arg2[%c1, %c0_47, %c0_48] : memref<3x384x128xbf16, #tpu.memory_space<vmem>>, vector<1x384x128xbf16>
    %30 = vector.shape_cast %29 : vector<1x384x128xbf16> to vector<384x128xbf16>
    %cst_49 = arith.constant dense<0.000000e+00> : vector<256x128xf32>
    %31 = tpu.matmul %28, %30, %cst_49 {dimension_numbers = #tpu.dot_dimension_numbers<[1], [0], [0], [1], [0, 0, 1, 1], [], []>} : vector<256x384xbf16>, vector<384x128xbf16>, vector<256x128xf32> -> vector<256x128xf32>
    %c0_50 = arith.constant 0 : index
    %c0_51 = arith.constant 0 : index
    %32 = vector.load %arg13[%c0_50, %c0_51] : memref<256x128xf32, #tpu.memory_space<vmem>>, vector<256x128xf32>
    %33 = arith.addf %32, %31 : vector<256x128xf32>
    %c0_52 = arith.constant 0 : index
    %c0_53 = arith.constant 0 : index
    %34 = vector.load %arg13[%c0_52, %c0_53] : memref<256x128xf32, #tpu.memory_space<vmem>>, vector<256x128xf32>
    tpu.vector_store %arg13[%c0_52, %c0_53], %33 {strides = array<i32>} : memref<256x128xf32, #tpu.memory_space<vmem>>, vector<256x128xf32>,
    %c9_54 = arith.constant 9 : index
    %c0_55 = arith.constant 0 : index
    %c0_56 = arith.constant 0 : index
    %35 = vector.load %arg12[%c9_54, %c0_55, %c0_56] : memref<32x16x384xbf16, #tpu.memory_space<vmem>>, vector<16x16x384xbf16>
    %36 = vector.shape_cast %35 : vector<16x16x384xbf16> to vector<256x384xbf16>
    %c2 = arith.constant 2 : index
    %c0_57 = arith.constant 0 : index
    %c0_58 = arith.constant 0 : index
    %37 = vector.load %arg2[%c2, %c0_57, %c0_58] : memref<3x384x128xbf16, #tpu.memory_space<vmem>>, vector<1x384x128xbf16>
    %38 = vector.shape_cast %37 : vector<1x384x128xbf16> to vector<384x128xbf16>
    %cst_59 = arith.constant dense<0.000000e+00> : vector<256x128xf32>
    %39 = tpu.matmul %36, %38, %cst_59 {dimension_numbers = #tpu.dot_dimension_numbers<[1], [0], [0], [1], [0, 0, 1, 1], [], []>} : vector<256x384xbf16>, vector<384x128xbf16>, vector<256x128xf32> -> vector<256x128xf32>
    %c0_60 = arith.constant 0 : index
    %c0_61 = arith.constant 0 : index
    %40 = vector.load %arg13[%c0_60, %c0_61] : memref<256x128xf32, #tpu.memory_space<vmem>>, vector<256x128xf32>
    %41 = arith.addf %40, %39 : vector<256x128xf32>
    %c0_62 = arith.constant 0 : index
    %c0_63 = arith.constant 0 : index
    %42 = vector.load %arg13[%c0_62, %c0_63] : memref<256x128xf32, #tpu.memory_space<vmem>>, vector<256x128xf32>
    tpu.vector_store %arg13[%c0_62, %c0_63], %41 {strides = array<i32>} : memref<256x128xf32, #tpu.memory_space<vmem>>, vector<256x128xf32>,
    %c0_64 = arith.constant 0 : index
    %c0_65 = arith.constant 0 : index
    %43 = vector.load %arg13[%c0_64, %c0_65] : memref<256x128xf32, #tpu.memory_space<vmem>>, vector<256x128xf32>
    %c0_66 = arith.constant 0 : index
    %c0_67 = arith.constant 0 : index
    %44 = vector.load %arg3[%c0_66, %c0_67] : memref<1x128xf32, #tpu.memory_space<vmem>>, vector<1x128xf32>
    %45 = vector.broadcast %44 : vector<1x128xf32> to vector<256x128xf32>
    %46 = arith.addf %43, %45 : vector<256x128xf32>
    %cst_68 = arith.constant 0.000000e+00 : f32
    %47 = vector.broadcast %cst_68 : f32 to vector<256x128xf32>
    %48 = arith.maximumf %46, %47 : vector<256x128xf32>
    %49 = vector.shape_cast %48 : vector<256x128xf32> to vector<16x16x128xf32>
    %c0_69 = arith.constant 0 : index
    %c0_70 = arith.constant 0 : index
    %c0_71 = arith.constant 0 : index
    %c0_72 = arith.constant 0 : index
    %50 = vector.load %arg10[%c0_69, %c0_70, %c0_71, %c0_72] : memref<1x16x16x128xf32, #tpu.memory_space<vmem>>, vector<1x16x16x128xf32>
    %51 = vector.shape_cast %50 : vector<1x16x16x128xf32> to vector<16x16x128xf32>
    %52 = arith.addf %51, %49 : vector<16x16x128xf32>
    %c0_73 = arith.constant 0 : index
    %c0_74 = arith.constant 0 : index
    %c0_75 = arith.constant 0 : index
    %c0_76 = arith.constant 0 : index
    %53 = vector.load %arg10[%c0_73, %c0_74, %c0_75, %c0_76] : memref<1x16x16x128xf32, #tpu.memory_space<vmem>>, vector<1x16x16x128xf32>
    %54 = vector.shape_cast %53 : vector<1x16x16x128xf32> to vector<16x16x128xf32>
    %55 = vector.shape_cast %52 : vector<16x16x128xf32> to vector<1x16x16x128xf32>
    tpu.vector_store %arg10[%c0_73, %c0_74, %c0_75, %c0_76], %55 {strides = array<i32>} : memref<1x16x16x128xf32, #tpu.memory_space<vmem>>, vector<1x16x16x128xf32>,
    %c8_77 = arith.constant 8 : index
    %c8_78 = arith.constant 8 : index
    %c0_79 = arith.constant 0 : index
    %56 = vector.load %arg11[%c8_77, %c8_78, %c0_79] : memref<32x32x128xf32, #tpu.memory_space<vmem>>, vector<16x16x128xf32>
    tpu.vector_store %arg11[%c8_77, %c8_78, %c0_79], %49 {strides = array<i32>} : memref<32x32x128xf32, #tpu.memory_space<vmem>>, vector<16x16x128xf32>,
    %c6 = arith.constant 6 : index
    %c6_80 = arith.constant 6 : index
    %c0_81 = arith.constant 0 : index
    %57 = vector.load %arg11[%c6, %c6_80, %c0_81] : memref<32x32x128xf32, #tpu.memory_space<vmem>>, vector<20x16x128xf32>
    %58 = arith.truncf %57 : vector<20x16x128xf32> to vector<20x16x128xbf16>
    %c6_82 = arith.constant 6 : index
    %c0_83 = arith.constant 0 : index
    %c0_84 = arith.constant 0 : index
    %59 = vector.load %arg12[%c6_82, %c0_83, %c0_84] : memref<32x16x384xbf16, #tpu.memory_space<vmem>>, vector<20x16x128xbf16>
    tpu.vector_store %arg12[%c6_82, %c0_83, %c0_84], %58 {strides = array<i32>} : memref<32x16x384xbf16, #tpu.memory_space<vmem>>, vector<20x16x128xbf16>,
    %c6_85 = arith.constant 6 : index
    %c8_86 = arith.constant 8 : index
    %c0_87 = arith.constant 0 : index
    %60 = vector.load %arg11[%c6_85, %c8_86, %c0_87] : memref<32x32x128xf32, #tpu.memory_space<vmem>>, vector<20x16x128xf32>
    %61 = arith.truncf %60 : vector<20x16x128xf32> to vector<20x16x128xbf16>
    %c6_88 = arith.constant 6 : index
    %c0_89 = arith.constant 0 : index
    %c128_90 = arith.constant 128 : index
    %62 = vector.load %arg12[%c6_88, %c0_89, %c128_90] : memref<32x16x384xbf16, #tpu.memory_space<vmem>>, vector<20x16x128xbf16>
    tpu.vector_store %arg12[%c6_88, %c0_89, %c128_90], %61 {strides = array<i32>} : memref<32x16x384xbf16, #tpu.memory_space<vmem>>, vector<20x16x128xbf16>,
    %c6_91 = arith.constant 6 : index
    %c10 = arith.constant 10 : index
    %c0_92 = arith.constant 0 : index
    %63 = vector.load %arg11[%c6_91, %c10, %c0_92] : memref<32x32x128xf32, #tpu.memory_space<vmem>>, vector<20x16x128xf32>
    %64 = arith.truncf %63 : vector<20x16x128xf32> to vector<20x16x128xbf16>
    %c6_93 = arith.constant 6 : index
    %c0_94 = arith.constant 0 : index
    %c256_95 = arith.constant 256 : index
    %65 = vector.load %arg12[%c6_93, %c0_94, %c256_95] : memref<32x16x384xbf16, #tpu.memory_space<vmem>>, vector<20x16x128xbf16>
    tpu.vector_store %arg12[%c6_93, %c0_94, %c256_95], %64 {strides = array<i32>} : memref<32x16x384xbf16, #tpu.memory_space<vmem>>, vector<20x16x128xbf16>,
    %c6_96 = arith.constant 6 : index
    %c0_97 = arith.constant 0 : index
    %c0_98 = arith.constant 0 : index
    %66 = vector.load %arg12[%c6_96, %c0_97, %c0_98] : memref<32x16x384xbf16, #tpu.memory_space<vmem>>, vector<16x16x384xbf16>
    %67 = vector.shape_cast %66 : vector<16x16x384xbf16> to vector<256x384xbf16>
    %c0_99 = arith.constant 0 : index
    %c0_100 = arith.constant 0 : index
    %c0_101 = arith.constant 0 : index
    %68 = vector.load %arg4[%c0_99, %c0_100, %c0_101] : memref<3x384x128xbf16, #tpu.memory_space<vmem>>, vector<1x384x128xbf16>
    %69 = vector.shape_cast %68 : vector<1x384x128xbf16> to vector<384x128xbf16>
    %cst_102 = arith.constant dense<0.000000e+00> : vector<256x128xf32>
    %70 = tpu.matmul %67, %69, %cst_102 {dimension_numbers = #tpu.dot_dimension_numbers<[1], [0], [0], [1], [0, 0, 1, 1], [], []>} : vector<256x384xbf16>, vector<384x128xbf16>, vector<256x128xf32> -> vector<256x128xf32>
    %c0_103 = arith.constant 0 : index
    %c0_104 = arith.constant 0 : index
    %71 = vector.load %arg13[%c0_103, %c0_104] : memref<256x128xf32, #tpu.memory_space<vmem>>, vector<256x128xf32>
    tpu.vector_store %arg13[%c0_103, %c0_104], %70 {strides = array<i32>} : memref<256x128xf32, #tpu.memory_space<vmem>>, vector<256x128xf32>,
    %c8_105 = arith.constant 8 : index
    %c0_106 = arith.constant 0 : index
    %c0_107 = arith.constant 0 : index
    %72 = vector.load %arg12[%c8_105, %c0_106, %c0_107] : memref<32x16x384xbf16, #tpu.memory_space<vmem>>, vector<16x16x384xbf16>
    %73 = vector.shape_cast %72 : vector<16x16x384xbf16> to vector<256x384xbf16>
    %c1_108 = arith.constant 1 : index
    %c0_109 = arith.constant 0 : index
    %c0_110 = arith.constant 0 : index
    %74 = vector.load %arg4[%c1_108, %c0_109, %c0_110] : memref<3x384x128xbf16, #tpu.memory_space<vmem>>, vector<1x384x128xbf16>
    %75 = vector.shape_cast %74 : vector<1x384x128xbf16> to vector<384x128xbf16>
    %cst_111 = arith.constant dense<0.000000e+00> : vector<256x128xf32>
    %76 = tpu.matmul %73, %75, %cst_111 {dimension_numbers = #tpu.dot_dimension_numbers<[1], [0], [0], [1], [0, 0, 1, 1], [], []>} : vector<256x384xbf16>, vector<384x128xbf16>, vector<256x128xf32> -> vector<256x128xf32>
    %c0_112 = arith.constant 0 : index
    %c0_113 = arith.constant 0 : index
    %77 = vector.load %arg13[%c0_112, %c0_113] : memref<256x128xf32, #tpu.memory_space<vmem>>, vector<256x128xf32>
    %78 = arith.addf %77, %76 : vector<256x128xf32>
    %c0_114 = arith.constant 0 : index
    %c0_115 = arith.constant 0 : index
    %79 = vector.load %arg13[%c0_114, %c0_115] : memref<256x128xf32, #tpu.memory_space<vmem>>, vector<256x128xf32>
    tpu.vector_store %arg13[%c0_114, %c0_115], %78 {strides = array<i32>} : memref<256x128xf32, #tpu.memory_space<vmem>>, vector<256x128xf32>,
    %c10_116 = arith.constant 10 : index
    %c0_117 = arith.constant 0 : index
    %c0_118 = arith.constant 0 : index
    %80 = vector.load %arg12[%c10_116, %c0_117, %c0_118] : memref<32x16x384xbf16, #tpu.memory_space<vmem>>, vector<16x16x384xbf16>
    %81 = vector.shape_cast %80 : vector<16x16x384xbf16> to vector<256x384xbf16>
    %c2_119 = arith.constant 2 : index
    %c0_120 = arith.constant 0 : index
    %c0_121 = arith.constant 0 : index
    %82 = vector.load %arg4[%c2_119, %c0_120, %c0_121] : memref<3x384x128xbf16, #tpu.memory_space<vmem>>, vector<1x384x128xbf16>
    %83 = vector.shape_cast %82 : vector<1x384x128xbf16> to vector<384x128xbf16>
    %cst_122 = arith.constant dense<0.000000e+00> : vector<256x128xf32>
    %84 = tpu.matmul %81, %83, %cst_122 {dimension_numbers = #tpu.dot_dimension_numbers<[1], [0], [0], [1], [0, 0, 1, 1], [], []>} : vector<256x384xbf16>, vector<384x128xbf16>, vector<256x128xf32> -> vector<256x128xf32>
    %c0_123 = arith.constant 0 : index
    %c0_124 = arith.constant 0 : index
    %85 = vector.load %arg13[%c0_123, %c0_124] : memref<256x128xf32, #tpu.memory_space<vmem>>, vector<256x128xf32>
    %86 = arith.addf %85, %84 : vector<256x128xf32>
    %c0_125 = arith.constant 0 : index
    %c0_126 = arith.constant 0 : index
    %87 = vector.load %arg13[%c0_125, %c0_126] : memref<256x128xf32, #tpu.memory_space<vmem>>, vector<256x128xf32>
    tpu.vector_store %arg13[%c0_125, %c0_126], %86 {strides = array<i32>} : memref<256x128xf32, #tpu.memory_space<vmem>>, vector<256x128xf32>,
    %c0_127 = arith.constant 0 : index
    %c0_128 = arith.constant 0 : index
    %88 = vector.load %arg13[%c0_127, %c0_128] : memref<256x128xf32, #tpu.memory_space<vmem>>, vector<256x128xf32>
    %c0_129 = arith.constant 0 : index
    %c0_130 = arith.constant 0 : index
    %89 = vector.load %arg5[%c0_129, %c0_130] : memref<1x128xf32, #tpu.memory_space<vmem>>, vector<1x128xf32>
    %90 = vector.broadcast %89 : vector<1x128xf32> to vector<256x128xf32>
    %91 = arith.addf %88, %90 : vector<256x128xf32>
    %cst_131 = arith.constant 0.000000e+00 : f32
    %92 = vector.broadcast %cst_131 : f32 to vector<256x128xf32>
    %93 = arith.maximumf %91, %92 : vector<256x128xf32>
    %94 = vector.shape_cast %93 : vector<256x128xf32> to vector<16x16x128xf32>
    %c0_132 = arith.constant 0 : index
    %c0_133 = arith.constant 0 : index
    %c0_134 = arith.constant 0 : index
    %c0_135 = arith.constant 0 : index
    %95 = vector.load %arg10[%c0_132, %c0_133, %c0_134, %c0_135] : memref<1x16x16x128xf32, #tpu.memory_space<vmem>>, vector<1x16x16x128xf32>
    %96 = vector.shape_cast %95 : vector<1x16x16x128xf32> to vector<16x16x128xf32>
    %97 = arith.addf %96, %94 : vector<16x16x128xf32>
    %c0_136 = arith.constant 0 : index
    %c0_137 = arith.constant 0 : index
    %c0_138 = arith.constant 0 : index
    %c0_139 = arith.constant 0 : index
    %98 = vector.load %arg10[%c0_136, %c0_137, %c0_138, %c0_139] : memref<1x16x16x128xf32, #tpu.memory_space<vmem>>, vector<1x16x16x128xf32>
    %99 = vector.shape_cast %98 : vector<1x16x16x128xf32> to vector<16x16x128xf32>
    %100 = vector.shape_cast %97 : vector<16x16x128xf32> to vector<1x16x16x128xf32>
    tpu.vector_store %arg10[%c0_136, %c0_137, %c0_138, %c0_139], %100 {strides = array<i32>} : memref<1x16x16x128xf32, #tpu.memory_space<vmem>>, vector<1x16x16x128xf32>,
    %c8_140 = arith.constant 8 : index
    %c8_141 = arith.constant 8 : index
    %c0_142 = arith.constant 0 : index
    %101 = vector.load %arg11[%c8_140, %c8_141, %c0_142] : memref<32x32x128xf32, #tpu.memory_space<vmem>>, vector<16x16x128xf32>
    tpu.vector_store %arg11[%c8_140, %c8_141, %c0_142], %94 {strides = array<i32>} : memref<32x32x128xf32, #tpu.memory_space<vmem>>, vector<16x16x128xf32>,
    %c4 = arith.constant 4 : index
    %c4_143 = arith.constant 4 : index
    %c0_144 = arith.constant 0 : index
    %102 = vector.load %arg11[%c4, %c4_143, %c0_144] : memref<32x32x128xf32, #tpu.memory_space<vmem>>, vector<24x16x128xf32>
    %103 = arith.truncf %102 : vector<24x16x128xf32> to vector<24x16x128xbf16>
    %c4_145 = arith.constant 4 : index
    %c0_146 = arith.constant 0 : index
    %c0_147 = arith.constant 0 : index
    %104 = vector.load %arg12[%c4_145, %c0_146, %c0_147] : memref<32x16x384xbf16, #tpu.memory_space<vmem>>, vector<24x16x128xbf16>
    tpu.vector_store %arg12[%c4_145, %c0_146, %c0_147], %103 {strides = array<i32>} : memref<32x16x384xbf16, #tpu.memory_space<vmem>>, vector<24x16x128xbf16>,
    %c4_148 = arith.constant 4 : index
    %c8_149 = arith.constant 8 : index
    %c0_150 = arith.constant 0 : index
    %105 = vector.load %arg11[%c4_148, %c8_149, %c0_150] : memref<32x32x128xf32, #tpu.memory_space<vmem>>, vector<24x16x128xf32>
    %106 = arith.truncf %105 : vector<24x16x128xf32> to vector<24x16x128xbf16>
    %c4_151 = arith.constant 4 : index
    %c0_152 = arith.constant 0 : index
    %c128_153 = arith.constant 128 : index
    %107 = vector.load %arg12[%c4_151, %c0_152, %c128_153] : memref<32x16x384xbf16, #tpu.memory_space<vmem>>, vector<24x16x128xbf16>
    tpu.vector_store %arg12[%c4_151, %c0_152, %c128_153], %106 {strides = array<i32>} : memref<32x16x384xbf16, #tpu.memory_space<vmem>>, vector<24x16x128xbf16>,
    %c4_154 = arith.constant 4 : index
    %c12 = arith.constant 12 : index
    %c0_155 = arith.constant 0 : index
    %108 = vector.load %arg11[%c4_154, %c12, %c0_155] : memref<32x32x128xf32, #tpu.memory_space<vmem>>, vector<24x16x128xf32>
    %109 = arith.truncf %108 : vector<24x16x128xf32> to vector<24x16x128xbf16>
    %c4_156 = arith.constant 4 : index
    %c0_157 = arith.constant 0 : index
    %c256_158 = arith.constant 256 : index
    %110 = vector.load %arg12[%c4_156, %c0_157, %c256_158] : memref<32x16x384xbf16, #tpu.memory_space<vmem>>, vector<24x16x128xbf16>
    tpu.vector_store %arg12[%c4_156, %c0_157, %c256_158], %109 {strides = array<i32>} : memref<32x16x384xbf16, #tpu.memory_space<vmem>>, vector<24x16x128xbf16>,
    %c4_159 = arith.constant 4 : index
    %c0_160 = arith.constant 0 : index
    %c0_161 = arith.constant 0 : index
    %111 = vector.load %arg12[%c4_159, %c0_160, %c0_161] : memref<32x16x384xbf16, #tpu.memory_space<vmem>>, vector<16x16x384xbf16>
    %112 = vector.shape_cast %111 : vector<16x16x384xbf16> to vector<256x384xbf16>
    %c0_162 = arith.constant 0 : index
    %c0_163 = arith.constant 0 : index
    %c0_164 = arith.constant 0 : index
    %113 = vector.load %arg6[%c0_162, %c0_163, %c0_164] : memref<3x384x128xbf16, #tpu.memory_space<vmem>>, vector<1x384x128xbf16>
    %114 = vector.shape_cast %113 : vector<1x384x128xbf16> to vector<384x128xbf16>
    %cst_165 = arith.constant dense<0.000000e+00> : vector<256x128xf32>
    %115 = tpu.matmul %112, %114, %cst_165 {dimension_numbers = #tpu.dot_dimension_numbers<[1], [0], [0], [1], [0, 0, 1, 1], [], []>} : vector<256x384xbf16>, vector<384x128xbf16>, vector<256x128xf32> -> vector<256x128xf32>
    %c0_166 = arith.constant 0 : index
    %c0_167 = arith.constant 0 : index
    %116 = vector.load %arg13[%c0_166, %c0_167] : memref<256x128xf32, #tpu.memory_space<vmem>>, vector<256x128xf32>
    tpu.vector_store %arg13[%c0_166, %c0_167], %115 {strides = array<i32>} : memref<256x128xf32, #tpu.memory_space<vmem>>, vector<256x128xf32>,
    %c8_168 = arith.constant 8 : index
    %c0_169 = arith.constant 0 : index
    %c0_170 = arith.constant 0 : index
    %117 = vector.load %arg12[%c8_168, %c0_169, %c0_170] : memref<32x16x384xbf16, #tpu.memory_space<vmem>>, vector<16x16x384xbf16>
    %118 = vector.shape_cast %117 : vector<16x16x384xbf16> to vector<256x384xbf16>
    %c1_171 = arith.constant 1 : index
    %c0_172 = arith.constant 0 : index
    %c0_173 = arith.constant 0 : index
    %119 = vector.load %arg6[%c1_171, %c0_172, %c0_173] : memref<3x384x128xbf16, #tpu.memory_space<vmem>>, vector<1x384x128xbf16>
    %120 = vector.shape_cast %119 : vector<1x384x128xbf16> to vector<384x128xbf16>
    %cst_174 = arith.constant dense<0.000000e+00> : vector<256x128xf32>
    %121 = tpu.matmul %118, %120, %cst_174 {dimension_numbers = #tpu.dot_dimension_numbers<[1], [0], [0], [1], [0, 0, 1, 1], [], []>} : vector<256x384xbf16>, vector<384x128xbf16>, vector<256x128xf32> -> vector<256x128xf32>
    %c0_175 = arith.constant 0 : index
    %c0_176 = arith.constant 0 : index
    %122 = vector.load %arg13[%c0_175, %c0_176] : memref<256x128xf32, #tpu.memory_space<vmem>>, vector<256x128xf32>
    %123 = arith.addf %122, %121 : vector<256x128xf32>
    %c0_177 = arith.constant 0 : index
    %c0_178 = arith.constant 0 : index
    %124 = vector.load %arg13[%c0_177, %c0_178] : memref<256x128xf32, #tpu.memory_space<vmem>>, vector<256x128xf32>
    tpu.vector_store %arg13[%c0_177, %c0_178], %123 {strides = array<i32>} : memref<256x128xf32, #tpu.memory_space<vmem>>, vector<256x128xf32>,
    %c12_179 = arith.constant 12 : index
    %c0_180 = arith.constant 0 : index
    %c0_181 = arith.constant 0 : index
    %125 = vector.load %arg12[%c12_179, %c0_180, %c0_181] : memref<32x16x384xbf16, #tpu.memory_space<vmem>>, vector<16x16x384xbf16>
    %126 = vector.shape_cast %125 : vector<16x16x384xbf16> to vector<256x384xbf16>
    %c2_182 = arith.constant 2 : index
    %c0_183 = arith.constant 0 : index
    %c0_184 = arith.constant 0 : index
    %127 = vector.load %arg6[%c2_182, %c0_183, %c0_184] : memref<3x384x128xbf16, #tpu.memory_space<vmem>>, vector<1x384x128xbf16>
    %128 = vector.shape_cast %127 : vector<1x384x128xbf16> to vector<384x128xbf16>
    %cst_185 = arith.constant dense<0.000000e+00> : vector<256x128xf32>
    %129 = tpu.matmul %126, %128, %cst_185 {dimension_numbers = #tpu.dot_dimension_numbers<[1], [0], [0], [1], [0, 0, 1, 1], [], []>} : vector<256x384xbf16>, vector<384x128xbf16>, vector<256x128xf32> -> vector<256x128xf32>
    %c0_186 = arith.constant 0 : index
    %c0_187 = arith.constant 0 : index
    %130 = vector.load %arg13[%c0_186, %c0_187] : memref<256x128xf32, #tpu.memory_space<vmem>>, vector<256x128xf32>
    %131 = arith.addf %130, %129 : vector<256x128xf32>
    %c0_188 = arith.constant 0 : index
    %c0_189 = arith.constant 0 : index
    %132 = vector.load %arg13[%c0_188, %c0_189] : memref<256x128xf32, #tpu.memory_space<vmem>>, vector<256x128xf32>
    tpu.vector_store %arg13[%c0_188, %c0_189], %131 {strides = array<i32>} : memref<256x128xf32, #tpu.memory_space<vmem>>, vector<256x128xf32>,
    %c0_190 = arith.constant 0 : index
    %c0_191 = arith.constant 0 : index
    %133 = vector.load %arg13[%c0_190, %c0_191] : memref<256x128xf32, #tpu.memory_space<vmem>>, vector<256x128xf32>
    %c0_192 = arith.constant 0 : index
    %c0_193 = arith.constant 0 : index
    %134 = vector.load %arg7[%c0_192, %c0_193] : memref<1x128xf32, #tpu.memory_space<vmem>>, vector<1x128xf32>
    %135 = vector.broadcast %134 : vector<1x128xf32> to vector<256x128xf32>
    %136 = arith.addf %133, %135 : vector<256x128xf32>
    %cst_194 = arith.constant 0.000000e+00 : f32
    %137 = vector.broadcast %cst_194 : f32 to vector<256x128xf32>
    %138 = arith.maximumf %136, %137 : vector<256x128xf32>
    %139 = vector.shape_cast %138 : vector<256x128xf32> to vector<16x16x128xf32>
    %c0_195 = arith.constant 0 : index
    %c0_196 = arith.constant 0 : index
    %c0_197 = arith.constant 0 : index
    %c0_198 = arith.constant 0 : index
    %140 = vector.load %arg10[%c0_195, %c0_196, %c0_197, %c0_198] : memref<1x16x16x128xf32, #tpu.memory_space<vmem>>, vector<1x16x16x128xf32>
    %141 = vector.shape_cast %140 : vector<1x16x16x128xf32> to vector<16x16x128xf32>
    %142 = arith.addf %141, %139 : vector<16x16x128xf32>
    %c0_199 = arith.constant 0 : index
    %c0_200 = arith.constant 0 : index
    %c0_201 = arith.constant 0 : index
    %c0_202 = arith.constant 0 : index
    %143 = vector.load %arg10[%c0_199, %c0_200, %c0_201, %c0_202] : memref<1x16x16x128xf32, #tpu.memory_space<vmem>>, vector<1x16x16x128xf32>
    %144 = vector.shape_cast %143 : vector<1x16x16x128xf32> to vector<16x16x128xf32>
    %145 = vector.shape_cast %142 : vector<16x16x128xf32> to vector<1x16x16x128xf32>
    tpu.vector_store %arg10[%c0_199, %c0_200, %c0_201, %c0_202], %145 {strides = array<i32>} : memref<1x16x16x128xf32, #tpu.memory_space<vmem>>, vector<1x16x16x128xf32>,
    %c8_203 = arith.constant 8 : index
    %c8_204 = arith.constant 8 : index
    %c0_205 = arith.constant 0 : index
    %146 = vector.load %arg11[%c8_203, %c8_204, %c0_205] : memref<32x32x128xf32, #tpu.memory_space<vmem>>, vector<16x16x128xf32>
    tpu.vector_store %arg11[%c8_203, %c8_204, %c0_205], %139 {strides = array<i32>} : memref<32x32x128xf32, #tpu.memory_space<vmem>>, vector<16x16x128xf32>,
    %c0_206 = arith.constant 0 : index
    %c0_207 = arith.constant 0 : index
    %c0_208 = arith.constant 0 : index
    %147 = vector.load %arg11[%c0_206, %c0_207, %c0_208] : memref<32x32x128xf32, #tpu.memory_space<vmem>>, vector<32x16x128xf32>
    %148 = arith.truncf %147 : vector<32x16x128xf32> to vector<32x16x128xbf16>
    %c0_209 = arith.constant 0 : index
    %c0_210 = arith.constant 0 : index
    %c0_211 = arith.constant 0 : index
    %149 = vector.load %arg12[%c0_209, %c0_210, %c0_211] : memref<32x16x384xbf16, #tpu.memory_space<vmem>>, vector<32x16x128xbf16>
    tpu.vector_store %arg12[%c0_209, %c0_210, %c0_211], %148 {strides = array<i32>} : memref<32x16x384xbf16, #tpu.memory_space<vmem>>, vector<32x16x128xbf16>,
    %c0_212 = arith.constant 0 : index
    %c8_213 = arith.constant 8 : index
    %c0_214 = arith.constant 0 : index
    %150 = vector.load %arg11[%c0_212, %c8_213, %c0_214] : memref<32x32x128xf32, #tpu.memory_space<vmem>>, vector<32x16x128xf32>
    %151 = arith.truncf %150 : vector<32x16x128xf32> to vector<32x16x128xbf16>
    %c0_215 = arith.constant 0 : index
    %c0_216 = arith.constant 0 : index
    %c128_217 = arith.constant 128 : index
    %152 = vector.load %arg12[%c0_215, %c0_216, %c128_217] : memref<32x16x384xbf16, #tpu.memory_space<vmem>>, vector<32x16x128xbf16>
    tpu.vector_store %arg12[%c0_215, %c0_216, %c128_217], %151 {strides = array<i32>} : memref<32x16x384xbf16, #tpu.memory_space<vmem>>, vector<32x16x128xbf16>,
    %c0_218 = arith.constant 0 : index
    %c16 = arith.constant 16 : index
    %c0_219 = arith.constant 0 : index
    %153 = vector.load %arg11[%c0_218, %c16, %c0_219] : memref<32x32x128xf32, #tpu.memory_space<vmem>>, vector<32x16x128xf32>
    %154 = arith.truncf %153 : vector<32x16x128xf32> to vector<32x16x128xbf16>
    %c0_220 = arith.constant 0 : index
    %c0_221 = arith.constant 0 : index
    %c256_222 = arith.constant 256 : index
    %155 = vector.load %arg12[%c0_220, %c0_221, %c256_222] : memref<32x16x384xbf16, #tpu.memory_space<vmem>>, vector<32x16x128xbf16>
    tpu.vector_store %arg12[%c0_220, %c0_221, %c256_222], %154 {strides = array<i32>} : memref<32x16x384xbf16, #tpu.memory_space<vmem>>, vector<32x16x128xbf16>,
    %c0_223 = arith.constant 0 : index
    %c0_224 = arith.constant 0 : index
    %c0_225 = arith.constant 0 : index
    %156 = vector.load %arg12[%c0_223, %c0_224, %c0_225] : memref<32x16x384xbf16, #tpu.memory_space<vmem>>, vector<16x16x384xbf16>
    %157 = vector.shape_cast %156 : vector<16x16x384xbf16> to vector<256x384xbf16>
    %c0_226 = arith.constant 0 : index
    %c0_227 = arith.constant 0 : index
    %c0_228 = arith.constant 0 : index
    %158 = vector.load %arg8[%c0_226, %c0_227, %c0_228] : memref<3x384x128xbf16, #tpu.memory_space<vmem>>, vector<1x384x128xbf16>
    %159 = vector.shape_cast %158 : vector<1x384x128xbf16> to vector<384x128xbf16>
    %cst_229 = arith.constant dense<0.000000e+00> : vector<256x128xf32>
    %160 = tpu.matmul %157, %159, %cst_229 {dimension_numbers = #tpu.dot_dimension_numbers<[1], [0], [0], [1], [0, 0, 1, 1], [], []>} : vector<256x384xbf16>, vector<384x128xbf16>, vector<256x128xf32> -> vector<256x128xf32>
    %c0_230 = arith.constant 0 : index
    %c0_231 = arith.constant 0 : index
    %161 = vector.load %arg13[%c0_230, %c0_231] : memref<256x128xf32, #tpu.memory_space<vmem>>, vector<256x128xf32>
    tpu.vector_store %arg13[%c0_230, %c0_231], %160 {strides = array<i32>} : memref<256x128xf32, #tpu.memory_space<vmem>>, vector<256x128xf32>,
    %c8_232 = arith.constant 8 : index
    %c0_233 = arith.constant 0 : index
    %c0_234 = arith.constant 0 : index
    %162 = vector.load %arg12[%c8_232, %c0_233, %c0_234] : memref<32x16x384xbf16, #tpu.memory_space<vmem>>, vector<16x16x384xbf16>
    %163 = vector.shape_cast %162 : vector<16x16x384xbf16> to vector<256x384xbf16>
    %c1_235 = arith.constant 1 : index
    %c0_236 = arith.constant 0 : index
    %c0_237 = arith.constant 0 : index
    %164 = vector.load %arg8[%c1_235, %c0_236, %c0_237] : memref<3x384x128xbf16, #tpu.memory_space<vmem>>, vector<1x384x128xbf16>
    %165 = vector.shape_cast %164 : vector<1x384x128xbf16> to vector<384x128xbf16>
    %cst_238 = arith.constant dense<0.000000e+00> : vector<256x128xf32>
    %166 = tpu.matmul %163, %165, %cst_238 {dimension_numbers = #tpu.dot_dimension_numbers<[1], [0], [0], [1], [0, 0, 1, 1], [], []>} : vector<256x384xbf16>, vector<384x128xbf16>, vector<256x128xf32> -> vector<256x128xf32>
    %c0_239 = arith.constant 0 : index
    %c0_240 = arith.constant 0 : index
    %167 = vector.load %arg13[%c0_239, %c0_240] : memref<256x128xf32, #tpu.memory_space<vmem>>, vector<256x128xf32>
    %168 = arith.addf %167, %166 : vector<256x128xf32>
    %c0_241 = arith.constant 0 : index
    %c0_242 = arith.constant 0 : index
    %169 = vector.load %arg13[%c0_241, %c0_242] : memref<256x128xf32, #tpu.memory_space<vmem>>, vector<256x128xf32>
    tpu.vector_store %arg13[%c0_241, %c0_242], %168 {strides = array<i32>} : memref<256x128xf32, #tpu.memory_space<vmem>>, vector<256x128xf32>,
    %c16_243 = arith.constant 16 : index
    %c0_244 = arith.constant 0 : index
    %c0_245 = arith.constant 0 : index
    %170 = vector.load %arg12[%c16_243, %c0_244, %c0_245] : memref<32x16x384xbf16, #tpu.memory_space<vmem>>, vector<16x16x384xbf16>
    %171 = vector.shape_cast %170 : vector<16x16x384xbf16> to vector<256x384xbf16>
    %c2_246 = arith.constant 2 : index
    %c0_247 = arith.constant 0 : index
    %c0_248 = arith.constant 0 : index
    %172 = vector.load %arg8[%c2_246, %c0_247, %c0_248] : memref<3x384x128xbf16, #tpu.memory_space<vmem>>, vector<1x384x128xbf16>
    %173 = vector.shape_cast %172 : vector<1x384x128xbf16> to vector<384x128xbf16>
    %cst_249 = arith.constant dense<0.000000e+00> : vector<256x128xf32>
    %174 = tpu.matmul %171, %173, %cst_249 {dimension_numbers = #tpu.dot_dimension_numbers<[1], [0], [0], [1], [0, 0, 1, 1], [], []>} : vector<256x384xbf16>, vector<384x128xbf16>, vector<256x128xf32> -> vector<256x128xf32>
    %c0_250 = arith.constant 0 : index
    %c0_251 = arith.constant 0 : index
    %175 = vector.load %arg13[%c0_250, %c0_251] : memref<256x128xf32, #tpu.memory_space<vmem>>, vector<256x128xf32>
    %176 = arith.addf %175, %174 : vector<256x128xf32>
    %c0_252 = arith.constant 0 : index
    %c0_253 = arith.constant 0 : index
    %177 = vector.load %arg13[%c0_252, %c0_253] : memref<256x128xf32, #tpu.memory_space<vmem>>, vector<256x128xf32>
    tpu.vector_store %arg13[%c0_252, %c0_253], %176 {strides = array<i32>} : memref<256x128xf32, #tpu.memory_space<vmem>>, vector<256x128xf32>,
    %c0_254 = arith.constant 0 : index
    %c0_255 = arith.constant 0 : index
    %178 = vector.load %arg13[%c0_254, %c0_255] : memref<256x128xf32, #tpu.memory_space<vmem>>, vector<256x128xf32>
    %c0_256 = arith.constant 0 : index
    %c0_257 = arith.constant 0 : index
    %179 = vector.load %arg9[%c0_256, %c0_257] : memref<1x128xf32, #tpu.memory_space<vmem>>, vector<1x128xf32>
    %180 = vector.broadcast %179 : vector<1x128xf32> to vector<256x128xf32>
    %181 = arith.addf %178, %180 : vector<256x128xf32>
    %cst_258 = arith.constant 0.000000e+00 : f32
    %182 = vector.broadcast %cst_258 : f32 to vector<256x128xf32>
    %183 = arith.maximumf %181, %182 : vector<256x128xf32>
    %184 = vector.shape_cast %183 : vector<256x128xf32> to vector<16x16x128xf32>
    %c0_259 = arith.constant 0 : index
    %c0_260 = arith.constant 0 : index
    %c0_261 = arith.constant 0 : index
    %c0_262 = arith.constant 0 : index
    %185 = vector.load %arg10[%c0_259, %c0_260, %c0_261, %c0_262] : memref<1x16x16x128xf32, #tpu.memory_space<vmem>>, vector<1x16x16x128xf32>
    %186 = vector.shape_cast %185 : vector<1x16x16x128xf32> to vector<16x16x128xf32>
    %187 = arith.addf %186, %184 : vector<16x16x128xf32>
    %c0_263 = arith.constant 0 : index
    %c0_264 = arith.constant 0 : index
    %c0_265 = arith.constant 0 : index
    %c0_266 = arith.constant 0 : index
    %188 = vector.load %arg10[%c0_263, %c0_264, %c0_265, %c0_266] : memref<1x16x16x128xf32, #tpu.memory_space<vmem>>, vector<1x16x16x128xf32>
    %189 = vector.shape_cast %188 : vector<1x16x16x128xf32> to vector<16x16x128xf32>
    %190 = vector.shape_cast %187 : vector<16x16x128xf32> to vector<1x16x16x128xf32>
    tpu.vector_store %arg10[%c0_263, %c0_264, %c0_265, %c0_266], %190 {strides = array<i32>} : memref<1x16x16x128xf32, #tpu.memory_space<vmem>>, vector<1x16x16x128xf32>,
    return
  }
  func.func @transform_0(%arg0: i32) -> (i32, i32, i32, i32) {
    %c0_i32 = arith.constant 0 : i32
    %c0_i32_0 = arith.constant 0 : i32
    %c0_i32_1 = arith.constant 0 : i32
    %c0_i32_2 = arith.constant 0 : i32
    return %arg0, %c0_i32, %c0_i32_0, %c0_i32_1 : i32, i32, i32, i32
  }
  func.func @transform_1(%arg0: i32) -> (i32, i32, i32) {
    %c0_i32 = arith.constant 0 : i32
    %c0_i32_0 = arith.constant 0 : i32
    %c0_i32_1 = arith.constant 0 : i32
    %c0_i32_2 = arith.constant 0 : i32
    return %c0_i32, %c0_i32_0, %c0_i32_1 : i32, i32, i32
  }
  func.func @transform_2(%arg0: i32) -> (i32, i32) {
    %c0_i32 = arith.constant 0 : i32
    %c0_i32_0 = arith.constant 0 : i32
    %c0_i32_1 = arith.constant 0 : i32
    return %c0_i32, %c0_i32_0 : i32, i32
  }
  func.func @transform_3(%arg0: i32) -> (i32, i32, i32) {
    %c0_i32 = arith.constant 0 : i32
    %c0_i32_0 = arith.constant 0 : i32
    %c0_i32_1 = arith.constant 0 : i32
    %c0_i32_2 = arith.constant 0 : i32
    return %c0_i32, %c0_i32_0, %c0_i32_1 : i32, i32, i32
  }
  func.func @transform_4(%arg0: i32) -> (i32, i32) {
    %c0_i32 = arith.constant 0 : i32
    %c0_i32_0 = arith.constant 0 : i32
    %c0_i32_1 = arith.constant 0 : i32
    return %c0_i32, %c0_i32_0 : i32, i32
  }
  func.func @transform_5(%arg0: i32) -> (i32, i32, i32) {
    %c0_i32 = arith.constant 0 : i32
    %c0_i32_0 = arith.constant 0 : i32
    %c0_i32_1 = arith.constant 0 : i32
    %c0_i32_2 = arith.constant 0 : i32
    return %c0_i32, %c0_i32_0, %c0_i32_1 : i32, i32, i32
  }
  func.func @transform_6(%arg0: i32) -> (i32, i32) {
    %c0_i32 = arith.constant 0 : i32
    %c0_i32_0 = arith.constant 0 : i32
    %c0_i32_1 = arith.constant 0 : i32
    return %c0_i32, %c0_i32_0 : i32, i32
  }
  func.func @transform_7(%arg0: i32) -> (i32, i32, i32) {
    %c0_i32 = arith.constant 0 : i32
    %c0_i32_0 = arith.constant 0 : i32
    %c0_i32_1 = arith.constant 0 : i32
    %c0_i32_2 = arith.constant 0 : i32
    return %c0_i32, %c0_i32_0, %c0_i32_1 : i32, i32, i32
  }
  func.func @transform_8(%arg0: i32) -> (i32, i32) {
    %c0_i32 = arith.constant 0 : i32
    %c0_i32_0 = arith.constant 0 : i32
    %c0_i32_1 = arith.constant 0 : i32
    return %c0_i32, %c0_i32_0 : i32, i32
  }
  func.func @transform_9(%arg0: i32) -> (i32, i32, i32, i32) {
    %c0_i32 = arith.constant 0 : i32
    %c0_i32_0 = arith.constant 0 : i32
    %c0_i32_1 = arith.constant 0 : i32
    %c0_i32_2 = arith.constant 0 : i32
    return %arg0, %c0_i32, %c0_i32_0, %c0_i32_1 : i32, i32, i32, i32
  }
}

</mosaic_0001>

<bundles_post_ra>
// kernel: tpu_custom_call.1
= control target key start
LH: loop header
LB: loop body
LE: loop exit
PB: predicated region body
PF: predicated region fallthrough
CT: control target
= control target key end

     0   :  { %7 = vsyncpa [#allocation3], 0  ;;  %s690_s0 = inlined_call_operand.hbm [shape: f32[16,128], index: 0, kind: input, shape index: {}]   ;;  %s691_s1 = inlined_call_operand.hbm [shape: f32[8,128], index: 1, kind: input, shape index: {}]   ;;  %s692_s2 = inlined_call_operand.hbm [shape: f32[16,128], index: 2, kind: output, shape index: {}]  }
   0x1   :  { %9 = vsyncpa [#allocation3 + $0x1], 0 }
   0x2   :  { %10 = vsyncpa [#allocation6], 0 }
   0x3   :  { %11 = vsyncpa [#allocation4], 0 }
   0x4   :  { %13 = vsyncpa [#allocation4 + $0x1], 0  ;;  %s489_s9 = smov 0   ;;  %s491_s10 = smov 0  }
   0x5   :  { %s493_s11 = smov 0   ;;  %s495_s12 = smov 0  }
   0x6 LB: > { %s510_s13 = sadd.s32 4294967295, %s469_s12   ;;  %s270_s14 = sadd.s32 4294967294, %s469_s12   ;;  %s469_s12 = sphi %s495_s12, %s716_s12   ;;  %s465_s11 = sphi %s493_s11, %s715_s11   ;;  %s461_s10 = sphi %s491_s10, %s714_s10   ;;  %s457_s9 = sphi %s489_s9, %s713_s9  }
   0x7   : > { %p39_p0 = scmp.ne.s32.totalorder %s461_s10, %s457_s9  ;;  %p693_p1 = scmp.eq.s32.totalorder %s510_s13, 0 }
   0x8   : > { %p90_p3 = scmp.eq.s32.totalorder %s270_s14, 1  ;;  %p271_p5 = scmp.ge.s32.totalorder %s469_s12, 1 }
   0x9   : > { %p519_p4 = por %p693_p1, %p39_p0  ;;  %p97_p7 = scmp.lt.s32.totalorder %s469_s12, 3 }
   0xa   : > { %p524_p6 = por %p90_p3, %p39_p0  ;;  %s471_s18 = smov [#allocation5]  }
   0xb   : > { %s696_s15 = scalar_select %p519_p4, 1, 0 }
   0xc   : > { %s697_s16 = scalar_select %p524_p6, 1, 0 }
   0xd   : > { %p529_p8 = pnand %p271_p5, %p97_p7  ;;  %s110_s19 = sshll.u32 %s471_s18, 4  ;;  %s111_s19 = int_to_ptr.vmem [resolvable:$true] %s110_s19 }
   0xe   : > { %s537_s20 = sadd.s32 1, %s469_s12   ;;  %s26_s24 = sadd.s32 1, %s465_s11 }
   0xf   : > { %s698_s17 = scalar_select %p529_p8, 1, 0 }
  0x10   : > { %p292_p10 = pneg %p529_p8  ;;  %s23_s22 = ssub.s32 %s469_s12, %s537_s20 }
  0x11   : > { %p547_p12 = scmp.eq.s32.totalorder %s23_s22, 0  ;;  %s341_s27 = scalar_lea.hbm %s691_s1, 128 }
  0x12   : > { %p541_p11 = pnand %p292_p10, %p693_p1  ;;  %p342_p0 = scmp.ne.s32.totalorder %s691_s1, %s341_s27 }
  0x13   : > { %s700_s23 = scalar_select %p547_p12, 1, 0 }
  0x14   : > { %p343_p3 = pneg %p541_p11  ;;  %p348_p10 = scmp.lt.u32.totalorder %s341_s27, %s691_s1 }
  0x16   : > { %p344_p5 = pnand %p343_p3, %p342_p0 }
  0x18   : > { %p345_p7 = pneg %p344_p5 }
  0x1a   : > { %p350_p9 = pnand %p348_p10, %p345_p7 }
  0x1c   : > { %353 = shalt.err (!%p350_p9)
}
  0x1d   : > { %s354_s4 = scalar_lea.vmem %s111_s19, 128  ;;  %p362_p6 = scmp.lt.s32.totalorder %s111_s19, %s111_s19 }
  0x1e   : > { %p355_p1 = scmp.ne.s32.totalorder %s111_s19, %s354_s4  ;;  %p363_p4 = scmp.lt.s32.totalorder %s354_s4, %s354_s4 }
  0x20   : > { %p357_p2 = pnand %p355_p1, %p343_p3  ;;  %p364_p8 = por %p363_p4, %p362_p6 }
  0x22   : > { %p358_p13 = pneg %p357_p2 }
  0x24   : > { %p365_p12 = pnand %p364_p8, %p358_p13 }
  0x26   : > { %368 = shalt.err (!%p365_p12)
}
  0x27   : > { %295 = dma.hbm_to_vmem [thread:$0]  (!%p541_p11), %s691_s1, 128, %s111_s19, [#allocation6]  }
  0x28   : > { %p701_p1 = scmp.ne.s32.totalorder %s700_s23, 0  ;;  %p34_p2 = scmp.eq.s32.totalorder %s469_s12, 0 }
  0x29   : > { %p702_p4 = scmp.ne.s32.totalorder %s465_s11, %s461_s10  ;;  %p703_p6 = scmp.eq.s32.totalorder %s510_s13, 1 }
  0x2a   : > { %s573_s7 = scalar_select %p701_p1, %s465_s11, %s26_s24  }
  0x2b   : > { %p581_p8 = por %p703_p6, %p702_p4  ;;  %p305_p9 = scmp.lt.s32.totalorder %s469_s12, 2 }
  0x2c   : > { %s121_s14 = sand.u32 1, %s465_s11   ;;  %p705_p12 = pmov %p702_p4 }
  0x2d   : > { %s274_s18 = sshll.u32 %s121_s14, 3  ;;  %s275_s21 = sshll.u32 %s469_s12, 7 }
  0x2e   : > { %p35_p13 = por %p34_p2, %p705_p12  ;;  %s594_s19 = scalar_lea.hbm %s690_s0, %s275_s21 }
  0x2f   : > { %s125_s23 = scalar_lea.vmem [#allocation2], %s274_s18  ;;  %s122_s27 = scalar_lea.sflag [#allocation3], %s121_s14 }
  0x30   : > { %s132_s24 = sshll.u32 %s125_s23, 4  ;;  %p596_p11 = pnand %p305_p9, %p35_p13  ;;  %s600_s24 = int_to_ptr.vmem [resolvable:$true] %s132_s24 }
  0x31   : > { %s369_s28 = scalar_lea.hbm %s594_s19, 128  ;;  %s374_s3 = scalar_lea.hbm %s690_s0, 256 }
  0x32   : > { %p370_p0 = scmp.ne.s32.totalorder %s594_s19, %s369_s28  ;;  %p371_p3 = pneg %p596_p11 }
  0x33   : > { %p375_p10 = scmp.lt.u32.totalorder %s594_s19, %s690_s0  ;;  %p376_p1 = scmp.lt.u32.totalorder %s374_s3, %s369_s28 }
  0x34   : > { %p372_p5 = pnand %p371_p3, %p370_p0  ;;  %p378_p4 = scmp.lt.u32.totalorder %s369_s28, %s594_s19 }
  0x35   : > { %p377_p2 = por %p376_p1, %p375_p10 }
  0x36   : > { %p373_p7 = pneg %p372_p5 }
  0x37   : > { %p379_p6 = por %p378_p4, %p377_p2 }
  0x39   : > { %p380_p9 = pnand %p379_p6, %p373_p7 }
  0x3b   : > { %383 = shalt.err (!%p380_p9)
}
  0x3c   : > { %s384_s6 = scalar_lea.vmem %s600_s24, 128  ;;  %s472_s14 = smov [#allocation2]  }
  0x3d   : > { %p385_p12 = scmp.ne.s32.totalorder %s600_s24, %s384_s6  ;;  %s389_s18 = sshll.u32 %s472_s14, 4  ;;  %s390_s18 = int_to_ptr.vmem [resolvable:$false] %s389_s18 }
  0x3e   : > { %s391_s21 = scalar_lea.vmem %s390_s18, 256  ;;  %p392_p5 = scmp.lt.s32.totalorder %s600_s24, %s390_s18 }
  0x3f   : > { %p387_p13 = pnand %p385_p12, %p371_p3  ;;  %p393_p10 = scmp.lt.s32.totalorder %s391_s21, %s384_s6 }
  0x41   : > { %p388_p0 = pneg %p387_p13  ;;  %p394_p1 = por %p393_p10, %p392_p5 }
  0x43   : > { %p395_p2 = pnand %p394_p1, %p388_p0 }
  0x45   : > { %398 = shalt.err (!%p395_p2)
}
  0x46   : > { %299 = dma.hbm_to_vmem [thread:$0]  (!%p596_p11), %s594_s19, 128, %s600_s24, %s122_s27  }
  0x47   : > { %p707_p7 = scmp.ne.s32.totalorder %s698_s17, 0 }
  0x48   : > { %s630_s22 = sand.u32 (!%p707_p7), 1, %s461_s10   ;;  %p708_p3 = scmp.ne.s32.totalorder (!%p707_p7), %s696_s15, 0 }
  0x49   : > { %141 = sbr.rel (%p707_p7) target bundleno = 109 (0x6d), region = 28  ;;  %s277_s25 = sshll.u32 (!%p707_p7), %s630_s22, 3 }
  0x4a   : > { %s144_s23 = scalar_lea.sflag (!%p707_p7), [#allocation3], %s630_s22  ;;  %s147_s28 = scalar_lea.vmem (!%p707_p7), [#allocation2], %s277_s25 }
  0x50   : > { %444 = dma.done.wait (%p708_p3), %s144_s23, 128  }
  0x51   : > { %446 = vsyncadd (%p708_p3), %s144_s23, 4294967168  ;;  %p709_p4 = scmp.eq.s32.totalorder %s510_s13, 0 }
  0x53   : > { %448 = dma.done.wait (%p709_p4), [#allocation6], 128   ;;  %p710_p11 = pmov %p709_p4 }
  0x54   : > { %s171_s17 = scalar_lea.vmem [#allocation7], %s277_s25  ;;  %s281_s24 = sshll.u32 %s510_s13, 7  ;;  %v172_v0 = vld [vmem:[%s147_s28] sm:$0xff]  ;;  %v173_v1 = vld [vmem:[#allocation5] sm:$0xff] }
  0x55   : > { %450 = vsyncadd (%p710_p11), [#allocation6], 4294967168  ;;  %s190_s19 = sshll.u32 %s171_s17, 4  ;;  %v174_v2 = vadd.f32 %v173_v1, %v172_v0  ;;  %s648_s27 = scalar_lea.hbm %s692_s2, %s281_s24  ;;  %s643_s19 = int_to_ptr.vmem [resolvable:$true] %s190_s19 }
  0x56   : > { %s177_s29 = scalar_lea.sflag [#allocation4], %s630_s22  ;;  %s399_s30 = scalar_lea.vmem %s643_s19, 128 }
  0x57   : > { %175 = vst [vmem:[%s171_s17] sm:$0xff] %v174_v2  ;;  %p400_p6 = scmp.ne.s32.totalorder %s643_s19, %s399_s30  ;;  %s473_s13 = smov [#allocation7]  }
  0x58   : > { %s403_s3 = sshll.u32 %s473_s13, 4  ;;  %s404_s3 = int_to_ptr.vmem [resolvable:$false] %s403_s3 }
  0x59   : > { %p401_p9 = pnand %p400_p6, %p581_p8  ;;  %s405_s4 = scalar_lea.vmem %s404_s3, 256 }
  0x5a   : > { %p406_p13 = scmp.lt.s32.totalorder %s643_s19, %s404_s3  ;;  %p407_p0 = scmp.lt.s32.totalorder %s405_s4, %s399_s30 }
  0x5b   : > { %p402_p12 = pneg %p401_p9 }
  0x5c   : > { %p408_p5 = por %p407_p0, %p406_p13 }
  0x5e   : > { %p409_p10 = pnand %p408_p5, %p402_p12 }
  0x60   : > { %412 = shalt.err (!%p409_p10)
}
  0x61   : > { %s413_s5 = scalar_lea.hbm %s648_s27, 128  ;;  %s417_s18 = scalar_lea.hbm %s692_s2, 256 }
  0x62   : > { %p414_p1 = scmp.ne.s32.totalorder %s648_s27, %s413_s5  ;;  %p418_p3 = scmp.lt.u32.totalorder %s648_s27, %s692_s2 }
  0x63   : > { %p419_p4 = scmp.lt.u32.totalorder %s417_s18, %s413_s5  ;;  %p421_p6 = scmp.lt.u32.totalorder %s413_s5, %s648_s27 }
  0x64   : > { %p415_p2 = pnand %p414_p1, %p581_p8 }
  0x65   : > { %p420_p11 = por %p419_p4, %p418_p3 }
  0x66   : > { %p416_p7 = pneg %p415_p2 }
  0x67   : > { %p422_p9 = por %p421_p6, %p420_p11 }
  0x69   : > { %p423_p12 = pnand %p422_p9, %p416_p7 }
  0x6b   : > { %426 = shalt.err (!%p423_p12)
}
  0x6c   : > { %290 = dma.vmem_to_hbm [thread:$0]  (%p581_p8), %s643_s19, 128, %s648_s27, %s177_s29  }
  0x6d PF: > { %s202_s25 = sand.u32 1, %s457_s9   ;;  %p711_p13 = scmp.ne.s32.totalorder %s697_s16, 0 }
  0x6e   : > { %p712_p0 = scmp.ge.s32.totalorder %s469_s12, 2  ;;  %s203_s23 = scalar_lea.sflag [#allocation4], %s202_s25 }
  0x70   : > { %p301_p5 = pnand %p712_p0, %p711_p13 }
  0x72   : > { %452 = dma.done.wait (!%p301_p5), %s203_s23, 128  }
  0x73   : > { %454 = vsyncadd (!%p301_p5), %s203_s23, 4294967168  ;;  %p16_p10 = scmp.ge.s32.totalorder %s537_s20, 4   ;;  %s713_s9 = smov %s461_s10 }
  0x74   : > { %s714_s10 = smov %s465_s11  ;;  %s715_s11 = smov %s573_s7 }
  0x75   : > { %s716_s12 = smov %s537_s20  ;;  %18 = sbr.rel (!%p16_p10) target bundleno = 6 (0x6), region = 77 }
  0x7c   :  { %208 = vsyncpa [#allocation3], 1 }
  0x7d   :  { %210 = vsyncpa [#allocation3 + $0x1], 1 }
  0x7e   :  { %211 = vsyncpa [#allocation6], 1 }
  0x7f   :  { %212 = vsyncpa [#allocation4], 1 }
  0x80   :  { %214 = vsyncpa [#allocation4 + $0x1], 1 }

// kernel: dblock_forward.1
= control target key start
LH: loop header
LB: loop body
LE: loop exit
PB: predicated region body
PF: predicated region fallthrough
CT: control target
= control target key end

     0   :  { %s14164_s30 = smov 0   ;;  %s18008_s0 = inlined_call_operand.vmem [shape: f32[2,16,16,128], index: 0, kind: input, shape index: {}]   ;;  %s18009_s1 = inlined_call_operand.vmem [shape: bf16[3,384,128], index: 1, kind: input, shape index: {}]   ;;  %s18010_s2 = inlined_call_operand.vmem [shape: f32[1,128], index: 2, kind: input, shape index: {}]   ;;  %s18011_s3 = inlined_call_operand.vmem [shape: bf16[3,384,128], index: 3, kind: input, shape index: {}]   ;;  %s18012_s4 = inlined_call_operand.vmem [shape: f32[1,128], index: 4, kind: input, shape index: {}]   ;;  %s18013_s5 = inlined_call_operand.vmem [shape: bf16[3,384,128], index: 5, kind: input, shape index: {}]   ;;  %s18014_s6 = inlined_call_operand.vmem [shape: f32[1,128], index: 6, kind: input, shape index: {}]   ;;  %s18015_s7 = inlined_call_operand.vmem [shape: bf16[3,384,128], index: 7, kind: input, shape index: {}]   ;;  %s18016_s8 = inlined_call_operand.vmem [shape: f32[1,128], index: 8, kind: input, shape index: {}]   ;;  %s18017_s9 = inlined_call_operand.vmem [shape: f32[2,16,16,128], index: 9, kind: output, shape index: {}]  }
   0x1 LB: > { %s10262_s10 = sadd.s32 4294967295, %s14110_s30   ;;  %p10266_p0 = scmp.ge.s32.totalorder %s14110_s30, 1  ;;  %s14110_s30 = sphi %s14164_s30, %s19_s30  }
   0x2   : > { %p287_p1 = scmp.lt.s32.totalorder %s14110_s30, 3 }
   0x4   : > { %p288_p2 = pnand %p10266_p0, %p287_p1 }
   0x6   : > { %291 = sbr.rel (%p288_p2) target bundleno = 2187 (0x88b), region = 56 }
   0xd   : > { %v14175_v0 = vld [vmem:[%s18009_s1 + $0x40] sm:$0xff]   ;;  %v14112_v2 = vmov 0.0   ;;  %v14113_v5 = vmov 0.0|0.0   ;;  %v13812_v6 = vld [vmem:[%s18009_s1 + $0x48] sm:$0xff]   ;;  %v13816_v10 = vld [vmem:[%s18009_s1 + $0x50] sm:$0xff]   ;;  %p323_p3 = scmp.lt.s32.totalorder %s10262_s10, 1 }
   0xe   : > { %v14180_v1 = vld [vmem:[%s18009_s1 + $0x100] sm:$0xff]   ;;  %363 = vst [vmem:[#allocation2 + $0xe8] sm:$0xff] %v14112_v2  ;;  %364 = vst [vmem:[#allocation2 + $0xf0] sm:$0xff] %v14112_v2  ;;  %10951 = vmatprep.subr.bf16.mxu0 %v14175_v0  ;;  %1018 = vmatprep.mubr.bf16.mxu0 %v14113_v5  ;;  %v13813_v7 = vld [vmem:[%s18009_s1 + $0x108] sm:$0xff]  }
   0xf   : > { %350 = vst [vmem:[#allocation2 + $0x80] sm:$0xff] %v14112_v2  ;;  %351 = vst [vmem:[#allocation2 + $0x88] sm:$0xff] %v14112_v2  ;;  %v13810_v3 = vld [vmem:[%s18009_s1] sm:$0xff]   ;;  %11087 = vmatprep.subr.bf16.mxu1 %v14180_v1  ;;  %v13814_v8 = vld [vmem:[%s18009_s1 + $0x8] sm:$0xff]   ;;  %s18069_s10 = smov (!%p323_p3, %s10262_s10), 1 }
  0x10   : > { %352 = vst [vmem:[#allocation2 + $0x90] sm:$0xff] %v14112_v2  ;;  %353 = vst [vmem:[#allocation2 + $0x98] sm:$0xff] %v14112_v2  ;;  %v13811_v4 = vld [vmem:[%s18009_s1 + $0xc0] sm:$0xff]   ;;  %10952 = vmatpush3.bf16.msra.mxu0 %v13810_v3  ;;  %v13815_v9 = vld [vmem:[%s18009_s1 + $0xc8] sm:$0xff]   ;;  %s10949_s27 = sshll.u32 %s18069_s10, 8 }
  0x11   : > { %354 = vst [vmem:[#allocation2 + $0xa0] sm:$0xff] %v14112_v2  ;;  %355 = vst [vmem:[#allocation2 + $0xa8] sm:$0xff] %v14112_v2  ;;  %11088 = vmatpush3.bf16.msra.mxu1 %v13811_v4  ;;  %10953 = vmatprep.subr.bf16.mxu0 %v13812_v6  ;;  %v13817_v11 = vld [vmem:[%s18009_s1 + $0x110] sm:$0xff]   ;;  %v13820_v14 = vld [vmem:[%s18009_s1 + $0x58] sm:$0xff]   ;;  %s14339_s17 = scalar_lea.vmem %s18008_s0, %s10949_s27  ;;  %s14347_s21 = scalar_lea.vmem %s18017_s9, %s10949_s27 }
  0x12   : > { %356 = vst [vmem:[#allocation2 + $0xb0] sm:$0xff] %v14112_v2  ;;  %357 = vst [vmem:[#allocation2 + $0xb8] sm:$0xff] %v14112_v2  ;;  %11089 = vmatprep.subr.bf16.mxu1 %v13813_v7  ;;  %v13818_v12 = vld [vmem:[%s18009_s1 + $0x10] sm:$0xff]   ;;  %v13821_v15 = vld [vmem:[%s18009_s1 + $0x118] sm:$0xff]  }
  0x13   : > { %358 = vst [vmem:[#allocation2 + $0xc0] sm:$0xff] %v14112_v2  ;;  %359 = vst [vmem:[#allocation2 + $0xc8] sm:$0xff] %v14112_v2  ;;  %v13819_v13 = vld [vmem:[%s18009_s1 + $0xd0] sm:$0xff]   ;;  %v13822_v16 = vld [vmem:[%s18009_s1 + $0x18] sm:$0xff]  }
  0x14   : > { %360 = vst [vmem:[#allocation2 + $0xd0] sm:$0xff] %v14112_v2  ;;  %361 = vst [vmem:[#allocation2 + $0xd8] sm:$0xff] %v14112_v2  ;;  %10954 = vmatpush3.bf16.msra.mxu0 %v13814_v8  ;;  %v13823_v17 = vld [vmem:[%s18009_s1 + $0xd8] sm:$0xff]   ;;  %v13824_v18 = vld [vmem:[%s18009_s1 + $0x60] sm:$0xff]  }
  0x15   : > { %362 = vst [vmem:[#allocation2 + $0xe0] sm:$0xff] %v14112_v2  ;;  %365 = vst [vmem:[#allocation2 + $0xf8] sm:$0xff] %v14112_v2  ;;  %11090 = vmatpush3.bf16.msra.mxu1 %v13815_v9  ;;  %10955 = vmatprep.subr.bf16.mxu0 %v13816_v10  ;;  %v13825_v19 = vld [vmem:[%s18009_s1 + $0x120] sm:$0xff]   ;;  %v13828_v22 = vld [vmem:[%s18009_s1 + $0x68] sm:$0xff]  }
  0x16   : > { %367 = vst [vmem:[#allocation2 + $0x300] sm:$0xff] %v14112_v2  ;;  %368 = vst [vmem:[#allocation2 + $0x308] sm:$0xff] %v14112_v2  ;;  %11091 = vmatprep.subr.bf16.mxu1 %v13817_v11  ;;  %v13826_v20 = vld [vmem:[%s18009_s1 + $0x20] sm:$0xff]   ;;  %v13829_v23 = vld [vmem:[%s18009_s1 + $0x128] sm:$0xff]  }
  0x17   : > { %369 = vst [vmem:[#allocation2 + $0x310] sm:$0xff] %v14112_v2  ;;  %370 = vst [vmem:[#allocation2 + $0x318] sm:$0xff] %v14112_v2  ;;  %v13827_v21 = vld [vmem:[%s18009_s1 + $0xe0] sm:$0xff]   ;;  %v13830_v24 = vld [vmem:[%s18009_s1 + $0x28] sm:$0xff]  }
  0x18   : > { %371 = vst [vmem:[#allocation2 + $0x320] sm:$0xff] %v14112_v2  ;;  %372 = vst [vmem:[#allocation2 + $0x328] sm:$0xff] %v14112_v2  ;;  %10956 = vmatpush3.bf16.msra.mxu0 %v13818_v12  ;;  %v13831_v25 = vld [vmem:[%s18009_s1 + $0xe8] sm:$0xff]   ;;  %v13832_v26 = vld [vmem:[%s18009_s1 + $0x70] sm:$0xff]  }
  0x19   : > { %373 = vst [vmem:[#allocation2 + $0x330] sm:$0xff] %v14112_v2  ;;  %374 = vst [vmem:[#allocation2 + $0x338] sm:$0xff] %v14112_v2  ;;  %11092 = vmatpush3.bf16.msra.mxu1 %v13819_v13  ;;  %10957 = vmatprep.subr.bf16.mxu0 %v13820_v14  ;;  %v13833_v27 = vld [vmem:[%s18009_s1 + $0x130] sm:$0xff]   ;;  %v13836_v30 = vld [vmem:[%s18009_s1 + $0x78] sm:$0xff]  }
  0x1a   : > { %375 = vst [vmem:[#allocation2 + $0x340] sm:$0xff] %v14112_v2  ;;  %376 = vst [vmem:[#allocation2 + $0x348] sm:$0xff] %v14112_v2  ;;  %11093 = vmatprep.subr.bf16.mxu1 %v13821_v15  ;;  %v13834_v28 = vld [vmem:[%s18009_s1 + $0x30] sm:$0xff]   ;;  %v13837_v31 = vld [vmem:[%s18009_s1 + $0x138] sm:$0xff]  }
  0x1b   : > { %377 = vst [vmem:[#allocation2 + $0x350] sm:$0xff] %v14112_v2  ;;  %378 = vst [vmem:[#allocation2 + $0x358] sm:$0xff] %v14112_v2  ;;  %v13835_v29 = vld [vmem:[%s18009_s1 + $0xf0] sm:$0xff]   ;;  %v13838_v32 = vld [vmem:[%s18009_s1 + $0x38] sm:$0xff]  }
  0x1c   : > { %379 = vst [vmem:[#allocation2 + $0x360] sm:$0xff] %v14112_v2  ;;  %380 = vst [vmem:[#allocation2 + $0x368] sm:$0xff] %v14112_v2  ;;  %10958 = vmatpush3.bf16.msra.mxu0 %v13822_v16  ;;  %v13839_v33 = vld [vmem:[%s18009_s1 + $0xf8] sm:$0xff]   ;;  %v432_v34 = vld [vmem:[%s14339_s17] sm:$0xff] }
  0x1d   : > { %381 = vst [vmem:[#allocation2 + $0x370] sm:$0xff] %v14112_v2  ;;  %382 = vst [vmem:[#allocation2 + $0x378] sm:$0xff] %v14112_v2  ;;  %11094 = vmatpush3.bf16.msra.mxu1 %v13823_v17  ;;  %10959 = vmatprep.subr.bf16.mxu0 %v13824_v18  ;;  %v433_v35 = vld [vmem:[%s14339_s17 + $0x8] sm:$0xff]  ;;  %v13840_v40 = vld [vmem:[%s18009_s1 + $0x80] sm:$0xff]  }
  0x1e   : > { %400 = vst [vmem:[#allocation2 + $0x100] sm:$0xff] %v14112_v2  ;;  %401 = vst [vmem:[#allocation2 + $0x120] sm:$0xff] %v14112_v2  ;;  %11095 = vmatprep.subr.bf16.mxu1 %v13825_v19  ;;  %v529_v36 = vld [vmem:[#allocation2 + $0xe7] sm:$0xff]  ;;  %v639_v37 = vpack.c.bf16 %v433_v35, %v432_v34  ;;  %v530_v38 = vld [vmem:[#allocation2 + $0xef] sm:$0xff] }
  0x1f   : > { %402 = vst [vmem:[#allocation2 + $0x140] sm:$0xff] %v14112_v2  ;;  %403 = vst [vmem:[#allocation2 + $0x160] sm:$0xff] %v14112_v2  ;;  %v565_v39 = vpack.c.bf16 %v530_v38, %v529_v36  ;;  %v434_v41 = vld [vmem:[%s14339_s17 + $0x10] sm:$0xff]  ;;  %v435_v42 = vld [vmem:[%s14339_s17 + $0x18] sm:$0xff] }
  0x20   : > { %404 = vst [vmem:[#allocation2 + $0x180] sm:$0xff] %v14112_v2  ;;  %405 = vst [vmem:[#allocation2 + $0x1a0] sm:$0xff] %v14112_v2  ;;  %10960 = vmatpush3.bf16.msra.mxu0 %v13826_v20  ;;  %1614 = vmatprep.mubr.bf16.mxu1 %v639_v37  ;;  %v14364_v43 = vld [vmem:[%s14339_s17 + $0x20] sm:$0xff]  ;;  %v14367_v44 = vld [vmem:[%s14339_s17 + $0x28] sm:$0xff]  ;;  %v14414_v56 = vpack.c.bf16 %v435_v42, %v434_v41 }
  0x21   : > { %406 = vst [vmem:[#allocation2 + $0x1c0] sm:$0xff] %v14112_v2  ;;  %407 = vst [vmem:[#allocation2 + $0x1e0] sm:$0xff] %v14112_v2  ;;  %11096 = vmatpush3.bf16.msra.mxu1 %v13827_v21  ;;  %10961 = vmatprep.subr.bf16.mxu0 %v13828_v22  ;;  %v13841_v45 = vld [vmem:[%s18009_s1 + $0x88] sm:$0xff]   ;;  %v14379_v46 = vld [vmem:[%s14339_s17 + $0x30] sm:$0xff]  ;;  %v14467_v4 = vpack.c.bf16 %v14367_v44, %v14364_v43 }
  0x22   : > { %408 = vst [vmem:[#allocation2 + $0x200] sm:$0xff] %v14112_v2  ;;  %409 = vst [vmem:[#allocation2 + $0x220] sm:$0xff] %v14112_v2  ;;  %11097 = vmatprep.subr.bf16.mxu1 %v13829_v23  ;;  %v14382_v47 = vld [vmem:[%s14339_s17 + $0x38] sm:$0xff]  ;;  %v14388_v48 = vld [vmem:[%s14339_s17 + $0x40] sm:$0xff] }
  0x23   : > { %410 = vst [vmem:[#allocation2 + $0x240] sm:$0xff] %v14112_v2  ;;  %411 = vst [vmem:[#allocation2 + $0x260] sm:$0xff] %v14112_v2  ;;  %v14391_v49 = vld [vmem:[%s14339_s17 + $0x48] sm:$0xff]  ;;  %v13842_v50 = vld [vmem:[%s18009_s1 + $0x90] sm:$0xff]   ;;  %v14520_v20 = vpack.c.bf16 %v14382_v47, %v14379_v46 }
  0x24   : > { %412 = vst [vmem:[#allocation2 + $0x280] sm:$0xff] %v14112_v2  ;;  %413 = vst [vmem:[#allocation2 + $0x2a0] sm:$0xff] %v14112_v2  ;;  %10962 = vmatpush3.bf16.msra.mxu0 %v13830_v24  ;;  %v14406_v51 = vld [vmem:[%s14339_s17 + $0x50] sm:$0xff]  ;;  %v14409_v52 = vld [vmem:[%s14339_s17 + $0x58] sm:$0xff]  ;;  %v14559_v36 = vpack.c.bf16 %v14391_v49, %v14388_v48 }
  0x25   : > { %414 = vst [vmem:[#allocation2 + $0x2c0] sm:$0xff] %v14112_v2  ;;  %415 = vst [vmem:[#allocation2 + $0x2e0] sm:$0xff] %v14112_v2  ;;  %11098 = vmatpush3.bf16.msra.mxu1 %v13831_v25  ;;  %10963 = vmatprep.subr.bf16.mxu0 %v13832_v26  ;;  %v14412_v53 = vld [vmem:[%s14339_s17 + $0x60] sm:$0xff]  ;;  %v14423_v57 = vld [vmem:[%s14339_s17 + $0x68] sm:$0xff] }
  0x26   : > { %416 = vst [vmem:[#allocation2 + $0x118] sm:$0xff] %v14112_v2  ;;  %417 = vst [vmem:[#allocation2 + $0x138] sm:$0xff] %v14112_v2  ;;  %11099 = vmatprep.subr.bf16.mxu1 %v13833_v27  ;;  %v13843_v59 = vld [vmem:[%s18009_s1 + $0x98] sm:$0xff]   ;;  %v14435_v60 = vld [vmem:[%s14339_s17 + $0x70] sm:$0xff] }
  0x27   : > { %418 = vst [vmem:[#allocation2 + $0x158] sm:$0xff] %v14112_v2  ;;  %419 = vst [vmem:[#allocation2 + $0x178] sm:$0xff] %v14112_v2  ;;  %v14438_v62 = vld [vmem:[%s14339_s17 + $0x78] sm:$0xff]  ;;  %v13844_v0 = vld [vmem:[%s18009_s1 + $0x140] sm:$0xff]  }
  0x28   : > { %420 = vst [vmem:[#allocation2 + $0x198] sm:$0xff] %v14112_v2  ;;  %421 = vst [vmem:[#allocation2 + $0x1b8] sm:$0xff] %v14112_v2  ;;  %10964 = vmatpush3.bf16.msra.mxu0 %v13834_v28  ;;  %v14452_v1 = vld [vmem:[%s14339_s17 + $0x80] sm:$0xff]  ;;  %v14473_v6 = vld [vmem:[%s14339_s17 + $0x90] sm:$0xff] }
  0x29   : > { %422 = vst [vmem:[#allocation2 + $0x1d8] sm:$0xff] %v14112_v2  ;;  %423 = vst [vmem:[#allocation2 + $0x1f8] sm:$0xff] %v14112_v2  ;;  %11100 = vmatpush3.bf16.msra.mxu1 %v13835_v29  ;;  %10965 = vmatprep.subr.bf16.mxu0 %v13836_v30  ;;  %v13845_v5 = vld [vmem:[%s18009_s1 + $0xa0] sm:$0xff]   ;;  %v14476_v7 = vld [vmem:[%s14339_s17 + $0x98] sm:$0xff] }
  0x2a   : > { %424 = vst [vmem:[#allocation2 + $0x218] sm:$0xff] %v14112_v2  ;;  %425 = vst [vmem:[#allocation2 + $0x238] sm:$0xff] %v14112_v2  ;;  %11101 = vmatprep.subr.bf16.mxu1 %v13837_v31  ;;  %v13846_v10 = vld [vmem:[%s18009_s1 + $0x148] sm:$0xff]   ;;  %v14489_v11 = vld [vmem:[%s14339_s17 + $0xa0] sm:$0xff] }
  0x2b   : > { %426 = vst [vmem:[#allocation2 + $0x258] sm:$0xff] %v14112_v2  ;;  %427 = vst [vmem:[#allocation2 + $0x278] sm:$0xff] %v14112_v2  ;;  %v14494_v12 = vld [vmem:[%s14339_s17 + $0xa8] sm:$0xff]  ;;  %v454_v14 = vld [vmem:[%s14339_s17 + $0xb0] sm:$0xff] }
  0x2c   : > { %428 = vst [vmem:[#allocation2 + $0x298] sm:$0xff] %v14112_v2  ;;  %429 = vst [vmem:[#allocation2 + $0x2b8] sm:$0xff] %v14112_v2  ;;  %10966 = vmatpush3.bf16.msra.mxu0 %v13838_v32  ;;  %v13847_v13 = vld [vmem:[%s18009_s1 + $0xa8] sm:$0xff]   ;;  %v455_v15 = vld [vmem:[%s14339_s17 + $0xb8] sm:$0xff] }
  0x2d   : > { %430 = vst [vmem:[#allocation2 + $0x2d8] sm:$0xff] %v14112_v2  ;;  %431 = vst [vmem:[#allocation2 + $0x2f8] sm:$0xff] %v14112_v2  ;;  %11102 = vmatpush3.bf16.msra.mxu1 %v13839_v33  ;;  %12583 = vmatprep.subr.bf16.mxu0 %v13840_v40  ;;  %v14455_v2 = vld [vmem:[%s14339_s17 + $0x88] sm:$0xff]  ;;  %v14508_v16 = vpack.c.bf16 %v455_v15, %v454_v14  ;;  %v13848_v18 = vld [vmem:[%s18009_s1 + $0x150] sm:$0xff]  }
  0x2e   : > { %496 = vst [vmem:[#allocation2 + $0x108] sm:$0xff] %v432_v34  ;;  %497 = vst [vmem:[#allocation2 + $0x110] sm:$0xff] %v433_v35  ;;  %12631 = vmatprep.subr.bf16.mxu1 %v13844_v0  ;;  %v456_v19 = vld [vmem:[%s14339_s17 + $0xc0] sm:$0xff]  ;;  %v457_v21 = vld [vmem:[%s14339_s17 + $0xc8] sm:$0xff] }
  0x2f   : > { %464 = vst [vmem:[%s14347_s21] sm:$0xff] %v432_v34  ;;  %465 = vst [vmem:[%s14347_s21 + $0x8] sm:$0xff] %v433_v35  ;;  %1019 = vmatmul.mubr.bf16.vlgmr.msra.gmra.mrb[0].mxu0 %v565_v39  ;;  %v14524_v22 = vpack.c.bf16 %v457_v21, %v456_v19  ;;  %v13849_v23 = vld [vmem:[%s18009_s1 + $0xb0] sm:$0xff]   ;;  %v459_v25 = vld [vmem:[%s14339_s17 + $0xd8] sm:$0xff] }
  0x30   : > { %498 = vst [vmem:[#allocation2 + $0x128] sm:$0xff] %v434_v41  ;;  %499 = vst [vmem:[#allocation2 + $0x130] sm:$0xff] %v435_v42  ;;  %12584 = vmatpush3.bf16.msra.mxu0 %v13840_v40  ;;  %1026 = vmatprep.mubr.bf16.mxu0 %v639_v37  ;;  %v458_v24 = vld [vmem:[%s14339_s17 + $0xd0] sm:$0xff]  ;;  %v13850_v28 = vld [vmem:[%s18009_s1 + $0x158] sm:$0xff]  }
  0x31   : > { %466 = vst [vmem:[%s14347_s21 + $0x10] sm:$0xff] %v434_v41  ;;  %467 = vst [vmem:[%s14347_s21 + $0x18] sm:$0xff] %v435_v42  ;;  %12585 = vmatprep.subr.bf16.mxu0 %v13841_v45  ;;  %v14533_v27 = vpack.c.bf16 %v459_v25, %v458_v24  ;;  %v460_v30 = vld [vmem:[%s14339_s17 + $0xe0] sm:$0xff]  ;;  %v461_v31 = vld [vmem:[%s14339_s17 + $0xe8] sm:$0xff] }
  0x32   : > { %500 = vst [vmem:[#allocation2 + $0x148] sm:$0xff] %v14364_v43  ;;  %501 = vst [vmem:[#allocation2 + $0x150] sm:$0xff] %v14367_v44  ;;  %v14545_v32 = vpack.c.bf16 %v461_v31, %v460_v30  ;;  %v13851_v33 = vld [vmem:[%s18009_s1 + $0xb8] sm:$0xff]   ;;  %v13852_v35 = vld [vmem:[%s18009_s1 + $0x160] sm:$0xff]  }
  0x33   : > { %468 = vst [vmem:[%s14347_s21 + $0x20] sm:$0xff] %v14364_v43  ;;  %469 = vst [vmem:[%s14347_s21 + $0x28] sm:$0xff] %v14367_v44  ;;  %v462_v37 = vld [vmem:[%s14339_s17 + $0xf0] sm:$0xff]  ;;  %v463_v38 = vld [vmem:[%s14339_s17 + $0xf8] sm:$0xff] }
  0x34   : > { %502 = vst [vmem:[#allocation2 + $0x168] sm:$0xff] %v14379_v46  ;;  %470 = vst [vmem:[%s14347_s21 + $0x30] sm:$0xff] %v14379_v46  ;;  %12586 = vmatpush3.bf16.msra.mxu0 %v13841_v45  ;;  %v13853_v39 = vld [vmem:[%s18009_s1 + $0x168] sm:$0xff]   ;;  %v14566_v40 = vpack.c.bf16 %v463_v38, %v462_v37  ;;  %v13854_v43 = vld [vmem:[%s18009_s1 + $0x170] sm:$0xff]   ;;  %v14581_v45 = vpack.c.bf16 %v14409_v52, %v14406_v51 }
  0x35   : > { %503 = vst [vmem:[#allocation2 + $0x170] sm:$0xff] %v14382_v47  ;;  %471 = vst [vmem:[%s14347_s21 + $0x38] sm:$0xff] %v14382_v47  ;;  %v531_v54 = vld [vmem:[#allocation2 + $0x107] sm:$0xff]  ;;  %v532_v55 = vld [vmem:[#allocation2 + $0x10f] sm:$0xff]  ;;  %12587 = vmatprep.subr.bf16.mxu0 %v13842_v50 }
  0x36   : > { %504 = vst [vmem:[#allocation2 + $0x188] sm:$0xff] %v14388_v48  ;;  %505 = vst [vmem:[#allocation2 + $0x190] sm:$0xff] %v14391_v49  ;;  %v566_v58 = vpack.c.bf16 %v532_v55, %v531_v54  ;;  %v13856_v46 = vld [vmem:[%s18009_s1 + $0x1c0] sm:$0xff]   ;;  %v13855_v47 = vld [vmem:[%s18009_s1 + $0x178] sm:$0xff]  }
  0x37   : > { %472 = vst [vmem:[%s14347_s21 + $0x40] sm:$0xff] %v14388_v48  ;;  %473 = vst [vmem:[%s14347_s21 + $0x48] sm:$0xff] %v14391_v49  ;;  %v533_v61 = vld [vmem:[#allocation2 + $0x127] sm:$0xff]  ;;  %v534_v63 = vld [vmem:[#allocation2 + $0x12f] sm:$0xff] }
  0x38   : > { %506 = vst [vmem:[#allocation2 + $0x1a8] sm:$0xff] %v14406_v51  ;;  %507 = vst [vmem:[#allocation2 + $0x1b0] sm:$0xff] %v14409_v52  ;;  %1615 = vmatmul.mubr.bf16.vlgmr.msra.gmra.mrb[0].mxu1 %v566_v58  ;;  %1027 = vmatmul.mubr.bf16.gmra.mrb[4].mxu0 %v566_v58  ;;  %v14457_v3 = vpack.c.bf16 %v534_v63, %v533_v61  ;;  %v14608_v58 = vld [vmem:[%s18009_s1 + $0x200] sm:$0xff]   ;;  %v14623_v63 = vpack.c.bf16 %v14455_v2, %v14452_v1 }
  0x39   : > { %474 = vst [vmem:[%s14347_s21 + $0x50] sm:$0xff] %v14406_v51  ;;  %475 = vst [vmem:[%s14347_s21 + $0x58] sm:$0xff] %v14409_v52  ;;  %1622 = vmatprep.mubr.bf16.mxu1 %v14414_v56  ;;  %1034 = vmatprep.mubr.bf16.mxu0 %v14414_v56  ;;  %v535_v8 = vld [vmem:[#allocation2 + $0x147] sm:$0xff]  ;;  %v536_v9 = vld [vmem:[#allocation2 + $0x14f] sm:$0xff]  ;;  %v14597_v51 = vpack.c.bf16 %v14423_v57, %v14412_v53 }
  0x3a   : > { %508 = vst [vmem:[#allocation2 + $0x1c8] sm:$0xff] %v14412_v53  ;;  %476 = vst [vmem:[%s14347_s21 + $0x60] sm:$0xff] %v14412_v53  ;;  %12588 = vmatpush3.bf16.msra.mxu0 %v13842_v50  ;;  %12632 = vmatpush3.bf16.msra.mxu1 %v13844_v0  ;;  %v14512_v17 = vpack.c.bf16 %v536_v9, %v535_v8  ;;  %v14612_v53 = vpack.c.bf16 %v14438_v62, %v14435_v60 }
  0x3b   : > { %509 = vst [vmem:[#allocation2 + $0x1d0] sm:$0xff] %v14423_v57  ;;  %477 = vst [vmem:[%s14347_s21 + $0x68] sm:$0xff] %v14423_v57  ;;  %12589 = vmatprep.subr.bf16.mxu0 %v13843_v59  ;;  %12633 = vmatprep.subr.bf16.mxu1 %v13846_v10  ;;  %v537_v26 = vld [vmem:[#allocation2 + $0x167] sm:$0xff] }
  0x3c   : > { %510 = vst [vmem:[#allocation2 + $0x1e8] sm:$0xff] %v14435_v60  ;;  %478 = vst [vmem:[%s14347_s21 + $0x70] sm:$0xff] %v14435_v60  ;;  %v538_v29 = vld [vmem:[#allocation2 + $0x16f] sm:$0xff] }
  0x3d   : > { %511 = vst [vmem:[#allocation2 + $0x1f0] sm:$0xff] %v14438_v62  ;;  %479 = vst [vmem:[%s14347_s21 + $0x78] sm:$0xff] %v14438_v62  ;;  %v14552_v34 = vpack.c.bf16 %v538_v29, %v537_v26  ;;  %v539_v41 = vld [vmem:[#allocation2 + $0x187] sm:$0xff]  ;;  %v540_v42 = vld [vmem:[#allocation2 + $0x18f] sm:$0xff] }
  0x3e   : > { %512 = vst [vmem:[#allocation2 + $0x208] sm:$0xff] %v14452_v1  ;;  %513 = vst [vmem:[#allocation2 + $0x210] sm:$0xff] %v14455_v2  ;;  %12590 = vmatpush3.bf16.msra.mxu0 %v13843_v59  ;;  %12634 = vmatpush3.bf16.msra.mxu1 %v13846_v10  ;;  %v14577_v44 = vpack.c.bf16 %v540_v42, %v539_v41  ;;  %v674_v26 = vld [vmem:[#allocation2 + $0xe9] sm:$0xff]  ;;  %v13857_v42 = vld [vmem:[%s18009_s1 + $0x180] sm:$0xff]  }
  0x3f   : > { %480 = vst [vmem:[%s14347_s21 + $0x80] sm:$0xff] %v14452_v1  ;;  %481 = vst [vmem:[%s14347_s21 + $0x88] sm:$0xff] %v14455_v2  ;;  %12591 = vmatprep.subr.bf16.mxu0 %v13845_v5  ;;  %12635 = vmatprep.subr.bf16.mxu1 %v13848_v18  ;;  %v541_v48 = vld [vmem:[#allocation2 + $0x1a7] sm:$0xff]  ;;  %v542_v49 = vld [vmem:[#allocation2 + $0x1af] sm:$0xff]  ;;  %v14643_v2 = vpack.c.bf16 %v14494_v12, %v14489_v11 }
  0x40   : > { %514 = vst [vmem:[#allocation2 + $0x228] sm:$0xff] %v14473_v6  ;;  %515 = vst [vmem:[#allocation2 + $0x230] sm:$0xff] %v14476_v7  ;;  %1623 = vmatmul.mubr.bf16.gmra.mrb[4].mxu1 %v14457_v3  ;;  %1035 = vmatmul.mubr.bf16.gmra.mrb[8].mxu0 %v14457_v3  ;;  %v14593_v50 = vpack.c.bf16 %v542_v49, %v541_v48  ;;  %v680_v48 = vld [vmem:[#allocation2 + $0x149] sm:$0xff]  ;;  %v681_v49 = vld [vmem:[#allocation2 + $0x151] sm:$0xff] }
  0x41   : > { %482 = vst [vmem:[%s14347_s21 + $0x90] sm:$0xff] %v14473_v6  ;;  %483 = vst [vmem:[%s14347_s21 + $0x98] sm:$0xff] %v14476_v7  ;;  %1630 = vmatprep.mubr.bf16.mxu1 %v14467_v4  ;;  %1042 = vmatprep.mubr.bf16.mxu0 %v14467_v4  ;;  %v543_v52 = vld [vmem:[#allocation2 + $0x1c7] sm:$0xff] }
  0x42   : > { %516 = vst [vmem:[#allocation2 + $0x248] sm:$0xff] %v14489_v11  ;;  %484 = vst [vmem:[%s14347_s21 + $0xa0] sm:$0xff] %v14489_v11  ;;  %12592 = vmatpush3.bf16.msra.mxu0 %v13845_v5  ;;  %12636 = vmatpush3.bf16.msra.mxu1 %v13848_v18  ;;  %v544_v54 = vld [vmem:[#allocation2 + $0x1cf] sm:$0xff]  ;;  %v14633_v5 = vpack.c.bf16 %v14476_v7, %v14473_v6 }
  0x43   : > { %517 = vst [vmem:[#allocation2 + $0x250] sm:$0xff] %v14494_v12  ;;  %485 = vst [vmem:[%s14347_s21 + $0xa8] sm:$0xff] %v14494_v12  ;;  %12593 = vmatprep.subr.bf16.mxu0 %v13847_v13  ;;  %12637 = vmatprep.subr.bf16.mxu1 %v13850_v28  ;;  %v14603_v55 = vpack.c.bf16 %v544_v54, %v543_v52  ;;  %v545_v57 = vld [vmem:[#allocation2 + $0x1e7] sm:$0xff]  ;;  %v13860_v54 = vld [vmem:[%s18009_s1 + $0x1d0] sm:$0xff]  }
  0x44   : > { %518 = vst [vmem:[#allocation2 + $0x268] sm:$0xff] %v454_v14  ;;  %519 = vst [vmem:[#allocation2 + $0x270] sm:$0xff] %v455_v15  ;;  %v546_v59 = vld [vmem:[#allocation2 + $0x1ef] sm:$0xff] }
  0x45   : > { %486 = vst [vmem:[%s14347_s21 + $0xb0] sm:$0xff] %v454_v14  ;;  %487 = vst [vmem:[%s14347_s21 + $0xb8] sm:$0xff] %v455_v15  ;;  %v14619_v61 = vpack.c.bf16 %v546_v59, %v545_v57  ;;  %v547_v60 = vld [vmem:[#allocation2 + $0x207] sm:$0xff]  ;;  %v548_v62 = vld [vmem:[#allocation2 + $0x20f] sm:$0xff] }
  0x46   : > { %520 = vst [vmem:[#allocation2 + $0x288] sm:$0xff] %v456_v19  ;;  %488 = vst [vmem:[%s14347_s21 + $0xc0] sm:$0xff] %v456_v19  ;;  %12594 = vmatpush3.bf16.msra.mxu0 %v13847_v13  ;;  %12638 = vmatpush3.bf16.msra.mxu1 %v13850_v28  ;;  %v14629_v0 = vpack.c.bf16 %v548_v62, %v547_v60  ;;  %v675_v28 = vld [vmem:[#allocation2 + $0xf1] sm:$0xff]  ;;  %v13859_v52 = vld [vmem:[%s18009_s1 + $0x188] sm:$0xff]   ;;  %v14699_v62 = vpack.c.bf16 %v681_v49, %v680_v48 }
  0x47   : > { %521 = vst [vmem:[#allocation2 + $0x290] sm:$0xff] %v457_v21  ;;  %489 = vst [vmem:[%s14347_s21 + $0xc8] sm:$0xff] %v457_v21  ;;  %12595 = vmatprep.subr.bf16.mxu0 %v13849_v23  ;;  %12639 = vmatprep.subr.bf16.mxu1 %v13852_v35  ;;  %v549_v8 = vld [vmem:[#allocation2 + $0x227] sm:$0xff]  ;;  %v550_v9 = vld [vmem:[#allocation2 + $0x22f] sm:$0xff] }
  0x48   : > { %1631 = vmatmul.mubr.bf16.gmra.mrb[8].mxu1 %v14512_v17  ;;  %522 = vst [vmem:[#allocation2 + $0x2a8] sm:$0xff] %v458_v24  ;;  %523 = vst [vmem:[#allocation2 + $0x2b0] sm:$0xff] %v459_v25  ;;  %1043 = vmatmul.mubr.bf16.gmra.mrb[12].mxu0 %v14512_v17  ;;  %v14639_v1 = vpack.c.bf16 %v550_v9, %v549_v8  ;;  %v682_v57 = vld [vmem:[#allocation2 + $0x169] sm:$0xff]  ;;  %v683_v59 = vld [vmem:[#allocation2 + $0x171] sm:$0xff] }
  0x49   : > { %490 = vst [vmem:[%s14347_s21 + $0xd0] sm:$0xff] %v458_v24  ;;  %491 = vst [vmem:[%s14347_s21 + $0xd8] sm:$0xff] %v459_v25  ;;  %1638 = vmatprep.mubr.bf16.mxu1 %v14520_v20  ;;  %1050 = vmatprep.mubr.bf16.mxu0 %v14520_v20  ;;  %v551_v10 = vld [vmem:[#allocation2 + $0x247] sm:$0xff]  ;;  %v13861_v60 = vld [vmem:[%s18009_s1 + $0x190] sm:$0xff]  }
  0x4a   : > { %524 = vst [vmem:[#allocation2 + $0x2c8] sm:$0xff] %v460_v30  ;;  %525 = vst [vmem:[#allocation2 + $0x2d0] sm:$0xff] %v461_v31  ;;  %12596 = vmatpush3.bf16.msra.mxu0 %v13849_v23  ;;  %12640 = vmatpush3.bf16.msra.mxu1 %v13852_v35  ;;  %v552_v13 = vld [vmem:[#allocation2 + $0x24f] sm:$0xff]  ;;  %v13862_v8 = vld [vmem:[%s18009_s1 + $0x1d8] sm:$0xff]  }
  0x4b   : > { %492 = vst [vmem:[%s14347_s21 + $0xe0] sm:$0xff] %v460_v30  ;;  %493 = vst [vmem:[%s14347_s21 + $0xe8] sm:$0xff] %v461_v31  ;;  %12597 = vmatprep.subr.bf16.mxu0 %v13851_v33  ;;  %12641 = vmatprep.subr.bf16.mxu1 %v13853_v39  ;;  %v14649_v6 = vpack.c.bf16 %v552_v13, %v551_v10  ;;  %v553_v7 = vld [vmem:[#allocation2 + $0x267] sm:$0xff]  ;;  %v554_v14 = vld [vmem:[#allocation2 + $0x26f] sm:$0xff]  ;;  %v710_v30 = vpack.c.bf16 %v675_v28, %v674_v26 }
  0x4c   : > { %526 = vst [vmem:[#allocation2 + $0x2e8] sm:$0xff] %v462_v37  ;;  %527 = vst [vmem:[#allocation2 + $0x2f0] sm:$0xff] %v463_v38  ;;  %v14655_v11 = vpack.c.bf16 %v554_v14, %v553_v7  ;;  %v676_v31 = vld [vmem:[#allocation2 + $0x109] sm:$0xff]  ;;  %v14708_v10 = vpack.c.bf16 %v683_v59, %v682_v57  ;;  %v685_v7 = vld [vmem:[#allocation2 + $0x191] sm:$0xff] }
  0x4d   : > { %494 = vst [vmem:[%s14347_s21 + $0xf0] sm:$0xff] %v462_v37  ;;  %495 = vst [vmem:[%s14347_s21 + $0xf8] sm:$0xff] %v463_v38  ;;  %v555_v12 = vld [vmem:[#allocation2 + $0x287] sm:$0xff]  ;;  %v13863_v14 = vld [vmem:[%s18009_s1 + $0x198] sm:$0xff]  }
  0x4e   : > { %12598 = vmatpush3.bf16.msra.mxu0 %v13851_v33  ;;  %12642 = vmatpush3.bf16.msra.mxu1 %v13853_v39  ;;  %v556_v15 = vld [vmem:[#allocation2 + $0x28f] sm:$0xff]  ;;  %v13871_v28 = vld [vmem:[%s18009_s1 + $0x218] sm:$0xff]  }
  0x4f   : > { %12643 = vmatprep.subr.bf16.mxu1 %v13854_v43  ;;  %11223 = vmatprep.subr.bf16.mxu0 %v13856_v46  ;;  %v14661_v18 = vpack.c.bf16 %v556_v15, %v555_v12  ;;  %v557_v19 = vld [vmem:[#allocation2 + $0x2a7] sm:$0xff]  ;;  %v558_v21 = vld [vmem:[#allocation2 + $0x2af] sm:$0xff]  ;;  %v13878_v57 = vld [vmem:[%s18009_s1 + $0x1b8] sm:$0xff]  }
  0x50   : > { %1639 = vmatmul.mubr.bf16.gmra.mrb[12].mxu1 %v14552_v34  ;;  %1051 = vmatmul.mubr.bf16.gmra.mrb[16].mxu0 %v14552_v34  ;;  %v14667_v23 = vpack.c.bf16 %v558_v21, %v557_v19  ;;  %v677_v33 = vld [vmem:[#allocation2 + $0x111] sm:$0xff]  ;;  %v678_v38 = vld [vmem:[#allocation2 + $0x129] sm:$0xff]  ;;  %v13864_v12 = vld [vmem:[%s18009_s1 + $0x1e0] sm:$0xff]  }
  0x51   : > { %1646 = vmatprep.mubr.bf16.mxu1 %v14559_v36  ;;  %1058 = vmatprep.mubr.bf16.mxu0 %v14559_v36  ;;  %v559_v24 = vld [vmem:[#allocation2 + $0x2c7] sm:$0xff]  ;;  %v560_v25 = vld [vmem:[#allocation2 + $0x2cf] sm:$0xff] }
  0x52   : > { %12644 = vmatpush3.bf16.msra.mxu1 %v13854_v43  ;;  %v14673_v29 = vpack.c.bf16 %v560_v25, %v559_v24  ;;  %v679_v39 = vld [vmem:[#allocation2 + $0x131] sm:$0xff]  ;;  %v711_v43 = vpack.c.bf16 %v677_v33, %v676_v31  ;;  %v13858_v46 = vld [vmem:[%s18009_s1 + $0x1c8] sm:$0xff]   ;;  %v13866_v24 = vld [vmem:[%s18009_s1 + $0x1a0] sm:$0xff]  }
  0x53   : > { %12645 = vmatprep.subr.bf16.mxu1 %v13855_v47  ;;  %v561_v35 = vld [vmem:[#allocation2 + $0x2e7] sm:$0xff]  ;;  %v562_v37 = vld [vmem:[#allocation2 + $0x2ef] sm:$0xff] }
  0x54   : > { %v14678_v41 = vpack.c.bf16 %v562_v37, %v561_v35  ;;  %v13867_v9 = vld [vmem:[%s18009_s1 + $0x208] sm:$0xff]   ;;  %v13869_v15 = vld [vmem:[%s18009_s1 + $0x210] sm:$0xff]   ;;  %v13873_v37 = vld [vmem:[%s18009_s1 + $0x220] sm:$0xff]  }
  0x55   : > { %v684_v13 = vld [vmem:[#allocation2 + $0x189] sm:$0xff]  ;;  %v687_v21 = vld [vmem:[#allocation2 + $0x1b1] sm:$0xff] }
  0x56   : > { %12646 = vmatpush3.bf16.msra.mxu1 %v13855_v47  ;;  %v14687_v47 = vpack.c.bf16 %v679_v39, %v678_v38  ;;  %v686_v19 = vld [vmem:[#allocation2 + $0x1a9] sm:$0xff]  ;;  %v14726_v25 = vpack.c.bf16 %v685_v7, %v684_v13  ;;  %v689_v31 = vld [vmem:[#allocation2 + $0x1d1] sm:$0xff] }
  0x57   : > { %12679 = vmatprep.subr.bf16.mxu1 %v14608_v58  ;;  %v13868_v26 = vld [vmem:[%s18009_s1 + $0x1e8] sm:$0xff]   ;;  %v13872_v35 = vld [vmem:[%s18009_s1 + $0x1f0] sm:$0xff]   ;;  %v13879_v13 = vld [vmem:[%s18009_s1 + $0x238] sm:$0xff]  }
  0x58   : > { %1647 = vmatmul.mubr.bf16.gmra.mrb[16].mxu1 %v14577_v44  ;;  %1059 = vmatmul.mubr.bf16.gmra.mrb[20].mxu0 %v14577_v44  ;;  %v13870_v33 = vld [vmem:[%s18009_s1 + $0x1a8] sm:$0xff]   ;;  %v691_v39 = vld [vmem:[#allocation2 + $0x1f1] sm:$0xff] }
  0x59   : > { %1654 = vmatprep.mubr.bf16.mxu1 %v14581_v45  ;;  %1066 = vmatprep.mubr.bf16.mxu0 %v14581_v45  ;;  %v690_v38 = vld [vmem:[#allocation2 + $0x1e9] sm:$0xff] }
  0x5a   : > { %v13875_v48 = vld [vmem:[%s18009_s1 + $0x228] sm:$0xff]   ;;  %v14761_v49 = vpack.c.bf16 %v691_v39, %v690_v38  ;;  %v13877_v59 = vld [vmem:[%s18009_s1 + $0x230] sm:$0xff]  }
  0x5b   : > { %v705_v38 = vld [vmem:[#allocation2 + $0x2d1] sm:$0xff] }
  0x60   : > { %1655 = vmatmul.mubr.bf16.gmra.mrb[20].mxu1 %v14593_v50  ;;  %1067 = vmatmul.mubr.bf16.gmra.mrb[24].mxu0 %v14593_v50 }
  0x61   : > { %1662 = vmatprep.mubr.bf16.mxu1 %v14597_v51  ;;  %1074 = vmatprep.mubr.bf16.mxu0 %v14597_v51 }
  0x68   : > { %1663 = vmatmul.mubr.bf16.gmra.mrb[24].mxu1 %v14603_v55  ;;  %1075 = vmatmul.mubr.bf16.gmra.mrb[28].mxu0 %v14603_v55 }
  0x69   : > { %1670 = vmatprep.mubr.bf16.mxu1 %v14612_v53  ;;  %1082 = vmatprep.mubr.bf16.mxu0 %v14612_v53 }
  0x70   : > { %1671 = vmatmul.mubr.bf16.gmra.mrb[28].mxu1 %v14619_v61  ;;  %1083 = vmatmul.mubr.bf16.gmra.mrb[32].mxu0 %v14619_v61 }
  0x71   : > { %1678 = vmatprep.mubr.bf16.mxu1 %v14623_v63  ;;  %1090 = vmatprep.mubr.bf16.mxu0 %v14623_v63 }
  0x78   : > { %1679 = vmatmul.mubr.bf16.gmra.mrb[32].mxu1 %v14629_v0  ;;  %1091 = vmatmul.mubr.bf16.gmra.mrb[36].mxu0 %v14629_v0 }
  0x79   : > { %1686 = vmatprep.mubr.bf16.mxu1 %v14633_v5  ;;  %1098 = vmatprep.mubr.bf16.mxu0 %v14633_v5 }
  0x80   : > { %1687 = vmatmul.mubr.bf16.gmra.mrb[36].mxu1 %v14639_v1  ;;  %1099 = vmatmul.mubr.bf16.gmra.mrb[40].mxu0 %v14639_v1 }
  0x81   : > { %1694 = vmatprep.mubr.bf16.mxu1 %v14643_v2  ;;  %1106 = vmatprep.mubr.bf16.mxu0 %v14643_v2 }
  0x88   : > { %1695 = vmatmul.mubr.bf16.gmra.mrb[40].mxu1 %v14649_v6  ;;  %1107 = vmatmul.mubr.bf16.gmra.mrb[44].mxu0 %v14649_v6 }
  0x89   : > { %1702 = vmatprep.mubr.bf16.mxu1 %v14508_v16  ;;  %1114 = vmatprep.mubr.bf16.mxu0 %v14508_v16 }
  0x90   : > { %1703 = vmatmul.mubr.bf16.gmra.mrb[44].mxu1 %v14655_v11  ;;  %1115 = vmatmul.mubr.bf16.gmra.mrb[48].mxu0 %v14655_v11 }
  0x91   : > { %1710 = vmatprep.mubr.bf16.mxu1 %v14524_v22  ;;  %1122 = vmatprep.mubr.bf16.mxu0 %v14524_v22 }
  0x98   : > { %1711 = vmatmul.mubr.bf16.gmra.mrb[48].mxu1 %v14661_v18  ;;  %1123 = vmatmul.mubr.bf16.gmra.mrb[52].mxu0 %v14661_v18 }
  0x99   : > { %1718 = vmatprep.mubr.bf16.mxu1 %v14533_v27  ;;  %1130 = vmatprep.mubr.bf16.mxu0 %v14533_v27 }
  0xa0   : > { %1719 = vmatmul.mubr.bf16.gmra.mrb[52].mxu1 %v14667_v23  ;;  %1131 = vmatmul.mubr.bf16.gmra.mrb[56].mxu0 %v14667_v23 }
  0xa1   : > { %1726 = vmatprep.mubr.bf16.mxu1 %v14545_v32  ;;  %1138 = vmatprep.mubr.bf16.mxu0 %v14545_v32 }
  0xa8   : > { %1727 = vmatmul.mubr.bf16.gmra.mrb[56].mxu1 %v14673_v29  ;;  %1139 = vmatmul.mubr.bf16.gmra.mrb[60].mxu0 %v14673_v29 }
  0xa9   : > { %1734 = vmatprep.mubr.bf16.mxu1 %v14566_v40  ;;  %12599 = vmatprep.mubr.bf16.mxu0 %v710_v30  ;;  %v688_v30 = vld [vmem:[#allocation2 + $0x1c9] sm:$0xff] }
  0xb0   : > { %1735 = vmatmul.mubr.bf16.gmra.mrb[60].mxu1 %v14678_v41  ;;  %12600 = vmatmul.mubr.bf16.vlgmr.msra.gmra.mrb[64].mxu0 %v711_v43 }
  0xb1   : > { %12647 = vmatprep.mubr.bf16.mxu1 %v711_v43  ;;  %11224 = vmatpush3.bf16.msra.mxu0 %v13857_v42  ;;  %v13874_v42 = vld [vmem:[%s18009_s1 + $0x1b0] sm:$0xff]   ;;  %v14752_v43 = vpack.c.bf16 %v689_v31, %v688_v30 }
  0xb2   : > { %12603 = vmatprep.mubr.bf16.mxu0 %v14687_v47  ;;  %11225 = vmatprep.subr.bf16.mxu0 %v13858_v46  ;;  %v13876_v46 = vld [vmem:[%s18009_s1 + $0x1f8] sm:$0xff]   ;;  %v702_v30 = vld [vmem:[#allocation2 + $0x2a9] sm:$0xff] }
  0xb3   : > { %v703_v31 = vld [vmem:[#allocation2 + $0x2b1] sm:$0xff] }
  0xb5   : > { %11226 = vmatpush3.bf16.msra.mxu0 %v13859_v52  ;;  %v692_v52 = vld [vmem:[#allocation2 + $0x209] sm:$0xff] }
  0xb6   : > { %11227 = vmatprep.subr.bf16.mxu0 %v13860_v54  ;;  %v693_v54 = vld [vmem:[#allocation2 + $0x211] sm:$0xff] }
  0xb8   : > { %12648 = vmatmul.mubr.bf16.vlgmr.msra.gmra.mrb[64].mxu1 %v14687_v47  ;;  %12604 = vmatmul.mubr.bf16.gmra.mrb[68].mxu0 %v14699_v62 }
  0xb9   : > { %12651 = vmatprep.mubr.bf16.mxu1 %v14699_v62  ;;  %12607 = vmatprep.mubr.bf16.mxu0 %v14708_v10 }
  0xba   : > { %11228 = vmatpush3.bf16.msra.mxu0 %v13861_v60  ;;  %12680 = vmatpush3.bf16.msra.mxu1 %v14608_v58  ;;  %v14735_v58 = vpack.c.bf16 %v687_v21, %v686_v19  ;;  %v694_v60 = vld [vmem:[#allocation2 + $0x229] sm:$0xff]  ;;  %v699_v19 = vld [vmem:[#allocation2 + $0x271] sm:$0xff] }
  0xbb   : > { %11229 = vmatprep.subr.bf16.mxu0 %v13862_v8  ;;  %12681 = vmatprep.subr.bf16.mxu1 %v13867_v9  ;;  %v695_v8 = vld [vmem:[#allocation2 + $0x231] sm:$0xff] }
  0xbc   : > { %v14778_v7 = vpack.c.bf16 %v695_v8, %v694_v60 }
  0xbe   : > { %11230 = vmatpush3.bf16.msra.mxu0 %v13863_v14  ;;  %12682 = vmatpush3.bf16.msra.mxu1 %v13867_v9  ;;  %v14772_v9 = vpack.c.bf16 %v693_v54, %v692_v52  ;;  %v696_v14 = vld [vmem:[#allocation2 + $0x249] sm:$0xff] }
  0xbf   : > { %11231 = vmatprep.subr.bf16.mxu0 %v13864_v12  ;;  %12683 = vmatprep.subr.bf16.mxu1 %v13869_v15  ;;  %v697_v12 = vld [vmem:[#allocation2 + $0x251] sm:$0xff] }
  0xc0   : > { %12652 = vmatmul.mubr.bf16.gmra.mrb[68].mxu1 %v14708_v10  ;;  %12608 = vmatmul.mubr.bf16.gmra.mrb[72].mxu0 %v14726_v25  ;;  %v14783_v21 = vpack.c.bf16 %v697_v12, %v696_v14 }
  0xc1   : > { %12655 = vmatprep.mubr.bf16.mxu1 %v14726_v25  ;;  %12611 = vmatprep.mubr.bf16.mxu0 %v14735_v58 }
  0xc2   : > { %11232 = vmatpush3.bf16.msra.mxu0 %v13866_v24  ;;  %12684 = vmatpush3.bf16.msra.mxu1 %v13869_v15  ;;  %v698_v15 = vld [vmem:[#allocation2 + $0x269] sm:$0xff] }
  0xc3   : > { %11233 = vmatprep.subr.bf16.mxu0 %v13868_v26  ;;  %12685 = vmatprep.subr.bf16.mxu1 %v13871_v28  ;;  %v14786_v24 = vpack.c.bf16 %v699_v19, %v698_v15  ;;  %v700_v26 = vld [vmem:[#allocation2 + $0x289] sm:$0xff] }
  0xc6   : > { %11234 = vmatpush3.bf16.msra.mxu0 %v13870_v33  ;;  %12686 = vmatpush3.bf16.msra.mxu1 %v13871_v28  ;;  %v701_v28 = vld [vmem:[#allocation2 + $0x291] sm:$0xff] }
  0xc7   : > { %11235 = vmatprep.subr.bf16.mxu0 %v13872_v35  ;;  %12687 = vmatprep.subr.bf16.mxu1 %v13873_v37  ;;  %v14791_v33 = vpack.c.bf16 %v701_v28, %v700_v26  ;;  %v14794_v35 = vpack.c.bf16 %v703_v31, %v702_v30 }
  0xc8   : > { %12656 = vmatmul.mubr.bf16.gmra.mrb[72].mxu1 %v14735_v58  ;;  %12612 = vmatmul.mubr.bf16.gmra.mrb[76].mxu0 %v14752_v43 }
  0xc9   : > { %12659 = vmatprep.mubr.bf16.mxu1 %v14752_v43  ;;  %12615 = vmatprep.mubr.bf16.mxu0 %v14761_v49 }
  0xca   : > { %11236 = vmatpush3.bf16.msra.mxu0 %v13874_v42  ;;  %12688 = vmatpush3.bf16.msra.mxu1 %v13873_v37  ;;  %v704_v37 = vld [vmem:[#allocation2 + $0x2c9] sm:$0xff] }
  0xcb   : > { %11237 = vmatprep.subr.bf16.mxu0 %v13876_v46  ;;  %12689 = vmatprep.subr.bf16.mxu1 %v13875_v48  ;;  %v14799_v39 = vpack.c.bf16 %v705_v38, %v704_v37  ;;  %v706_v42 = vld [vmem:[#allocation2 + $0x2e9] sm:$0xff]  ;;  %v707_v46 = vld [vmem:[#allocation2 + $0x2f1] sm:$0xff] }
  0xce   : > { %11238 = vmatpush3.bf16.msra.mxu0 %v13878_v57  ;;  %12690 = vmatpush3.bf16.msra.mxu1 %v13875_v48  ;;  %v14805_v48 = vpack.c.bf16 %v707_v46, %v706_v42 }
  0xcf   : > { %12691 = vmatprep.subr.bf16.mxu1 %v13877_v59 }
  0xd0   : > { %12660 = vmatmul.mubr.bf16.gmra.mrb[76].mxu1 %v14761_v49  ;;  %12616 = vmatmul.mubr.bf16.gmra.mrb[80].mxu0 %v14772_v9 }
  0xd1   : > { %12663 = vmatprep.mubr.bf16.mxu1 %v14772_v9  ;;  %12619 = vmatprep.mubr.bf16.mxu0 %v14778_v7 }
  0xd2   : > { %12692 = vmatpush3.bf16.msra.mxu1 %v13877_v59 }
  0xd3   : > { %12693 = vmatprep.subr.bf16.mxu1 %v13879_v13 }
  0xd6   : > { %12694 = vmatpush3.bf16.msra.mxu1 %v13879_v13 }
  0xd8   : > { %12664 = vmatmul.mubr.bf16.gmra.mrb[80].mxu1 %v14778_v7  ;;  %12620 = vmatmul.mubr.bf16.gmra.mrb[84].mxu0 %v14783_v21 }
  0xd9   : > { %12667 = vmatprep.mubr.bf16.mxu1 %v14783_v21  ;;  %12623 = vmatprep.mubr.bf16.mxu0 %v14786_v24 }
  0xe0   : > { %12668 = vmatmul.mubr.bf16.gmra.mrb[84].mxu1 %v14786_v24  ;;  %12624 = vmatmul.mubr.bf16.gmra.mrb[88].mxu0 %v14791_v33 }
  0xe1   : > { %12671 = vmatprep.mubr.bf16.mxu1 %v14791_v33  ;;  %12627 = vmatprep.mubr.bf16.mxu0 %v14794_v35 }
  0xe8   : > { %12672 = vmatmul.mubr.bf16.gmra.mrb[88].mxu1 %v14794_v35  ;;  %12628 = vmatmul.mubr.bf16.gmra.mrb[92].mxu0 %v14799_v39 }
  0xe9   : > { %12675 = vmatprep.mubr.bf16.mxu1 %v14799_v39  ;;  %2274 = vmatprep.mubr.bf16.mxu0 %v14414_v56 }
  0xf0   : > { %12676 = vmatmul.mubr.bf16.gmra.mrb[92].mxu1 %v14805_v48  ;;  %2275 = vmatmul.mubr.bf16.vlgmr.msra.gmra.mrb[96].mxu0 %v14457_v3 }
  0xf1   : > { %12695 = vmatprep.mubr.bf16.mxu1 %v14687_v47  ;;  %2282 = vmatprep.mubr.bf16.mxu0 %v14467_v4 }
  0xf8   : > { %12696 = vmatmul.mubr.bf16.vlgmr.msra.gmra.mrb[64].mxu1 %v14699_v62  ;;  %2283 = vmatmul.mubr.bf16.gmra.mrb[100].mxu0 %v14512_v17 }
  0xf9   : > { %12699 = vmatprep.mubr.bf16.mxu1 %v14708_v10  ;;  %2290 = vmatprep.mubr.bf16.mxu0 %v14520_v20 }
 0x100   : > { %12700 = vmatmul.mubr.bf16.gmra.mrb[68].mxu1 %v14726_v25  ;;  %2291 = vmatmul.mubr.bf16.gmra.mrb[104].mxu0 %v14552_v34 }
 0x101   : > { %12703 = vmatprep.mubr.bf16.mxu1 %v14735_v58  ;;  %2298 = vmatprep.mubr.bf16.mxu0 %v14559_v36 }
 0x102   : > { %v10967_v56 = vpop.f32.mrb[0].mxu0 }
 0x103   : > { %v10968_v3 = vpop.f32.mrb[1].mxu0 }
 0x104   : > { %v14819_v47 = vadd.f32 %v10968_v3, %v10967_v56  ;;  %v10970_v4 = vpop.f32.mrb[2].mxu0 }
 0x105   : > { %v10971_v62 = vpop.f32.mrb[3].mxu0 }
 0x106   : > { %v14822_v10 = vadd.f32 %v10971_v62, %v10970_v4 }
 0x108   : > { %12704 = vmatmul.mubr.bf16.gmra.mrb[72].mxu1 %v14752_v43  ;;  %2299 = vmatmul.mubr.bf16.gmra.mrb[108].mxu0 %v14577_v44 }
 0x109   : > { %12707 = vmatprep.mubr.bf16.mxu1 %v14761_v49  ;;  %2306 = vmatprep.mubr.bf16.mxu0 %v14581_v45 }
 0x10b   : > { %v11103_v17 = vpop.f32.mrb[0].mxu1  ;;  %v10973_v20 = vpop.f32.mrb[4].mxu0 }
 0x10c   : > { %v11104_v34 = vpop.f32.mrb[1].mxu1  ;;  %v10974_v36 = vpop.f32.mrb[5].mxu0 }
 0x10d   : > { %v14827_v25 = vadd.f32 %v11104_v34, %v11103_v17  ;;  %v11106_v58 = vpop.f32.mrb[2].mxu1  ;;  %v14829_v52 = vadd.f32 %v10974_v36, %v10973_v20  ;;  %v10976_v54 = vpop.f32.mrb[6].mxu0 }
 0x10e   : > { %v11107_v57 = vpop.f32.mrb[3].mxu1  ;;  %v10977_v43 = vpop.f32.mrb[7].mxu0 }
 0x10f   : > { %v14831_v59 = vadd.f32 %v11107_v57, %v11106_v58  ;;  %v14834_v49 = vadd.f32 %v10977_v43, %v10976_v54 }
 0x110   : > { %12708 = vmatmul.mubr.bf16.gmra.mrb[76].mxu1 %v14772_v9  ;;  %2307 = vmatmul.mubr.bf16.gmra.mrb[112].mxu0 %v14593_v50 }
 0x111   : > { %12711 = vmatprep.mubr.bf16.mxu1 %v14778_v7  ;;  %2314 = vmatprep.mubr.bf16.mxu0 %v14597_v51 }
 0x113   : > { %v11109_v44 = vpop.f32.mrb[4].mxu1  ;;  %v10979_v45 = vpop.f32.mrb[8].mxu0 }
 0x114   : > { %v11110_v60 = vpop.f32.mrb[5].mxu1  ;;  %v10980_v8 = vpop.f32.mrb[9].mxu0 }
 0x115   : > { %v14839_v13 = vadd.f32 %v11110_v60, %v11109_v44  ;;  %v11112_v14 = vpop.f32.mrb[6].mxu1  ;;  %v14841_v12 = vadd.f32 %v10980_v8, %v10979_v45  ;;  %v10982_v15 = vpop.f32.mrb[10].mxu0 }
 0x116   : > { %v11113_v19 = vpop.f32.mrb[7].mxu1  ;;  %v10983_v9 = vpop.f32.mrb[11].mxu0 }
 0x117   : > { %v14843_v26 = vadd.f32 %v11113_v19, %v11112_v14  ;;  %v14846_v7 = vadd.f32 %v10983_v9, %v10982_v15  ;;  %v13881_v9 = vld [vmem:[%s18011_s3] sm:$0xff]  }
 0x118   : > { %12712 = vmatmul.mubr.bf16.gmra.mrb[80].mxu1 %v14783_v21  ;;  %2315 = vmatmul.mubr.bf16.gmra.mrb[116].mxu0 %v14603_v55 }
 0x119   : > { %12715 = vmatprep.mubr.bf16.mxu1 %v14786_v24  ;;  %2322 = vmatprep.mubr.bf16.mxu0 %v14612_v53 }
 0x11b   : > { %v11115_v50 = vpop.f32.mrb[8].mxu1  ;;  %v10985_v51 = vpop.f32.mrb[12].mxu0 }
 0x11c   : > { %v11116_v28 = vpop.f32.mrb[9].mxu1  ;;  %v10986_v30 = vpop.f32.mrb[13].mxu0 }
 0x11d   : > { %v14851_v31 = vadd.f32 %v11116_v28, %v11115_v50  ;;  %v11118_v37 = vpop.f32.mrb[10].mxu1  ;;  %v14853_v38 = vadd.f32 %v10986_v30, %v10985_v51  ;;  %v10988_v42 = vpop.f32.mrb[14].mxu0  ;;  %v13882_v50 = vld [vmem:[%s18011_s3 + $0x48] sm:$0xff]  }
 0x11e   : > { %v11119_v46 = vpop.f32.mrb[11].mxu1  ;;  %v10989_v21 = vpop.f32.mrb[15].mxu0  ;;  %v13883_v28 = vld [vmem:[%s18011_s3 + $0x8] sm:$0xff]  }
 0x11f   : > { %v14855_v56 = vadd.f32 %v11119_v46, %v11118_v37  ;;  %v14858_v24 = vadd.f32 %v10989_v21, %v10988_v42 }
 0x120   : > { %12716 = vmatmul.mubr.bf16.gmra.mrb[84].mxu1 %v14791_v33  ;;  %2323 = vmatmul.mubr.bf16.gmra.mrb[120].mxu0 %v14619_v61  ;;  %v708_v61 = vld [vmem:[#allocation2 + $0x309] sm:$0xff] }
 0x121   : > { %12719 = vmatprep.mubr.bf16.mxu1 %v14794_v35  ;;  %2330 = vmatprep.mubr.bf16.mxu0 %v14623_v63  ;;  %v709_v63 = vld [vmem:[#allocation2 + $0x311] sm:$0xff] }
 0x122   : > { %v727_v57 = vpack.c.bf16 %v709_v63, %v708_v61 }
 0x123   : > { %v11121_v55 = vpop.f32.mrb[12].mxu1  ;;  %v10991_v53 = vpop.f32.mrb[16].mxu0 }
 0x124   : > { %v11122_v3 = vpop.f32.mrb[13].mxu1  ;;  %v10992_v4 = vpop.f32.mrb[17].mxu0 }
 0x125   : > { %v14863_v62 = vadd.f32 %v11122_v3, %v11121_v55  ;;  %v11124_v17 = vpop.f32.mrb[14].mxu1  ;;  %v14865_v20 = vadd.f32 %v10992_v4, %v10991_v53  ;;  %v10994_v34 = vpop.f32.mrb[18].mxu0 }
 0x126   : > { %v11125_v36 = vpop.f32.mrb[15].mxu1  ;;  %v10995_v33 = vpop.f32.mrb[19].mxu0 }
 0x127   : > { %v14867_v58 = vadd.f32 %v11125_v36, %v11124_v17  ;;  %v14870_v35 = vadd.f32 %v10995_v33, %v10994_v34  ;;  %v13884_v17 = vld [vmem:[%s18011_s3 + $0x50] sm:$0xff]   ;;  %v13886_v36 = vld [vmem:[%s18011_s3 + $0x58] sm:$0xff]   ;;  %v13888_v33 = vld [vmem:[%s18011_s3 + $0x80] sm:$0xff]  }
 0x128   : > { %12720 = vmatmul.mubr.bf16.gmra.mrb[88].mxu1 %v14799_v39  ;;  %2331 = vmatmul.mubr.bf16.gmra.mrb[124].mxu0 %v14629_v0  ;;  %v13885_v34 = vld [vmem:[%s18011_s3 + $0x10] sm:$0xff]  }
 0x129   : > { %12723 = vmatprep.mubr.bf16.mxu1 %v14805_v48  ;;  %2338 = vmatprep.mubr.bf16.mxu0 %v14633_v5  ;;  %v13880_v5 = vld [vmem:[%s18011_s3 + $0x40] sm:$0xff]  }
 0x12a   : > { %11359 = vmatprep.subr.bf16.mxu0 %v13880_v5  ;;  %12727 = vmatprep.subr.bf16.mxu1 %v13888_v33  ;;  %v13889_v5 = vld [vmem:[%s18011_s3 + $0x60] sm:$0xff]  }
 0x12b   : > { %v11127_v54 = vpop.f32.mrb[16].mxu1  ;;  %v10997_v43 = vpop.f32.mrb[20].mxu0  ;;  %11360 = vmatpush3.bf16.msra.mxu0 %v13881_v9  ;;  %12728 = vmatpush3.bf16.msra.mxu1 %v13888_v33  ;;  %v13890_v9 = vld [vmem:[%s18011_s3 + $0x20] sm:$0xff]  }
 0x12c   : > { %v11128_v44 = vpop.f32.mrb[17].mxu1  ;;  %v10998_v45 = vpop.f32.mrb[21].mxu0  ;;  %11361 = vmatprep.subr.bf16.mxu0 %v13882_v50  ;;  %v13891_v50 = vld [vmem:[%s18011_s3 + $0x88] sm:$0xff]  }
 0x12d   : > { %v14875_v60 = vadd.f32 %v11128_v44, %v11127_v54  ;;  %v11130_v8 = vpop.f32.mrb[18].mxu1  ;;  %v14877_v14 = vadd.f32 %v10998_v45, %v10997_v43  ;;  %v11000_v39 = vpop.f32.mrb[22].mxu0  ;;  %12729 = vmatprep.subr.bf16.mxu1 %v13891_v50 }
 0x12e   : > { %v11131_v15 = vpop.f32.mrb[19].mxu1  ;;  %v11001_v19 = vpop.f32.mrb[23].mxu0 }
 0x12f   : > { %v14879_v48 = vadd.f32 %v11131_v15, %v11130_v8  ;;  %v14881_v0 = vadd.f32 %v11001_v19, %v11000_v39  ;;  %11362 = vmatpush3.bf16.msra.mxu0 %v13883_v28  ;;  %12730 = vmatpush3.bf16.msra.mxu1 %v13891_v50 }
 0x130   : > { %12724 = vmatmul.mubr.bf16.gmra.mrb[92].mxu1 %v727_v57  ;;  %2339 = vmatmul.mubr.bf16.gmra.mrb[128].mxu0 %v14639_v1 }
 0x131   : > { %2346 = vmatprep.mubr.bf16.mxu0 %v14643_v2  ;;  %11363 = vmatprep.subr.bf16.mxu0 %v13884_v17 }
 0x133   : > { %v11133_v51 = vpop.f32.mrb[20].mxu1  ;;  %v11003_v30 = vpop.f32.mrb[24].mxu0  ;;  %11364 = vmatpush3.bf16.msra.mxu0 %v13885_v34 }
 0x134   : > { %v11134_v37 = vpop.f32.mrb[21].mxu1  ;;  %v11004_v1 = vpop.f32.mrb[25].mxu0  ;;  %11365 = vmatprep.subr.bf16.mxu0 %v13886_v36 }
 0x135   : > { %v14897_v42 = vadd.f32 %v11134_v37, %v11133_v51  ;;  %v11136_v46 = vpop.f32.mrb[22].mxu1  ;;  %v14899_v21 = vadd.f32 %v11004_v1, %v11003_v30  ;;  %v11006_v2 = vpop.f32.mrb[26].mxu0  ;;  %v13892_v51 = vld [vmem:[%s18011_s3 + $0x68] sm:$0xff]   ;;  %v13894_v30 = vld [vmem:[%s18011_s3 + $0x90] sm:$0xff]  }
 0x136   : > { %v11137_v55 = vpop.f32.mrb[23].mxu1  ;;  %v11007_v53 = vpop.f32.mrb[27].mxu0  ;;  %12731 = vmatprep.subr.bf16.mxu1 %v13894_v30 }
 0x137   : > { %v14901_v3 = vadd.f32 %v11137_v55, %v11136_v46  ;;  %v14903_v4 = vadd.f32 %v11007_v53, %v11006_v2  ;;  %12732 = vmatpush3.bf16.msra.mxu1 %v13894_v30  ;;  %v13900_v30 = vld [vmem:[%s18011_s3 + $0xa0] sm:$0xff]  }
 0x138   : > { %2347 = vmatmul.mubr.bf16.gmra.mrb[132].mxu0 %v14649_v6  ;;  %v13887_v6 = vld [vmem:[%s18011_s3 + $0x18] sm:$0xff]  }
 0x139   : > { %2354 = vmatprep.mubr.bf16.mxu0 %v14508_v16  ;;  %11366 = vmatpush3.bf16.msra.mxu0 %v13887_v6  ;;  %v13896_v6 = vld [vmem:[%s18011_s3 + $0x30] sm:$0xff]  }
 0x13a   : > { %11367 = vmatprep.subr.bf16.mxu0 %v13889_v5 }
 0x13b   : > { %v11139_v61 = vpop.f32.mrb[24].mxu1  ;;  %v11009_v63 = vpop.f32.mrb[28].mxu0 }
 0x13c   : > { %v11140_v54 = vpop.f32.mrb[25].mxu1  ;;  %v11010_v16 = vpop.f32.mrb[29].mxu0 }
 0x13d   : > { %v14922_v57 = vadd.f32 %v11140_v54, %v11139_v61  ;;  %v11142_v43 = vpop.f32.mrb[26].mxu1  ;;  %v14924_v44 = vadd.f32 %v11010_v16, %v11009_v63  ;;  %v11012_v45 = vpop.f32.mrb[30].mxu0  ;;  %11368 = vmatpush3.bf16.msra.mxu0 %v13890_v9  ;;  %v13895_v61 = vld [vmem:[%s18011_s3 + $0x70] sm:$0xff]  }
 0x13e   : > { %v11143_v8 = vpop.f32.mrb[27].mxu1  ;;  %v11013_v39 = vpop.f32.mrb[31].mxu0  ;;  %11369 = vmatprep.subr.bf16.mxu0 %v13892_v51 }
 0x13f   : > { %v14926_v15 = vadd.f32 %v11143_v8, %v11142_v43  ;;  %v14928_v19 = vadd.f32 %v11013_v39, %v11012_v45  ;;  %v13897_v43 = vld [vmem:[%s18011_s3 + $0x98] sm:$0xff]  }
 0x140   : > { %2355 = vmatmul.mubr.bf16.gmra.mrb[136].mxu0 %v14655_v11  ;;  %v13893_v11 = vld [vmem:[%s18011_s3 + $0x28] sm:$0xff]   ;;  %12733 = vmatprep.subr.bf16.mxu1 %v13897_v43 }
 0x141   : > { %2362 = vmatprep.mubr.bf16.mxu0 %v14524_v22  ;;  %11370 = vmatpush3.bf16.msra.mxu0 %v13893_v11 }
 0x142   : > { %11371 = vmatprep.subr.bf16.mxu0 %v13895_v61  ;;  %12734 = vmatpush3.bf16.msra.mxu1 %v13897_v43 }
 0x143   : > { %v11145_v28 = vpop.f32.mrb[28].mxu1  ;;  %v11015_v22 = vpop.f32.mrb[32].mxu0  ;;  %12735 = vmatprep.subr.bf16.mxu1 %v13900_v30 }
 0x144   : > { %v11146_v37 = vpop.f32.mrb[29].mxu1  ;;  %v11016_v1 = vpop.f32.mrb[33].mxu0 }
 0x145   : > { %v14950_v46 = vadd.f32 %v11146_v37, %v11145_v28  ;;  %v11148_v2 = vpop.f32.mrb[30].mxu1  ;;  %v14952_v55 = vadd.f32 %v11016_v1, %v11015_v22  ;;  %v11018_v53 = vpop.f32.mrb[34].mxu0  ;;  %11372 = vmatpush3.bf16.msra.mxu0 %v13896_v6 }
 0x146   : > { %v11149_v17 = vpop.f32.mrb[31].mxu1  ;;  %v11019_v34 = vpop.f32.mrb[35].mxu0  ;;  %12736 = vmatpush3.bf16.msra.mxu1 %v13900_v30 }
 0x147   : > { %v14954_v36 = vadd.f32 %v11149_v17, %v11148_v2  ;;  %v14956_v33 = vadd.f32 %v11019_v34, %v11018_v53  ;;  %v13901_v2 = vld [vmem:[%s18011_s3 + $0xa8] sm:$0xff]  }
 0x148   : > { %2363 = vmatmul.mubr.bf16.gmra.mrb[140].mxu0 %v14661_v18  ;;  %v13898_v18 = vld [vmem:[%s18011_s3 + $0x78] sm:$0xff]   ;;  %12737 = vmatprep.subr.bf16.mxu1 %v13901_v2 }
 0x149   : > { %2370 = vmatprep.mubr.bf16.mxu0 %v14533_v27  ;;  %v13899_v27 = vld [vmem:[%s18011_s3 + $0x38] sm:$0xff]   ;;  %11373 = vmatprep.subr.bf16.mxu0 %v13898_v18 }
 0x14a   : > { %11374 = vmatpush3.bf16.msra.mxu0 %v13899_v27  ;;  %12738 = vmatpush3.bf16.msra.mxu1 %v13901_v2 }
 0x14b   : > { %v11151_v63 = vpop.f32.mrb[32].mxu1  ;;  %v11021_v54 = vpop.f32.mrb[36].mxu0 }
 0x14c   : > { %v11152_v16 = vpop.f32.mrb[33].mxu1  ;;  %v11022_v45 = vpop.f32.mrb[37].mxu0 }
 0x14d   : > { %v14972_v8 = vadd.f32 %v11152_v16, %v11151_v63  ;;  %v11154_v39 = vpop.f32.mrb[34].mxu1  ;;  %v14977_v5 = vadd.f32 %v11022_v45, %v11021_v54  ;;  %v11024_v9 = vpop.f32.mrb[38].mxu0  ;;  %v13902_v16 = vld [vmem:[%s18011_s3 + $0xb0] sm:$0xff]  }
 0x14e   : > { %v11155_v50 = vpop.f32.mrb[35].mxu1  ;;  %v11025_v51 = vpop.f32.mrb[39].mxu0  ;;  %12739 = vmatprep.subr.bf16.mxu1 %v13902_v16 }
 0x14f   : > { %v14979_v28 = vadd.f32 %v11155_v50, %v11154_v39  ;;  %v14981_v11 = vadd.f32 %v11025_v51, %v11024_v9  ;;  %12740 = vmatpush3.bf16.msra.mxu1 %v13902_v16  ;;  %v13903_v39 = vld [vmem:[%s18011_s3 + $0xb8] sm:$0xff]  }
 0x150   : > { %2371 = vmatmul.mubr.bf16.gmra.mrb[144].mxu0 %v14667_v23  ;;  %12741 = vmatprep.subr.bf16.mxu1 %v13903_v39 }
 0x151   : > { %2378 = vmatprep.mubr.bf16.mxu0 %v14545_v32 }
 0x153   : > { %v11157_v22 = vpop.f32.mrb[36].mxu1  ;;  %v11027_v37 = vpop.f32.mrb[40].mxu0  ;;  %12742 = vmatpush3.bf16.msra.mxu1 %v13903_v39 }
 0x154   : > { %v11158_v1 = vpop.f32.mrb[37].mxu1  ;;  %v11028_v53 = vpop.f32.mrb[41].mxu0 }
 0x155   : > { %v14991_v17 = vadd.f32 %v11158_v1, %v11157_v22  ;;  %v11160_v34 = vpop.f32.mrb[38].mxu1  ;;  %v14993_v61 = vadd.f32 %v11028_v53, %v11027_v37  ;;  %v11030_v6 = vpop.f32.mrb[42].mxu0  ;;  %v14096_v22 = vld [vmem:[#allocation2 + $0xe8] sm:$0xff]  ;;  %v3054_v1 = vld [vmem:[#allocation2 + $0xd2] sm:$0xff] }
 0x156   : > { %v11161_v63 = vpop.f32.mrb[39].mxu1  ;;  %v11031_v23 = vpop.f32.mrb[43].mxu0 }
 0x157   : > { %v14995_v32 = vadd.f32 %v11161_v63, %v11160_v34  ;;  %v14997_v54 = vadd.f32 %v11031_v23, %v11030_v6  ;;  %v3055_v6 = vld [vmem:[#allocation2 + $0xea] sm:$0xff]  ;;  %v3056_v63 = vld [vmem:[#allocation2 + $0xf2] sm:$0xff] }
 0x158   : > { %2379 = vmatmul.mubr.bf16.gmra.mrb[148].mxu0 %v14673_v29  ;;  %v655_v29 = vpack.c.bf16 %v14096_v22, %v14096_v22  ;;  %v3094_v16 = vpack.c.bf16 %v3056_v63, %v3055_v6  ;;  %v2893_v63 = vld [vmem:[#allocation2 + $0xce] sm:$0xff] }
 0x159   : > { %18030 = vst [vmem:[#allocation5_spill] sm:$0xff] %v14997_v54  ;;  %2386 = vmatprep.mubr.bf16.mxu0 %v14566_v40  ;;  %v3053_v40 = vld [vmem:[#allocation2 + $0xca] sm:$0xff] }
 0x15a   : > { %v3093_v34 = vpack.c.bf16 %v3054_v1, %v3053_v40 }
 0x15b   : > { %v11163_v43 = vpop.f32.mrb[40].mxu1  ;;  %v11033_v18 = vpop.f32.mrb[44].mxu0 }
 0x15c   : > { %v11164_v45 = vpop.f32.mrb[41].mxu1  ;;  %v11034_v27 = vpop.f32.mrb[45].mxu0  ;;  %12743 = vmatprep.mubr.bf16.mxu1 %v3093_v34  ;;  %v2892_v34 = vld [vmem:[#allocation2 + $0xc6] sm:$0xff] }
 0x15d   : > { %v15007_v9 = vadd.f32 %v11164_v45, %v11163_v43  ;;  %v11166_v50 = vpop.f32.mrb[42].mxu1  ;;  %v15009_v51 = vadd.f32 %v11034_v27, %v11033_v18  ;;  %v11036_v30 = vpop.f32.mrb[46].mxu0  ;;  %v563_v43 = vld [vmem:[#allocation2 + $0x307] sm:$0xff]  ;;  %v564_v18 = vld [vmem:[#allocation2 + $0x30f] sm:$0xff]  ;;  %12744 = vmatmul.mubr.bf16.vlgmr.msra.gmra.mrb[96].mxu1 %v3094_v16 }
 0x15e   : > { %v11167_v37 = vpop.f32.mrb[43].mxu1  ;;  %v11037_v2 = vpop.f32.mrb[47].mxu0 }
 0x15f   : > { %18031 = vst [vmem:[#allocation6_spill] sm:$0xff] %v15007_v9  ;;  %v15011_v53 = vadd.f32 %v11167_v37, %v11166_v50  ;;  %v15013_v23 = vadd.f32 %v11037_v2, %v11036_v30  ;;  %v582_v50 = vpack.c.bf16 %v564_v18, %v563_v43 }
 0x160   : > { %2387 = vmatmul.mubr.bf16.gmra.mrb[152].mxu0 %v14678_v41 }
 0x161   : > { %18032 = vst [vmem:[#allocation7_spill] sm:$0xff] %v15011_v53  ;;  %18033 = vst [vmem:[#allocation8_spill] sm:$0xff] %v15013_v23  ;;  %2394 = vmatprep.mubr.bf16.mxu0 %v655_v29 }
 0x163   : > { %v11169_v45 = vpop.f32.mrb[44].mxu1  ;;  %v11039_v27 = vpop.f32.mrb[48].mxu0 }
 0x164   : > { %v11170_v22 = vpop.f32.mrb[45].mxu1  ;;  %v11040_v54 = vpop.f32.mrb[49].mxu0 }
 0x165   : > { %v15016_v37 = vadd.f32 %v11170_v22, %v11169_v45  ;;  %v11172_v39 = vpop.f32.mrb[46].mxu1  ;;  %v15018_v40 = vadd.f32 %v11040_v54, %v11039_v27  ;;  %v11042_v30 = vpop.f32.mrb[50].mxu0  ;;  %v2932_v54 = vpack.c.bf16 %v2893_v63, %v2892_v34 }
 0x166   : > { %v11173_v1 = vpop.f32.mrb[47].mxu1  ;;  %v11043_v2 = vpop.f32.mrb[51].mxu0 }
 0x167   : > { %18034 = vst [vmem:[#allocation9_spill] sm:$0xff] %v15018_v40  ;;  %v15020_v6 = vadd.f32 %v11173_v1, %v11172_v39  ;;  %v15022_v41 = vadd.f32 %v11043_v2, %v11042_v30  ;;  %v2895_v2 = vld [vmem:[#allocation2 + $0xee] sm:$0xff] }
 0x168   : > { %2395 = vmatmul.mubr.bf16.gmra.mrb[156].mxu0 %v582_v50  ;;  %v2894_v50 = vld [vmem:[#allocation2 + $0xe6] sm:$0xff] }
 0x169   : > { %18035 = vst [vmem:[#allocation10_spill] sm:$0xff] %v15020_v6  ;;  %18036 = vst [vmem:[#allocation11_spill] sm:$0xff] %v15022_v41  ;;  %3405 = vmatprep.mubr.bf16.mxu0 %v655_v29 }
 0x16b   : > { %v11175_v16 = vpop.f32.mrb[48].mxu1  ;;  %v11045_v53 = vpop.f32.mrb[52].mxu0 }
 0x16c   : > { %v11176_v9 = vpop.f32.mrb[49].mxu1  ;;  %v11046_v43 = vpop.f32.mrb[53].mxu0 }
 0x16d   : > { %v15024_v18 = vadd.f32 %v11176_v9, %v11175_v16  ;;  %v11178_v45 = vpop.f32.mrb[50].mxu1  ;;  %v15026_v27 = vadd.f32 %v11046_v43, %v11045_v53  ;;  %v11048_v22 = vpop.f32.mrb[54].mxu0  ;;  %v2933_v53 = vpack.c.bf16 %v2895_v2, %v2894_v50 }
 0x16e   : > { %v11179_v40 = vpop.f32.mrb[51].mxu1  ;;  %v11049_v39 = vpop.f32.mrb[55].mxu0 }
 0x16f   : > { %18037 = vst [vmem:[#allocation12_spill] sm:$0xff] %v15024_v18  ;;  %v15028_v1 = vadd.f32 %v11179_v40, %v11178_v45  ;;  %v15030_v30 = vadd.f32 %v11049_v39, %v11048_v22 }
 0x170   : > { %3406 = vmatmul.mubr.bf16.vlgmr.msra.gmra.mrb[160].mxu0 %v2932_v54 }
 0x171   : > { %18038 = vst [vmem:[#allocation13_spill] sm:$0xff] %v15028_v1  ;;  %18039 = vst [vmem:[#allocation14_spill] sm:$0xff] %v15030_v30  ;;  %3413 = vmatprep.mubr.bf16.mxu0 %v655_v29 }
 0x173   : > { %v11181_v41 = vpop.f32.mrb[52].mxu1  ;;  %v11051_v6 = vpop.f32.mrb[56].mxu0 }
 0x174   : > { %v11182_v23 = vpop.f32.mrb[53].mxu1  ;;  %v11052_v9 = vpop.f32.mrb[57].mxu0 }
 0x175   : > { %v15032_v16 = vadd.f32 %v11182_v23, %v11181_v41  ;;  %v11184_v34 = vpop.f32.mrb[54].mxu1  ;;  %v15034_v63 = vadd.f32 %v11052_v9, %v11051_v6  ;;  %v11054_v43 = vpop.f32.mrb[58].mxu0 }
 0x176   : > { %v11185_v18 = vpop.f32.mrb[55].mxu1  ;;  %v11055_v40 = vpop.f32.mrb[59].mxu0 }
 0x177   : > { %18040 = vst [vmem:[#allocation15_spill] sm:$0xff] %v15034_v63  ;;  %v15036_v45 = vadd.f32 %v11185_v18, %v11184_v34  ;;  %v15038_v22 = vadd.f32 %v11055_v40, %v11054_v43 }
 0x178   : > { %3414 = vmatmul.mubr.bf16.gmra.mrb[164].mxu0 %v2933_v53 }
 0x179   : > { %18041 = vst [vmem:[#allocation16_spill] sm:$0xff] %v15038_v22 }
 0x17b   : > { %v11187_v29 = vpop.f32.mrb[56].mxu1  ;;  %v11057_v54 = vpop.f32.mrb[60].mxu0 }
 0x17c   : > { %v11188_v39 = vpop.f32.mrb[57].mxu1  ;;  %v11058_v1 = vpop.f32.mrb[61].mxu0 }
 0x17d   : > { %v15040_v30 = vadd.f32 %v11188_v39, %v11187_v29  ;;  %v11190_v23 = vpop.f32.mrb[58].mxu1  ;;  %v15042_v41 = vadd.f32 %v11058_v1, %v11057_v54  ;;  %v11060_v50 = vpop.f32.mrb[62].mxu0 }
 0x17e   : > { %v11191_v6 = vpop.f32.mrb[59].mxu1  ;;  %v11061_v2 = vpop.f32.mrb[63].mxu0 }
 0x17f   : > { %18042 = vst [vmem:[#allocation17_spill] sm:$0xff] %v15040_v30  ;;  %v15044_v9 = vadd.f32 %v11191_v6, %v11190_v23  ;;  %v15046_v63 = vadd.f32 %v11061_v2, %v11060_v50 }
 0x183   : > { %v11193_v18 = vpop.f32.mrb[60].mxu1  ;;  %v12601_v34 = vpop.f32.mrb[64].mxu0 }
 0x184   : > { %v11194_v43 = vpop.f32.mrb[61].mxu1  ;;  %v1190_v53 = vadd.f32 %v12601_v34, %v14829_v52  ;;  %v1181_v40 = vpop.f32.mrb[65].mxu0 }
 0x185   : > { %v15049_v22 = vadd.f32 %v11194_v43, %v11193_v18  ;;  %v11196_v29 = vpop.f32.mrb[62].mxu1  ;;  %v1182_v39 = vadd.f32 %v14819_v47, %v1181_v40  ;;  %v12602_v1 = vpop.f32.mrb[66].mxu0 }
 0x186   : > { %v11197_v54 = vpop.f32.mrb[63].mxu1  ;;  %v15053_v30 = vadd.f32 %v14839_v13, %v1190_v53  ;;  %v1193_v23 = vadd.f32 %v12602_v1, %v14834_v49  ;;  %v1184_v50 = vpop.f32.mrb[67].mxu0 }
 0x187   : > { %v15056_v6 = vadd.f32 %v11197_v54, %v11196_v29  ;;  %v15059_v2 = vadd.f32 %v14827_v25, %v1182_v39  ;;  %v1185_v52 = vadd.f32 %v14822_v10, %v1184_v50 }
 0x188   : > { %v15063_v18 = vadd.f32 %v14843_v26, %v1193_v23 }
 0x189   : > { %v15066_v47 = vadd.f32 %v14831_v59, %v1185_v52 }
 0x18b   : > { %v12605_v34 = vpop.f32.mrb[68].mxu0 }
 0x18c   : > { %v1206_v13 = vadd.f32 %v12605_v34, %v14853_v38  ;;  %v1197_v43 = vpop.f32.mrb[69].mxu0 }
 0x18d   : > { %v1198_v49 = vadd.f32 %v14841_v12, %v1197_v43  ;;  %v12606_v53 = vpop.f32.mrb[70].mxu0  ;;  %v13904_v12 = vld [vmem:[%s18011_s3 + $0x140] sm:$0xff]  }
 0x18e   : > { %v15071_v40 = vadd.f32 %v14863_v62, %v1206_v13  ;;  %v1209_v25 = vadd.f32 %v12606_v53, %v14858_v24  ;;  %v1200_v29 = vpop.f32.mrb[71].mxu0  ;;  %12775 = vmatprep.subr.bf16.mxu1 %v13904_v12 }
 0x18f   : > { %v15075_v10 = vadd.f32 %v14851_v31, %v1198_v49  ;;  %v1201_v26 = vadd.f32 %v14846_v7, %v1200_v29  ;;  %12776 = vmatpush3.bf16.msra.mxu1 %v13904_v12 }
 0x190   : > { %v15079_v59 = vadd.f32 %v14867_v58, %v1209_v25 }
 0x191   : > { %v15082_v38 = vadd.f32 %v14855_v56, %v1201_v26 }
 0x193   : > { %v12609_v39 = vpop.f32.mrb[72].mxu0 }
 0x194   : > { %v1222_v62 = vadd.f32 %v12609_v39, %v14877_v14  ;;  %v1213_v24 = vpop.f32.mrb[73].mxu0 }
 0x195   : > { %v1214_v1 = vadd.f32 %v14865_v20, %v1213_v24  ;;  %v12610_v31 = vpop.f32.mrb[74].mxu0 }
 0x196   : > { %v15090_v7 = vadd.f32 %v14897_v42, %v1222_v62  ;;  %v1225_v58 = vadd.f32 %v12610_v31, %v14881_v0  ;;  %v1216_v54 = vpop.f32.mrb[75].mxu0  ;;  %v13905_v42 = vld [vmem:[%s18011_s3 + $0x148] sm:$0xff]  }
 0x197   : > { %v15094_v56 = vadd.f32 %v14875_v60, %v1214_v1  ;;  %v1217_v23 = vadd.f32 %v14870_v35, %v1216_v54  ;;  %12777 = vmatprep.subr.bf16.mxu1 %v13905_v42 }
 0x198   : > { %v15098_v50 = vadd.f32 %v14901_v3, %v1225_v58  ;;  %12778 = vmatpush3.bf16.msra.mxu1 %v13905_v42  ;;  %v18045_v58 = vld [vmem:[#allocation5_spill] sm:$0xff] }
 0x199   : > { %v15101_v14 = vadd.f32 %v14879_v48, %v1217_v23  ;;  %v18046_v23 = vld [vmem:[#allocation10_spill] sm:$0xff] }
 0x19b   : > { %v12613_v20 = vpop.f32.mrb[76].mxu0 }
 0x19c   : > { %v1238_v0 = vadd.f32 %v12613_v20, %v14924_v44  ;;  %v1229_v52 = vpop.f32.mrb[77].mxu0 }
 0x19d   : > { %v1230_v34 = vadd.f32 %v14899_v21, %v1229_v52  ;;  %v12614_v60 = vpop.f32.mrb[78].mxu0  ;;  %v13908_v52 = vld [vmem:[%s18011_s3 + $0x160] sm:$0xff]  }
 0x19e   : > { %v15109_v35 = vadd.f32 %v14950_v46, %v1238_v0  ;;  %v1241_v3 = vadd.f32 %v12614_v60, %v14928_v19  ;;  %v1232_v13 = vpop.f32.mrb[79].mxu0  ;;  %v13906_v46 = vld [vmem:[%s18011_s3 + $0x150] sm:$0xff]  }
 0x19f   : > { %v15113_v48 = vadd.f32 %v14922_v57, %v1230_v34  ;;  %v1233_v43 = vadd.f32 %v14903_v4, %v1232_v13  ;;  %12779 = vmatprep.subr.bf16.mxu1 %v13906_v46  ;;  %v18048_v13 = vld [vmem:[#allocation9_spill] sm:$0xff] }
 0x1a0   : > { %v15117_v49 = vadd.f32 %v14954_v36, %v1241_v3  ;;  %12780 = vmatpush3.bf16.msra.mxu1 %v13906_v46  ;;  %v13911_v3 = vld [vmem:[%s18011_s3 + $0x108] sm:$0xff]  }
 0x1a1   : > { %v15120_v44 = vadd.f32 %v14926_v15, %v1233_v43  ;;  %v13912_v46 = vld [vmem:[%s18011_s3 + $0xc8] sm:$0xff]  }
 0x1a3   : > { %v12617_v21 = vpop.f32.mrb[80].mxu0 }
 0x1a4   : > { %v1254_v19 = vadd.f32 %v12617_v21, %v14977_v5  ;;  %v1245_v53 = vpop.f32.mrb[81].mxu0 }
 0x1a5   : > { %v1246_v25 = vadd.f32 %v14952_v55, %v1245_v53  ;;  %v12618_v57 = vpop.f32.mrb[82].mxu0  ;;  %v18049_v53 = vld [vmem:[#allocation14_spill] sm:$0xff] }
 0x1a6   : > { %v15128_v4 = vadd.f32 %v14991_v17, %v1254_v19  ;;  %v1257_v36 = vadd.f32 %v12618_v57, %v14981_v11  ;;  %v1248_v29 = vpop.f32.mrb[83].mxu0  ;;  %v13907_v17 = vld [vmem:[%s18011_s3 + $0x158] sm:$0xff]  }
 0x1a7   : > { %v15132_v15 = vadd.f32 %v14972_v8, %v1246_v25  ;;  %v1249_v26 = vadd.f32 %v14956_v33, %v1248_v29  ;;  %12781 = vmatprep.subr.bf16.mxu1 %v13907_v17  ;;  %v18051_v29 = vld [vmem:[#allocation11_spill] sm:$0xff] }
 0x1a8   : > { %v15136_v39 = vadd.f32 %v14995_v32, %v1257_v36  ;;  %v18043_v32 = vld [vmem:[#allocation8_spill] sm:$0xff]  ;;  %12782 = vmatpush3.bf16.msra.mxu1 %v13907_v17  ;;  %v13914_v17 = vld [vmem:[%s18011_s3 + $0x110] sm:$0xff]  }
 0x1a9   : > { %v15139_v5 = vadd.f32 %v14979_v28, %v1249_v26  ;;  %v18044_v28 = vld [vmem:[#allocation6_spill] sm:$0xff]  ;;  %12783 = vmatprep.subr.bf16.mxu1 %v13908_v52 }
 0x1ab   : > { %v12621_v55 = vpop.f32.mrb[84].mxu0 }
 0x1ac   : > { %v1270_v11 = vadd.f32 %v12621_v55, %v15009_v51  ;;  %v1261_v12 = vpop.f32.mrb[85].mxu0  ;;  %v18047_v51 = vld [vmem:[#allocation7_spill] sm:$0xff]  ;;  %12784 = vmatpush3.bf16.msra.mxu1 %v13908_v52 }
 0x1ad   : > { %v1262_v62 = vadd.f32 %v14993_v61, %v1261_v12  ;;  %v12622_v8 = vpop.f32.mrb[86].mxu0  ;;  %v13909_v61 = vld [vmem:[%s18011_s3 + $0x100] sm:$0xff]   ;;  %v13915_v12 = vld [vmem:[%s18011_s3 + $0xd0] sm:$0xff]  }
 0x1ae   : > { %v15147_v33 = vadd.f32 %v15016_v37, %v1270_v11  ;;  %v1273_v24 = vadd.f32 %v12622_v8, %v18043_v32  ;;  %v1264_v1 = vpop.f32.mrb[87].mxu0  ;;  %v13910_v37 = vld [vmem:[%s18011_s3 + $0xc0] sm:$0xff]   ;;  %11495 = vmatprep.subr.bf16.mxu0 %v13909_v61  ;;  %v13913_v8 = vld [vmem:[%s18011_s3 + $0x168] sm:$0xff]  }
 0x1af   : > { %v15151_v31 = vadd.f32 %v18044_v28, %v1262_v62  ;;  %v1265_v54 = vadd.f32 %v18045_v58, %v1264_v1  ;;  %11496 = vmatpush3.bf16.msra.mxu0 %v13910_v37  ;;  %v18053_v1 = vld [vmem:[#allocation15_spill] sm:$0xff]  ;;  %12785 = vmatprep.subr.bf16.mxu1 %v13913_v8 }
 0x1b0   : > { %v15155_v20 = vadd.f32 %v18046_v23, %v1273_v24  ;;  %11497 = vmatprep.subr.bf16.mxu0 %v13911_v3  ;;  %v13916_v24 = vld [vmem:[%s18011_s3 + $0x118] sm:$0xff]   ;;  %12786 = vmatpush3.bf16.msra.mxu1 %v13913_v8 }
 0x1b1   : > { %v15161_v42 = vadd.f32 %v18047_v51, %v1265_v54  ;;  %v13917_v54 = vld [vmem:[%s18011_s3 + $0xd8] sm:$0xff]  }
 0x1b2   : > { %v13927_v8 = vld [vmem:[%s18011_s3 + $0xf8] sm:$0xff]  }
 0x1b3   : > { %v12625_v0 = vpop.f32.mrb[88].mxu0  ;;  %11498 = vmatpush3.bf16.msra.mxu0 %v13912_v46 }
 0x1b4   : > { %v1286_v34 = vadd.f32 %v12625_v0, %v15026_v27  ;;  %v1277_v60 = vpop.f32.mrb[89].mxu0  ;;  %v18050_v27 = vld [vmem:[#allocation12_spill] sm:$0xff]  ;;  %11499 = vmatprep.subr.bf16.mxu0 %v13914_v17 }
 0x1b5   : > { %v1278_v43 = vadd.f32 %v18048_v13, %v1277_v60  ;;  %v12626_v21 = vpop.f32.mrb[90].mxu0  ;;  %v18055_v0 = vld [vmem:[#allocation16_spill] sm:$0xff]  ;;  %v13919_v60 = vld [vmem:[%s18011_s3 + $0x120] sm:$0xff]   ;;  %v13918_v13 = vld [vmem:[%s18011_s3 + $0x170] sm:$0xff]  }
 0x1b6   : > { %v15178_v19 = vadd.f32 %v15032_v16, %v1286_v34  ;;  %v1289_v25 = vadd.f32 %v12626_v21, %v18049_v53  ;;  %v1280_v57 = vpop.f32.mrb[91].mxu0  ;;  %v18052_v16 = vld [vmem:[#allocation13_spill] sm:$0xff]  ;;  %12787 = vmatprep.subr.bf16.mxu1 %v13918_v13 }
 0x1b7   : > { %v15182_v36 = vadd.f32 %v18050_v27, %v1278_v43  ;;  %v1281_v26 = vadd.f32 %v18051_v29, %v1280_v57  ;;  %11500 = vmatpush3.bf16.msra.mxu0 %v13915_v12  ;;  %v13921_v43 = vld [vmem:[%s18011_s3 + $0x128] sm:$0xff]   ;;  %12788 = vmatpush3.bf16.msra.mxu1 %v13918_v13  ;;  %v13924_v27 = vld [vmem:[%s18011_s3 + $0x130] sm:$0xff]  }
 0x1b8   : > { %v15186_v55 = vadd.f32 %v15036_v45, %v1289_v25  ;;  %11501 = vmatprep.subr.bf16.mxu0 %v13916_v24  ;;  %v2764_v13 = vld [vmem:[%s14347_s21 + $0x8] sm:$0xff] }
 0x1b9   : > { %v15192_v11 = vadd.f32 %v18052_v16, %v1281_v26  ;;  %v13925_v26 = vld [vmem:[%s18011_s3 + $0xf0] sm:$0xff]   ;;  %v15248_v16 = vld [vmem:[%s18010_s2] ss:$0 sm:$0xff] }
 0x1bb   : > { %v12629_v62 = vpop.f32.mrb[92].mxu0  ;;  %11502 = vmatpush3.bf16.msra.mxu0 %v13917_v54 }
 0x1bc   : > { %v1302_v45 = vadd.f32 %v12629_v62, %v15042_v41  ;;  %v1293_v32 = vpop.f32.mrb[93].mxu0  ;;  %v18054_v41 = vld [vmem:[#allocation17_spill] sm:$0xff]  ;;  %11503 = vmatprep.subr.bf16.mxu0 %v13919_v60  ;;  %v13923_v62 = vld [vmem:[%s18011_s3 + $0x178] sm:$0xff]  }
 0x1bd   : > { %v1294_v28 = vadd.f32 %v18053_v1, %v1293_v32  ;;  %v12630_v58 = vpop.f32.mrb[94].mxu0  ;;  %v13928_v1 = vld [vmem:[%s18011_s3 + $0x1c0] sm:$0xff]   ;;  %12789 = vmatprep.subr.bf16.mxu1 %v13923_v62 }
 0x1be   : > { %v15209_v23 = vadd.f32 %v15049_v22, %v1302_v45  ;;  %v1305_v61 = vadd.f32 %v12630_v58, %v15046_v63  ;;  %v1296_v51 = vpop.f32.mrb[95].mxu0  ;;  %v13920_v63 = vld [vmem:[%s18011_s3 + $0xe0] sm:$0xff]   ;;  %12790 = vmatpush3.bf16.msra.mxu1 %v13923_v62 }
 0x1bf   : > { %v15213_v37 = vadd.f32 %v18054_v41, %v1294_v28  ;;  %v1297_v52 = vadd.f32 %v18055_v0, %v1296_v51  ;;  %11504 = vmatpush3.bf16.msra.mxu0 %v13920_v63  ;;  %v2763_v0 = vld [vmem:[%s14347_s21] sm:$0xff]  ;;  %11631 = vmatprep.subr.bf16.mxu1 %v13928_v1 }
 0x1c0   : > { %v15217_v34 = vadd.f32 %v15056_v6, %v1305_v61  ;;  %11505 = vmatprep.subr.bf16.mxu0 %v13921_v43 }
 0x1c1   : > { %v15223_v22 = vadd.f32 %v15044_v9, %v1297_v52  ;;  %v13922_v9 = vld [vmem:[%s18011_s3 + $0xe8] sm:$0xff]  }
 0x1c3   : > { %v11239_v3 = vpop.f32.mrb[96].mxu0  ;;  %11506 = vmatpush3.bf16.msra.mxu0 %v13922_v9 }
 0x1c4   : > { %v11240_v6 = vpop.f32.mrb[97].mxu0  ;;  %11507 = vmatprep.subr.bf16.mxu0 %v13924_v27 }
 0x1c5   : > { %v11241_v21 = vadd.f32 %v11240_v6, %v11239_v3  ;;  %v11242_v46 = vpop.f32.mrb[98].mxu0 }
 0x1c6   : > { %v11243_v53 = vpop.f32.mrb[99].mxu0 }
 0x1c7   : > { %v13165_v25 = vadd.f32 %v15059_v2, %v11241_v21  ;;  %v11244_v57 = vadd.f32 %v11243_v53, %v11242_v46  ;;  %11508 = vmatpush3.bf16.msra.mxu0 %v13925_v26 }
 0x1c9   : > { %v13173_v29 = vadd.f32 %v15066_v47, %v11244_v57  ;;  %v13926_v47 = vld [vmem:[%s18011_s3 + $0x138] sm:$0xff]  }
 0x1ca   : > { %11509 = vmatprep.subr.bf16.mxu0 %v13926_v47 }
 0x1cb   : > { %v12697_v17 = vpop.f32.mrb[64].mxu1  ;;  %v11245_v12 = vpop.f32.mrb[100].mxu0  ;;  %11510 = vmatpush3.bf16.msra.mxu0 %v13927_v8 }
 0x1cc   : > { %v2437_v2 = vpop.f32.mrb[65].mxu1  ;;  %v11246_v24 = vpop.f32.mrb[101].mxu0 }
 0x1cd   : > { %v13166_v45 = vadd.f32 %v13165_v25, %v2437_v2  ;;  %v12698_v32 = vpop.f32.mrb[66].mxu1  ;;  %v11247_v58 = vadd.f32 %v11246_v24, %v11245_v12  ;;  %v11248_v54 = vpop.f32.mrb[102].mxu0 }
 0x1ce   : > { %v2440_v28 = vpop.f32.mrb[67].mxu1  ;;  %v11249_v41 = vpop.f32.mrb[103].mxu0 }
 0x1cf   : > { %v2699_v61 = vadd.f32 %v13166_v45, %v15248_v16  ;;  %v13174_v51 = vadd.f32 %v13173_v29, %v2440_v28  ;;  %v13161_v52 = vadd.f32 %v15053_v30, %v11247_v58  ;;  %v11250_v60 = vadd.f32 %v11249_v41, %v11248_v54  ;;  %v2765_v29 = vld [vmem:[%s14347_s21 + $0x10] sm:$0xff]  ;;  %v2766_v45 = vld [vmem:[%s14347_s21 + $0x18] sm:$0xff] }
 0x1d1   : > { %v2731_v63 = vmax.f32 %v2699_v61, 0.0  ;;  %v2700_v3 = vadd.f32 %v13174_v51, %v15248_v16  ;;  %v13162_v6 = vadd.f32 %v13161_v52, %v12697_v17  ;;  %v13169_v43 = vadd.f32 %v15063_v18, %v11250_v60 }
 0x1d3   : > { %v2795_v21 = vadd.f32 %v2763_v0, %v2731_v63  ;;  %2859 = vst [vmem:[#allocation2 + $0x108] sm:$0xff] %v2731_v63  ;;  %v2732_v46 = vmax.f32 %v2700_v3, 0.0  ;;  %v15268_v9 = vpop.f32.mrb[68].mxu1  ;;  %v2701_v53 = vadd.f32 %v13162_v6, %v15248_v16  ;;  %v13170_v25 = vadd.f32 %v13169_v43, %v12698_v32  ;;  %v11251_v57 = vpop.f32.mrb[104].mxu0 }
 0x1d4   : > { %v2453_v30 = vpop.f32.mrb[69].mxu1  ;;  %v11252_v17 = vpop.f32.mrb[105].mxu0 }
 0x1d5   : > { %2827 = vst [vmem:[%s14347_s21] sm:$0xff] %v2795_v21  ;;  %v2796_v27 = vadd.f32 %v2764_v13, %v2732_v46  ;;  %2860 = vst [vmem:[#allocation2 + $0x110] sm:$0xff] %v2732_v46  ;;  %v15273_v26 = vpop.f32.mrb[70].mxu1  ;;  %v15275_v18 = vpack.c.bf16 %v2732_v46, %v2731_v63  ;;  %v2733_v2 = vmax.f32 %v2701_v53, 0.0  ;;  %v2702_v12 = vadd.f32 %v13170_v25, %v15248_v16  ;;  %v11254_v8 = vpop.f32.mrb[106].mxu0  ;;  %v2767_v21 = vld [vmem:[%s14347_s21 + $0x20] sm:$0xff] }
 0x1d6   : > { %v2456_v62 = vpop.f32.mrb[71].mxu1  ;;  %v11253_v47 = vadd.f32 %v11252_v17, %v11251_v57  ;;  %v11255_v32 = vpop.f32.mrb[107].mxu0 }
 0x1d7   : > { %2828 = vst [vmem:[%s14347_s21 + $0x8] sm:$0xff] %v2796_v27  ;;  %3421 = vmatprep.mubr.bf16.mxu0 %v15275_v18  ;;  %v2797_v24 = vadd.f32 %v2765_v29, %v2733_v2  ;;  %2861 = vst [vmem:[#allocation2 + $0x128] sm:$0xff] %v2733_v2  ;;  %v2734_v1 = vmax.f32 %v2702_v12, 0.0  ;;  %v11256_v58 = vadd.f32 %v11255_v32, %v11254_v8 }
 0x1d8   : > { %v13181_v28 = vadd.f32 %v15075_v10, %v11253_v47 }
 0x1d9   : > { %2829 = vst [vmem:[%s14347_s21 + $0x10] sm:$0xff] %v2797_v24  ;;  %v2798_v54 = vadd.f32 %v2766_v45, %v2734_v1  ;;  %2862 = vst [vmem:[#allocation2 + $0x130] sm:$0xff] %v2734_v1  ;;  %v13189_v51 = vadd.f32 %v15082_v38, %v11256_v58  ;;  %v15284_v41 = vpack.c.bf16 %v2734_v1, %v2733_v2  ;;  %v2768_v2 = vld [vmem:[%s14347_s21 + $0x28] sm:$0xff] }
 0x1da   : > { %v13182_v61 = vadd.f32 %v13181_v28, %v2453_v30  ;;  %v2896_v52 = vld [vmem:[#allocation2 + $0x106] sm:$0xff] }
 0x1db   : > { %v15286_v0 = vpop.f32.mrb[72].mxu1  ;;  %2830 = vst [vmem:[%s14347_s21 + $0x18] sm:$0xff] %v2798_v54  ;;  %v13190_v10 = vadd.f32 %v13189_v51, %v2456_v62  ;;  %v11257_v3 = vpop.f32.mrb[108].mxu0 }
 0x1dc   : > { %v2703_v60 = vadd.f32 %v13182_v61, %v15248_v16  ;;  %v15290_v63 = vpop.f32.mrb[73].mxu1  ;;  %v3057_v13 = vld [vmem:[#allocation2 + $0x10a] sm:$0xff]  ;;  %v3058_v6 = vld [vmem:[#allocation2 + $0x112] sm:$0xff]  ;;  %v11258_v53 = vpop.f32.mrb[109].mxu0 }
 0x1dd   : > { %v2897_v43 = vld [vmem:[#allocation2 + $0x10e] sm:$0xff]  ;;  %v15293_v46 = vpop.f32.mrb[74].mxu1  ;;  %v15295_v38 = vpack.c.bf16 %v3058_v6, %v3057_v13  ;;  %v2704_v57 = vadd.f32 %v13190_v10, %v15248_v16  ;;  %v11259_v29 = vadd.f32 %v11258_v53, %v11257_v3  ;;  %v11260_v17 = vpop.f32.mrb[110].mxu0 }
 0x1de   : > { %v15297_v30 = vpack.c.bf16 %v2897_v43, %v2896_v52  ;;  %v2735_v25 = vmax.f32 %v2703_v60, 0.0  ;;  %v15300_v27 = vpop.f32.mrb[75].mxu1  ;;  %v11261_v12 = vpop.f32.mrb[111].mxu0  ;;  %v2898_v51 = vld [vmem:[#allocation2 + $0x126] sm:$0xff] }
 0x1df   : > { %12747 = vmatprep.mubr.bf16.mxu1 %v15295_v38  ;;  %v2736_v47 = vmax.f32 %v2704_v57, 0.0  ;;  %v13177_v8 = vadd.f32 %v15071_v40, %v11259_v29  ;;  %v11262_v45 = vadd.f32 %v11261_v12, %v11260_v17  ;;  %v2770_v17 = vld [vmem:[%s14347_s21 + $0x38] sm:$0xff] }
 0x1e0   : > { %3422 = vmatmul.mubr.bf16.gmra.mrb[168].mxu0 %v15297_v30  ;;  %v2799_v62 = vadd.f32 %v2767_v21, %v2735_v25  ;;  %2863 = vst [vmem:[#allocation2 + $0x148] sm:$0xff] %v2735_v25  ;;  %v3059_v32 = vld [vmem:[#allocation2 + $0x12a] sm:$0xff]  ;;  %v3060_v24 = vld [vmem:[#allocation2 + $0x132] sm:$0xff] }
 0x1e1   : > { %3429 = vmatprep.mubr.bf16.mxu0 %v15284_v41  ;;  %v2899_v1 = vld [vmem:[#allocation2 + $0x12e] sm:$0xff]  ;;  %v2800_v28 = vadd.f32 %v2768_v2, %v2736_v47  ;;  %2864 = vst [vmem:[#allocation2 + $0x150] sm:$0xff] %v2736_v47  ;;  %v13178_v58 = vadd.f32 %v13177_v8, %v15268_v9  ;;  %v13185_v54 = vadd.f32 %v15079_v59, %v11262_v45 }
 0x1e2   : > { %2831 = vst [vmem:[%s14347_s21 + $0x20] sm:$0xff] %v2799_v62  ;;  %v15310_v61 = vpack.c.bf16 %v3060_v24, %v3059_v32  ;;  %v15314_v40 = vpack.c.bf16 %v2899_v1, %v2898_v51  ;;  %v15316_v60 = vpack.c.bf16 %v2736_v47, %v2735_v25  ;;  %v2769_v59 = vld [vmem:[%s14347_s21 + $0x30] sm:$0xff] }
 0x1e3   : > { %v15312_v52 = vpop.f32.mrb[76].mxu1  ;;  %2832 = vst [vmem:[%s14347_s21 + $0x28] sm:$0xff] %v2800_v28  ;;  %v2705_v10 = vadd.f32 %v13178_v58, %v15248_v16  ;;  %v13186_v13 = vadd.f32 %v13185_v54, %v15273_v26  ;;  %v11263_v9 = vpop.f32.mrb[112].mxu0 }
 0x1e4   : > { %v15320_v3 = vpop.f32.mrb[77].mxu1  ;;  %12748 = vmatmul.mubr.bf16.gmra.mrb[100].mxu1 %v15310_v61  ;;  %v11264_v43 = vpop.f32.mrb[113].mxu0 }
 0x1e5   : > { %v15325_v6 = vpop.f32.mrb[78].mxu1  ;;  %v2737_v21 = vmax.f32 %v2705_v10, 0.0  ;;  %v2706_v53 = vadd.f32 %v13186_v13, %v15248_v16  ;;  %v11265_v57 = vadd.f32 %v11264_v43, %v11263_v9  ;;  %v11266_v29 = vpop.f32.mrb[114].mxu0 }
 0x1e6   : > { %v15328_v25 = vpop.f32.mrb[79].mxu1  ;;  %v11267_v2 = vpop.f32.mrb[115].mxu0 }
 0x1e7   : > { %v2801_v26 = vadd.f32 %v2769_v59, %v2737_v21  ;;  %2865 = vst [vmem:[#allocation2 + $0x168] sm:$0xff] %v2737_v21  ;;  %v2738_v12 = vmax.f32 %v2706_v53, 0.0  ;;  %v13197_v62 = vadd.f32 %v15094_v56, %v11265_v57  ;;  %v11268_v47 = vadd.f32 %v11267_v2, %v11266_v29  ;;  %v2900_v54 = vld [vmem:[#allocation2 + $0x146] sm:$0xff] }
 0x1e8   : > { %3430 = vmatmul.mubr.bf16.gmra.mrb[172].mxu0 %v15314_v40  ;;  %v3061_v8 = vld [vmem:[#allocation2 + $0x14a] sm:$0xff]  ;;  %v3062_v45 = vld [vmem:[#allocation2 + $0x152] sm:$0xff] }
 0x1e9   : > { %3437 = vmatprep.mubr.bf16.mxu0 %v15316_v60  ;;  %v2901_v32 = vld [vmem:[#allocation2 + $0x14e] sm:$0xff]  ;;  %2833 = vst [vmem:[%s14347_s21 + $0x30] sm:$0xff] %v2801_v26  ;;  %v2802_v24 = vadd.f32 %v2770_v17, %v2738_v12  ;;  %2866 = vst [vmem:[#allocation2 + $0x170] sm:$0xff] %v2738_v12  ;;  %v13198_v1 = vadd.f32 %v13197_v62, %v15290_v63  ;;  %v13205_v28 = vadd.f32 %v15101_v14, %v11268_v47  ;;  %v2771_v14 = vld [vmem:[%s14347_s21 + $0x40] sm:$0xff] }
 0x1ea   : > { %v15337_v58 = vpack.c.bf16 %v3062_v45, %v3061_v8  ;;  %v15341_v56 = vpack.c.bf16 %v2901_v32, %v2900_v54  ;;  %v15343_v10 = vpack.c.bf16 %v2738_v12, %v2737_v21  ;;  %v2772_v26 = vld [vmem:[%s14347_s21 + $0x48] sm:$0xff] }
 0x1eb   : > { %v15339_v51 = vpop.f32.mrb[80].mxu1  ;;  %2834 = vst [vmem:[%s14347_s21 + $0x38] sm:$0xff] %v2802_v24  ;;  %v2707_v13 = vadd.f32 %v13198_v1, %v15248_v16  ;;  %v13206_v59 = vadd.f32 %v13205_v28, %v15300_v27  ;;  %v11269_v63 = vpop.f32.mrb[116].mxu0 }
 0x1ec   : > { %18056 = vst [vmem:[#allocation8_spill] sm:$0xff] %v15343_v10  ;;  %v15347_v9 = vpop.f32.mrb[81].mxu1  ;;  %12751 = vmatprep.mubr.bf16.mxu1 %v15337_v58  ;;  %v11270_v53 = vpop.f32.mrb[117].mxu0 }
 0x1ed   : > { %v15352_v43 = vpop.f32.mrb[82].mxu1  ;;  %v2739_v57 = vmax.f32 %v2707_v13, 0.0  ;;  %v2708_v29 = vadd.f32 %v13206_v59, %v15248_v16  ;;  %v11271_v17 = vadd.f32 %v11270_v53, %v11269_v63  ;;  %v11272_v2 = vpop.f32.mrb[118].mxu0 }
 0x1ee   : > { %v15355_v21 = vpop.f32.mrb[83].mxu1  ;;  %v11273_v12 = vpop.f32.mrb[119].mxu0  ;;  %v2902_v59 = vld [vmem:[#allocation2 + $0x166] sm:$0xff] }
 0x1ef   : > { %v2803_v27 = vadd.f32 %v2771_v14, %v2739_v57  ;;  %2867 = vst [vmem:[#allocation2 + $0x188] sm:$0xff] %v2739_v57  ;;  %v2740_v62 = vmax.f32 %v2708_v29, 0.0  ;;  %v13193_v47 = vadd.f32 %v15090_v7, %v11271_v17  ;;  %v11274_v8 = vadd.f32 %v11273_v12, %v11272_v2 }
 0x1f0   : > { %3438 = vmatmul.mubr.bf16.gmra.mrb[176].mxu0 %v15341_v56  ;;  %v3063_v45 = vld [vmem:[#allocation2 + $0x16a] sm:$0xff]  ;;  %v3064_v32 = vld [vmem:[#allocation2 + $0x172] sm:$0xff] }
 0x1f1   : > { %3445 = vmatprep.mubr.bf16.mxu0 %v15343_v10  ;;  %v2903_v24 = vld [vmem:[#allocation2 + $0x16e] sm:$0xff]  ;;  %2835 = vst [vmem:[%s14347_s21 + $0x40] sm:$0xff] %v2803_v27  ;;  %v2804_v1 = vadd.f32 %v2772_v26, %v2740_v62  ;;  %2868 = vst [vmem:[#allocation2 + $0x190] sm:$0xff] %v2740_v62  ;;  %v13194_v28 = vadd.f32 %v13193_v47, %v15286_v0  ;;  %v13201_v54 = vadd.f32 %v15098_v50, %v11274_v8  ;;  %v2774_v8 = vld [vmem:[%s14347_s21 + $0x58] sm:$0xff] }
 0x1f2   : > { %v15364_v13 = vpack.c.bf16 %v3064_v32, %v3063_v45  ;;  %v15368_v7 = vpack.c.bf16 %v2903_v24, %v2902_v59  ;;  %v15370_v14 = vpack.c.bf16 %v2740_v62, %v2739_v57  ;;  %v2773_v50 = vld [vmem:[%s14347_s21 + $0x50] sm:$0xff] }
 0x1f3   : > { %v15366_v63 = vpop.f32.mrb[84].mxu1  ;;  %2836 = vst [vmem:[%s14347_s21 + $0x48] sm:$0xff] %v2804_v1  ;;  %v2709_v53 = vadd.f32 %v13194_v28, %v15248_v16  ;;  %v13202_v17 = vadd.f32 %v13201_v54, %v15293_v46  ;;  %v11275_v0 = vpop.f32.mrb[120].mxu0 }
 0x1f4   : > { %18057 = vst [vmem:[#allocation6_spill] sm:$0xff] %v15368_v7  ;;  %18058 = vst [vmem:[#allocation5_spill] sm:$0xff] %v15370_v14  ;;  %v15374_v29 = vpop.f32.mrb[85].mxu1  ;;  %12752 = vmatmul.mubr.bf16.gmra.mrb[104].mxu1 %v15364_v13  ;;  %v11276_v26 = vpop.f32.mrb[121].mxu0 }
 0x1f5   : > { %v15379_v2 = vpop.f32.mrb[86].mxu1  ;;  %v2741_v12 = vmax.f32 %v2709_v53, 0.0  ;;  %v2710_v27 = vadd.f32 %v13202_v17, %v15248_v16  ;;  %v11277_v62 = vadd.f32 %v11276_v26, %v11275_v0  ;;  %v11278_v47 = vpop.f32.mrb[122].mxu0 }
 0x1f6   : > { %v15382_v57 = vpop.f32.mrb[87].mxu1  ;;  %v11279_v45 = vpop.f32.mrb[123].mxu0  ;;  %v2904_v26 = vld [vmem:[#allocation2 + $0x186] sm:$0xff] }
 0x1f7   : > { %v2805_v46 = vadd.f32 %v2773_v50, %v2741_v12  ;;  %2869 = vst [vmem:[#allocation2 + $0x1a8] sm:$0xff] %v2741_v12  ;;  %v2742_v32 = vmax.f32 %v2710_v27, 0.0  ;;  %v13213_v24 = vadd.f32 %v15113_v48, %v11277_v62  ;;  %v11280_v1 = vadd.f32 %v11279_v45, %v11278_v47 }
 0x1f8   : > { %3446 = vmatmul.mubr.bf16.gmra.mrb[180].mxu0 %v15368_v7  ;;  %v3065_v28 = vld [vmem:[#allocation2 + $0x18a] sm:$0xff]  ;;  %v3066_v54 = vld [vmem:[#allocation2 + $0x192] sm:$0xff] }
 0x1f9   : > { %3453 = vmatprep.mubr.bf16.mxu0 %v15370_v14  ;;  %v2905_v59 = vld [vmem:[#allocation2 + $0x18e] sm:$0xff]  ;;  %2837 = vst [vmem:[%s14347_s21 + $0x50] sm:$0xff] %v2805_v46  ;;  %v2806_v53 = vadd.f32 %v2774_v8, %v2742_v32  ;;  %2870 = vst [vmem:[#allocation2 + $0x1b0] sm:$0xff] %v2742_v32  ;;  %v13214_v17 = vadd.f32 %v13213_v24, %v15320_v3  ;;  %v13221_v0 = vadd.f32 %v15120_v44, %v11280_v1  ;;  %v2775_v44 = vld [vmem:[%s14347_s21 + $0x60] sm:$0xff] }
 0x1fa   : > { %v15391_v50 = vpack.c.bf16 %v3066_v54, %v3065_v28  ;;  %v15395_v48 = vpack.c.bf16 %v2905_v59, %v2904_v26  ;;  %v15397_v62 = vpack.c.bf16 %v2742_v32, %v2741_v12  ;;  %v2776_v59 = vld [vmem:[%s14347_s21 + $0x68] sm:$0xff] }
 0x1fb   : > { %v15393_v27 = vpop.f32.mrb[88].mxu1  ;;  %2838 = vst [vmem:[%s14347_s21 + $0x58] sm:$0xff] %v2806_v53  ;;  %v2711_v47 = vadd.f32 %v13214_v17, %v15248_v16  ;;  %v13222_v8 = vadd.f32 %v13221_v0, %v15328_v25  ;;  %v11281_v3 = vpop.f32.mrb[124].mxu0 }
 0x1fc   : > { %18059 = vst [vmem:[#allocation10_spill] sm:$0xff] %v15395_v48  ;;  %18060 = vst [vmem:[#allocation7_spill] sm:$0xff] %v15397_v62  ;;  %v15401_v45 = vpop.f32.mrb[89].mxu1  ;;  %12755 = vmatprep.mubr.bf16.mxu1 %v15391_v50  ;;  %v11282_v24 = vpop.f32.mrb[125].mxu0 }
 0x1fd   : > { %v15406_v46 = vpop.f32.mrb[90].mxu1  ;;  %v2743_v1 = vmax.f32 %v2711_v47, 0.0  ;;  %v2712_v28 = vadd.f32 %v13222_v8, %v15248_v16  ;;  %v11283_v32 = vadd.f32 %v11282_v24, %v11281_v3  ;;  %v11284_v54 = vpop.f32.mrb[126].mxu0 }
 0x1fe   : > { %v15409_v12 = vpop.f32.mrb[91].mxu1  ;;  %v11285_v53 = vpop.f32.mrb[127].mxu0 }
 0x1ff   : > { %v2807_v25 = vadd.f32 %v2775_v44, %v2743_v1  ;;  %2871 = vst [vmem:[#allocation2 + $0x1c8] sm:$0xff] %v2743_v1  ;;  %v2744_v17 = vmax.f32 %v2712_v28, 0.0  ;;  %v13209_v0 = vadd.f32 %v15109_v35, %v11283_v32  ;;  %v11286_v26 = vadd.f32 %v11285_v53, %v11284_v54  ;;  %v2906_v28 = vld [vmem:[#allocation2 + $0x1a6] sm:$0xff] }
 0x200   : > { %3454 = vmatmul.mubr.bf16.gmra.mrb[184].mxu0 %v15395_v48  ;;  %v3067_v47 = vld [vmem:[#allocation2 + $0x1aa] sm:$0xff]  ;;  %v3068_v8 = vld [vmem:[#allocation2 + $0x1b2] sm:$0xff] }
 0x201   : > { %3461 = vmatprep.mubr.bf16.mxu0 %v15397_v62  ;;  %v2907_v14 = vld [vmem:[#allocation2 + $0x1ae] sm:$0xff]  ;;  %2839 = vst [vmem:[%s14347_s21 + $0x60] sm:$0xff] %v2807_v25  ;;  %v2808_v3 = vadd.f32 %v2776_v59, %v2744_v17  ;;  %2872 = vst [vmem:[#allocation2 + $0x1d0] sm:$0xff] %v2744_v17  ;;  %v13210_v24 = vadd.f32 %v13209_v0, %v15312_v52  ;;  %v13217_v48 = vadd.f32 %v15117_v49, %v11286_v26 }
 0x202   : > { %v15418_v44 = vpack.c.bf16 %v3068_v8, %v3067_v47  ;;  %v15422_v35 = vpack.c.bf16 %v2907_v14, %v2906_v28  ;;  %v15424_v32 = vpack.c.bf16 %v2744_v17, %v2743_v1  ;;  %v2777_v49 = vld [vmem:[%s14347_s21 + $0x70] sm:$0xff]  ;;  %v2778_v8 = vld [vmem:[%s14347_s21 + $0x78] sm:$0xff] }
 0x203   : > { %v15420_v7 = vpop.f32.mrb[92].mxu1  ;;  %2840 = vst [vmem:[%s14347_s21 + $0x68] sm:$0xff] %v2808_v3  ;;  %v2713_v54 = vadd.f32 %v13210_v24, %v15248_v16  ;;  %v13218_v59 = vadd.f32 %v13217_v48, %v15325_v6  ;;  %v11287_v52 = vpop.f32.mrb[128].mxu0 }
 0x204   : > { %18061 = vst [vmem:[#allocation9_spill] sm:$0xff] %v15422_v35  ;;  %v15428_v53 = vpop.f32.mrb[93].mxu1  ;;  %12756 = vmatmul.mubr.bf16.gmra.mrb[108].mxu1 %v15418_v44  ;;  %v11288_v0 = vpop.f32.mrb[129].mxu0 }
 0x205   : > { %v15433_v25 = vpop.f32.mrb[94].mxu1  ;;  %v2745_v26 = vmax.f32 %v2713_v54, 0.0  ;;  %v2714_v14 = vadd.f32 %v13218_v59, %v15248_v16  ;;  %v11289_v17 = vadd.f32 %v11288_v0, %v11287_v52  ;;  %v11290_v47 = vpop.f32.mrb[130].mxu0 }
 0x206   : > { %v15436_v1 = vpop.f32.mrb[95].mxu1  ;;  %v11291_v3 = vpop.f32.mrb[131].mxu0 }
 0x207   : > { %v2809_v6 = vadd.f32 %v2777_v49, %v2745_v26  ;;  %2873 = vst [vmem:[#allocation2 + $0x1e8] sm:$0xff] %v2745_v26  ;;  %v2746_v48 = vmax.f32 %v2714_v14, 0.0  ;;  %v13229_v24 = vadd.f32 %v15132_v15, %v11289_v17  ;;  %v11292_v28 = vadd.f32 %v11291_v3, %v11290_v47  ;;  %v2908_v14 = vld [vmem:[#allocation2 + $0x1c6] sm:$0xff] }
 0x208   : > { %3462 = vmatmul.mubr.bf16.gmra.mrb[188].mxu0 %v15422_v35  ;;  %v3069_v54 = vld [vmem:[#allocation2 + $0x1ca] sm:$0xff]  ;;  %v3070_v59 = vld [vmem:[#allocation2 + $0x1d2] sm:$0xff] }
 0x209   : > { %3469 = vmatprep.mubr.bf16.mxu0 %v15424_v32  ;;  %v2909_v62 = vld [vmem:[#allocation2 + $0x1ce] sm:$0xff]  ;;  %2841 = vst [vmem:[%s14347_s21 + $0x70] sm:$0xff] %v2809_v6  ;;  %v2810_v52 = vadd.f32 %v2778_v8, %v2746_v48  ;;  %2874 = vst [vmem:[#allocation2 + $0x1f0] sm:$0xff] %v2746_v48  ;;  %v13230_v0 = vadd.f32 %v13229_v24, %v15347_v9  ;;  %v13237_v35 = vadd.f32 %v15139_v5, %v11292_v28  ;;  %v2779_v8 = vld [vmem:[%s14347_s21 + $0x80] sm:$0xff] }
 0x20a   : > { %v15445_v49 = vpack.c.bf16 %v3070_v59, %v3069_v54  ;;  %v15447_v10 = vpack.c.bf16 %v2909_v62, %v2908_v14  ;;  %v15449_v15 = vpack.c.bf16 %v2746_v48, %v2745_v26  ;;  %v2780_v62 = vld [vmem:[%s14347_s21 + $0x88] sm:$0xff] }
 0x20b   : > { %2842 = vst [vmem:[%s14347_s21 + $0x78] sm:$0xff] %v2810_v52  ;;  %v2715_v17 = vadd.f32 %v13230_v0, %v15248_v16  ;;  %v13238_v47 = vadd.f32 %v13237_v35, %v15355_v21  ;;  %v11293_v3 = vpop.f32.mrb[132].mxu0 }
 0x20c   : > { %12759 = vmatprep.mubr.bf16.mxu1 %v15445_v49  ;;  %v11294_v9 = vpop.f32.mrb[133].mxu0 }
 0x20d   : > { %v2747_v6 = vmax.f32 %v2715_v17, 0.0  ;;  %v2716_v5 = vadd.f32 %v13238_v47, %v15248_v16  ;;  %v11295_v24 = vadd.f32 %v11294_v9, %v11293_v3  ;;  %v11296_v28 = vpop.f32.mrb[134].mxu0 }
 0x20e   : > { %v11297_v26 = vpop.f32.mrb[135].mxu0 }
 0x20f   : > { %v2811_v48 = vadd.f32 %v2779_v8, %v2747_v6  ;;  %2875 = vst [vmem:[#allocation2 + $0x208] sm:$0xff] %v2747_v6  ;;  %v2748_v54 = vmax.f32 %v2716_v5, 0.0  ;;  %v13225_v21 = vadd.f32 %v15128_v4, %v11295_v24  ;;  %v11298_v35 = vadd.f32 %v11297_v26, %v11296_v28  ;;  %v2910_v8 = vld [vmem:[#allocation2 + $0x1e6] sm:$0xff] }
 0x210   : > { %3470 = vmatmul.mubr.bf16.gmra.mrb[192].mxu0 %v15447_v10  ;;  %v3071_v59 = vld [vmem:[#allocation2 + $0x1ea] sm:$0xff]  ;;  %v3072_v52 = vld [vmem:[#allocation2 + $0x1f2] sm:$0xff] }
 0x211   : > { %3477 = vmatprep.mubr.bf16.mxu0 %v15449_v15  ;;  %v2911_v0 = vld [vmem:[#allocation2 + $0x1ee] sm:$0xff]  ;;  %2843 = vst [vmem:[%s14347_s21 + $0x80] sm:$0xff] %v2811_v48  ;;  %v2812_v14 = vadd.f32 %v2780_v62, %v2748_v54  ;;  %2876 = vst [vmem:[#allocation2 + $0x210] sm:$0xff] %v2748_v54  ;;  %v13226_v17 = vadd.f32 %v13225_v21, %v15339_v51  ;;  %v13233_v47 = vadd.f32 %v15136_v39, %v11298_v35  ;;  %v2782_v35 = vld [vmem:[%s14347_s21 + $0x98] sm:$0xff] }
 0x212   : > { %v15464_v3 = vpack.c.bf16 %v3072_v52, %v3071_v59  ;;  %v15466_v9 = vpack.c.bf16 %v2911_v0, %v2910_v8  ;;  %v15468_v4 = vpack.c.bf16 %v2748_v54, %v2747_v6  ;;  %v2781_v62 = vld [vmem:[%s14347_s21 + $0x90] sm:$0xff] }
 0x213   : > { %2844 = vst [vmem:[%s14347_s21 + $0x88] sm:$0xff] %v2812_v14  ;;  %v2717_v5 = vadd.f32 %v13226_v17, %v15248_v16  ;;  %v13234_v24 = vadd.f32 %v13233_v47, %v15352_v43  ;;  %v11299_v28 = vpop.f32.mrb[136].mxu0 }
 0x214   : > { %12760 = vmatmul.mubr.bf16.gmra.mrb[112].mxu1 %v15464_v3  ;;  %v11300_v51 = vpop.f32.mrb[137].mxu0 }
 0x215   : > { %v2749_v26 = vmax.f32 %v2717_v5, 0.0  ;;  %v2718_v39 = vadd.f32 %v13234_v24, %v15248_v16  ;;  %v11301_v48 = vadd.f32 %v11300_v51, %v11299_v28  ;;  %v11302_v21 = vpop.f32.mrb[138].mxu0 }
 0x216   : > { %v11303_v6 = vpop.f32.mrb[139].mxu0  ;;  %v2912_v28 = vld [vmem:[#allocation2 + $0x206] sm:$0xff] }
 0x217   : > { %v2813_v54 = vadd.f32 %v2781_v62, %v2749_v26  ;;  %2877 = vst [vmem:[#allocation2 + $0x228] sm:$0xff] %v2749_v26  ;;  %v2750_v59 = vmax.f32 %v2718_v39, 0.0  ;;  %v13245_v43 = vadd.f32 %v15151_v31, %v11301_v48  ;;  %v11304_v52 = vadd.f32 %v11303_v6, %v11302_v21  ;;  %v2783_v21 = vld [vmem:[%s14347_s21 + $0xa0] sm:$0xff] }
 0x218   : > { %3478 = vmatmul.mubr.bf16.gmra.mrb[196].mxu0 %v15466_v9  ;;  %v3073_v0 = vld [vmem:[#allocation2 + $0x20a] sm:$0xff]  ;;  %v3074_v14 = vld [vmem:[#allocation2 + $0x212] sm:$0xff] }
 0x219   : > { %3485 = vmatprep.mubr.bf16.mxu0 %v15468_v4  ;;  %v2913_v17 = vld [vmem:[#allocation2 + $0x20e] sm:$0xff]  ;;  %2845 = vst [vmem:[%s14347_s21 + $0x90] sm:$0xff] %v2813_v54  ;;  %v2814_v47 = vadd.f32 %v2782_v35, %v2750_v59  ;;  %2878 = vst [vmem:[#allocation2 + $0x230] sm:$0xff] %v2750_v59  ;;  %v13246_v8 = vadd.f32 %v13245_v43, %v15374_v29  ;;  %v13253_v5 = vadd.f32 %v15161_v42, %v11304_v52 }
 0x21a   : > { %v15483_v24 = vpack.c.bf16 %v3074_v14, %v3073_v0  ;;  %v15485_v62 = vpack.c.bf16 %v2913_v17, %v2912_v28  ;;  %v15487_v31 = vpack.c.bf16 %v2750_v59, %v2749_v26  ;;  %v2784_v43 = vld [vmem:[%s14347_s21 + $0xa8] sm:$0xff] }
 0x21b   : > { %2846 = vst [vmem:[%s14347_s21 + $0x98] sm:$0xff] %v2814_v47  ;;  %v2719_v51 = vadd.f32 %v13246_v8, %v15248_v16  ;;  %v13254_v39 = vadd.f32 %v13253_v5, %v15382_v57  ;;  %v11305_v48 = vpop.f32.mrb[140].mxu0 }
 0x21c   : > { %12763 = vmatprep.mubr.bf16.mxu1 %v15483_v24  ;;  %v11306_v29 = vpop.f32.mrb[141].mxu0 }
 0x21d   : > { %v2751_v35 = vmax.f32 %v2719_v51, 0.0  ;;  %v2720_v42 = vadd.f32 %v13254_v39, %v15248_v16  ;;  %v11307_v6 = vadd.f32 %v11306_v29, %v11305_v48  ;;  %v11308_v54 = vpop.f32.mrb[142].mxu0 }
 0x21e   : > { %v11309_v26 = vpop.f32.mrb[143].mxu0  ;;  %v2914_v39 = vld [vmem:[#allocation2 + $0x226] sm:$0xff] }
 0x21f   : > { %v2815_v59 = vadd.f32 %v2783_v21, %v2751_v35  ;;  %2879 = vst [vmem:[#allocation2 + $0x248] sm:$0xff] %v2751_v35  ;;  %v2752_v52 = vmax.f32 %v2720_v42, 0.0  ;;  %v13241_v57 = vadd.f32 %v15147_v33, %v11307_v6  ;;  %v11310_v0 = vadd.f32 %v11309_v26, %v11308_v54  ;;  %v2785_v6 = vld [vmem:[%s14347_s21 + $0xb0] sm:$0xff] }
 0x220   : > { %3486 = vmatmul.mubr.bf16.gmra.mrb[200].mxu0 %v15485_v62  ;;  %v3075_v14 = vld [vmem:[#allocation2 + $0x22a] sm:$0xff]  ;;  %v3076_v17 = vld [vmem:[#allocation2 + $0x232] sm:$0xff] }
 0x221   : > { %3493 = vmatprep.mubr.bf16.mxu0 %v15487_v31  ;;  %v2915_v47 = vld [vmem:[#allocation2 + $0x22e] sm:$0xff]  ;;  %2847 = vst [vmem:[%s14347_s21 + $0xa0] sm:$0xff] %v2815_v59  ;;  %v2816_v8 = vadd.f32 %v2784_v43, %v2752_v52  ;;  %2880 = vst [vmem:[#allocation2 + $0x250] sm:$0xff] %v2752_v52  ;;  %v13242_v5 = vadd.f32 %v13241_v57, %v15366_v63  ;;  %v13249_v28 = vadd.f32 %v15155_v20, %v11310_v0  ;;  %v2786_v59 = vld [vmem:[%s14347_s21 + $0xb8] sm:$0xff] }
 0x222   : > { %v15502_v51 = vpack.c.bf16 %v3076_v17, %v3075_v14  ;;  %v15504_v48 = vpack.c.bf16 %v2915_v47, %v2914_v39  ;;  %v15506_v33 = vpack.c.bf16 %v2752_v52, %v2751_v35 }
 0x223   : > { %2848 = vst [vmem:[%s14347_s21 + $0xa8] sm:$0xff] %v2816_v8  ;;  %v2721_v21 = vadd.f32 %v13242_v5, %v15248_v16  ;;  %v13250_v29 = vadd.f32 %v13249_v28, %v15379_v2  ;;  %v11311_v42 = vpop.f32.mrb[144].mxu0 }
 0x224   : > { %12764 = vmatmul.mubr.bf16.gmra.mrb[116].mxu1 %v15502_v51  ;;  %v11312_v63 = vpop.f32.mrb[145].mxu0 }
 0x225   : > { %v2753_v54 = vmax.f32 %v2721_v21, 0.0  ;;  %v2722_v20 = vadd.f32 %v13250_v29, %v15248_v16  ;;  %v11313_v43 = vadd.f32 %v11312_v63, %v11311_v42  ;;  %v11314_v26 = vpop.f32.mrb[146].mxu0 }
 0x226   : > { %v11315_v35 = vpop.f32.mrb[147].mxu0  ;;  %v2916_v21 = vld [vmem:[#allocation2 + $0x246] sm:$0xff] }
 0x227   : > { %v2817_v52 = vadd.f32 %v2785_v6, %v2753_v54  ;;  %2881 = vst [vmem:[#allocation2 + $0x268] sm:$0xff] %v2753_v54  ;;  %v2754_v57 = vmax.f32 %v2722_v20, 0.0  ;;  %v13261_v2 = vadd.f32 %v15182_v36, %v11313_v43  ;;  %v11316_v0 = vadd.f32 %v11315_v35, %v11314_v26  ;;  %v2787_v20 = vld [vmem:[%s14347_s21 + $0xc0] sm:$0xff]  ;;  %v2788_v35 = vld [vmem:[%s14347_s21 + $0xc8] sm:$0xff] }
 0x228   : > { %3494 = vmatmul.mubr.bf16.gmra.mrb[204].mxu0 %v15504_v48  ;;  %v3077_v14 = vld [vmem:[#allocation2 + $0x24a] sm:$0xff]  ;;  %v3078_v17 = vld [vmem:[#allocation2 + $0x252] sm:$0xff] }
 0x229   : > { %3501 = vmatprep.mubr.bf16.mxu0 %v15506_v33  ;;  %v2917_v47 = vld [vmem:[#allocation2 + $0x24e] sm:$0xff]  ;;  %2849 = vst [vmem:[%s14347_s21 + $0xb0] sm:$0xff] %v2817_v52  ;;  %v2818_v8 = vadd.f32 %v2786_v59, %v2754_v57  ;;  %2882 = vst [vmem:[#allocation2 + $0x270] sm:$0xff] %v2754_v57  ;;  %v13262_v5 = vadd.f32 %v13261_v2, %v15401_v45  ;;  %v13269_v28 = vadd.f32 %v15192_v11, %v11316_v0 }
 0x22a   : > { %v15521_v39 = vpack.c.bf16 %v3078_v17, %v3077_v14  ;;  %v15523_v29 = vpack.c.bf16 %v2917_v47, %v2916_v21  ;;  %v15525_v36 = vpack.c.bf16 %v2754_v57, %v2753_v54 }
 0x22b   : > { %2850 = vst [vmem:[%s14347_s21 + $0xb8] sm:$0xff] %v2818_v8  ;;  %v2723_v42 = vadd.f32 %v13262_v5, %v15248_v16  ;;  %v13270_v6 = vadd.f32 %v13269_v28, %v15409_v12  ;;  %v11317_v63 = vpop.f32.mrb[148].mxu0 }
 0x22c   : > { %12767 = vmatprep.mubr.bf16.mxu1 %v15521_v39  ;;  %v11318_v45 = vpop.f32.mrb[149].mxu0 }
 0x22d   : > { %v2755_v43 = vmax.f32 %v2723_v42, 0.0  ;;  %v2724_v11 = vadd.f32 %v13270_v6, %v15248_v16  ;;  %v11319_v26 = vadd.f32 %v11318_v45, %v11317_v63  ;;  %v11320_v59 = vpop.f32.mrb[150].mxu0  ;;  %v2789_v45 = vld [vmem:[%s14347_s21 + $0xd0] sm:$0xff] }
 0x22e   : > { %v11321_v54 = vpop.f32.mrb[151].mxu0  ;;  %v2918_v21 = vld [vmem:[#allocation2 + $0x266] sm:$0xff] }
 0x22f   : > { %v2819_v52 = vadd.f32 %v2787_v20, %v2755_v43  ;;  %2883 = vst [vmem:[#allocation2 + $0x288] sm:$0xff] %v2755_v43  ;;  %v2756_v57 = vmax.f32 %v2724_v11, 0.0  ;;  %v13257_v12 = vadd.f32 %v15178_v19, %v11319_v26  ;;  %v11322_v2 = vadd.f32 %v11321_v54, %v11320_v59 }
 0x230   : > { %3502 = vmatmul.mubr.bf16.gmra.mrb[208].mxu0 %v15523_v29  ;;  %v3079_v0 = vld [vmem:[#allocation2 + $0x26a] sm:$0xff]  ;;  %v3080_v14 = vld [vmem:[#allocation2 + $0x272] sm:$0xff] }
 0x231   : > { %3509 = vmatprep.mubr.bf16.mxu0 %v15525_v36  ;;  %v2919_v17 = vld [vmem:[#allocation2 + $0x26e] sm:$0xff]  ;;  %2851 = vst [vmem:[%s14347_s21 + $0xc0] sm:$0xff] %v2819_v52  ;;  %v2820_v47 = vadd.f32 %v2788_v35, %v2756_v57  ;;  %2884 = vst [vmem:[#allocation2 + $0x290] sm:$0xff] %v2756_v57  ;;  %v13258_v8 = vadd.f32 %v13257_v12, %v15393_v27  ;;  %v13265_v5 = vadd.f32 %v15186_v55, %v11322_v2  ;;  %v2790_v35 = vld [vmem:[%s14347_s21 + $0xd8] sm:$0xff] }
 0x232   : > { %v15540_v28 = vpack.c.bf16 %v3080_v14, %v3079_v0  ;;  %v15542_v42 = vpack.c.bf16 %v2919_v17, %v2918_v21  ;;  %v15544_v19 = vpack.c.bf16 %v2756_v57, %v2755_v43 }
 0x233   : > { %2852 = vst [vmem:[%s14347_s21 + $0xc8] sm:$0xff] %v2820_v47  ;;  %v2725_v6 = vadd.f32 %v13258_v8, %v15248_v16  ;;  %v13266_v63 = vadd.f32 %v13265_v5, %v15406_v46  ;;  %v11323_v20 = vpop.f32.mrb[152].mxu0 }
 0x234   : > { %12768 = vmatmul.mubr.bf16.gmra.mrb[120].mxu1 %v15540_v28  ;;  %v11324_v27 = vpop.f32.mrb[153].mxu0 }
 0x235   : > { %v2757_v11 = vmax.f32 %v2725_v6, 0.0  ;;  %v2726_v55 = vadd.f32 %v13266_v63, %v15248_v16  ;;  %v11325_v26 = vadd.f32 %v11324_v27, %v11323_v20  ;;  %v11326_v59 = vpop.f32.mrb[154].mxu0 }
 0x236   : > { %v11327_v43 = vpop.f32.mrb[155].mxu0  ;;  %v2920_v5 = vld [vmem:[#allocation2 + $0x286] sm:$0xff] }
 0x237   : > { %v2821_v54 = vadd.f32 %v2789_v45, %v2757_v11  ;;  %2885 = vst [vmem:[#allocation2 + $0x2a8] sm:$0xff] %v2757_v11  ;;  %v2758_v52 = vmax.f32 %v2726_v55, 0.0  ;;  %v13277_v46 = vadd.f32 %v15213_v37, %v11325_v26  ;;  %v11328_v57 = vadd.f32 %v11327_v43, %v11326_v59  ;;  %v2791_v45 = vld [vmem:[%s14347_s21 + $0xe0] sm:$0xff]  ;;  %v2792_v59 = vld [vmem:[%s14347_s21 + $0xe8] sm:$0xff] }
 0x238   : > { %3510 = vmatmul.mubr.bf16.gmra.mrb[212].mxu0 %v15542_v42  ;;  %v3081_v12 = vld [vmem:[#allocation2 + $0x28a] sm:$0xff]  ;;  %v3082_v2 = vld [vmem:[#allocation2 + $0x292] sm:$0xff] }
 0x239   : > { %3517 = vmatprep.mubr.bf16.mxu0 %v15544_v19  ;;  %v2921_v0 = vld [vmem:[#allocation2 + $0x28e] sm:$0xff]  ;;  %2853 = vst [vmem:[%s14347_s21 + $0xd0] sm:$0xff] %v2821_v54  ;;  %v2822_v14 = vadd.f32 %v2790_v35, %v2758_v52  ;;  %2886 = vst [vmem:[#allocation2 + $0x2b0] sm:$0xff] %v2758_v52  ;;  %v13278_v17 = vadd.f32 %v13277_v46, %v15428_v53  ;;  %v13285_v47 = vadd.f32 %v15223_v22, %v11328_v57 }
 0x23a   : > { %v15559_v8 = vpack.c.bf16 %v3082_v2, %v3081_v12  ;;  %v15561_v21 = vpack.c.bf16 %v2921_v0, %v2920_v5  ;;  %v15563_v37 = vpack.c.bf16 %v2758_v52, %v2757_v11 }
 0x23b   : > { %2854 = vst [vmem:[%s14347_s21 + $0xd8] sm:$0xff] %v2822_v14  ;;  %v2727_v6 = vadd.f32 %v13278_v17, %v15248_v16  ;;  %v13286_v63 = vadd.f32 %v13285_v47, %v15436_v1  ;;  %v11329_v20 = vpop.f32.mrb[156].mxu0  ;;  %v14097_v47 = vld [vmem:[%s18010_s2] ss:$0 sm:$0xff] }
 0x23c   : > { %12771 = vmatprep.mubr.bf16.mxu1 %v15559_v8  ;;  %v11330_v53 = vpop.f32.mrb[157].mxu0 }
 0x23d   : > { %v2759_v27 = vmax.f32 %v2727_v6, 0.0  ;;  %v2728_v22 = vadd.f32 %v13286_v63, %v15248_v16  ;;  %v11331_v55 = vadd.f32 %v11330_v53, %v11329_v20  ;;  %v11332_v26 = vpop.f32.mrb[158].mxu0 }
 0x23e   : > { %v11333_v11 = vpop.f32.mrb[159].mxu0  ;;  %v2922_v14 = vld [vmem:[#allocation2 + $0x2a6] sm:$0xff] }
 0x23f   : > { %v2823_v35 = vadd.f32 %v2791_v45, %v2759_v27  ;;  %2887 = vst [vmem:[#allocation2 + $0x2c8] sm:$0xff] %v2759_v27  ;;  %v2760_v43 = vmax.f32 %v2728_v22, 0.0  ;;  %v13273_v1 = vadd.f32 %v15209_v23, %v11331_v55  ;;  %v11334_v54 = vadd.f32 %v11333_v11, %v11332_v26  ;;  %v2794_v22 = vld [vmem:[%s14347_s21 + $0xf8] sm:$0xff] }
 0x240   : > { %3518 = vmatmul.mubr.bf16.gmra.mrb[216].mxu0 %v15561_v21  ;;  %v3083_v52 = vld [vmem:[#allocation2 + $0x2aa] sm:$0xff]  ;;  %v3084_v46 = vld [vmem:[#allocation2 + $0x2b2] sm:$0xff] }
 0x241   : > { %3525 = vmatprep.mubr.bf16.mxu0 %v15563_v37  ;;  %v2923_v57 = vld [vmem:[#allocation2 + $0x2ae] sm:$0xff]  ;;  %2855 = vst [vmem:[%s14347_s21 + $0xe0] sm:$0xff] %v2823_v35  ;;  %v2824_v16 = vadd.f32 %v2792_v59, %v2760_v43  ;;  %2888 = vst [vmem:[#allocation2 + $0x2d0] sm:$0xff] %v2760_v43  ;;  %v13274_v12 = vadd.f32 %v13273_v1, %v15420_v7  ;;  %v13281_v2 = vadd.f32 %v15217_v34, %v11334_v54 }
 0x242   : > { %v15578_v0 = vpack.c.bf16 %v3084_v46, %v3083_v52  ;;  %v15580_v17 = vpack.c.bf16 %v2923_v57, %v2922_v14  ;;  %v15582_v23 = vpack.c.bf16 %v2760_v43, %v2759_v27  ;;  %v2793_v34 = vld [vmem:[%s14347_s21 + $0xf0] sm:$0xff]  ;;  %v13930_v35 = vld [vmem:[%s18011_s3 + $0x1c8] sm:$0xff]   ;;  %v13937_v14 = vld [vmem:[%s18011_s3 + $0x1a0] sm:$0xff]  }
 0x243   : > { %2856 = vst [vmem:[%s14347_s21 + $0xe8] sm:$0xff] %v2824_v16  ;;  %v2729_v5 = vadd.f32 %v14097_v47, %v13274_v12  ;;  %v13282_v6 = vadd.f32 %v13281_v2, %v15433_v25  ;;  %v11375_v7 = vpop.f32.mrb[160].mxu0  ;;  %v13932_v52 = vld [vmem:[%s18011_s3 + $0x1d0] sm:$0xff]   ;;  %v13934_v2 = vld [vmem:[%s18011_s3 + $0x1d8] sm:$0xff]  }
 0x244   : > { %12772 = vmatmul.mubr.bf16.gmra.mrb[124].mxu1 %v15578_v0  ;;  %v11376_v63 = vpop.f32.mrb[161].mxu0  ;;  %v13933_v12 = vld [vmem:[%s18011_s3 + $0x190] sm:$0xff]  }
 0x245   : > { %12791 = vmatprep.mubr.bf16.mxu1 %v15295_v38  ;;  %v2761_v20 = vmax.f32 %v2729_v5, 0.0  ;;  %v2730_v45 = vadd.f32 %v14097_v47, %v13282_v6  ;;  %v15592_v53 = vadd.f32 %v11376_v63, %v11375_v7  ;;  %v11378_v27 = vpop.f32.mrb[162].mxu0  ;;  %v13929_v38 = vld [vmem:[%s18011_s3 + $0x180] sm:$0xff]   ;;  %v13938_v47 = vld [vmem:[%s18011_s3 + $0x1e8] sm:$0xff]   ;;  %v13940_v5 = vld [vmem:[%s18011_s3 + $0x1f0] sm:$0xff]  }
 0x246   : > { %v11379_v55 = vpop.f32.mrb[163].mxu0  ;;  %v18062_v6 = vld [vmem:[#allocation8_spill] sm:$0xff]  ;;  %v13941_v7 = vld [vmem:[%s18011_s3 + $0x1b0] sm:$0xff]  }
 0x247   : > { %v2825_v26 = vadd.f32 %v2793_v34, %v2761_v20  ;;  %2889 = vst [vmem:[#allocation2 + $0x2e8] sm:$0xff] %v2761_v20  ;;  %v2762_v25 = vmax.f32 %v2730_v45, 0.0  ;;  %v15597_v59 = vadd.f32 %v11379_v55, %v11378_v27  ;;  %v13942_v34 = vld [vmem:[%s18011_s3 + $0x1f8] sm:$0xff]   ;;  %v18063_v45 = vld [vmem:[#allocation6_spill] sm:$0xff]  ;;  %v18064_v27 = vld [vmem:[#allocation5_spill] sm:$0xff] }
 0x248   : > { %3526 = vmatmul.mubr.bf16.gmra.mrb[220].mxu0 %v15580_v17  ;;  %v13943_v63 = vld [vmem:[%s18011_s3 + $0x1b8] sm:$0xff]   ;;  %v18066_v55 = vld [vmem:[#allocation7_spill] sm:$0xff] }
 0x249   : > { %4000 = vmatprep.mubr.bf16.mxu0 %v15275_v18  ;;  %2857 = vst [vmem:[%s14347_s21 + $0xf0] sm:$0xff] %v2825_v26  ;;  %v2826_v11 = vadd.f32 %v2794_v22, %v2762_v25  ;;  %2890 = vst [vmem:[#allocation2 + $0x2f0] sm:$0xff] %v2762_v25  ;;  %v15606_v43 = vpack.c.bf16 %v2762_v25, %v2761_v20  ;;  %v13931_v18 = vld [vmem:[%s18011_s3 + $0x188] sm:$0xff]   ;;  %v13944_v20 = vld [vmem:[%s18011_s3 + $0x200] sm:$0xff]  }
 0x24a   : > { %v18065_v22 = vld [vmem:[#allocation10_spill] sm:$0xff]  ;;  %v18067_v26 = vld [vmem:[#allocation9_spill] sm:$0xff] }
 0x24b   : > { %2858 = vst [vmem:[%s14347_s21 + $0xf8] sm:$0xff] %v2826_v11  ;;  %v11381_v1 = vpop.f32.mrb[164].mxu0  ;;  %v3085_v25 = vld [vmem:[#allocation2 + $0x2ca] sm:$0xff] }
 0x24c   : > { %12792 = vmatmul.mubr.bf16.vlgmr.msra.gmra.mrb[96].mxu1 %v15310_v61  ;;  %v11382_v54 = vpop.f32.mrb[165].mxu0 }
 0x24d   : > { %12795 = vmatprep.mubr.bf16.mxu1 %v15337_v58  ;;  %11632 = vmatpush3.bf16.msra.mxu1 %v13929_v38  ;;  %v15617_v46 = vadd.f32 %v11382_v54, %v11381_v1  ;;  %v11384_v57 = vpop.f32.mrb[166].mxu0  ;;  %v3086_v38 = vld [vmem:[#allocation2 + $0x2d2] sm:$0xff]  ;;  %v13945_v54 = vld [vmem:[%s18011_s3 + $0x208] sm:$0xff]  }
 0x24e   : > { %11633 = vmatprep.subr.bf16.mxu1 %v13930_v35  ;;  %v11385_v61 = vpop.f32.mrb[167].mxu0  ;;  %v15679_v11 = vpack.c.bf16 %v3086_v38, %v3085_v25  ;;  %v14098_v25 = vld [vmem:[#allocation2 + $0xe8] sm:$0xff] }
 0x24f   : > { %v15621_v16 = vadd.f32 %v11385_v61, %v11384_v57  ;;  %v13949_v57 = vld [vmem:[%s18011_s3 + $0x228] sm:$0xff]   ;;  %v13950_v61 = vld [vmem:[%s18011_s3 + $0x230] sm:$0xff]   ;;  %v15756_v38 = vpack.c.bf16 %v14098_v25, %v14098_v25 }
 0x250   : > { %4001 = vmatmul.mubr.bf16.vlgmr.msra.gmra.mrb[224].mxu0 %v15297_v30  ;;  %v13936_v30 = vld [vmem:[%s18011_s3 + $0x1e0] sm:$0xff]   ;;  %v3087_v35 = vld [vmem:[#allocation2 + $0x2ea] sm:$0xff]  ;;  %v3088_v1 = vld [vmem:[#allocation2 + $0x2f2] sm:$0xff] }
 0x251   : > { %4008 = vmatprep.mubr.bf16.mxu0 %v15284_v41  ;;  %11634 = vmatpush3.bf16.msra.mxu1 %v13931_v18  ;;  %v13935_v41 = vld [vmem:[%s18011_s3 + $0x198] sm:$0xff]   ;;  %v15685_v18 = vpack.c.bf16 %v3088_v1, %v3087_v35 }
 0x252   : > { %11635 = vmatprep.subr.bf16.mxu1 %v13932_v52  ;;  %v13946_v52 = vld [vmem:[%s18011_s3 + $0x210] sm:$0xff]  }
 0x254   : > { %12796 = vmatmul.mubr.bf16.gmra.mrb[100].mxu1 %v15364_v13 }
 0x255   : > { %12799 = vmatprep.mubr.bf16.mxu1 %v15391_v50  ;;  %11636 = vmatpush3.bf16.msra.mxu1 %v13933_v12  ;;  %v13951_v12 = vld [vmem:[%s18011_s3 + $0x238] sm:$0xff]  }
 0x256   : > { %11637 = vmatprep.subr.bf16.mxu1 %v13934_v2 }
 0x258   : > { %4009 = vmatmul.mubr.bf16.gmra.mrb[228].mxu0 %v15314_v40  ;;  %v13939_v40 = vld [vmem:[%s18011_s3 + $0x1a8] sm:$0xff]  }
 0x259   : > { %4016 = vmatprep.mubr.bf16.mxu0 %v15316_v60  ;;  %11638 = vmatpush3.bf16.msra.mxu1 %v13935_v41 }
 0x25a   : > { %11639 = vmatprep.subr.bf16.mxu1 %v13936_v30 }
 0x25c   : > { %12800 = vmatmul.mubr.bf16.gmra.mrb[104].mxu1 %v15418_v44 }
 0x25d   : > { %12803 = vmatprep.mubr.bf16.mxu1 %v15445_v49  ;;  %11640 = vmatpush3.bf16.msra.mxu1 %v13937_v14 }
 0x25e   : > { %11641 = vmatprep.subr.bf16.mxu1 %v13938_v47 }
 0x260   : > { %4017 = vmatmul.mubr.bf16.gmra.mrb[232].mxu0 %v15341_v56 }
 0x261   : > { %4024 = vmatprep.mubr.bf16.mxu0 %v18062_v6  ;;  %11642 = vmatpush3.bf16.msra.mxu1 %v13939_v40 }
 0x262   : > { %11643 = vmatprep.subr.bf16.mxu1 %v13940_v5 }
 0x264   : > { %12804 = vmatmul.mubr.bf16.gmra.mrb[108].mxu1 %v15464_v3 }
 0x265   : > { %12807 = vmatprep.mubr.bf16.mxu1 %v15483_v24  ;;  %11644 = vmatpush3.bf16.msra.mxu1 %v13941_v7  ;;  %v2924_v7 = vld [vmem:[#allocation2 + $0x2c6] sm:$0xff] }
 0x266   : > { %11645 = vmatprep.subr.bf16.mxu1 %v13942_v34 }
 0x268   : > { %4025 = vmatmul.mubr.bf16.gmra.mrb[236].mxu0 %v18063_v45 }
 0x269   : > { %4032 = vmatprep.mubr.bf16.mxu0 %v18064_v27  ;;  %11646 = vmatpush3.bf16.msra.mxu1 %v13943_v63 }
 0x26a   : > { %12823 = vmatprep.subr.bf16.mxu1 %v13944_v20 }
 0x26c   : > { %12808 = vmatmul.mubr.bf16.gmra.mrb[112].mxu1 %v15502_v51 }
 0x26d   : > { %12811 = vmatprep.mubr.bf16.mxu1 %v15521_v39 }
 0x270   : > { %4033 = vmatmul.mubr.bf16.gmra.mrb[240].mxu0 %v18065_v22 }
 0x271   : > { %4040 = vmatprep.mubr.bf16.mxu0 %v18066_v55 }
 0x274   : > { %12812 = vmatmul.mubr.bf16.gmra.mrb[116].mxu1 %v15540_v28 }
 0x275   : > { %12815 = vmatprep.mubr.bf16.mxu1 %v15559_v8 }
 0x278   : > { %4041 = vmatmul.mubr.bf16.gmra.mrb[244].mxu0 %v18067_v26 }
 0x279   : > { %4048 = vmatprep.mubr.bf16.mxu0 %v15424_v32 }
 0x27c   : > { %12816 = vmatmul.mubr.bf16.gmra.mrb[120].mxu1 %v15578_v0 }
 0x27d   : > { %12819 = vmatprep.mubr.bf16.mxu1 %v15679_v11 }
 0x280   : > { %4049 = vmatmul.mubr.bf16.gmra.mrb[248].mxu0 %v15447_v10 }
 0x281   : > { %4056 = vmatprep.mubr.bf16.mxu0 %v15449_v15 }
 0x284   : > { %12820 = vmatmul.mubr.bf16.gmra.mrb[124].mxu1 %v15685_v18 }
 0x285   : > { %4660 = vmatprep.mubr.bf16.mxu1 %v15316_v60  ;;  %v13947_v60 = vld [vmem:[%s18011_s3 + $0x218] sm:$0xff]  }
 0x288   : > { %4057 = vmatmul.mubr.bf16.gmra.mrb[252].mxu0 %v15466_v9 }
 0x289   : > { %4064 = vmatprep.mubr.bf16.mxu0 %v15468_v4 }
 0x28c   : > { %4661 = vmatmul.mubr.bf16.vlgmr.msra.gmra.mrb[128].mxu1 %v15341_v56  ;;  %v13948_v56 = vld [vmem:[%s18011_s3 + $0x220] sm:$0xff]  }
 0x28d   : > { %4668 = vmatprep.mubr.bf16.mxu1 %v18062_v6  ;;  %12824 = vmatpush3.bf16.msra.mxu1 %v13944_v20  ;;  %v2927_v20 = vld [vmem:[#allocation2 + $0x2ee] sm:$0xff] }
 0x28e   : > { %12825 = vmatprep.subr.bf16.mxu1 %v13945_v54 }
 0x290   : > { %4065 = vmatmul.mubr.bf16.gmra.mrb[0].mxu0 %v15485_v62 }
 0x291   : > { %4072 = vmatprep.mubr.bf16.mxu0 %v15487_v31  ;;  %12826 = vmatpush3.bf16.msra.mxu1 %v13945_v54 }
 0x292   : > { %12827 = vmatprep.subr.bf16.mxu1 %v13946_v52 }
 0x294   : > { %4669 = vmatmul.mubr.bf16.gmra.mrb[132].mxu1 %v18063_v45 }
 0x295   : > { %4676 = vmatprep.mubr.bf16.mxu1 %v18064_v27  ;;  %12828 = vmatpush3.bf16.msra.mxu1 %v13946_v52 }
 0x296   : > { %12829 = vmatprep.subr.bf16.mxu1 %v13947_v60 }
 0x298   : > { %4073 = vmatmul.mubr.bf16.gmra.mrb[4].mxu0 %v15504_v48 }
 0x299   : > { %4080 = vmatprep.mubr.bf16.mxu0 %v15506_v33  ;;  %12830 = vmatpush3.bf16.msra.mxu1 %v13947_v60 }
 0x29a   : > { %12831 = vmatprep.subr.bf16.mxu1 %v13948_v56 }
 0x29c   : > { %4677 = vmatmul.mubr.bf16.gmra.mrb[136].mxu1 %v18065_v22 }
 0x29d   : > { %4684 = vmatprep.mubr.bf16.mxu1 %v18066_v55  ;;  %12832 = vmatpush3.bf16.msra.mxu1 %v13948_v56 }
 0x29e   : > { %12833 = vmatprep.subr.bf16.mxu1 %v13949_v57 }
 0x2a0   : > { %4081 = vmatmul.mubr.bf16.gmra.mrb[8].mxu0 %v15523_v29 }
 0x2a1   : > { %4088 = vmatprep.mubr.bf16.mxu0 %v15525_v36  ;;  %12834 = vmatpush3.bf16.msra.mxu1 %v13949_v57 }
 0x2a2   : > { %12835 = vmatprep.subr.bf16.mxu1 %v13950_v61 }
 0x2a4   : > { %4685 = vmatmul.mubr.bf16.gmra.mrb[140].mxu1 %v18067_v26 }
 0x2a5   : > { %4692 = vmatprep.mubr.bf16.mxu1 %v15424_v32  ;;  %12836 = vmatpush3.bf16.msra.mxu1 %v13950_v61 }
 0x2a6   : > { %12837 = vmatprep.subr.bf16.mxu1 %v13951_v12 }
 0x2a8   : > { %4089 = vmatmul.mubr.bf16.gmra.mrb[12].mxu0 %v15542_v42 }
 0x2a9   : > { %4096 = vmatprep.mubr.bf16.mxu0 %v15544_v19  ;;  %12838 = vmatpush3.bf16.msra.mxu1 %v13951_v12 }
 0x2ac   : > { %4693 = vmatmul.mubr.bf16.gmra.mrb[144].mxu1 %v15447_v10 }
 0x2ad   : > { %4700 = vmatprep.mubr.bf16.mxu1 %v15449_v15  ;;  %v2925_v15 = vld [vmem:[#allocation2 + $0x2ce] sm:$0xff] }
 0x2b0   : > { %4097 = vmatmul.mubr.bf16.gmra.mrb[16].mxu0 %v15561_v21 }
 0x2b1   : > { %4104 = vmatprep.mubr.bf16.mxu0 %v15563_v37 }
 0x2b3   : > { %v11387_v2 = vpop.f32.mrb[168].mxu0 }
 0x2b4   : > { %v11388_v41 = vpop.f32.mrb[169].mxu0  ;;  %4701 = vmatmul.mubr.bf16.gmra.mrb[148].mxu1 %v15466_v9  ;;  %v15743_v9 = vpack.c.bf16 %v2925_v15, %v2924_v7 }
 0x2b5   : > { %v15732_v30 = vadd.f32 %v11388_v41, %v11387_v2  ;;  %v11390_v32 = vpop.f32.mrb[170].mxu0  ;;  %4708 = vmatprep.mubr.bf16.mxu1 %v15468_v4 }
 0x2b6   : > { %v11391_v14 = vpop.f32.mrb[171].mxu0 }
 0x2b7   : > { %v15736_v47 = vadd.f32 %v11391_v14, %v11390_v32 }
 0x2b8   : > { %4105 = vmatmul.mubr.bf16.gmra.mrb[20].mxu0 %v15580_v17 }
 0x2b9   : > { %4112 = vmatprep.mubr.bf16.mxu0 %v15582_v23 }
 0x2bb   : > { %v11393_v10 = vpop.f32.mrb[172].mxu0 }
 0x2bc   : > { %v11394_v40 = vpop.f32.mrb[173].mxu0  ;;  %4709 = vmatmul.mubr.bf16.gmra.mrb[152].mxu1 %v15485_v62  ;;  %v2926_v62 = vld [vmem:[#allocation2 + $0x2e6] sm:$0xff] }
 0x2bd   : > { %v15740_v5 = vadd.f32 %v11394_v40, %v11393_v10  ;;  %v11396_v6 = vpop.f32.mrb[174].mxu0  ;;  %4716 = vmatprep.mubr.bf16.mxu1 %v15487_v31  ;;  %v2949_v26 = vpack.c.bf16 %v2927_v20, %v2926_v62 }
 0x2be   : > { %v11397_v34 = vpop.f32.mrb[175].mxu0 }
 0x2bf   : > { %v15746_v4 = vadd.f32 %v11397_v34, %v11396_v6 }
 0x2c0   : > { %4113 = vmatmul.mubr.bf16.gmra.mrb[24].mxu0 %v15743_v9 }
 0x2c1   : > { %4120 = vmatprep.mubr.bf16.mxu0 %v15606_v43 }
 0x2c3   : > { %v11399_v63 = vpop.f32.mrb[176].mxu0 }
 0x2c4   : > { %v11400_v45 = vpop.f32.mrb[177].mxu0  ;;  %4717 = vmatmul.mubr.bf16.gmra.mrb[156].mxu1 %v15504_v48 }
 0x2c5   : > { %v15750_v27 = vadd.f32 %v11400_v45, %v11399_v63  ;;  %v11402_v22 = vpop.f32.mrb[178].mxu0  ;;  %4724 = vmatprep.mubr.bf16.mxu1 %v15506_v33 }
 0x2c6   : > { %v11403_v55 = vpop.f32.mrb[179].mxu0 }
 0x2c7   : > { %v15754_v31 = vadd.f32 %v11403_v55, %v11402_v22 }
 0x2c8   : > { %4121 = vmatmul.mubr.bf16.gmra.mrb[28].mxu0 %v2949_v26 }
 0x2c9   : > { %5839 = vmatprep.mubr.bf16.mxu0 %v15756_v38 }
 0x2cb   : > { %v11405_v35 = vpop.f32.mrb[180].mxu0 }
 0x2cc   : > { %v11406_v1 = vpop.f32.mrb[181].mxu0  ;;  %4725 = vmatmul.mubr.bf16.gmra.mrb[160].mxu1 %v15523_v29  ;;  %v13952_v29 = vld [vmem:[%s18013_s5 + $0x40] sm:$0xff]  }
 0x2cd   : > { %v15759_v54 = vadd.f32 %v11406_v1, %v11405_v35  ;;  %v11408_v52 = vpop.f32.mrb[182].mxu0  ;;  %4732 = vmatprep.mubr.bf16.mxu1 %v15525_v36  ;;  %v13953_v36 = vld [vmem:[%s18013_s5] sm:$0xff]   ;;  %11767 = vmatprep.subr.bf16.mxu0 %v13952_v29 }
 0x2ce   : > { %v11409_v48 = vpop.f32.mrb[183].mxu0  ;;  %11768 = vmatpush3.bf16.msra.mxu0 %v13953_v36 }
 0x2cf   : > { %v15763_v60 = vadd.f32 %v11409_v48, %v11408_v52  ;;  %v2928_v48 = vld [vmem:[#allocation2 + $0x306] sm:$0xff] }
 0x2d3   : > { %v11411_v33 = vpop.f32.mrb[184].mxu0 }
 0x2d4   : > { %v11412_v56 = vpop.f32.mrb[185].mxu0  ;;  %4733 = vmatmul.mubr.bf16.gmra.mrb[164].mxu1 %v15542_v42 }
 0x2d5   : > { %v15765_v57 = vadd.f32 %v11412_v56, %v11411_v33  ;;  %v11414_v61 = vpop.f32.mrb[186].mxu0  ;;  %4740 = vmatprep.mubr.bf16.mxu1 %v15544_v19  ;;  %v2929_v33 = vld [vmem:[#allocation2 + $0x30e] sm:$0xff] }
 0x2d6   : > { %v11415_v12 = vpop.f32.mrb[187].mxu0 }
 0x2d7   : > { %v15769_v2 = vadd.f32 %v11415_v12, %v11414_v61  ;;  %v2950_v61 = vpack.c.bf16 %v2929_v33, %v2928_v48 }
 0x2db   : > { %v11417_v41 = vpop.f32.mrb[188].mxu0 }
 0x2dc   : > { %v11418_v32 = vpop.f32.mrb[189].mxu0  ;;  %4741 = vmatmul.mubr.bf16.gmra.mrb[168].mxu1 %v15561_v21  ;;  %v13954_v21 = vld [vmem:[%s18013_s5 + $0x48] sm:$0xff]  }
 0x2dd   : > { %v15777_v14 = vadd.f32 %v11418_v32, %v11417_v41  ;;  %v11420_v42 = vpop.f32.mrb[190].mxu0  ;;  %4748 = vmatprep.mubr.bf16.mxu1 %v15563_v37  ;;  %v13955_v37 = vld [vmem:[%s18013_s5 + $0x8] sm:$0xff]   ;;  %11769 = vmatprep.subr.bf16.mxu0 %v13954_v21 }
 0x2de   : > { %v11421_v19 = vpop.f32.mrb[191].mxu0  ;;  %11770 = vmatpush3.bf16.msra.mxu0 %v13955_v37  ;;  %v2930_v32 = vld [vmem:[#allocation2 + $0x326] sm:$0xff] }
 0x2df   : > { %v15781_v10 = vadd.f32 %v11421_v19, %v11420_v42  ;;  %v2931_v42 = vld [vmem:[#allocation2 + $0x32e] sm:$0xff] }
 0x2e3   : > { %v11423_v15 = vpop.f32.mrb[192].mxu0 }
 0x2e4   : > { %v11424_v40 = vpop.f32.mrb[193].mxu0  ;;  %4749 = vmatmul.mubr.bf16.gmra.mrb[172].mxu1 %v15580_v17 }
 0x2e5   : > { %v15783_v6 = vadd.f32 %v11424_v40, %v11423_v15  ;;  %v11426_v7 = vpop.f32.mrb[194].mxu0  ;;  %4756 = vmatprep.mubr.bf16.mxu1 %v15582_v23  ;;  %v2951_v15 = vpack.c.bf16 %v2931_v42, %v2930_v32 }
 0x2e6   : > { %v11427_v34 = vpop.f32.mrb[195].mxu0 }
 0x2e7   : > { %v15787_v63 = vadd.f32 %v11427_v34, %v11426_v7 }
 0x2eb   : > { %v11429_v20 = vpop.f32.mrb[196].mxu0 }
 0x2ec   : > { %v11430_v45 = vpop.f32.mrb[197].mxu0  ;;  %4757 = vmatmul.mubr.bf16.gmra.mrb[176].mxu1 %v15743_v9  ;;  %v13957_v9 = vld [vmem:[%s18013_s5 + $0x10] sm:$0xff]  }
 0x2ed   : > { %v15795_v22 = vadd.f32 %v11430_v45, %v11429_v20  ;;  %v11432_v17 = vpop.f32.mrb[198].mxu0  ;;  %4764 = vmatprep.mubr.bf16.mxu1 %v15606_v43  ;;  %v13956_v43 = vld [vmem:[%s18013_s5 + $0x50] sm:$0xff]   ;;  %v13958_v45 = vld [vmem:[%s18013_s5 + $0x58] sm:$0xff]  }
 0x2ee   : > { %v11433_v23 = vpop.f32.mrb[199].mxu0  ;;  %11771 = vmatprep.subr.bf16.mxu0 %v13956_v43 }
 0x2ef   : > { %v15799_v62 = vadd.f32 %v11433_v23, %v11432_v17  ;;  %11772 = vmatpush3.bf16.msra.mxu0 %v13957_v9  ;;  %v13959_v17 = vld [vmem:[%s18013_s5 + $0x18] sm:$0xff]  }
 0x2f0   : > { %11773 = vmatprep.subr.bf16.mxu0 %v13958_v45 }
 0x2f3   : > { %v11435_v55 = vpop.f32.mrb[200].mxu0  ;;  %11774 = vmatpush3.bf16.msra.mxu0 %v13959_v17 }
 0x2f4   : > { %v11436_v25 = vpop.f32.mrb[201].mxu0  ;;  %4765 = vmatmul.mubr.bf16.gmra.mrb[180].mxu1 %v2949_v26 }
 0x2f5   : > { %v15801_v35 = vadd.f32 %v11436_v25, %v11435_v55  ;;  %v11438_v1 = vpop.f32.mrb[202].mxu0  ;;  %4772 = vmatprep.mubr.bf16.mxu1 %v15756_v38 }
 0x2f6   : > { %v11439_v52 = vpop.f32.mrb[203].mxu0 }
 0x2f7   : > { %v15804_v56 = vadd.f32 %v11439_v52, %v11438_v1 }
 0x2fb   : > { %v11441_v12 = vpop.f32.mrb[204].mxu0 }
 0x2fc   : > { %v11442_v29 = vpop.f32.mrb[205].mxu0  ;;  %4773 = vmatmul.mubr.bf16.gmra.mrb[184].mxu1 %v2950_v61 }
 0x2fd   : > { %v15812_v26 = vadd.f32 %v11442_v29, %v11441_v12  ;;  %v11444_v36 = vpop.f32.mrb[206].mxu0  ;;  %4780 = vmatprep.mubr.bf16.mxu1 %v15756_v38 }
 0x2fe   : > { %v11445_v41 = vpop.f32.mrb[207].mxu0 }
 0x2ff   : > { %v15815_v19 = vadd.f32 %v11445_v41, %v11444_v36 }
 0x303   : > { %v11447_v40 = vpop.f32.mrb[208].mxu0 }
 0x304   : > { %v11448_v7 = vpop.f32.mrb[209].mxu0  ;;  %4781 = vmatmul.mubr.bf16.gmra.mrb[188].mxu1 %v2951_v15 }
 0x305   : > { %v15817_v34 = vadd.f32 %v11448_v7, %v11447_v40  ;;  %v11450_v21 = vpop.f32.mrb[210].mxu0  ;;  %12839 = vmatprep.mubr.bf16.mxu1 %v15337_v58  ;;  %v13962_v40 = vld [vmem:[%s18013_s5 + $0x68] sm:$0xff]  }
 0x306   : > { %v11451_v37 = vpop.f32.mrb[211].mxu0  ;;  %v13963_v7 = vld [vmem:[%s18013_s5 + $0x28] sm:$0xff]  }
 0x307   : > { %v15820_v20 = vadd.f32 %v11451_v37, %v11450_v21 }
 0x30b   : > { %v11453_v23 = vpop.f32.mrb[212].mxu0 }
 0x30c   : > { %v11454_v55 = vpop.f32.mrb[213].mxu0  ;;  %12840 = vmatmul.mubr.bf16.vlgmr.msra.gmra.mrb[96].mxu1 %v15364_v13  ;;  %v13960_v13 = vld [vmem:[%s18013_s5 + $0x60] sm:$0xff]  }
 0x30d   : > { %v15828_v25 = vadd.f32 %v11454_v55, %v11453_v23  ;;  %v11456_v1 = vpop.f32.mrb[214].mxu0  ;;  %12843 = vmatprep.mubr.bf16.mxu1 %v15391_v50  ;;  %v13961_v50 = vld [vmem:[%s18013_s5 + $0x20] sm:$0xff]   ;;  %11775 = vmatprep.subr.bf16.mxu0 %v13960_v13 }
 0x30e   : > { %v11457_v58 = vpop.f32.mrb[215].mxu0  ;;  %11776 = vmatpush3.bf16.msra.mxu0 %v13961_v50  ;;  %v3090_v50 = vld [vmem:[#allocation2 + $0x312] sm:$0xff] }
 0x30f   : > { %v15832_v52 = vadd.f32 %v11457_v58, %v11456_v1  ;;  %11777 = vmatprep.subr.bf16.mxu0 %v13962_v40 }
 0x312   : > { %11778 = vmatpush3.bf16.msra.mxu0 %v13963_v7  ;;  %v3092_v7 = vld [vmem:[#allocation2 + $0x332] sm:$0xff] }
 0x313   : > { %v11459_v48 = vpop.f32.mrb[216].mxu0 }
 0x314   : > { %v11460_v33 = vpop.f32.mrb[217].mxu0  ;;  %12844 = vmatmul.mubr.bf16.gmra.mrb[100].mxu1 %v15418_v44 }
 0x315   : > { %v15834_v61 = vadd.f32 %v11460_v33, %v11459_v48  ;;  %v11462_v43 = vpop.f32.mrb[218].mxu0  ;;  %12847 = vmatprep.mubr.bf16.mxu1 %v15445_v49 }
 0x316   : > { %v11463_v9 = vpop.f32.mrb[219].mxu0 }
 0x317   : > { %v15838_v12 = vadd.f32 %v11463_v9, %v11462_v43 }
 0x31b   : > { %v11465_v29 = vpop.f32.mrb[220].mxu0 }
 0x31c   : > { %v11466_v36 = vpop.f32.mrb[221].mxu0  ;;  %12848 = vmatmul.mubr.bf16.gmra.mrb[104].mxu1 %v15464_v3 }
 0x31d   : > { %v15846_v41 = vadd.f32 %v11466_v36, %v11465_v29  ;;  %v11468_v44 = vpop.f32.mrb[222].mxu0  ;;  %12851 = vmatprep.mubr.bf16.mxu1 %v15483_v24 }
 0x31e   : > { %v11469_v49 = vpop.f32.mrb[223].mxu0 }
 0x31f   : > { %v15850_v32 = vadd.f32 %v11469_v49, %v11468_v44 }
 0x323   : > { %v11511_v42 = vpop.f32.mrb[224].mxu0 }
 0x324   : > { %v11512_v15 = vpop.f32.mrb[225].mxu0  ;;  %12852 = vmatmul.mubr.bf16.gmra.mrb[108].mxu1 %v15502_v51 }
 0x325   : > { %v11513_v21 = vadd.f32 %v11512_v15, %v11511_v42  ;;  %v11514_v37 = vpop.f32.mrb[226].mxu0  ;;  %12855 = vmatprep.mubr.bf16.mxu1 %v15521_v39 }
 0x326   : > { %v11515_v3 = vpop.f32.mrb[227].mxu0 }
 0x327   : > { %v11516_v24 = vadd.f32 %v11515_v3, %v11514_v37  ;;  %v15861_v45 = vadd.f32 %v11513_v21, %v15592_v53 }
 0x329   : > { %v15864_v17 = vadd.f32 %v11516_v24, %v15597_v59  ;;  %v13964_v59 = vld [vmem:[%s18013_s5 + $0x70] sm:$0xff]  }
 0x32a   : > { %11779 = vmatprep.subr.bf16.mxu0 %v13964_v59 }
 0x32b   : > { %v11517_v23 = vpop.f32.mrb[228].mxu0 }
 0x32c   : > { %v11518_v55 = vpop.f32.mrb[229].mxu0  ;;  %12856 = vmatmul.mubr.bf16.gmra.mrb[112].mxu1 %v15540_v28  ;;  %v13965_v28 = vld [vmem:[%s18013_s5 + $0x30] sm:$0xff]  }
 0x32d   : > { %v11519_v1 = vadd.f32 %v11518_v55, %v11517_v23  ;;  %v11520_v58 = vpop.f32.mrb[230].mxu0  ;;  %12859 = vmatprep.mubr.bf16.mxu1 %v15559_v8  ;;  %11780 = vmatpush3.bf16.msra.mxu0 %v13965_v28  ;;  %v13966_v23 = vld [vmem:[%s18013_s5 + $0x78] sm:$0xff]  }
 0x32e   : > { %v11521_v48 = vpop.f32.mrb[231].mxu0  ;;  %11781 = vmatprep.subr.bf16.mxu0 %v13966_v23  ;;  %v13973_v23 = vld [vmem:[%s18013_s5 + $0x110] sm:$0xff]  }
 0x32f   : > { %v11522_v51 = vadd.f32 %v11521_v48, %v11520_v58  ;;  %v15869_v39 = vadd.f32 %v11519_v1, %v15617_v46 }
 0x331   : > { %v15872_v33 = vadd.f32 %v11522_v51, %v15621_v16  ;;  %v3089_v16 = vld [vmem:[#allocation2 + $0x30a] sm:$0xff] }
 0x332   : > { %v3111_v44 = vpack.c.bf16 %v3090_v50, %v3089_v16  ;;  %v5278_v50 = vld [vmem:[#allocation2 + $0x84] sm:$0xff] }
 0x333   : > { %v11523_v53 = vpop.f32.mrb[232].mxu0 }
 0x334   : > { %v11524_v43 = vpop.f32.mrb[233].mxu0  ;;  %12860 = vmatmul.mubr.bf16.gmra.mrb[116].mxu1 %v15578_v0 }
 0x335   : > { %v11525_v9 = vadd.f32 %v11524_v43, %v11523_v53  ;;  %v11526_v13 = vpop.f32.mrb[234].mxu0  ;;  %12863 = vmatprep.mubr.bf16.mxu1 %v15679_v11  ;;  %v3091_v11 = vld [vmem:[#allocation2 + $0x32a] sm:$0xff] }
 0x336   : > { %v11527_v8 = vpop.f32.mrb[235].mxu0 }
 0x337   : > { %v11528_v46 = vadd.f32 %v11527_v8, %v11526_v13  ;;  %v15883_v29 = vadd.f32 %v11525_v9, %v15732_v30  ;;  %v3112_v30 = vpack.c.bf16 %v3092_v7, %v3091_v11  ;;  %v13971_v7 = vld [vmem:[%s18013_s5 + $0x108] sm:$0xff]  }
 0x339   : > { %v15886_v36 = vadd.f32 %v11528_v46, %v15736_v47 }
 0x33b   : > { %v11529_v49 = vpop.f32.mrb[236].mxu0 }
 0x33c   : > { %v11530_v42 = vpop.f32.mrb[237].mxu0  ;;  %12864 = vmatmul.mubr.bf16.gmra.mrb[120].mxu1 %v15685_v18  ;;  %v13967_v18 = vld [vmem:[%s18013_s5 + $0x38] sm:$0xff]  }
 0x33d   : > { %v11531_v15 = vadd.f32 %v11530_v42, %v11529_v49  ;;  %v11532_v40 = vpop.f32.mrb[238].mxu0  ;;  %12867 = vmatprep.mubr.bf16.mxu1 %v3111_v44  ;;  %11782 = vmatpush3.bf16.msra.mxu0 %v13967_v18 }
 0x33e   : > { %v11533_v0 = vpop.f32.mrb[239].mxu0 }
 0x33f   : > { %v11534_v21 = vadd.f32 %v11533_v0, %v11532_v40  ;;  %v15890_v37 = vadd.f32 %v11531_v15, %v15740_v5  ;;  %v13969_v15 = vld [vmem:[%s18013_s5 + $0x100] sm:$0xff]  }
 0x340   : > { %11903 = vmatprep.subr.bf16.mxu1 %v13969_v15  ;;  %v5283_v15 = vld [vmem:[#allocation2 + $0xcc] sm:$0xff] }
 0x341   : > { %v15893_v3 = vadd.f32 %v11534_v21, %v15746_v4  ;;  %v13972_v21 = vld [vmem:[%s18013_s5 + $0xc8] sm:$0xff]  }
 0x343   : > { %v11535_v47 = vpop.f32.mrb[240].mxu0 }
 0x344   : > { %v11536_v24 = vpop.f32.mrb[241].mxu0  ;;  %12868 = vmatmul.mubr.bf16.gmra.mrb[124].mxu1 %v3112_v30 }
 0x345   : > { %v11537_v55 = vadd.f32 %v11536_v24, %v11535_v47  ;;  %v11538_v1 = vpop.f32.mrb[242].mxu0  ;;  %v5281_v24 = vld [vmem:[#allocation2 + $0xac] sm:$0xff] }
 0x346   : > { %v11539_v58 = vpop.f32.mrb[243].mxu0 }
 0x347   : > { %v11540_v5 = vadd.f32 %v11539_v58, %v11538_v1  ;;  %v15902_v4 = vadd.f32 %v11537_v55, %v15750_v27  ;;  %v5279_v27 = vld [vmem:[#allocation2 + $0x8c] sm:$0xff] }
 0x348   : > { %v5326_v42 = vpack.c.bf16 %v5279_v27, %v5278_v50  ;;  %v13974_v1 = vld [vmem:[%s18013_s5 + $0xd0] sm:$0xff]  }
 0x349   : > { %v15905_v48 = vadd.f32 %v11540_v5, %v15754_v31  ;;  %v13968_v31 = vld [vmem:[%s18013_s5 + $0x80] sm:$0xff]  }
 0x34a   : > { %12871 = vmatprep.subr.bf16.mxu0 %v13968_v31  ;;  %5840 = vmatmul.mubr.bf16.vlgmr.msra.gmra.mrb[32].mxu0 %v5326_v42  ;;  %v5282_v42 = vld [vmem:[#allocation2 + $0xc4] sm:$0xff] }
 0x34b   : > { %v11541_v51 = vpop.f32.mrb[244].mxu0  ;;  %12872 = vmatpush3.bf16.msra.mxu0 %v13968_v31  ;;  %5847 = vmatprep.mubr.bf16.mxu0 %v15756_v38 }
 0x34c   : > { %v11542_v53 = vpop.f32.mrb[245].mxu0 }
 0x34d   : > { %v11543_v43 = vadd.f32 %v11542_v53, %v11541_v51  ;;  %v11544_v59 = vpop.f32.mrb[246].mxu0 }
 0x34e   : > { %v11545_v28 = vpop.f32.mrb[247].mxu0 }
 0x34f   : > { %v11546_v9 = vadd.f32 %v11545_v28, %v11544_v59  ;;  %v15908_v13 = vadd.f32 %v11543_v43, %v15759_v54  ;;  %v13970_v54 = vld [vmem:[%s18013_s5 + $0xc0] sm:$0xff]  }
 0x350   : > { %11904 = vmatpush3.bf16.msra.mxu1 %v13970_v54 }
 0x351   : > { %v15911_v8 = vadd.f32 %v11546_v9, %v15763_v60  ;;  %11905 = vmatprep.subr.bf16.mxu1 %v13971_v7 }
 0x353   : > { %v11547_v46 = vpop.f32.mrb[248].mxu0 }
 0x354   : > { %v11548_v16 = vpop.f32.mrb[249].mxu0  ;;  %11906 = vmatpush3.bf16.msra.mxu1 %v13972_v21 }
 0x355   : > { %v11549_v44 = vadd.f32 %v11548_v16, %v11547_v46  ;;  %v11550_v49 = vpop.f32.mrb[250].mxu0  ;;  %11907 = vmatprep.subr.bf16.mxu1 %v13973_v23 }
 0x356   : > { %v11551_v60 = vpop.f32.mrb[251].mxu0 }
 0x357   : > { %v11552_v40 = vadd.f32 %v11551_v60, %v11550_v49  ;;  %v15923_v0 = vadd.f32 %v11549_v44, %v15765_v57  ;;  %v5280_v57 = vld [vmem:[#allocation2 + $0xa4] sm:$0xff]  ;;  %v13975_v49 = vld [vmem:[%s18013_s5 + $0x118] sm:$0xff]  }
 0x358   : > { %v5327_v55 = vpack.c.bf16 %v5281_v24, %v5280_v57  ;;  %11908 = vmatpush3.bf16.msra.mxu1 %v13974_v1  ;;  %v13978_v57 = vld [vmem:[%s18013_s5 + $0x120] sm:$0xff]   ;;  %v13977_v1 = vld [vmem:[%s18013_s5 + $0x88] sm:$0xff]  }
 0x359   : > { %v15927_v11 = vadd.f32 %v11552_v40, %v15769_v2  ;;  %v5328_v40 = vpack.c.bf16 %v5283_v15, %v5282_v42  ;;  %11909 = vmatprep.subr.bf16.mxu1 %v13975_v49  ;;  %12873 = vmatprep.subr.bf16.mxu0 %v13977_v1 }
 0x35a   : > { %5848 = vmatmul.mubr.bf16.gmra.mrb[36].mxu0 %v5327_v55 }
 0x35b   : > { %v11553_v30 = vpop.f32.mrb[252].mxu0  ;;  %5855 = vmatprep.mubr.bf16.mxu0 %v15756_v38  ;;  %12874 = vmatpush3.bf16.msra.mxu0 %v13977_v1 }
 0x35c   : > { %v11554_v47 = vpop.f32.mrb[253].mxu0 }
 0x35d   : > { %v11555_v18 = vadd.f32 %v11554_v47, %v11553_v30  ;;  %v11556_v2 = vpop.f32.mrb[254].mxu0 }
 0x35e   : > { %v11557_v58 = vpop.f32.mrb[255].mxu0 }
 0x35f   : > { %v11558_v5 = vadd.f32 %v11557_v58, %v11556_v2  ;;  %v15942_v51 = vadd.f32 %v11555_v18, %v15777_v14  ;;  %v11647_v53 = vpop.f32.mrb[128].mxu1 }
 0x360   : > { %v11648_v43 = vpop.f32.mrb[129].mxu1 }
 0x361   : > { %v15946_v59 = vadd.f32 %v11558_v5, %v15781_v10  ;;  %v11649_v28 = vadd.f32 %v11648_v43, %v11647_v53  ;;  %v11650_v9 = vpop.f32.mrb[130].mxu1  ;;  %v13976_v10 = vld [vmem:[%s18013_s5 + $0xd8] sm:$0xff]   ;;  %v13980_v5 = vld [vmem:[%s18013_s5 + $0x128] sm:$0xff]  }
 0x362   : > { %v11651_v16 = vpop.f32.mrb[131].mxu1  ;;  %11910 = vmatpush3.bf16.msra.mxu1 %v13976_v10  ;;  %5856 = vmatmul.mubr.bf16.gmra.mrb[40].mxu0 %v5328_v40  ;;  %v5284_v53 = vld [vmem:[#allocation2 + $0xe4] sm:$0xff]  ;;  %v5285_v43 = vld [vmem:[#allocation2 + $0xec] sm:$0xff] }
 0x363   : > { %v11559_v46 = vpop.f32.mrb[0].mxu0  ;;  %v11652_v27 = vadd.f32 %v11651_v16, %v11650_v9  ;;  %v15949_v31 = vadd.f32 %v15861_v45, %v11649_v28  ;;  %5863 = vmatprep.mubr.bf16.mxu0 %v15756_v38  ;;  %11911 = vmatprep.subr.bf16.mxu1 %v13978_v57 }
 0x364   : > { %v11560_v50 = vpop.f32.mrb[1].mxu0 }
 0x365   : > { %v11561_v44 = vadd.f32 %v11560_v50, %v11559_v46  ;;  %v11562_v14 = vpop.f32.mrb[2].mxu0  ;;  %v15958_v60 = vadd.f32 %v15864_v17, %v11652_v27  ;;  %v5329_v46 = vpack.c.bf16 %v5285_v43, %v5284_v53 }
 0x366   : > { %v11563_v54 = vpop.f32.mrb[3].mxu0 }
 0x367   : > { %v15961_v45 = vadd.f32 %v11561_v44, %v15783_v6  ;;  %v11564_v7 = vadd.f32 %v11563_v54, %v11562_v14  ;;  %v11653_v21 = vpop.f32.mrb[132].mxu1  ;;  %v13979_v6 = vld [vmem:[%s18013_s5 + $0xe0] sm:$0xff]   ;;  %v13982_v14 = vld [vmem:[%s18013_s5 + $0x130] sm:$0xff]  }
 0x368   : > { %v11654_v47 = vpop.f32.mrb[133].mxu1  ;;  %11912 = vmatpush3.bf16.msra.mxu1 %v13979_v6 }
 0x369   : > { %v15964_v30 = vadd.f32 %v11564_v7, %v15787_v63  ;;  %v11655_v17 = vadd.f32 %v11654_v47, %v11653_v21  ;;  %v11656_v24 = vpop.f32.mrb[134].mxu1  ;;  %11913 = vmatprep.subr.bf16.mxu1 %v13980_v5  ;;  %v13984_v47 = vld [vmem:[%s18013_s5 + $0x138] sm:$0xff]  }
 0x36a   : > { %v11657_v18 = vpop.f32.mrb[135].mxu1  ;;  %5864 = vmatmul.mubr.bf16.gmra.mrb[44].mxu0 %v5329_v46 }
 0x36b   : > { %v11565_v23 = vpop.f32.mrb[4].mxu0  ;;  %v11658_v55 = vadd.f32 %v11657_v18, %v11656_v24  ;;  %v15974_v63 = vadd.f32 %v15869_v39, %v11655_v17  ;;  %v13981_v39 = vld [vmem:[%s18013_s5 + $0xe8] sm:$0xff]   ;;  %v13985_v24 = vld [vmem:[%s18013_s5 + $0xf8] sm:$0xff]  }
 0x36c   : > { %v11566_v2 = vpop.f32.mrb[5].mxu0  ;;  %11914 = vmatpush3.bf16.msra.mxu1 %v13981_v39 }
 0x36d   : > { %v11567_v38 = vadd.f32 %v11566_v2, %v11565_v23  ;;  %v11568_v58 = vpop.f32.mrb[6].mxu0  ;;  %v15983_v9 = vadd.f32 %v15872_v33, %v11658_v55  ;;  %11915 = vmatprep.subr.bf16.mxu1 %v13982_v14 }
 0x36e   : > { %v11569_v28 = vpop.f32.mrb[7].mxu0 }
 0x36f   : > { %v15989_v16 = vadd.f32 %v11567_v38, %v15795_v22  ;;  %v11570_v50 = vadd.f32 %v11569_v28, %v11568_v58  ;;  %v11659_v27 = vpop.f32.mrb[136].mxu1  ;;  %v13983_v22 = vld [vmem:[%s18013_s5 + $0xf0] sm:$0xff]  }
 0x370   : > { %v11660_v33 = vpop.f32.mrb[137].mxu1  ;;  %11916 = vmatpush3.bf16.msra.mxu1 %v13983_v22 }
 0x371   : > { %v15992_v44 = vadd.f32 %v11570_v50, %v15799_v62  ;;  %v11661_v49 = vadd.f32 %v11660_v33, %v11659_v27  ;;  %v11662_v42 = vpop.f32.mrb[138].mxu1  ;;  %11917 = vmatprep.subr.bf16.mxu1 %v13984_v47 }
 0x372   : > { %v11663_v54 = vpop.f32.mrb[139].mxu1 }
 0x373   : > { %v11571_v15 = vpop.f32.mrb[8].mxu0  ;;  %v11664_v40 = vadd.f32 %v11663_v54, %v11662_v42  ;;  %v16001_v7 = vadd.f32 %v15883_v29, %v11661_v49 }
 0x374   : > { %v11572_v10 = vpop.f32.mrb[9].mxu0  ;;  %11918 = vmatpush3.bf16.msra.mxu1 %v13985_v24 }
 0x375   : > { %v11573_v62 = vadd.f32 %v11572_v10, %v11571_v15  ;;  %v11574_v21 = vpop.f32.mrb[10].mxu0  ;;  %v16007_v17 = vadd.f32 %v15886_v36, %v11664_v40 }
 0x376   : > { %v11575_v57 = vpop.f32.mrb[11].mxu0 }
 0x377   : > { %v16013_v6 = vadd.f32 %v11573_v62, %v15801_v35  ;;  %v11576_v29 = vadd.f32 %v11575_v57, %v11574_v21  ;;  %v11665_v23 = vpop.f32.mrb[140].mxu1  ;;  %v13986_v35 = vld [vmem:[%s18013_s5 + $0x90] sm:$0xff]  }
 0x378   : > { %v11666_v2 = vpop.f32.mrb[141].mxu1  ;;  %12875 = vmatprep.subr.bf16.mxu0 %v13986_v35 }
 0x379   : > { %v16016_v18 = vadd.f32 %v11576_v29, %v15804_v56  ;;  %v11667_v55 = vadd.f32 %v11666_v2, %v11665_v23  ;;  %v11668_v1 = vpop.f32.mrb[142].mxu1  ;;  %12876 = vmatpush3.bf16.msra.mxu0 %v13986_v35 }
 0x37a   : > { %v11669_v36 = vpop.f32.mrb[143].mxu1 }
 0x37b   : > { %v11577_v38 = vpop.f32.mrb[12].mxu0  ;;  %v11670_v5 = vadd.f32 %v11669_v36, %v11668_v1  ;;  %v16019_v53 = vadd.f32 %v15890_v37, %v11667_v55 }
 0x37c   : > { %v11578_v58 = vpop.f32.mrb[13].mxu0 }
 0x37d   : > { %v11579_v43 = vadd.f32 %v11578_v58, %v11577_v38  ;;  %v11580_v28 = vpop.f32.mrb[14].mxu0  ;;  %v16025_v56 = vadd.f32 %v15893_v3, %v11670_v5 }
 0x37e   : > { %v11581_v39 = vpop.f32.mrb[15].mxu0 }
 0x37f   : > { %v16028_v46 = vadd.f32 %v11579_v43, %v15812_v26  ;;  %v11582_v50 = vadd.f32 %v11581_v39, %v11580_v28  ;;  %v11671_v27 = vpop.f32.mrb[144].mxu1 }
 0x380   : > { %v11672_v33 = vpop.f32.mrb[145].mxu1 }
 0x381   : > { %v16031_v37 = vadd.f32 %v11582_v50, %v15815_v19  ;;  %v11673_v14 = vadd.f32 %v11672_v33, %v11671_v27  ;;  %v11674_v49 = vpop.f32.mrb[146].mxu1 }
 0x382   : > { %v11675_v22 = vpop.f32.mrb[147].mxu1 }
 0x383   : > { %v11583_v42 = vpop.f32.mrb[16].mxu0  ;;  %v11676_v54 = vadd.f32 %v11675_v22, %v11674_v49  ;;  %v16034_v3 = vadd.f32 %v15902_v4, %v11673_v14 }
 0x384   : > { %v11584_v15 = vpop.f32.mrb[17].mxu0 }
 0x385   : > { %v11585_v10 = vadd.f32 %v11584_v15, %v11583_v42  ;;  %v11586_v40 = vpop.f32.mrb[18].mxu0  ;;  %v16037_v62 = vadd.f32 %v15905_v48, %v11676_v54 }
 0x386   : > { %v11587_v26 = vpop.f32.mrb[19].mxu0 }
 0x387   : > { %v16040_v21 = vadd.f32 %v11585_v10, %v15817_v34  ;;  %v11588_v19 = vadd.f32 %v11587_v26, %v11586_v40  ;;  %v11677_v47 = vpop.f32.mrb[148].mxu1  ;;  %v13987_v34 = vld [vmem:[%s18013_s5 + $0x98] sm:$0xff]  }
 0x388   : > { %v11678_v24 = vpop.f32.mrb[149].mxu1  ;;  %12877 = vmatprep.subr.bf16.mxu0 %v13987_v34 }
 0x389   : > { %v16043_v57 = vadd.f32 %v11588_v19, %v15820_v20  ;;  %v11679_v29 = vadd.f32 %v11678_v24, %v11677_v47  ;;  %v11680_v23 = vpop.f32.mrb[150].mxu1  ;;  %12878 = vmatpush3.bf16.msra.mxu0 %v13987_v34 }
 0x38a   : > { %v11681_v4 = vpop.f32.mrb[151].mxu1 }
 0x38b   : > { %v11589_v2 = vpop.f32.mrb[20].mxu0  ;;  %v11682_v1 = vadd.f32 %v11681_v4, %v11680_v23  ;;  %v16046_v38 = vadd.f32 %v15908_v13, %v11679_v29 }
 0x38c   : > { %v11590_v55 = vpop.f32.mrb[21].mxu0 }
 0x38d   : > { %v11591_v48 = vadd.f32 %v11590_v55, %v11589_v2  ;;  %v11592_v36 = vpop.f32.mrb[22].mxu0  ;;  %v16052_v20 = vadd.f32 %v15911_v8, %v11682_v1 }
 0x38e   : > { %v11593_v58 = vpop.f32.mrb[23].mxu0 }
 0x38f   : > { %v16055_v5 = vadd.f32 %v11591_v48, %v15828_v25  ;;  %v11594_v35 = vadd.f32 %v11593_v58, %v11592_v36  ;;  %v11683_v43 = vpop.f32.mrb[152].mxu1 }
 0x390   : > { %v11684_v28 = vpop.f32.mrb[153].mxu1 }
 0x391   : > { %v16058_v13 = vadd.f32 %v11594_v35, %v15832_v52  ;;  %v11685_v39 = vadd.f32 %v11684_v28, %v11683_v43  ;;  %v11686_v50 = vpop.f32.mrb[154].mxu1 }
 0x392   : > { %v11687_v33 = vpop.f32.mrb[155].mxu1 }
 0x393   : > { %v11595_v27 = vpop.f32.mrb[24].mxu0  ;;  %v11688_v49 = vadd.f32 %v11687_v33, %v11686_v50  ;;  %v16061_v8 = vadd.f32 %v15923_v0, %v11685_v39 }
 0x394   : > { %v11596_v14 = vpop.f32.mrb[25].mxu0 }
 0x395   : > { %v11597_v42 = vadd.f32 %v11596_v14, %v11595_v27  ;;  %v11598_v22 = vpop.f32.mrb[26].mxu0  ;;  %v16064_v15 = vadd.f32 %v15927_v11, %v11688_v49 }
 0x396   : > { %v11599_v25 = vpop.f32.mrb[27].mxu0 }
 0x397   : > { %v16067_v54 = vadd.f32 %v11597_v42, %v15834_v61  ;;  %v11600_v52 = vadd.f32 %v11599_v25, %v11598_v22  ;;  %v11689_v10 = vpop.f32.mrb[156].mxu1  ;;  %v13988_v61 = vld [vmem:[%s18013_s5 + $0xa0] sm:$0xff]  }
 0x398   : > { %v11690_v26 = vpop.f32.mrb[157].mxu1  ;;  %12879 = vmatprep.subr.bf16.mxu0 %v13988_v61 }
 0x399   : > { %v16070_v40 = vadd.f32 %v11600_v52, %v15838_v12  ;;  %v11691_v19 = vadd.f32 %v11690_v26, %v11689_v10  ;;  %v11692_v47 = vpop.f32.mrb[158].mxu1  ;;  %12880 = vmatpush3.bf16.msra.mxu0 %v13988_v61 }
 0x39a   : > { %v11693_v0 = vpop.f32.mrb[159].mxu1 }
 0x39b   : > { %v11601_v24 = vpop.f32.mrb[28].mxu0  ;;  %v11694_v23 = vadd.f32 %v11693_v0, %v11692_v47  ;;  %v16073_v2 = vadd.f32 %v15942_v51, %v11691_v19  ;;  %v13990_v47 = vld [vmem:[%s18013_s5 + $0xb0] sm:$0xff]  }
 0x39c   : > { %v11602_v29 = vpop.f32.mrb[29].mxu0 }
 0x39d   : > { %v11603_v11 = vadd.f32 %v11602_v29, %v11601_v24  ;;  %v11604_v4 = vpop.f32.mrb[30].mxu0  ;;  %v16079_v12 = vadd.f32 %v15946_v59, %v11694_v23  ;;  %v13989_v59 = vld [vmem:[%s18013_s5 + $0xa8] sm:$0xff]  }
 0x39e   : > { %v11605_v55 = vpop.f32.mrb[31].mxu0  ;;  %12881 = vmatprep.subr.bf16.mxu0 %v13989_v59 }
 0x39f   : > { %v16082_v1 = vadd.f32 %v11603_v11, %v15846_v41  ;;  %v11606_v34 = vadd.f32 %v11605_v55, %v11604_v4  ;;  %v11695_v48 = vpop.f32.mrb[160].mxu1  ;;  %12882 = vmatpush3.bf16.msra.mxu0 %v13989_v59 }
 0x3a0   : > { %v11696_v36 = vpop.f32.mrb[161].mxu1  ;;  %12883 = vmatprep.subr.bf16.mxu0 %v13990_v47 }
 0x3a1   : > { %v16085_v51 = vadd.f32 %v11606_v34, %v15850_v32  ;;  %v11697_v58 = vadd.f32 %v11696_v36, %v11695_v48  ;;  %v11698_v35 = vpop.f32.mrb[162].mxu1 }
 0x3a2   : > { %v11699_v43 = vpop.f32.mrb[163].mxu1 }
 0x3a3   : > { %v11700_v28 = vadd.f32 %v11699_v43, %v11698_v35  ;;  %v16088_v39 = vadd.f32 %v15961_v45, %v11697_v58  ;;  %12884 = vmatpush3.bf16.msra.mxu0 %v13990_v47  ;;  %v13991_v35 = vld [vmem:[%s18013_s5 + $0xb8] sm:$0xff]  }
 0x3a4   : > { %12885 = vmatprep.subr.bf16.mxu0 %v13991_v35 }
 0x3a5   : > { %v16094_v41 = vadd.f32 %v15964_v30, %v11700_v28 }
 0x3a7   : > { %v11701_v50 = vpop.f32.mrb[164].mxu1  ;;  %12886 = vmatpush3.bf16.msra.mxu0 %v13991_v35 }
 0x3a8   : > { %v11702_v32 = vpop.f32.mrb[165].mxu1 }
 0x3a9   : > { %v11703_v27 = vadd.f32 %v11702_v32, %v11701_v50  ;;  %v11704_v33 = vpop.f32.mrb[166].mxu1 }
 0x3aa   : > { %v11705_v14 = vpop.f32.mrb[167].mxu1 }
 0x3ab   : > { %v11706_v49 = vadd.f32 %v11705_v14, %v11704_v33  ;;  %v16097_v42 = vadd.f32 %v15989_v16, %v11703_v27 }
 0x3ad   : > { %v16100_v45 = vadd.f32 %v15992_v44, %v11706_v49 }
 0x3af   : > { %v11707_v22 = vpop.f32.mrb[168].mxu1 }
 0x3b0   : > { %v11708_v25 = vpop.f32.mrb[169].mxu1 }
 0x3b1   : > { %v11709_v52 = vadd.f32 %v11708_v25, %v11707_v22  ;;  %v11710_v10 = vpop.f32.mrb[170].mxu1 }
 0x3b2   : > { %v11711_v30 = vpop.f32.mrb[171].mxu1 }
 0x3b3   : > { %v11712_v26 = vadd.f32 %v11711_v30, %v11710_v10  ;;  %v16103_v19 = vadd.f32 %v16013_v6, %v11709_v52  ;;  %v16138_v10 = vld [vmem:[%s18013_s5 + $0x140] sm:$0xff]  }
 0x3b4   : > { %12919 = vmatprep.subr.bf16.mxu0 %v16138_v10 }
 0x3b5   : > { %v16109_v24 = vadd.f32 %v16016_v18, %v11712_v26 }
 0x3b7   : > { %v11713_v16 = vpop.f32.mrb[172].mxu1 }
 0x3b8   : > { %v11714_v44 = vpop.f32.mrb[173].mxu1 }
 0x3b9   : > { %v11715_v0 = vadd.f32 %v11714_v44, %v11713_v16  ;;  %v11716_v29 = vpop.f32.mrb[174].mxu1 }
 0x3ba   : > { %v11717_v23 = vpop.f32.mrb[175].mxu1 }
 0x3bb   : > { %v11718_v61 = vadd.f32 %v11717_v23, %v11716_v29  ;;  %v16112_v11 = vadd.f32 %v16028_v46, %v11715_v0 }
 0x3bd   : > { %v16115_v6 = vadd.f32 %v16031_v37, %v11718_v61 }
 0x3bf   : > { %v11719_v4 = vpop.f32.mrb[176].mxu1 }
 0x3c0   : > { %v11720_v55 = vpop.f32.mrb[177].mxu1 }
 0x3c1   : > { %v11721_v34 = vadd.f32 %v11720_v55, %v11719_v4  ;;  %v11722_v48 = vpop.f32.mrb[178].mxu1 }
 0x3c2   : > { %v11723_v18 = vpop.f32.mrb[179].mxu1 }
 0x3c3   : > { %v11724_v36 = vadd.f32 %v11723_v18, %v11722_v48  ;;  %v16118_v58 = vadd.f32 %v16040_v21, %v11721_v34 }
 0x3c5   : > { %v16124_v43 = vadd.f32 %v16043_v57, %v11724_v36 }
 0x3c7   : > { %v11725_v46 = vpop.f32.mrb[180].mxu1 }
 0x3c8   : > { %v11726_v37 = vpop.f32.mrb[181].mxu1 }
 0x3c9   : > { %v11727_v28 = vadd.f32 %v11726_v37, %v11725_v46  ;;  %v11728_v59 = vpop.f32.mrb[182].mxu1 }
 0x3ca   : > { %v11729_v50 = vpop.f32.mrb[183].mxu1 }
 0x3cb   : > { %v11730_v32 = vadd.f32 %v11729_v50, %v11728_v59  ;;  %v16127_v27 = vadd.f32 %v16055_v5, %v11727_v28  ;;  %v5149_v28 = vld [vmem:[%s14347_s21] sm:$0xff]  ;;  %v5152_v50 = vld [vmem:[%s14347_s21 + $0x18] sm:$0xff] }
 0x3cd   : > { %v16130_v21 = vadd.f32 %v16058_v13, %v11730_v32 }
 0x3cf   : > { %v11731_v33 = vpop.f32.mrb[184].mxu1 }
 0x3d0   : > { %v11732_v14 = vpop.f32.mrb[185].mxu1 }
 0x3d1   : > { %v11733_v49 = vadd.f32 %v11732_v14, %v11731_v33  ;;  %v11734_v22 = vpop.f32.mrb[186].mxu1  ;;  %v5150_v14 = vld [vmem:[%s14347_s21 + $0x8] sm:$0xff] }
 0x3d2   : > { %v11735_v57 = vpop.f32.mrb[187].mxu1 }
 0x3d3   : > { %v11736_v25 = vadd.f32 %v11735_v57, %v11734_v22  ;;  %v16133_v52 = vadd.f32 %v16067_v54, %v11733_v49 }
 0x3d5   : > { %v16141_v5 = vadd.f32 %v16070_v40, %v11736_v25  ;;  %v16153_v40 = vld [vmem:[%s18012_s4] ss:$0 sm:$0xff] }
 0x3d7   : > { %v11737_v13 = vpop.f32.mrb[188].mxu1 }
 0x3d8   : > { %v11738_v30 = vpop.f32.mrb[189].mxu1 }
 0x3d9   : > { %v11739_v26 = vadd.f32 %v11738_v30, %v11737_v13  ;;  %v11740_v47 = vpop.f32.mrb[190].mxu1 }
 0x3da   : > { %v11741_v16 = vpop.f32.mrb[191].mxu1 }
 0x3db   : > { %v11742_v44 = vadd.f32 %v11741_v16, %v11740_v47  ;;  %v16145_v54 = vadd.f32 %v16082_v1, %v11739_v26 }
 0x3dd   : > { %v16148_v0 = vadd.f32 %v16085_v51, %v11742_v44 }
 0x3df   : > { %v12841_v29 = vpop.f32.mrb[96].mxu1 }
 0x3e0   : > { %v13289_v23 = vadd.f32 %v15974_v63, %v12841_v29  ;;  %v4823_v61 = vpop.f32.mrb[97].mxu1  ;;  %v5151_v63 = vld [vmem:[%s14347_s21 + $0x10] sm:$0xff] }
 0x3e1   : > { %v13292_v4 = vadd.f32 %v15949_v31, %v4823_v61  ;;  %v12842_v55 = vpop.f32.mrb[98].mxu1  ;;  %v5155_v61 = vld [vmem:[%s14347_s21 + $0x30] sm:$0xff] }
 0x3e2   : > { %v5087_v34 = vadd.f32 %v13289_v23, %v16153_v40  ;;  %v13295_v1 = vadd.f32 %v15983_v9, %v12842_v55  ;;  %v4826_v51 = vpop.f32.mrb[99].mxu1 }
 0x3e3   : > { %v5085_v48 = vadd.f32 %v13292_v4, %v16153_v40  ;;  %v13298_v18 = vadd.f32 %v15958_v60, %v4826_v51 }
 0x3e4   : > { %v5119_v36 = vmax.f32 %v5087_v34, 0.0  ;;  %v5088_v35 = vadd.f32 %v13295_v1, %v16153_v40 }
 0x3e5   : > { %v5117_v46 = vmax.f32 %v5085_v48, 0.0  ;;  %v5086_v31 = vadd.f32 %v13298_v18, %v16153_v40  ;;  %v5156_v48 = vld [vmem:[%s14347_s21 + $0x38] sm:$0xff] }
 0x3e6   : > { %v5183_v37 = vadd.f32 %v5151_v63, %v5119_v36  ;;  %5247 = vst [vmem:[#allocation2 + $0x128] sm:$0xff] %v5119_v36  ;;  %v5120_v59 = vmax.f32 %v5088_v35, 0.0  ;;  %v5154_v35 = vld [vmem:[%s14347_s21 + $0x28] sm:$0xff] }
 0x3e7   : > { %v5181_v9 = vadd.f32 %v5149_v28, %v5117_v46  ;;  %5245 = vst [vmem:[#allocation2 + $0x108] sm:$0xff] %v5117_v46  ;;  %v5118_v32 = vmax.f32 %v5086_v31, 0.0  ;;  %v12845_v33 = vpop.f32.mrb[100].mxu1 }
 0x3e8   : > { %5215 = vst [vmem:[%s14347_s21 + $0x10] sm:$0xff] %v5183_v37  ;;  %v5184_v60 = vadd.f32 %v5152_v50, %v5120_v59  ;;  %5248 = vst [vmem:[#allocation2 + $0x130] sm:$0xff] %v5120_v59  ;;  %v13301_v49 = vadd.f32 %v16019_v53, %v12845_v33  ;;  %v4839_v22 = vpop.f32.mrb[101].mxu1  ;;  %v5428_v57 = vpack.c.bf16 %v5120_v59, %v5119_v36 }
 0x3e9   : > { %5213 = vst [vmem:[%s14347_s21] sm:$0xff] %v5181_v9  ;;  %v5182_v25 = vadd.f32 %v5150_v14, %v5118_v32  ;;  %5246 = vst [vmem:[#allocation2 + $0x110] sm:$0xff] %v5118_v32  ;;  %v13304_v13 = vadd.f32 %v16001_v7, %v4839_v22  ;;  %v12846_v30 = vpop.f32.mrb[102].mxu1  ;;  %v5427_v26 = vpack.c.bf16 %v5118_v32, %v5117_v46 }
 0x3ea   : > { %5216 = vst [vmem:[%s14347_s21 + $0x18] sm:$0xff] %v5184_v60  ;;  %v5091_v47 = vadd.f32 %v13301_v49, %v16153_v40  ;;  %v13307_v16 = vadd.f32 %v16025_v56, %v12846_v30  ;;  %v4842_v44 = vpop.f32.mrb[103].mxu1  ;;  %v5153_v56 = vld [vmem:[%s14347_s21 + $0x20] sm:$0xff] }
 0x3eb   : > { %5214 = vst [vmem:[%s14347_s21 + $0x8] sm:$0xff] %v5182_v25  ;;  %v5089_v53 = vadd.f32 %v13304_v13, %v16153_v40  ;;  %v13310_v29 = vadd.f32 %v16007_v17, %v4842_v44  ;;  %5871 = vmatprep.mubr.bf16.mxu0 %v5427_v26  ;;  %6434 = vmatprep.mubr.bf16.mxu1 %v5427_v26  ;;  %v5159_v13 = vld [vmem:[%s14347_s21 + $0x50] sm:$0xff] }
 0x3ec   : > { %v5123_v23 = vmax.f32 %v5091_v47, 0.0  ;;  %v5092_v7 = vadd.f32 %v13307_v16, %v16153_v40  ;;  %v5157_v47 = vld [vmem:[%s14347_s21 + $0x40] sm:$0xff] }
 0x3ed   : > { %v5121_v4 = vmax.f32 %v5089_v53, 0.0  ;;  %v5090_v55 = vadd.f32 %v13310_v29, %v16153_v40  ;;  %v5160_v53 = vld [vmem:[%s14347_s21 + $0x58] sm:$0xff] }
 0x3ee   : > { %v5187_v34 = vadd.f32 %v5155_v61, %v5123_v23  ;;  %5251 = vst [vmem:[#allocation2 + $0x168] sm:$0xff] %v5123_v23  ;;  %v5124_v1 = vmax.f32 %v5092_v7, 0.0  ;;  %v5286_v31 = vld [vmem:[#allocation2 + $0x104] sm:$0xff] }
 0x3ef   : > { %v5185_v51 = vadd.f32 %v5153_v56, %v5121_v4  ;;  %5249 = vst [vmem:[#allocation2 + $0x148] sm:$0xff] %v5121_v4  ;;  %v5122_v17 = vmax.f32 %v5090_v55, 0.0  ;;  %v12849_v18 = vpop.f32.mrb[104].mxu1  ;;  %v5158_v7 = vld [vmem:[%s14347_s21 + $0x48] sm:$0xff] }
 0x3f0   : > { %5219 = vst [vmem:[%s14347_s21 + $0x30] sm:$0xff] %v5187_v34  ;;  %v5188_v36 = vadd.f32 %v5156_v48, %v5124_v1  ;;  %5252 = vst [vmem:[#allocation2 + $0x170] sm:$0xff] %v5124_v1  ;;  %v13313_v63 = vadd.f32 %v16046_v38, %v12849_v18  ;;  %v4855_v46 = vpop.f32.mrb[105].mxu1  ;;  %v16185_v37 = vld [vmem:[#allocation2 + $0x10c] sm:$0xff]  ;;  %v16187_v28 = vpack.c.bf16 %v5124_v1, %v5123_v23  ;;  %v5288_v55 = vld [vmem:[#allocation2 + $0x124] sm:$0xff] }
 0x3f1   : > { %5217 = vst [vmem:[%s14347_s21 + $0x20] sm:$0xff] %v5185_v51  ;;  %v5186_v59 = vadd.f32 %v5154_v35, %v5122_v17  ;;  %5250 = vst [vmem:[#allocation2 + $0x150] sm:$0xff] %v5122_v17  ;;  %v13316_v9 = vadd.f32 %v16034_v3, %v4855_v46  ;;  %v12850_v50 = vpop.f32.mrb[106].mxu1  ;;  %v5330_v32 = vpack.c.bf16 %v16185_v37, %v5286_v31  ;;  %v5163_v31 = vld [vmem:[%s14347_s21 + $0x70] sm:$0xff] }
 0x3f2   : > { %v5429_v33 = vpack.c.bf16 %v5122_v17, %v5121_v4  ;;  %5220 = vst [vmem:[%s14347_s21 + $0x38] sm:$0xff] %v5188_v36  ;;  %v5095_v38 = vadd.f32 %v13313_v63, %v16153_v40  ;;  %v13319_v60 = vadd.f32 %v16052_v20, %v12850_v50  ;;  %v4858_v14 = vpop.f32.mrb[107].mxu1  ;;  %v5161_v50 = vld [vmem:[%s14347_s21 + $0x60] sm:$0xff] }
 0x3f3   : > { %5218 = vst [vmem:[%s14347_s21 + $0x28] sm:$0xff] %v5186_v59  ;;  %v5093_v49 = vadd.f32 %v13316_v9, %v16153_v40  ;;  %v13322_v22 = vadd.f32 %v16037_v62, %v4858_v14  ;;  %5872 = vmatmul.mubr.bf16.gmra.mrb[48].mxu0 %v5330_v32  ;;  %6435 = vmatmul.mubr.bf16.vlgmr.msra.gmra.mrb[192].mxu1 %v5330_v32  ;;  %v16202_v62 = vld [vmem:[#allocation2 + $0x12c] sm:$0xff] }
 0x3f4   : > { %v5127_v3 = vmax.f32 %v5095_v38, 0.0  ;;  %v5096_v25 = vadd.f32 %v13319_v60, %v16153_v40  ;;  %5879 = vmatprep.mubr.bf16.mxu0 %v5428_v57  ;;  %6442 = vmatprep.mubr.bf16.mxu1 %v5428_v57  ;;  %v5331_v48 = vpack.c.bf16 %v16202_v62, %v5288_v55  ;;  %v5164_v60 = vld [vmem:[%s14347_s21 + $0x78] sm:$0xff] }
 0x3f5   : > { %v5125_v30 = vmax.f32 %v5093_v49, 0.0  ;;  %v5094_v20 = vadd.f32 %v13322_v22, %v16153_v40  ;;  %v5162_v22 = vld [vmem:[%s14347_s21 + $0x68] sm:$0xff] }
 0x3f6   : > { %v5191_v26 = vadd.f32 %v5159_v13, %v5127_v3  ;;  %5255 = vst [vmem:[#allocation2 + $0x1a8] sm:$0xff] %v5127_v3  ;;  %v5128_v16 = vmax.f32 %v5096_v25, 0.0  ;;  %v5290_v13 = vld [vmem:[#allocation2 + $0x144] sm:$0xff] }
 0x3f7   : > { %v5189_v44 = vadd.f32 %v5157_v47, %v5125_v30  ;;  %5253 = vst [vmem:[#allocation2 + $0x188] sm:$0xff] %v5125_v30  ;;  %v5126_v29 = vmax.f32 %v5094_v20, 0.0  ;;  %v12853_v23 = vpop.f32.mrb[108].mxu1 }
 0x3f8   : > { %5223 = vst [vmem:[%s14347_s21 + $0x50] sm:$0xff] %v5191_v26  ;;  %v5192_v57 = vadd.f32 %v5160_v53, %v5128_v16  ;;  %5256 = vst [vmem:[#allocation2 + $0x1b0] sm:$0xff] %v5128_v16  ;;  %v13325_v61 = vadd.f32 %v16073_v2, %v12853_v23  ;;  %v4871_v4 = vpop.f32.mrb[109].mxu1  ;;  %v16208_v34 = vpack.c.bf16 %v5128_v16, %v5127_v3 }
 0x3f9   : > { %5221 = vst [vmem:[%s14347_s21 + $0x40] sm:$0xff] %v5189_v44  ;;  %v5190_v56 = vadd.f32 %v5158_v7, %v5126_v29  ;;  %5254 = vst [vmem:[#allocation2 + $0x190] sm:$0xff] %v5126_v29  ;;  %v13328_v1 = vadd.f32 %v16061_v8, %v4871_v4  ;;  %v12854_v51 = vpop.f32.mrb[110].mxu1  ;;  %v16213_v17 = vpack.c.bf16 %v5126_v29, %v5125_v30 }
 0x3fa   : > { %5224 = vst [vmem:[%s14347_s21 + $0x58] sm:$0xff] %v5192_v57  ;;  %v5099_v18 = vadd.f32 %v13325_v61, %v16153_v40  ;;  %v13331_v2 = vadd.f32 %v16079_v12, %v12854_v51  ;;  %v4874_v36 = vpop.f32.mrb[111].mxu1  ;;  %v5167_v61 = vld [vmem:[%s14347_s21 + $0x90] sm:$0xff] }
 0x3fb   : > { %5222 = vst [vmem:[%s14347_s21 + $0x48] sm:$0xff] %v5190_v56  ;;  %v5097_v35 = vadd.f32 %v13328_v1, %v16153_v40  ;;  %v13334_v63 = vadd.f32 %v16064_v15, %v4874_v36  ;;  %5880 = vmatmul.mubr.bf16.gmra.mrb[52].mxu0 %v5331_v48  ;;  %6443 = vmatmul.mubr.bf16.gmra.mrb[196].mxu1 %v5331_v48  ;;  %v16225_v15 = vld [vmem:[#allocation2 + $0x14c] sm:$0xff]  ;;  %v5165_v56 = vld [vmem:[%s14347_s21 + $0x80] sm:$0xff]  ;;  %v5168_v48 = vld [vmem:[%s14347_s21 + $0x98] sm:$0xff] }
 0x3fc   : > { %v5131_v8 = vmax.f32 %v5099_v18, 0.0  ;;  %v5100_v46 = vadd.f32 %v13331_v2, %v16153_v40  ;;  %5887 = vmatprep.mubr.bf16.mxu0 %v5429_v33  ;;  %6450 = vmatprep.mubr.bf16.mxu1 %v5429_v33  ;;  %v5332_v16 = vpack.c.bf16 %v16225_v15, %v5290_v13  ;;  %v16250_v1 = vld [vmem:[#allocation2 + $0x16c] sm:$0xff] }
 0x3fd   : > { %v5129_v59 = vmax.f32 %v5097_v35, 0.0  ;;  %v5098_v12 = vadd.f32 %v13334_v63, %v16153_v40  ;;  %v5166_v36 = vld [vmem:[%s14347_s21 + $0x88] sm:$0xff] }
 0x3fe   : > { %v5195_v9 = vadd.f32 %v5163_v31, %v5131_v8  ;;  %5259 = vst [vmem:[#allocation2 + $0x1e8] sm:$0xff] %v5131_v8  ;;  %v5132_v32 = vmax.f32 %v5100_v46, 0.0 }
 0x3ff   : > { %v5193_v38 = vadd.f32 %v5161_v50, %v5129_v59  ;;  %5257 = vst [vmem:[#allocation2 + $0x1c8] sm:$0xff] %v5129_v59  ;;  %v5130_v14 = vmax.f32 %v5098_v12, 0.0  ;;  %v12857_v49 = vpop.f32.mrb[112].mxu1 }
 0x400   : > { %5227 = vst [vmem:[%s14347_s21 + $0x70] sm:$0xff] %v5195_v9  ;;  %v5196_v33 = vadd.f32 %v5164_v60, %v5132_v32  ;;  %5260 = vst [vmem:[#allocation2 + $0x1f0] sm:$0xff] %v5132_v32  ;;  %v13337_v3 = vadd.f32 %v16097_v42, %v12857_v49  ;;  %v4887_v25 = vpop.f32.mrb[113].mxu1  ;;  %v16231_v30 = vpack.c.bf16 %v5132_v32, %v5131_v8  ;;  %v5292_v8 = vld [vmem:[#allocation2 + $0x164] sm:$0xff]  ;;  %v16275_v13 = vld [vmem:[#allocation2 + $0x18c] sm:$0xff] }
 0x401   : > { %5225 = vst [vmem:[%s14347_s21 + $0x60] sm:$0xff] %v5193_v38  ;;  %v5194_v20 = vadd.f32 %v5162_v22, %v5130_v14  ;;  %5258 = vst [vmem:[#allocation2 + $0x1d0] sm:$0xff] %v5130_v14  ;;  %v13340_v26 = vadd.f32 %v16088_v39, %v4887_v25  ;;  %v12858_v47 = vpop.f32.mrb[114].mxu1  ;;  %v16236_v44 = vpack.c.bf16 %v5130_v14, %v5129_v59  ;;  %v5169_v25 = vld [vmem:[%s14347_s21 + $0xa0] sm:$0xff] }
 0x402   : > { %5228 = vst [vmem:[%s14347_s21 + $0x78] sm:$0xff] %v5196_v33  ;;  %v5103_v53 = vadd.f32 %v13337_v3, %v16153_v40  ;;  %v13343_v42 = vadd.f32 %v16100_v45, %v12858_v47  ;;  %v4890_v29 = vpop.f32.mrb[115].mxu1  ;;  %v5333_v9 = vpack.c.bf16 %v16250_v1, %v5292_v8  ;;  %v5171_v33 = vld [vmem:[%s14347_s21 + $0xb0] sm:$0xff] }
 0x403   : > { %5226 = vst [vmem:[%s14347_s21 + $0x68] sm:$0xff] %v5194_v20  ;;  %v5101_v23 = vadd.f32 %v13340_v26, %v16153_v40  ;;  %v13346_v57 = vadd.f32 %v16094_v41, %v4890_v29  ;;  %5888 = vmatmul.mubr.bf16.gmra.mrb[56].mxu0 %v5332_v16  ;;  %6451 = vmatmul.mubr.bf16.gmra.mrb[200].mxu1 %v5332_v16  ;;  %v5172_v26 = vld [vmem:[%s14347_s21 + $0xb8] sm:$0xff] }
 0x404   : > { %v5135_v39 = vmax.f32 %v5103_v53, 0.0  ;;  %v5104_v7 = vadd.f32 %v13343_v42, %v16153_v40  ;;  %5895 = vmatprep.mubr.bf16.mxu0 %v16187_v28  ;;  %6458 = vmatprep.mubr.bf16.mxu1 %v16187_v28  ;;  %v5170_v42 = vld [vmem:[%s14347_s21 + $0xa8] sm:$0xff] }
 0x405   : > { %v5133_v45 = vmax.f32 %v5101_v23, 0.0  ;;  %v5102_v4 = vadd.f32 %v13346_v57, %v16153_v40  ;;  %v5294_v57 = vld [vmem:[#allocation2 + $0x184] sm:$0xff] }
 0x406   : > { %v5199_v55 = vadd.f32 %v5167_v61, %v5135_v39  ;;  %5263 = vst [vmem:[#allocation2 + $0x228] sm:$0xff] %v5135_v39  ;;  %v5136_v41 = vmax.f32 %v5104_v7, 0.0 }
 0x407   : > { %v5197_v51 = vadd.f32 %v5165_v56, %v5133_v45  ;;  %5261 = vst [vmem:[#allocation2 + $0x208] sm:$0xff] %v5133_v45  ;;  %v5134_v18 = vmax.f32 %v5102_v4, 0.0  ;;  %v12861_v2 = vpop.f32.mrb[116].mxu1  ;;  %v16286_v4 = vpack.c.bf16 %v16275_v13, %v5294_v57  ;;  %v5180_v57 = vld [vmem:[%s14347_s21 + $0xf8] sm:$0xff] }
 0x408   : > { %5231 = vst [vmem:[%s14347_s21 + $0x90] sm:$0xff] %v5199_v55  ;;  %v5200_v28 = vadd.f32 %v5168_v48, %v5136_v41  ;;  %5264 = vst [vmem:[#allocation2 + $0x230] sm:$0xff] %v5136_v41  ;;  %v13349_v35 = vadd.f32 %v16112_v11, %v12861_v2  ;;  %v4903_v63 = vpop.f32.mrb[117].mxu1  ;;  %v16256_v46 = vpack.c.bf16 %v5136_v41, %v5135_v39 }
 0x409   : > { %5229 = vst [vmem:[%s14347_s21 + $0x80] sm:$0xff] %v5197_v51  ;;  %v5198_v31 = vadd.f32 %v5166_v36, %v5134_v18  ;;  %5262 = vst [vmem:[#allocation2 + $0x210] sm:$0xff] %v5134_v18  ;;  %v13352_v59 = vadd.f32 %v16103_v19, %v4903_v63  ;;  %v12862_v12 = vpop.f32.mrb[118].mxu1  ;;  %v16261_v50 = vpack.c.bf16 %v5134_v18, %v5133_v45  ;;  %v16304_v63 = vld [vmem:[#allocation2 + $0x1ac] sm:$0xff] }
 0x40a   : > { %5232 = vst [vmem:[%s14347_s21 + $0x98] sm:$0xff] %v5200_v28  ;;  %v5107_v32 = vadd.f32 %v13349_v35, %v16153_v40  ;;  %v13355_v11 = vadd.f32 %v16115_v6, %v12862_v12  ;;  %v4906_v38 = vpop.f32.mrb[119].mxu1 }
 0x40b   : > { %5230 = vst [vmem:[%s14347_s21 + $0x88] sm:$0xff] %v5198_v31  ;;  %v5105_v60 = vadd.f32 %v13352_v59, %v16153_v40  ;;  %v13358_v14 = vadd.f32 %v16109_v24, %v4906_v38  ;;  %5896 = vmatmul.mubr.bf16.gmra.mrb[60].mxu0 %v5333_v9  ;;  %6459 = vmatmul.mubr.bf16.gmra.mrb[204].mxu1 %v5333_v9  ;;  %v5176_v31 = vld [vmem:[%s14347_s21 + $0xd8] sm:$0xff] }
 0x40c   : > { %v5139_v19 = vmax.f32 %v5107_v32, 0.0  ;;  %v5108_v49 = vadd.f32 %v13355_v11, %v16153_v40  ;;  %5903 = vmatprep.mubr.bf16.mxu0 %v16213_v17  ;;  %6466 = vmatprep.mubr.bf16.mxu1 %v16213_v17  ;;  %v5174_v32 = vld [vmem:[%s14347_s21 + $0xc8] sm:$0xff] }
 0x40d   : > { %v5137_v6 = vmax.f32 %v5105_v60, 0.0  ;;  %v5106_v22 = vadd.f32 %v13358_v14, %v16153_v40  ;;  %v5296_v60 = vld [vmem:[#allocation2 + $0x1a4] sm:$0xff] }
 0x40e   : > { %v5203_v3 = vadd.f32 %v5171_v33, %v5139_v19  ;;  %5267 = vst [vmem:[#allocation2 + $0x268] sm:$0xff] %v5139_v19  ;;  %v5140_v24 = vmax.f32 %v5108_v49, 0.0 }
 0x40f   : > { %v5201_v20 = vadd.f32 %v5169_v25, %v5137_v6  ;;  %5265 = vst [vmem:[#allocation2 + $0x248] sm:$0xff] %v5137_v6  ;;  %v5138_v47 = vmax.f32 %v5106_v22, 0.0  ;;  %v12865_v16 = vpop.f32.mrb[120].mxu1 }
 0x410   : > { %5235 = vst [vmem:[%s14347_s21 + $0xb0] sm:$0xff] %v5203_v3  ;;  %v5204_v53 = vadd.f32 %v5172_v26, %v5140_v24  ;;  %5268 = vst [vmem:[#allocation2 + $0x270] sm:$0xff] %v5140_v24  ;;  %v13361_v29 = vadd.f32 %v16127_v27, %v12865_v16  ;;  %v4919_v23 = vpop.f32.mrb[121].mxu1  ;;  %v16281_v39 = vpack.c.bf16 %v5140_v24, %v5139_v19 }
 0x411   : > { %5233 = vst [vmem:[%s14347_s21 + $0xa0] sm:$0xff] %v5201_v20  ;;  %v5202_v7 = vadd.f32 %v5170_v42, %v5138_v47  ;;  %5266 = vst [vmem:[#allocation2 + $0x250] sm:$0xff] %v5138_v47  ;;  %v13364_v61 = vadd.f32 %v16118_v58, %v4919_v23  ;;  %v12866_v45 = vpop.f32.mrb[122].mxu1  ;;  %v16288_v55 = vpack.c.bf16 %v5138_v47, %v5137_v6 }
 0x412   : > { %5236 = vst [vmem:[%s14347_s21 + $0xb8] sm:$0xff] %v5204_v53  ;;  %v5111_v56 = vadd.f32 %v13361_v29, %v16153_v40  ;;  %v13367_v27 = vadd.f32 %v16130_v21, %v12866_v45  ;;  %v4922_v41 = vpop.f32.mrb[123].mxu1  ;;  %v5175_v21 = vld [vmem:[%s14347_s21 + $0xd0] sm:$0xff]  ;;  %v16315_v6 = vpack.c.bf16 %v16304_v63, %v5296_v60  ;;  %v5177_v53 = vld [vmem:[%s14347_s21 + $0xe0] sm:$0xff]  ;;  %v5178_v45 = vld [vmem:[%s14347_s21 + $0xe8] sm:$0xff] }
 0x413   : > { %5234 = vst [vmem:[%s14347_s21 + $0xa8] sm:$0xff] %v5202_v7  ;;  %v5109_v51 = vadd.f32 %v13364_v61, %v16153_v40  ;;  %v13370_v48 = vadd.f32 %v16124_v43, %v4922_v41  ;;  %5904 = vmatmul.mubr.bf16.gmra.mrb[64].mxu0 %v16286_v4  ;;  %6467 = vmatmul.mubr.bf16.gmra.mrb[208].mxu1 %v16286_v4  ;;  %v5173_v43 = vld [vmem:[%s14347_s21 + $0xc0] sm:$0xff]  ;;  %v16333_v29 = vld [vmem:[#allocation2 + $0x1cc] sm:$0xff] }
 0x414   : > { %v5143_v58 = vmax.f32 %v5111_v56, 0.0  ;;  %v5112_v18 = vadd.f32 %v13367_v27, %v16153_v40  ;;  %5911 = vmatprep.mubr.bf16.mxu0 %v16208_v34  ;;  %6474 = vmatprep.mubr.bf16.mxu1 %v16208_v34  ;;  %v5298_v56 = vld [vmem:[#allocation2 + $0x1c4] sm:$0xff] }
 0x415   : > { %v5141_v2 = vmax.f32 %v5109_v51, 0.0  ;;  %v5110_v28 = vadd.f32 %v13370_v48, %v16153_v40  ;;  %v16342_v41 = vpack.c.bf16 %v16333_v29, %v5298_v56  ;;  %v16352_v48 = vld [vmem:[#allocation2 + $0x1ec] sm:$0xff]  ;;  %v5308_v56 = vld [vmem:[#allocation2 + $0x264] sm:$0xff] }
 0x416   : > { %v5207_v36 = vadd.f32 %v5175_v21, %v5143_v58  ;;  %5271 = vst [vmem:[#allocation2 + $0x2a8] sm:$0xff] %v5143_v58  ;;  %v5144_v35 = vmax.f32 %v5112_v18, 0.0 }
 0x417   : > { %v5205_v8 = vadd.f32 %v5173_v43, %v5141_v2  ;;  %5269 = vst [vmem:[#allocation2 + $0x288] sm:$0xff] %v5141_v2  ;;  %v5142_v59 = vmax.f32 %v5110_v28, 0.0  ;;  %v12869_v12 = vpop.f32.mrb[124].mxu1 }
 0x418   : > { %5239 = vst [vmem:[%s14347_s21 + $0xd0] sm:$0xff] %v5207_v36  ;;  %v5208_v9 = vadd.f32 %v5176_v31, %v5144_v35  ;;  %5272 = vst [vmem:[#allocation2 + $0x2b0] sm:$0xff] %v5144_v35  ;;  %v13373_v11 = vadd.f32 %v16145_v54, %v12869_v12  ;;  %v4935_v38 = vpop.f32.mrb[125].mxu1  ;;  %v16310_v14 = vpack.c.bf16 %v5144_v35, %v5143_v58  ;;  %v5300_v58 = vld [vmem:[#allocation2 + $0x1e4] sm:$0xff] }
 0x419   : > { %5237 = vst [vmem:[%s14347_s21 + $0xc0] sm:$0xff] %v5205_v8  ;;  %v5206_v19 = vadd.f32 %v5174_v32, %v5142_v59  ;;  %5270 = vst [vmem:[#allocation2 + $0x290] sm:$0xff] %v5142_v59  ;;  %v13376_v49 = vadd.f32 %v16133_v52, %v4935_v38  ;;  %v12870_v33 = vpop.f32.mrb[126].mxu1  ;;  %v16317_v22 = vpack.c.bf16 %v5142_v59, %v5141_v2  ;;  %v16365_v8 = vld [vmem:[#allocation2 + $0x20c] sm:$0xff]  ;;  %v5302_v31 = vld [vmem:[#allocation2 + $0x204] sm:$0xff] }
 0x41a   : > { %5240 = vst [vmem:[%s14347_s21 + $0xd8] sm:$0xff] %v5208_v9  ;;  %v5115_v3 = vadd.f32 %v13373_v11, %v16153_v40  ;;  %v13379_v54 = vadd.f32 %v16148_v0, %v12870_v33  ;;  %v4938_v25 = vpop.f32.mrb[127].mxu1  ;;  %v5179_v0 = vld [vmem:[%s14347_s21 + $0xf0] sm:$0xff]  ;;  %v16355_v18 = vpack.c.bf16 %v16352_v48, %v5300_v58  ;;  %v16368_v59 = vpack.c.bf16 %v16365_v8, %v5302_v31 }
 0x41b   : > { %5238 = vst [vmem:[%s14347_s21 + $0xc8] sm:$0xff] %v5206_v19  ;;  %v5113_v24 = vadd.f32 %v13376_v49, %v16153_v40  ;;  %v13382_v20 = vadd.f32 %v16141_v5, %v4938_v25  ;;  %5912 = vmatmul.mubr.bf16.gmra.mrb[68].mxu0 %v16315_v6  ;;  %6475 = vmatmul.mubr.bf16.gmra.mrb[212].mxu1 %v16315_v6  ;;  %v16378_v19 = vld [vmem:[#allocation2 + $0x22c] sm:$0xff]  ;;  %v5304_v49 = vld [vmem:[#allocation2 + $0x224] sm:$0xff] }
 0x41c   : > { %v5147_v52 = vmax.f32 %v5115_v3, 0.0  ;;  %v5116_v26 = vadd.f32 %v13379_v54, %v16153_v40  ;;  %5919 = vmatprep.mubr.bf16.mxu0 %v16236_v44  ;;  %6482 = vmatprep.mubr.bf16.mxu1 %v16236_v44  ;;  %v16381_v33 = vpack.c.bf16 %v16378_v19, %v5304_v49  ;;  %v13993_v49 = vld [vmem:[%s18013_s5 + $0x148] sm:$0xff]  }
 0x41d   : > { %v5145_v47 = vmax.f32 %v5113_v24, 0.0  ;;  %v5114_v16 = vadd.f32 %v13382_v20, %v16153_v40  ;;  %v11783_v21 = vpop.f32.mrb[32].mxu0 }
 0x41e   : > { %v5211_v5 = vadd.f32 %v5179_v0, %v5147_v52  ;;  %5275 = vst [vmem:[#allocation2 + $0x2e8] sm:$0xff] %v5147_v52  ;;  %v5148_v42 = vmax.f32 %v5116_v26, 0.0  ;;  %v11784_v2 = vpop.f32.mrb[33].mxu0  ;;  %v5306_v0 = vld [vmem:[#allocation2 + $0x244] sm:$0xff] }
 0x41f   : > { %v5209_v23 = vadd.f32 %v5177_v53, %v5145_v47  ;;  %5273 = vst [vmem:[#allocation2 + $0x2c8] sm:$0xff] %v5145_v47  ;;  %v5146_v7 = vmax.f32 %v5114_v16, 0.0  ;;  %v16359_v28 = vadd.f32 %v11784_v2, %v11783_v21  ;;  %v11786_v36 = vpop.f32.mrb[34].mxu0  ;;  %v5473_v21 = vld [vmem:[#allocation2 + $0xac] sm:$0xff]  ;;  %v5474_v2 = vld [vmem:[#allocation2 + $0xb4] sm:$0xff] }
 0x420   : > { %5243 = vst [vmem:[%s14347_s21 + $0xf0] sm:$0xff] %v5211_v5  ;;  %v5212_v61 = vadd.f32 %v5180_v57, %v5148_v42  ;;  %5276 = vst [vmem:[#allocation2 + $0x2f0] sm:$0xff] %v5148_v42  ;;  %v16338_v27 = vpack.c.bf16 %v5148_v42, %v5147_v52  ;;  %v11787_v43 = vpop.f32.mrb[35].mxu0  ;;  %v16389_v52 = vld [vmem:[#allocation2 + $0x24c] sm:$0xff]  ;;  %v5472_v57 = vld [vmem:[#allocation2 + $0x94] sm:$0xff]  ;;  %v5520_v31 = vpack.c.bf16 %v5474_v2, %v5473_v21 }
 0x421   : > { %5241 = vst [vmem:[%s14347_s21 + $0xe0] sm:$0xff] %v5209_v23  ;;  %v5210_v40 = vadd.f32 %v5178_v45, %v5146_v7  ;;  %5274 = vst [vmem:[#allocation2 + $0x2d0] sm:$0xff] %v5146_v7  ;;  %v16344_v51 = vpack.c.bf16 %v5146_v7, %v5145_v47  ;;  %v16363_v35 = vadd.f32 %v11787_v43, %v11786_v36  ;;  %v5471_v23 = vld [vmem:[#allocation2 + $0x8c] sm:$0xff]  ;;  %v5476_v43 = vld [vmem:[#allocation2 + $0xd4] sm:$0xff] }
 0x422   : > { %5244 = vst [vmem:[%s14347_s21 + $0xf8] sm:$0xff] %v5212_v61  ;;  %v16394_v47 = vpack.c.bf16 %v16389_v52, %v5306_v0  ;;  %v16402_v61 = vld [vmem:[#allocation2 + $0x26c] sm:$0xff] }
 0x423   : > { %5242 = vst [vmem:[%s14347_s21 + $0xe8] sm:$0xff] %v5210_v40  ;;  %5920 = vmatmul.mubr.bf16.gmra.mrb[72].mxu0 %v16342_v41  ;;  %6483 = vmatmul.mubr.bf16.gmra.mrb[216].mxu1 %v16342_v41  ;;  %v5519_v40 = vpack.c.bf16 %v5472_v57, %v5471_v23  ;;  %v16407_v58 = vpack.c.bf16 %v16402_v61, %v5308_v56  ;;  %v16412_v36 = vld [vmem:[#allocation2 + $0x28c] sm:$0xff]  ;;  %v13995_v23 = vld [vmem:[%s18013_s5 + $0x158] sm:$0xff]  }
 0x424   : > { %5927 = vmatprep.mubr.bf16.mxu0 %v16231_v30  ;;  %6490 = vmatprep.mubr.bf16.mxu1 %v16231_v30  ;;  %v5482_v57 = vld [vmem:[#allocation2 + $0x134] sm:$0xff] }
 0x425   : > { %v5484_v56 = vld [vmem:[#allocation2 + $0x154] sm:$0xff]  ;;  %v5524_v21 = vpack.c.bf16 %v5482_v57, %v16202_v62 }
 0x426   : > { %v5496_v57 = vld [vmem:[#allocation2 + $0x214] sm:$0xff] }
 0x427   : > { %v16455_v62 = vld [vmem:[#allocation2 + $0x2ec] sm:$0xff] }
 0x42b   : > { %5928 = vmatmul.mubr.bf16.gmra.mrb[76].mxu0 %v16355_v18  ;;  %6491 = vmatmul.mubr.bf16.gmra.mrb[220].mxu1 %v16355_v18 }
 0x42c   : > { %5935 = vmatprep.mubr.bf16.mxu0 %v16261_v50  ;;  %6498 = vmatprep.mubr.bf16.mxu1 %v16261_v50 }
 0x42d   : > { %v11789_v12 = vpop.f32.mrb[36].mxu0 }
 0x42e   : > { %v11790_v9 = vpop.f32.mrb[37].mxu0 }
 0x42f   : > { %v16372_v32 = vadd.f32 %v11790_v9, %v11789_v12  ;;  %v11792_v11 = vpop.f32.mrb[38].mxu0  ;;  %v5310_v12 = vld [vmem:[#allocation2 + $0x284] sm:$0xff] }
 0x430   : > { %v11793_v38 = vpop.f32.mrb[39].mxu0  ;;  %v16415_v9 = vpack.c.bf16 %v16412_v36, %v5310_v12  ;;  %v5486_v12 = vld [vmem:[#allocation2 + $0x174] sm:$0xff] }
 0x431   : > { %v16376_v60 = vadd.f32 %v11793_v38, %v11792_v11  ;;  %v14099_v11 = vld [vmem:[#allocation2 + $0xcc] sm:$0xff] }
 0x432   : > { %v5521_v38 = vpack.c.bf16 %v5476_v43, %v14099_v11  ;;  %v5525_v43 = vpack.c.bf16 %v5484_v56, %v16225_v15  ;;  %v13998_v15 = vld [vmem:[%s18013_s5 + $0x170] sm:$0xff]   ;;  %v16487_v56 = vpack.c.bf16 %v5496_v57, %v16365_v8  ;;  %v14101_v57 = vld [vmem:[#allocation2 + $0xe8] sm:$0xff] }
 0x433   : > { %5936 = vmatmul.mubr.bf16.gmra.mrb[80].mxu0 %v16368_v59  ;;  %6499 = vmatmul.mubr.bf16.gmra.mrb[224].mxu1 %v16368_v59  ;;  %v5488_v11 = vld [vmem:[#allocation2 + $0x194] sm:$0xff] }
 0x434   : > { %5943 = vmatprep.mubr.bf16.mxu0 %v16256_v46  ;;  %6506 = vmatprep.mubr.bf16.mxu1 %v16256_v46 }
 0x435   : > { %v11795_v3 = vpop.f32.mrb[40].mxu0 }
 0x436   : > { %v11796_v54 = vpop.f32.mrb[41].mxu0 }
 0x437   : > { %v16387_v25 = vadd.f32 %v11796_v54, %v11795_v3  ;;  %v11798_v24 = vpop.f32.mrb[42].mxu0  ;;  %v5478_v3 = vld [vmem:[#allocation2 + $0xf4] sm:$0xff] }
 0x438   : > { %v11799_v20 = vpop.f32.mrb[43].mxu0  ;;  %v13994_v54 = vld [vmem:[%s18013_s5 + $0x150] sm:$0xff]  }
 0x439   : > { %v16391_v26 = vadd.f32 %v11799_v20, %v11798_v24  ;;  %v16426_v24 = vld [vmem:[#allocation2 + $0x2ac] sm:$0xff] }
 0x43a   : > { %v14100_v20 = vld [vmem:[#allocation2 + $0xec] sm:$0xff] }
 0x43b   : > { %5944 = vmatmul.mubr.bf16.gmra.mrb[84].mxu0 %v16381_v33  ;;  %6507 = vmatmul.mubr.bf16.gmra.mrb[228].mxu1 %v16381_v33  ;;  %v5522_v0 = vpack.c.bf16 %v5478_v3, %v14100_v20  ;;  %v13999_v20 = vld [vmem:[%s18013_s5 + $0x178] sm:$0xff]  }
 0x43c   : > { %5951 = vmatprep.mubr.bf16.mxu0 %v16288_v55  ;;  %6514 = vmatprep.mubr.bf16.mxu1 %v16288_v55 }
 0x43d   : > { %v11801_v16 = vpop.f32.mrb[44].mxu0 }
 0x43e   : > { %v11802_v5 = vpop.f32.mrb[45].mxu0 }
 0x43f   : > { %v16400_v53 = vadd.f32 %v11802_v5, %v11801_v16  ;;  %v11804_v42 = vpop.f32.mrb[46].mxu0  ;;  %v5480_v16 = vld [vmem:[#allocation2 + $0x114] sm:$0xff]  ;;  %v5312_v5 = vld [vmem:[#allocation2 + $0x2a4] sm:$0xff] }
 0x440   : > { %v11805_v7 = vpop.f32.mrb[47].mxu0 }
 0x441   : > { %v16404_v45 = vadd.f32 %v11805_v7, %v11804_v42  ;;  %v16429_v42 = vpack.c.bf16 %v16426_v24, %v5312_v5  ;;  %v16440_v7 = vld [vmem:[#allocation2 + $0x2cc] sm:$0xff] }
 0x443   : > { %5952 = vmatmul.mubr.bf16.gmra.mrb[88].mxu0 %v16394_v47  ;;  %6515 = vmatmul.mubr.bf16.gmra.mrb[232].mxu1 %v16394_v47 }
 0x444   : > { %5959 = vmatprep.mubr.bf16.mxu0 %v16281_v39  ;;  %6522 = vmatprep.mubr.bf16.mxu1 %v16281_v39 }
 0x44b   : > { %5960 = vmatmul.mubr.bf16.gmra.mrb[92].mxu0 %v16407_v58  ;;  %6523 = vmatmul.mubr.bf16.gmra.mrb[236].mxu1 %v16407_v58 }
 0x44c   : > { %6530 = vmatprep.mubr.bf16.mxu1 %v16317_v22  ;;  %12887 = vmatprep.mubr.bf16.mxu0 %v5519_v40  ;;  %v5314_v40 = vld [vmem:[#allocation2 + $0x2c4] sm:$0xff] }
 0x44d   : > { %v16447_v2 = vpack.c.bf16 %v16440_v7, %v5314_v40 }
 0x453   : > { %12888 = vmatmul.mubr.bf16.vlgmr.msra.gmra.mrb[96].mxu0 %v5520_v31  ;;  %6531 = vmatmul.mubr.bf16.gmra.mrb[240].mxu1 %v16415_v9  ;;  %v13997_v31 = vld [vmem:[%s18013_s5 + $0x168] sm:$0xff]  }
 0x454   : > { %6538 = vmatprep.mubr.bf16.mxu1 %v16310_v14  ;;  %12920 = vmatpush3.bf16.msra.mxu0 %v16138_v10  ;;  %v16432_v10 = vpack.c.bf16 %v5480_v16, %v16185_v37  ;;  %v13996_v37 = vld [vmem:[%s18013_s5 + $0x160] sm:$0xff]   ;;  %v5492_v16 = vld [vmem:[#allocation2 + $0x1d4] sm:$0xff] }
 0x455   : > { %12891 = vmatprep.mubr.bf16.mxu0 %v5521_v38  ;;  %12921 = vmatprep.subr.bf16.mxu0 %v13993_v49  ;;  %v5316_v38 = vld [vmem:[#allocation2 + $0x2e4] sm:$0xff]  ;;  %v16479_v5 = vpack.c.bf16 %v5492_v16, %v16333_v29  ;;  %v5500_v29 = vld [vmem:[#allocation2 + $0x254] sm:$0xff] }
 0x456   : > { %v16462_v3 = vpack.c.bf16 %v16455_v62, %v5316_v38  ;;  %v14010_v38 = vld [vmem:[%s18013_s5 + $0x1e8] sm:$0xff]   ;;  %v14015_v16 = vld [vmem:[%s18013_s5 + $0x1b8] sm:$0xff]  }
 0x458   : > { %12922 = vmatpush3.bf16.msra.mxu0 %v13993_v49  ;;  %v5526_v49 = vpack.c.bf16 %v5486_v12, %v16250_v1  ;;  %v14000_v1 = vld [vmem:[%s18013_s5 + $0x1c0] sm:$0xff]   ;;  %v14005_v12 = vld [vmem:[%s18013_s5 + $0x190] sm:$0xff]  }
 0x459   : > { %12923 = vmatprep.subr.bf16.mxu0 %v13994_v54 }
 0x45b   : > { %12892 = vmatmul.mubr.bf16.gmra.mrb[100].mxu0 %v5522_v0  ;;  %6539 = vmatmul.mubr.bf16.gmra.mrb[244].mxu1 %v16429_v42  ;;  %v5490_v0 = vld [vmem:[#allocation2 + $0x1b4] sm:$0xff] }
 0x45c   : > { %12895 = vmatprep.mubr.bf16.mxu0 %v16432_v10  ;;  %6546 = vmatprep.mubr.bf16.mxu1 %v16344_v51 }
 0x45d   : > { %12924 = vmatpush3.bf16.msra.mxu0 %v13994_v54  ;;  %v16465_v54 = vpack.c.bf16 %v5488_v11, %v16275_v13  ;;  %v16476_v13 = vpack.c.bf16 %v5490_v0, %v16304_v63  ;;  %v5498_v63 = vld [vmem:[#allocation2 + $0x234] sm:$0xff]  ;;  %v14009_v11 = vld [vmem:[%s18013_s5 + $0x1a0] sm:$0xff]  }
 0x45e   : > { %12925 = vmatprep.subr.bf16.mxu0 %v13995_v23  ;;  %v16492_v40 = vpack.c.bf16 %v5498_v63, %v16378_v19  ;;  %v14001_v19 = vld [vmem:[%s18013_s5 + $0x180] sm:$0xff]   ;;  %v14013_v0 = vld [vmem:[%s18013_s5 + $0x1b0] sm:$0xff]   ;;  %v16559_v63 = vpack.c.bf16 %v14101_v57, %v14101_v57 }
 0x461   : > { %12926 = vmatpush3.bf16.msra.mxu0 %v13995_v23  ;;  %v5494_v23 = vld [vmem:[#allocation2 + $0x1f4] sm:$0xff] }
 0x462   : > { %12927 = vmatprep.subr.bf16.mxu0 %v13996_v37 }
 0x463   : > { %12896 = vmatmul.mubr.bf16.gmra.mrb[104].mxu0 %v5524_v21  ;;  %6547 = vmatmul.mubr.bf16.gmra.mrb[248].mxu1 %v16447_v2 }
 0x464   : > { %12899 = vmatprep.mubr.bf16.mxu0 %v5525_v43  ;;  %6554 = vmatprep.mubr.bf16.mxu1 %v16338_v27 }
 0x465   : > { %12928 = vmatpush3.bf16.msra.mxu0 %v13996_v37  ;;  %v16484_v37 = vpack.c.bf16 %v5494_v23, %v16352_v48  ;;  %v5502_v48 = vld [vmem:[#allocation2 + $0x274] sm:$0xff]  ;;  %v14016_v23 = vld [vmem:[%s18013_s5 + $0x200] sm:$0xff]  }
 0x466   : > { %12929 = vmatprep.subr.bf16.mxu0 %v13997_v31  ;;  %v16500_v8 = vpack.c.bf16 %v5502_v48, %v16402_v61  ;;  %v14003_v61 = vld [vmem:[%s18013_s5 + $0x188] sm:$0xff]  }
 0x469   : > { %12930 = vmatpush3.bf16.msra.mxu0 %v13997_v31  ;;  %v16495_v31 = vpack.c.bf16 %v5500_v29, %v16389_v52  ;;  %v14002_v52 = vld [vmem:[%s18013_s5 + $0x1c8] sm:$0xff]   ;;  %v5504_v29 = vld [vmem:[#allocation2 + $0x294] sm:$0xff] }
 0x46a   : > { %12931 = vmatprep.subr.bf16.mxu0 %v13998_v15  ;;  %v16563_v48 = vpack.c.bf16 %v5504_v29, %v16412_v36  ;;  %v5510_v36 = vld [vmem:[#allocation2 + $0x2f4] sm:$0xff] }
 0x46b   : > { %12900 = vmatmul.mubr.bf16.gmra.mrb[108].mxu0 %v5526_v49  ;;  %6555 = vmatmul.mubr.bf16.gmra.mrb[252].mxu1 %v16462_v3 }
 0x46c   : > { %12903 = vmatprep.mubr.bf16.mxu0 %v16465_v54  ;;  %8367 = vmatprep.mubr.bf16.mxu1 %v16559_v63 }
 0x46d   : > { %12932 = vmatpush3.bf16.msra.mxu0 %v13998_v15  ;;  %v14008_v15 = vld [vmem:[%s18013_s5 + $0x1e0] sm:$0xff]  }
 0x46e   : > { %12933 = vmatprep.subr.bf16.mxu0 %v13999_v20 }
 0x471   : > { %12934 = vmatpush3.bf16.msra.mxu0 %v13999_v20  ;;  %v14012_v20 = vld [vmem:[%s18013_s5 + $0x1f0] sm:$0xff]  }
 0x472   : > { %12039 = vmatprep.subr.bf16.mxu0 %v14000_v1  ;;  %v14014_v1 = vld [vmem:[%s18013_s5 + $0x1f8] sm:$0xff]  }
 0x473   : > { %12904 = vmatmul.mubr.bf16.gmra.mrb[112].mxu0 %v16476_v13 }
 0x474   : > { %12907 = vmatprep.mubr.bf16.mxu0 %v16479_v5 }
 0x47b   : > { %12908 = vmatmul.mubr.bf16.gmra.mrb[116].mxu0 %v16484_v37 }
 0x47c   : > { %12911 = vmatprep.mubr.bf16.mxu0 %v16487_v56 }
 0x483   : > { %12912 = vmatmul.mubr.bf16.gmra.mrb[120].mxu0 %v16492_v40 }
 0x484   : > { %12915 = vmatprep.mubr.bf16.mxu0 %v16495_v31 }
 0x48b   : > { %12916 = vmatmul.mubr.bf16.gmra.mrb[124].mxu0 %v16500_v8 }
 0x48c   : > { %12935 = vmatprep.mubr.bf16.mxu0 %v16432_v10  ;;  %v14004_v10 = vld [vmem:[%s18013_s5 + $0x1d0] sm:$0xff]  }
 0x493   : > { %12936 = vmatmul.mubr.bf16.vlgmr.msra.gmra.mrb[96].mxu0 %v5524_v21  ;;  %v14006_v21 = vld [vmem:[%s18013_s5 + $0x1d8] sm:$0xff]  }
 0x494   : > { %12939 = vmatprep.mubr.bf16.mxu0 %v5525_v43  ;;  %12040 = vmatpush3.bf16.msra.mxu0 %v14001_v19  ;;  %v14007_v43 = vld [vmem:[%s18013_s5 + $0x198] sm:$0xff]  }
 0x495   : > { %12041 = vmatprep.subr.bf16.mxu0 %v14002_v52  ;;  %v5506_v19 = vld [vmem:[#allocation2 + $0x2b4] sm:$0xff] }
 0x496   : > { %v5508_v52 = vld [vmem:[#allocation2 + $0x2d4] sm:$0xff] }
 0x498   : > { %12042 = vmatpush3.bf16.msra.mxu0 %v14003_v61  ;;  %v16568_v61 = vpack.c.bf16 %v5506_v19, %v16426_v24 }
 0x499   : > { %12043 = vmatprep.subr.bf16.mxu0 %v14004_v10  ;;  %v16571_v10 = vpack.c.bf16 %v5508_v52, %v16440_v7 }
 0x49b   : > { %12940 = vmatmul.mubr.bf16.gmra.mrb[100].mxu0 %v5526_v49  ;;  %v14011_v49 = vld [vmem:[%s18013_s5 + $0x1a8] sm:$0xff]  }
 0x49c   : > { %12943 = vmatprep.mubr.bf16.mxu0 %v16465_v54  ;;  %12044 = vmatpush3.bf16.msra.mxu0 %v14005_v12 }
 0x49d   : > { %12045 = vmatprep.subr.bf16.mxu0 %v14006_v21 }
 0x4a0   : > { %12046 = vmatpush3.bf16.msra.mxu0 %v14007_v43 }
 0x4a1   : > { %12047 = vmatprep.subr.bf16.mxu0 %v14008_v15 }
 0x4a3   : > { %12944 = vmatmul.mubr.bf16.gmra.mrb[104].mxu0 %v16476_v13 }
 0x4a4   : > { %12947 = vmatprep.mubr.bf16.mxu0 %v16479_v5  ;;  %12048 = vmatpush3.bf16.msra.mxu0 %v14009_v11 }
 0x4a5   : > { %12049 = vmatprep.subr.bf16.mxu0 %v14010_v38 }
 0x4a8   : > { %12050 = vmatpush3.bf16.msra.mxu0 %v14011_v49 }
 0x4a9   : > { %12051 = vmatprep.subr.bf16.mxu0 %v14012_v20 }
 0x4ab   : > { %12948 = vmatmul.mubr.bf16.gmra.mrb[108].mxu0 %v16484_v37 }
 0x4ac   : > { %12951 = vmatprep.mubr.bf16.mxu0 %v16487_v56  ;;  %12052 = vmatpush3.bf16.msra.mxu0 %v14013_v0 }
 0x4ad   : > { %12053 = vmatprep.subr.bf16.mxu0 %v14014_v1  ;;  %v16578_v1 = vpack.c.bf16 %v5510_v36, %v16455_v62 }
 0x4b0   : > { %12054 = vmatpush3.bf16.msra.mxu0 %v14015_v16 }
 0x4b1   : > { %12967 = vmatprep.subr.bf16.mxu0 %v14016_v23 }
 0x4b3   : > { %12952 = vmatmul.mubr.bf16.gmra.mrb[112].mxu0 %v16492_v40 }
 0x4b4   : > { %12955 = vmatprep.mubr.bf16.mxu0 %v16495_v31 }
 0x4bb   : > { %12956 = vmatmul.mubr.bf16.gmra.mrb[116].mxu0 %v16500_v8 }
 0x4bc   : > { %12959 = vmatprep.mubr.bf16.mxu0 %v16563_v48 }
 0x4c3   : > { %12960 = vmatmul.mubr.bf16.gmra.mrb[120].mxu0 %v16568_v61 }
 0x4c4   : > { %12963 = vmatprep.mubr.bf16.mxu0 %v16571_v10 }
 0x4c6   : > { %v11807_v12 = vpop.f32.mrb[48].mxu0  ;;  %v11919_v21 = vpop.f32.mrb[192].mxu1 }
 0x4c7   : > { %v11808_v43 = vpop.f32.mrb[49].mxu0  ;;  %v11920_v15 = vpop.f32.mrb[193].mxu1 }
 0x4c8   : > { %v16575_v11 = vadd.f32 %v11808_v43, %v11807_v12  ;;  %v11921_v38 = vadd.f32 %v11920_v15, %v11919_v21  ;;  %v11810_v49 = vpop.f32.mrb[50].mxu0  ;;  %v11922_v20 = vpop.f32.mrb[194].mxu1 }
 0x4c9   : > { %v11811_v0 = vpop.f32.mrb[51].mxu0  ;;  %v11923_v24 = vpop.f32.mrb[195].mxu1 }
 0x4ca   : > { %v16581_v7 = vadd.f32 %v11921_v38, %v16359_v28  ;;  %v16583_v16 = vadd.f32 %v11811_v0, %v11810_v49  ;;  %v11924_v57 = vadd.f32 %v11923_v24, %v11922_v20  ;;  %v14017_v49 = vld [vmem:[%s18013_s5 + $0x208] sm:$0xff]   ;;  %v14018_v24 = vld [vmem:[%s18013_s5 + $0x210] sm:$0xff]  }
 0x4cb   : > { %12964 = vmatmul.mubr.bf16.gmra.mrb[124].mxu0 %v16578_v1 }
 0x4cc   : > { %v16587_v29 = vadd.f32 %v11924_v57, %v16363_v35  ;;  %7094 = vmatprep.mubr.bf16.mxu0 %v16213_v17 }
 0x4ce   : > { %v11813_v19 = vpop.f32.mrb[52].mxu0  ;;  %v11925_v52 = vpop.f32.mrb[196].mxu1 }
 0x4cf   : > { %v11814_v12 = vpop.f32.mrb[53].mxu0  ;;  %v11926_v21 = vpop.f32.mrb[197].mxu1 }
 0x4d0   : > { %v16590_v43 = vadd.f32 %v11814_v12, %v11813_v19  ;;  %v11927_v62 = vadd.f32 %v11926_v21, %v11925_v52  ;;  %v11816_v36 = vpop.f32.mrb[54].mxu0  ;;  %v11928_v28 = vpop.f32.mrb[198].mxu1 }
 0x4d1   : > { %v11817_v15 = vpop.f32.mrb[55].mxu0  ;;  %v11929_v38 = vpop.f32.mrb[199].mxu1 }
 0x4d2   : > { %v16596_v35 = vadd.f32 %v11927_v62, %v16372_v32  ;;  %v16598_v20 = vadd.f32 %v11817_v15, %v11816_v36  ;;  %v11930_v17 = vadd.f32 %v11929_v38, %v11928_v28 }
 0x4d3   : > { %7095 = vmatmul.mubr.bf16.vlgmr.msra.gmra.mrb[128].mxu0 %v16286_v4 }
 0x4d4   : > { %v16602_v0 = vadd.f32 %v11930_v17, %v16376_v60  ;;  %7102 = vmatprep.mubr.bf16.mxu0 %v16208_v34  ;;  %12968 = vmatpush3.bf16.msra.mxu0 %v14016_v23  ;;  %v14019_v34 = vld [vmem:[%s18013_s5 + $0x218] sm:$0xff]  }
 0x4d5   : > { %12969 = vmatprep.subr.bf16.mxu0 %v14017_v49 }
 0x4d6   : > { %v11819_v57 = vpop.f32.mrb[56].mxu0  ;;  %v11931_v19 = vpop.f32.mrb[200].mxu1 }
 0x4d7   : > { %v11820_v32 = vpop.f32.mrb[57].mxu0  ;;  %v11932_v52 = vpop.f32.mrb[201].mxu1 }
 0x4d8   : > { %v16608_v12 = vadd.f32 %v11820_v32, %v11819_v57  ;;  %v11933_v21 = vadd.f32 %v11932_v52, %v11931_v19  ;;  %v11822_v62 = vpop.f32.mrb[58].mxu0  ;;  %v11934_v4 = vpop.f32.mrb[202].mxu1  ;;  %12970 = vmatpush3.bf16.msra.mxu0 %v14017_v49  ;;  %v14020_v49 = vld [vmem:[%s18013_s5 + $0x220] sm:$0xff]  }
 0x4d9   : > { %v11823_v60 = vpop.f32.mrb[59].mxu0  ;;  %v11935_v36 = vpop.f32.mrb[203].mxu1  ;;  %12971 = vmatprep.subr.bf16.mxu0 %v14018_v24 }
 0x4da   : > { %v16614_v23 = vadd.f32 %v11933_v21, %v16387_v25  ;;  %v16616_v28 = vadd.f32 %v11823_v60, %v11822_v62  ;;  %v11936_v15 = vadd.f32 %v11935_v36, %v11934_v4 }
 0x4db   : > { %7103 = vmatmul.mubr.bf16.gmra.mrb[132].mxu0 %v16315_v6 }
 0x4dc   : > { %v16620_v38 = vadd.f32 %v11936_v15, %v16391_v26  ;;  %7110 = vmatprep.mubr.bf16.mxu0 %v16236_v44  ;;  %12972 = vmatpush3.bf16.msra.mxu0 %v14018_v24  ;;  %v14021_v44 = vld [vmem:[%s18013_s5 + $0x228] sm:$0xff]  }
 0x4dd   : > { %12973 = vmatprep.subr.bf16.mxu0 %v14019_v34 }
 0x4de   : > { %v11825_v17 = vpop.f32.mrb[60].mxu0  ;;  %v11937_v57 = vpop.f32.mrb[204].mxu1 }
 0x4df   : > { %v11826_v25 = vpop.f32.mrb[61].mxu0  ;;  %v11938_v19 = vpop.f32.mrb[205].mxu1 }
 0x4e0   : > { %v16626_v32 = vadd.f32 %v11826_v25, %v11825_v17  ;;  %v11939_v52 = vadd.f32 %v11938_v19, %v11937_v57  ;;  %v11828_v21 = vpop.f32.mrb[62].mxu0  ;;  %v11940_v6 = vpop.f32.mrb[206].mxu1  ;;  %12974 = vmatpush3.bf16.msra.mxu0 %v14019_v34  ;;  %v14022_v34 = vld [vmem:[%s18013_s5 + $0x230] sm:$0xff]  }
 0x4e1   : > { %v11829_v26 = vpop.f32.mrb[63].mxu0  ;;  %v11941_v62 = vpop.f32.mrb[207].mxu1  ;;  %12975 = vmatprep.subr.bf16.mxu0 %v14020_v49 }
 0x4e2   : > { %v16632_v24 = vadd.f32 %v11939_v52, %v16400_v53  ;;  %v16634_v4 = vadd.f32 %v11829_v26, %v11828_v21  ;;  %v11942_v60 = vadd.f32 %v11941_v62, %v11940_v6 }
 0x4e3   : > { %7111 = vmatmul.mubr.bf16.gmra.mrb[136].mxu0 %v16342_v41 }
 0x4e4   : > { %v16638_v36 = vadd.f32 %v11942_v60, %v16404_v45  ;;  %7118 = vmatprep.mubr.bf16.mxu0 %v16231_v30  ;;  %12976 = vmatpush3.bf16.msra.mxu0 %v14020_v49  ;;  %v14023_v30 = vld [vmem:[%s18013_s5 + $0x238] sm:$0xff]  }
 0x4e5   : > { %12977 = vmatprep.subr.bf16.mxu0 %v14021_v44 }
 0x4e6   : > { %v11831_v15 = vpop.f32.mrb[64].mxu0  ;;  %v11943_v17 = vpop.f32.mrb[208].mxu1 }
 0x4e7   : > { %v11832_v53 = vpop.f32.mrb[65].mxu0  ;;  %v11944_v57 = vpop.f32.mrb[209].mxu1 }
 0x4e8   : > { %v16644_v25 = vadd.f32 %v11832_v53, %v11831_v15  ;;  %v11945_v19 = vadd.f32 %v11944_v57, %v11943_v17  ;;  %v11834_v52 = vpop.f32.mrb[66].mxu0  ;;  %v11946_v41 = vpop.f32.mrb[210].mxu1  ;;  %12978 = vmatpush3.bf16.msra.mxu0 %v14021_v44 }
 0x4e9   : > { %v11835_v45 = vpop.f32.mrb[67].mxu0  ;;  %v11947_v21 = vpop.f32.mrb[211].mxu1  ;;  %12979 = vmatprep.subr.bf16.mxu0 %v14022_v34 }
 0x4ea   : > { %v16650_v49 = vadd.f32 %v11945_v19, %v16575_v11  ;;  %v16652_v6 = vadd.f32 %v11835_v45, %v11834_v52  ;;  %v11948_v26 = vadd.f32 %v11947_v21, %v11946_v41 }
 0x4eb   : > { %7119 = vmatmul.mubr.bf16.gmra.mrb[140].mxu0 %v16355_v18 }
 0x4ec   : > { %v16656_v62 = vadd.f32 %v11948_v26, %v16583_v16  ;;  %7126 = vmatprep.mubr.bf16.mxu0 %v16261_v50  ;;  %12980 = vmatpush3.bf16.msra.mxu0 %v14022_v34 }
 0x4ed   : > { %12981 = vmatprep.subr.bf16.mxu0 %v14023_v30 }
 0x4ee   : > { %v11837_v44 = vpop.f32.mrb[68].mxu0  ;;  %v11949_v60 = vpop.f32.mrb[212].mxu1 }
 0x4ef   : > { %v11838_v15 = vpop.f32.mrb[69].mxu0  ;;  %v11950_v17 = vpop.f32.mrb[213].mxu1 }
 0x4f0   : > { %v16659_v53 = vadd.f32 %v11838_v15, %v11837_v44  ;;  %v11951_v11 = vadd.f32 %v11950_v17, %v11949_v60  ;;  %v11840_v57 = vpop.f32.mrb[70].mxu0  ;;  %v11952_v19 = vpop.f32.mrb[214].mxu1  ;;  %12982 = vmatpush3.bf16.msra.mxu0 %v14023_v30 }
 0x4f1   : > { %v11841_v52 = vpop.f32.mrb[71].mxu0  ;;  %v11953_v41 = vpop.f32.mrb[215].mxu1 }
 0x4f2   : > { %v16662_v18 = vadd.f32 %v11951_v11, %v16590_v43  ;;  %v16664_v16 = vadd.f32 %v11841_v52, %v11840_v57  ;;  %v11954_v50 = vadd.f32 %v11953_v41, %v11952_v19  ;;  %v14025_v19 = vld [vmem:[%s18015_s7] sm:$0xff]  }
 0x4f3   : > { %7127 = vmatmul.mubr.bf16.gmra.mrb[144].mxu0 %v16368_v59 }
 0x4f4   : > { %v16668_v34 = vadd.f32 %v11954_v50, %v16598_v20  ;;  %7134 = vmatprep.mubr.bf16.mxu0 %v16256_v46  ;;  %v14024_v46 = vld [vmem:[%s18015_s7 + $0x40] sm:$0xff]  }
 0x4f5   : > { %12175 = vmatprep.subr.bf16.mxu1 %v14024_v46 }
 0x4f6   : > { %v11843_v45 = vpop.f32.mrb[72].mxu0  ;;  %v11955_v21 = vpop.f32.mrb[216].mxu1  ;;  %12176 = vmatpush3.bf16.msra.mxu1 %v14025_v19 }
 0x4f7   : > { %v11844_v26 = vpop.f32.mrb[73].mxu0  ;;  %v11956_v44 = vpop.f32.mrb[217].mxu1 }
 0x4f8   : > { %v16671_v30 = vadd.f32 %v11844_v26, %v11843_v45  ;;  %v11957_v60 = vadd.f32 %v11956_v44, %v11955_v21  ;;  %v11846_v15 = vpop.f32.mrb[74].mxu0  ;;  %v11958_v43 = vpop.f32.mrb[218].mxu1 }
 0x4f9   : > { %v11847_v17 = vpop.f32.mrb[75].mxu0  ;;  %v11959_v11 = vpop.f32.mrb[219].mxu1 }
 0x4fa   : > { %v16674_v57 = vadd.f32 %v11957_v60, %v16608_v12  ;;  %v16676_v59 = vadd.f32 %v11847_v17, %v11846_v15  ;;  %v11960_v20 = vadd.f32 %v11959_v11, %v11958_v43 }
 0x4fb   : > { %7135 = vmatmul.mubr.bf16.gmra.mrb[148].mxu0 %v16381_v33 }
 0x4fc   : > { %v16686_v52 = vadd.f32 %v11960_v20, %v16616_v28  ;;  %7142 = vmatprep.mubr.bf16.mxu0 %v16288_v55 }
 0x4fe   : > { %v11849_v12 = vpop.f32.mrb[76].mxu0  ;;  %v11961_v41 = vpop.f32.mrb[220].mxu1 }
 0x4ff   : > { %v11850_v50 = vpop.f32.mrb[77].mxu0  ;;  %v11962_v45 = vpop.f32.mrb[221].mxu1 }
 0x500   : > { %v16689_v33 = vadd.f32 %v11850_v50, %v11849_v12  ;;  %v11963_v21 = vadd.f32 %v11962_v45, %v11961_v41  ;;  %v11852_v26 = vpop.f32.mrb[78].mxu0  ;;  %v11964_v44 = vpop.f32.mrb[222].mxu1 }
 0x501   : > { %v11853_v60 = vpop.f32.mrb[79].mxu0  ;;  %v11965_v15 = vpop.f32.mrb[223].mxu1 }
 0x502   : > { %v16692_v43 = vadd.f32 %v11963_v21, %v16626_v32  ;;  %v16694_v28 = vadd.f32 %v11853_v60, %v11852_v26  ;;  %v11966_v17 = vadd.f32 %v11965_v15, %v11964_v44  ;;  %v14027_v44 = vld [vmem:[%s18015_s7 + $0x8] sm:$0xff]   ;;  %v14028_v60 = vld [vmem:[%s18015_s7 + $0x50] sm:$0xff]  }
 0x503   : > { %7143 = vmatmul.mubr.bf16.gmra.mrb[152].mxu0 %v16394_v47 }
 0x504   : > { %v16698_v55 = vadd.f32 %v11966_v17, %v16634_v4  ;;  %7150 = vmatprep.mubr.bf16.mxu0 %v16281_v39  ;;  %v14026_v39 = vld [vmem:[%s18015_s7 + $0x48] sm:$0xff]   ;;  %v14029_v17 = vld [vmem:[%s18015_s7 + $0x10] sm:$0xff]  }
 0x505   : > { %12177 = vmatprep.subr.bf16.mxu1 %v14026_v39 }
 0x506   : > { %v11855_v11 = vpop.f32.mrb[80].mxu0  ;;  %v11967_v20 = vpop.f32.mrb[224].mxu1  ;;  %12178 = vmatpush3.bf16.msra.mxu1 %v14027_v44 }
 0x507   : > { %v11856_v46 = vpop.f32.mrb[81].mxu0  ;;  %v11968_v19 = vpop.f32.mrb[225].mxu1  ;;  %12179 = vmatprep.subr.bf16.mxu1 %v14028_v60 }
 0x508   : > { %v16701_v12 = vadd.f32 %v11856_v46, %v11855_v11  ;;  %v11969_v41 = vadd.f32 %v11968_v19, %v11967_v20  ;;  %v11858_v50 = vpop.f32.mrb[82].mxu0  ;;  %v11970_v32 = vpop.f32.mrb[226].mxu1 }
 0x509   : > { %v11859_v45 = vpop.f32.mrb[83].mxu0  ;;  %v11971_v21 = vpop.f32.mrb[227].mxu1 }
 0x50a   : > { %v16704_v26 = vadd.f32 %v11969_v41, %v16644_v25  ;;  %v16706_v47 = vadd.f32 %v11859_v45, %v11858_v50  ;;  %v11972_v4 = vadd.f32 %v11971_v21, %v11970_v32  ;;  %12180 = vmatpush3.bf16.msra.mxu1 %v14029_v17 }
 0x50b   : > { %7151 = vmatmul.mubr.bf16.gmra.mrb[156].mxu0 %v16407_v58 }
 0x50c   : > { %v16719_v25 = vadd.f32 %v11972_v4, %v16652_v6  ;;  %7158 = vmatprep.mubr.bf16.mxu0 %v16317_v22 }
 0x50e   : > { %v11861_v15 = vpop.f32.mrb[84].mxu0  ;;  %v11973_v58 = vpop.f32.mrb[228].mxu1 }
 0x50f   : > { %v11862_v11 = vpop.f32.mrb[85].mxu0  ;;  %v11974_v20 = vpop.f32.mrb[229].mxu1 }
 0x510   : > { %v16725_v46 = vadd.f32 %v11862_v11, %v11861_v15  ;;  %v11975_v19 = vadd.f32 %v11974_v20, %v11973_v58  ;;  %v11864_v41 = vpop.f32.mrb[86].mxu0  ;;  %v11976_v50 = vpop.f32.mrb[230].mxu1 }
 0x511   : > { %v11865_v6 = vpop.f32.mrb[87].mxu0  ;;  %v11977_v32 = vpop.f32.mrb[231].mxu1 }
 0x512   : > { %v16728_v22 = vadd.f32 %v11975_v19, %v16659_v53  ;;  %v16730_v45 = vadd.f32 %v11865_v6, %v11864_v41  ;;  %v11978_v21 = vadd.f32 %v11977_v32, %v11976_v50 }
 0x513   : > { %7159 = vmatmul.mubr.bf16.gmra.mrb[160].mxu0 %v16415_v9 }
 0x514   : > { %v16734_v4 = vadd.f32 %v11978_v21, %v16664_v16  ;;  %7166 = vmatprep.mubr.bf16.mxu0 %v16310_v14 }
 0x516   : > { %v11867_v39 = vpop.f32.mrb[88].mxu0  ;;  %v11979_v44 = vpop.f32.mrb[232].mxu1 }
 0x517   : > { %v11868_v60 = vpop.f32.mrb[89].mxu0  ;;  %v11980_v15 = vpop.f32.mrb[233].mxu1 }
 0x518   : > { %v16737_v58 = vadd.f32 %v11868_v60, %v11867_v39  ;;  %v11981_v11 = vadd.f32 %v11980_v15, %v11979_v44  ;;  %v11870_v53 = vpop.f32.mrb[90].mxu0  ;;  %v11982_v20 = vpop.f32.mrb[234].mxu1 }
 0x519   : > { %v11871_v19 = vpop.f32.mrb[91].mxu0  ;;  %v11983_v41 = vpop.f32.mrb[235].mxu1 }
 0x51a   : > { %v16740_v17 = vadd.f32 %v11981_v11, %v16671_v30  ;;  %v11872_v9 = vadd.f32 %v11871_v19, %v11870_v53  ;;  %v11984_v50 = vadd.f32 %v11983_v41, %v11982_v20 }
 0x51b   : > { %7167 = vmatmul.mubr.bf16.gmra.mrb[164].mxu0 %v16429_v42 }
 0x51c   : > { %v16744_v14 = vadd.f32 %v11984_v50, %v16676_v59  ;;  %7174 = vmatprep.mubr.bf16.mxu0 %v16344_v51 }
 0x51e   : > { %v11873_v16 = vpop.f32.mrb[92].mxu0  ;;  %v11985_v6 = vpop.f32.mrb[236].mxu1 }
 0x51f   : > { %v11874_v32 = vpop.f32.mrb[93].mxu0  ;;  %v11986_v21 = vpop.f32.mrb[237].mxu1 }
 0x520   : > { %v16747_v39 = vadd.f32 %v11874_v32, %v11873_v16  ;;  %v11987_v44 = vadd.f32 %v11986_v21, %v11985_v6  ;;  %v11876_v60 = vpop.f32.mrb[94].mxu0  ;;  %v11988_v15 = vpop.f32.mrb[238].mxu1  ;;  %v16771_v21 = vld [vmem:[#allocation2 + $0x30c] sm:$0xff] }
 0x521   : > { %v11877_v30 = vpop.f32.mrb[95].mxu0  ;;  %v11989_v11 = vpop.f32.mrb[239].mxu1 }
 0x522   : > { %v16750_v53 = vadd.f32 %v11987_v44, %v16689_v33  ;;  %v11878_v42 = vadd.f32 %v11877_v30, %v11876_v60  ;;  %v11990_v20 = vadd.f32 %v11989_v11, %v11988_v15  ;;  %v14030_v33 = vld [vmem:[%s18015_s7 + $0x58] sm:$0xff]  }
 0x523   : > { %7175 = vmatmul.mubr.bf16.gmra.mrb[168].mxu0 %v16447_v2  ;;  %v14031_v2 = vld [vmem:[%s18015_s7 + $0x18] sm:$0xff]   ;;  %12181 = vmatprep.subr.bf16.mxu1 %v14030_v33 }
 0x524   : > { %v16754_v51 = vadd.f32 %v11990_v20, %v16694_v28  ;;  %7182 = vmatprep.mubr.bf16.mxu0 %v16338_v27  ;;  %v5318_v28 = vld [vmem:[#allocation2 + $0x304] sm:$0xff]  ;;  %12182 = vmatpush3.bf16.msra.mxu1 %v14031_v2 }
 0x525   : > { %v5346_v60 = vpack.c.bf16 %v16771_v21, %v5318_v28 }
 0x526   : > { %v11991_v59 = vpop.f32.mrb[240].mxu1 }
 0x527   : > { %v11992_v19 = vpop.f32.mrb[241].mxu1 }
 0x528   : > { %v11993_v41 = vadd.f32 %v11992_v19, %v11991_v59  ;;  %v11994_v50 = vpop.f32.mrb[242].mxu1  ;;  %v5320_v59 = vld [vmem:[#allocation2 + $0x324] sm:$0xff]  ;;  %v16781_v19 = vld [vmem:[#allocation2 + $0x32c] sm:$0xff] }
 0x529   : > { %v11995_v16 = vpop.f32.mrb[243].mxu1 }
 0x52a   : > { %v16758_v6 = vadd.f32 %v11993_v41, %v16701_v12  ;;  %v11996_v32 = vadd.f32 %v11995_v16, %v11994_v50  ;;  %v5347_v16 = vpack.c.bf16 %v16781_v19, %v5320_v59 }
 0x52b   : > { %7183 = vmatmul.mubr.bf16.gmra.mrb[172].mxu0 %v16462_v3 }
 0x52c   : > { %v16768_v27 = vadd.f32 %v11996_v32, %v16706_v47  ;;  %7190 = vmatprep.mubr.bf16.mxu0 %v16559_v63 }
 0x52e   : > { %v11997_v12 = vpop.f32.mrb[244].mxu1 }
 0x52f   : > { %v11998_v44 = vpop.f32.mrb[245].mxu1 }
 0x530   : > { %v11999_v15 = vadd.f32 %v11998_v44, %v11997_v12  ;;  %v12000_v30 = vpop.f32.mrb[246].mxu1  ;;  %v14033_v12 = vld [vmem:[%s18015_s7 + $0x20] sm:$0xff]  }
 0x531   : > { %v12001_v11 = vpop.f32.mrb[247].mxu1 }
 0x532   : > { %v16775_v20 = vadd.f32 %v11999_v15, %v16725_v46  ;;  %v12002_v3 = vadd.f32 %v12001_v11, %v12000_v30  ;;  %v5323_v15 = vld [vmem:[#allocation2 + $0x34c] sm:$0xff] }
 0x533   : > { %7191 = vmatmul.mubr.bf16.gmra.mrb[176].mxu0 %v5346_v60  ;;  %v5322_v60 = vld [vmem:[#allocation2 + $0x344] sm:$0xff] }
 0x534   : > { %v16778_v47 = vadd.f32 %v12002_v3, %v16730_v45  ;;  %7198 = vmatprep.mubr.bf16.mxu0 %v16559_v63  ;;  %v14032_v45 = vld [vmem:[%s18015_s7 + $0x60] sm:$0xff]   ;;  %v5348_v11 = vpack.c.bf16 %v5323_v15, %v5322_v60  ;;  %v14045_v60 = vld [vmem:[%s18015_s7 + $0x108] sm:$0xff]  }
 0x535   : > { %12183 = vmatprep.subr.bf16.mxu1 %v14032_v45  ;;  %v14035_v45 = vld [vmem:[%s18015_s7 + $0x28] sm:$0xff]  }
 0x536   : > { %v12003_v41 = vpop.f32.mrb[248].mxu1  ;;  %12184 = vmatpush3.bf16.msra.mxu1 %v14033_v12  ;;  %v14042_v12 = vld [vmem:[%s18015_s7 + $0x90] sm:$0xff]  }
 0x537   : > { %v12004_v50 = vpop.f32.mrb[249].mxu1 }
 0x538   : > { %v12005_v32 = vadd.f32 %v12004_v50, %v12003_v41  ;;  %v12006_v33 = vpop.f32.mrb[250].mxu1 }
 0x539   : > { %v12007_v2 = vpop.f32.mrb[251].mxu1 }
 0x53a   : > { %v16785_v46 = vadd.f32 %v12005_v32, %v16737_v58  ;;  %v12008_v28 = vadd.f32 %v12007_v2, %v12006_v33  ;;  %v5325_v33 = vld [vmem:[#allocation2 + $0x36c] sm:$0xff] }
 0x53b   : > { %7199 = vmatmul.mubr.bf16.gmra.mrb[180].mxu0 %v5347_v16 }
 0x53c   : > { %v16793_v44 = vadd.f32 %v12008_v28, %v11872_v9  ;;  %7206 = vmatprep.mubr.bf16.mxu0 %v16559_v63  ;;  %v5324_v9 = vld [vmem:[#allocation2 + $0x364] sm:$0xff] }
 0x53d   : > { %v5349_v2 = vpack.c.bf16 %v5325_v33, %v5324_v9  ;;  %v14034_v28 = vld [vmem:[%s18015_s7 + $0x68] sm:$0xff]  }
 0x53e   : > { %v12009_v58 = vpop.f32.mrb[252].mxu1  ;;  %12185 = vmatprep.subr.bf16.mxu1 %v14034_v28  ;;  %v14053_v28 = vld [vmem:[%s18015_s7 + $0xe0] sm:$0xff]  }
 0x53f   : > { %v12010_v30 = vpop.f32.mrb[253].mxu1  ;;  %12186 = vmatpush3.bf16.msra.mxu1 %v14035_v45 }
 0x540   : > { %v12011_v3 = vadd.f32 %v12010_v30, %v12009_v58  ;;  %v12012_v59 = vpop.f32.mrb[254].mxu1  ;;  %v14047_v58 = vld [vmem:[%s18015_s7 + $0x110] sm:$0xff]  }
 0x541   : > { %v12013_v41 = vpop.f32.mrb[255].mxu1  ;;  %v14048_v30 = vld [vmem:[%s18015_s7 + $0xd0] sm:$0xff]  }
 0x542   : > { %v16797_v50 = vadd.f32 %v12011_v3, %v16747_v39  ;;  %v12014_v32 = vadd.f32 %v12013_v41, %v12012_v59  ;;  %v14036_v39 = vld [vmem:[%s18015_s7 + $0x70] sm:$0xff]   ;;  %v14050_v3 = vld [vmem:[%s18015_s7 + $0xd8] sm:$0xff]  }
 0x543   : > { %7207 = vmatmul.mubr.bf16.gmra.mrb[184].mxu0 %v5348_v11  ;;  %12187 = vmatprep.subr.bf16.mxu1 %v14036_v39  ;;  %v14049_v11 = vld [vmem:[%s18015_s7 + $0x118] sm:$0xff]  }
 0x544   : > { %v16799_v16 = vadd.f32 %v12014_v32, %v11878_v42  ;;  %7214 = vmatprep.mubr.bf16.mxu0 %v16559_v63  ;;  %v14037_v42 = vld [vmem:[%s18015_s7 + $0x30] sm:$0xff]  }
 0x545   : > { %12188 = vmatpush3.bf16.msra.mxu1 %v14037_v42 }
 0x54b   : > { %7215 = vmatmul.mubr.bf16.gmra.mrb[188].mxu0 %v5349_v2 }
 0x54c   : > { %12983 = vmatprep.mubr.bf16.mxu0 %v16465_v54  ;;  %v14038_v54 = vld [vmem:[%s18015_s7 + $0x78] sm:$0xff]  }
 0x54d   : > { %12189 = vmatprep.subr.bf16.mxu1 %v14038_v54  ;;  %v14054_v54 = vld [vmem:[%s18015_s7 + $0x128] sm:$0xff]  }
 0x553   : > { %12984 = vmatmul.mubr.bf16.vlgmr.msra.gmra.mrb[96].mxu0 %v16476_v13  ;;  %v14039_v13 = vld [vmem:[%s18015_s7 + $0x38] sm:$0xff]  }
 0x554   : > { %12987 = vmatprep.mubr.bf16.mxu0 %v16479_v5  ;;  %12190 = vmatpush3.bf16.msra.mxu1 %v14039_v13  ;;  %v5512_v5 = vld [vmem:[#allocation2 + $0x314] sm:$0xff] }
 0x557   : > { %8368 = vmatmul.mubr.bf16.vlgmr.msra.gmra.mrb[0].mxu1 %v16559_v63 }
 0x558   : > { %8375 = vmatprep.mubr.bf16.mxu1 %v16559_v63 }
 0x55b   : > { %12988 = vmatmul.mubr.bf16.gmra.mrb[100].mxu0 %v16484_v37  ;;  %v5539_v37 = vpack.c.bf16 %v5512_v5, %v16771_v21  ;;  %v14043_v21 = vld [vmem:[%s18015_s7 + $0x100] sm:$0xff]  }
 0x55c   : > { %12991 = vmatprep.mubr.bf16.mxu0 %v16487_v56  ;;  %v14040_v56 = vld [vmem:[%s18015_s7 + $0x80] sm:$0xff]   ;;  %12311 = vmatprep.subr.bf16.mxu0 %v14043_v21 }
 0x55d   : > { %13015 = vmatprep.subr.bf16.mxu1 %v14040_v56 }
 0x55e   : > { %13016 = vmatpush3.bf16.msra.mxu1 %v14040_v56  ;;  %v14056_v56 = vld [vmem:[%s18015_s7 + $0x130] sm:$0xff]  }
 0x55f   : > { %8376 = vmatmul.mubr.bf16.gmra.mrb[4].mxu1 %v16559_v63 }
 0x560   : > { %8383 = vmatprep.mubr.bf16.mxu1 %v16559_v63 }
 0x563   : > { %12992 = vmatmul.mubr.bf16.gmra.mrb[104].mxu0 %v16492_v40  ;;  %v5514_v40 = vld [vmem:[#allocation2 + $0x334] sm:$0xff] }
 0x564   : > { %12995 = vmatprep.mubr.bf16.mxu0 %v16495_v31  ;;  %v5516_v31 = vld [vmem:[#allocation2 + $0x354] sm:$0xff] }
 0x567   : > { %8384 = vmatmul.mubr.bf16.gmra.mrb[8].mxu1 %v16559_v63 }
 0x568   : > { %8391 = vmatprep.mubr.bf16.mxu1 %v16559_v63 }
 0x56b   : > { %12996 = vmatmul.mubr.bf16.gmra.mrb[108].mxu0 %v16500_v8  ;;  %v5540_v8 = vpack.c.bf16 %v5514_v40, %v16781_v19  ;;  %v14044_v19 = vld [vmem:[%s18015_s7 + $0xc0] sm:$0xff]   ;;  %v14057_v40 = vld [vmem:[%s18015_s7 + $0xf0] sm:$0xff]  }
 0x56c   : > { %12999 = vmatprep.mubr.bf16.mxu0 %v16563_v48  ;;  %v5541_v48 = vpack.c.bf16 %v5516_v31, %v5323_v15  ;;  %12312 = vmatpush3.bf16.msra.mxu0 %v14044_v19  ;;  %v14046_v15 = vld [vmem:[%s18015_s7 + $0xc8] sm:$0xff]  }
 0x56d   : > { %12313 = vmatprep.subr.bf16.mxu0 %v14045_v60 }
 0x56f   : > { %8392 = vmatmul.mubr.bf16.gmra.mrb[12].mxu1 %v16559_v63 }
 0x570   : > { %8399 = vmatprep.mubr.bf16.mxu1 %v16559_v63  ;;  %12314 = vmatpush3.bf16.msra.mxu0 %v14046_v15 }
 0x571   : > { %12315 = vmatprep.subr.bf16.mxu0 %v14047_v58 }
 0x573   : > { %13000 = vmatmul.mubr.bf16.gmra.mrb[112].mxu0 %v16568_v61  ;;  %v5518_v61 = vld [vmem:[#allocation2 + $0x374] sm:$0xff] }
 0x574   : > { %13003 = vmatprep.mubr.bf16.mxu0 %v16571_v10  ;;  %v5542_v10 = vpack.c.bf16 %v5518_v61, %v5325_v33  ;;  %12316 = vmatpush3.bf16.msra.mxu0 %v14048_v30  ;;  %v14052_v33 = vld [vmem:[%s18015_s7 + $0x120] sm:$0xff]  }
 0x575   : > { %12317 = vmatprep.subr.bf16.mxu0 %v14049_v11 }
 0x577   : > { %8400 = vmatmul.mubr.bf16.gmra.mrb[16].mxu1 %v16559_v63 }
 0x578   : > { %8407 = vmatprep.mubr.bf16.mxu1 %v16559_v63  ;;  %12318 = vmatpush3.bf16.msra.mxu0 %v14050_v3 }
 0x579   : > { %12319 = vmatprep.subr.bf16.mxu0 %v14052_v33  ;;  %v14060_v33 = vld [vmem:[%s18015_s7 + $0xa0] sm:$0xff]  }
 0x57b   : > { %13004 = vmatmul.mubr.bf16.gmra.mrb[116].mxu0 %v16578_v1  ;;  %v14041_v1 = vld [vmem:[%s18015_s7 + $0x88] sm:$0xff]  }
 0x57c   : > { %13007 = vmatprep.mubr.bf16.mxu0 %v5539_v37  ;;  %13017 = vmatprep.subr.bf16.mxu1 %v14041_v1 }
 0x57d   : > { %13018 = vmatpush3.bf16.msra.mxu1 %v14041_v1  ;;  %12320 = vmatpush3.bf16.msra.mxu0 %v14053_v28 }
 0x57e   : > { %13019 = vmatprep.subr.bf16.mxu1 %v14042_v12  ;;  %12321 = vmatprep.subr.bf16.mxu0 %v14054_v54 }
 0x57f   : > { %8408 = vmatmul.mubr.bf16.gmra.mrb[20].mxu1 %v16559_v63 }
 0x580   : > { %8415 = vmatprep.mubr.bf16.mxu1 %v16559_v63 }
 0x581   : > { %13020 = vmatpush3.bf16.msra.mxu1 %v14042_v12 }
 0x583   : > { %13008 = vmatmul.mubr.bf16.gmra.mrb[120].mxu0 %v5540_v8 }
 0x584   : > { %13011 = vmatprep.mubr.bf16.mxu0 %v5541_v48  ;;  %v14051_v48 = vld [vmem:[%s18015_s7 + $0x98] sm:$0xff]  }
 0x585   : > { %13021 = vmatprep.subr.bf16.mxu1 %v14051_v48 }
 0x586   : > { %13022 = vmatpush3.bf16.msra.mxu1 %v14051_v48 }
 0x587   : > { %8416 = vmatmul.mubr.bf16.gmra.mrb[24].mxu1 %v16559_v63  ;;  %13023 = vmatprep.subr.bf16.mxu1 %v14060_v33 }
 0x588   : > { %8423 = vmatprep.mubr.bf16.mxu1 %v16559_v63 }
 0x58a   : > { %13024 = vmatpush3.bf16.msra.mxu1 %v14060_v33 }
 0x58b   : > { %13012 = vmatmul.mubr.bf16.gmra.mrb[124].mxu0 %v5542_v10  ;;  %v14058_v10 = vld [vmem:[%s18015_s7 + $0x138] sm:$0xff]  }
 0x58f   : > { %8424 = vmatmul.mubr.bf16.gmra.mrb[28].mxu1 %v16559_v63  ;;  %v14055_v63 = vld [vmem:[%s18015_s7 + $0xe8] sm:$0xff]  }
 0x590   : > { %12322 = vmatpush3.bf16.msra.mxu0 %v14055_v63 }
 0x591   : > { %12323 = vmatprep.subr.bf16.mxu0 %v14056_v56 }
 0x594   : > { %12324 = vmatpush3.bf16.msra.mxu0 %v14057_v40 }
 0x595   : > { %12325 = vmatprep.subr.bf16.mxu0 %v14058_v10 }
 0x5a6   : > { %v12055_v59 = vpop.f32.mrb[128].mxu0 }
 0x5a7   : > { %v12056_v41 = vpop.f32.mrb[129].mxu0 }
 0x5a8   : > { %v12057_v32 = vadd.f32 %v12056_v41, %v12055_v59  ;;  %v12058_v9 = vpop.f32.mrb[130].mxu0 }
 0x5a9   : > { %v12059_v2 = vpop.f32.mrb[131].mxu0 }
 0x5aa   : > { %v12060_v45 = vadd.f32 %v12059_v2, %v12058_v9  ;;  %v16889_v39 = vadd.f32 %v16581_v7, %v12057_v32 }
 0x5ac   : > { %v16892_v42 = vadd.f32 %v16587_v29, %v12060_v45 }
 0x5ae   : > { %v12061_v13 = vpop.f32.mrb[132].mxu0 }
 0x5af   : > { %v12062_v5 = vpop.f32.mrb[133].mxu0 }
 0x5b0   : > { %v12063_v37 = vadd.f32 %v12062_v5, %v12061_v13  ;;  %v12064_v7 = vpop.f32.mrb[134].mxu0 }
 0x5b1   : > { %v12065_v29 = vpop.f32.mrb[135].mxu0 }
 0x5b2   : > { %v12066_v31 = vadd.f32 %v12065_v29, %v12064_v7  ;;  %v16907_v8 = vadd.f32 %v16596_v35, %v12063_v37  ;;  %v14059_v35 = vld [vmem:[%s18015_s7 + $0xf8] sm:$0xff]  }
 0x5b3   : > { %12326 = vmatpush3.bf16.msra.mxu0 %v14059_v35 }
 0x5b4   : > { %v16913_v61 = vadd.f32 %v16602_v0, %v12066_v31  ;;  %v14061_v31 = vld [vmem:[%s18015_s7 + $0xa8] sm:$0xff]  }
 0x5b5   : > { %13025 = vmatprep.subr.bf16.mxu1 %v14061_v31 }
 0x5b6   : > { %v12067_v1 = vpop.f32.mrb[136].mxu0  ;;  %13026 = vmatpush3.bf16.msra.mxu1 %v14061_v31 }
 0x5b7   : > { %v12068_v21 = vpop.f32.mrb[137].mxu0 }
 0x5b8   : > { %v12069_v19 = vadd.f32 %v12068_v21, %v12067_v1  ;;  %v12070_v12 = vpop.f32.mrb[138].mxu0 }
 0x5b9   : > { %v12071_v60 = vpop.f32.mrb[139].mxu0 }
 0x5ba   : > { %v12072_v15 = vadd.f32 %v12071_v60, %v12070_v12  ;;  %v16922_v0 = vadd.f32 %v16614_v23, %v12069_v19 }
 0x5bc   : > { %v16925_v58 = vadd.f32 %v16620_v38, %v12072_v15 }
 0x5be   : > { %v12073_v30 = vpop.f32.mrb[140].mxu0 }
 0x5bf   : > { %v12074_v11 = vpop.f32.mrb[141].mxu0 }
 0x5c0   : > { %v12075_v3 = vadd.f32 %v12074_v11, %v12073_v30  ;;  %v12076_v59 = vpop.f32.mrb[142].mxu0 }
 0x5c1   : > { %v12077_v41 = vpop.f32.mrb[143].mxu0 }
 0x5c2   : > { %v12078_v32 = vadd.f32 %v12077_v41, %v12076_v59  ;;  %v16928_v9 = vadd.f32 %v16632_v24, %v12075_v3  ;;  %v14062_v59 = vld [vmem:[%s18015_s7 + $0xb0] sm:$0xff]  }
 0x5c3   : > { %13027 = vmatprep.subr.bf16.mxu1 %v14062_v59 }
 0x5c4   : > { %v16934_v2 = vadd.f32 %v16638_v36, %v12078_v32  ;;  %13028 = vmatpush3.bf16.msra.mxu1 %v14062_v59 }
 0x5c6   : > { %v12079_v23 = vpop.f32.mrb[144].mxu0 }
 0x5c7   : > { %v12080_v38 = vpop.f32.mrb[145].mxu0 }
 0x5c8   : > { %v12081_v28 = vadd.f32 %v12080_v38, %v12079_v23  ;;  %v12082_v45 = vpop.f32.mrb[146].mxu0 }
 0x5c9   : > { %v12083_v54 = vpop.f32.mrb[147].mxu0 }
 0x5ca   : > { %v12084_v63 = vadd.f32 %v12083_v54, %v12082_v45  ;;  %v16937_v13 = vadd.f32 %v16650_v49, %v12081_v28 }
 0x5cc   : > { %v16940_v24 = vadd.f32 %v16656_v62, %v12084_v63 }
 0x5ce   : > { %v12085_v5 = vpop.f32.mrb[148].mxu0 }
 0x5cf   : > { %v12086_v37 = vpop.f32.mrb[149].mxu0 }
 0x5d0   : > { %v12087_v7 = vadd.f32 %v12086_v37, %v12085_v5  ;;  %v12088_v56 = vpop.f32.mrb[150].mxu0 }
 0x5d1   : > { %v12089_v36 = vpop.f32.mrb[151].mxu0 }
 0x5d2   : > { %v12090_v29 = vadd.f32 %v12089_v36, %v12088_v56  ;;  %v16943_v40 = vadd.f32 %v16662_v18, %v12087_v7 }
 0x5d4   : > { %v16949_v48 = vadd.f32 %v16668_v34, %v12090_v29 }
 0x5d6   : > { %v12091_v49 = vpop.f32.mrb[152].mxu0 }
 0x5d7   : > { %v12092_v62 = vpop.f32.mrb[153].mxu0 }
 0x5d8   : > { %v12093_v10 = vadd.f32 %v12092_v62, %v12091_v49  ;;  %v12094_v35 = vpop.f32.mrb[154].mxu0 }
 0x5d9   : > { %v12095_v1 = vpop.f32.mrb[155].mxu0 }
 0x5da   : > { %v12096_v21 = vadd.f32 %v12095_v1, %v12094_v35  ;;  %v16952_v19 = vadd.f32 %v16674_v57, %v12093_v10 }
 0x5dc   : > { %v16955_v18 = vadd.f32 %v16686_v52, %v12096_v21 }
 0x5de   : > { %v12097_v12 = vpop.f32.mrb[156].mxu0 }
 0x5df   : > { %v12098_v60 = vpop.f32.mrb[157].mxu0 }
 0x5e0   : > { %v12099_v15 = vadd.f32 %v12098_v60, %v12097_v12  ;;  %v12100_v30 = vpop.f32.mrb[158].mxu0 }
 0x5e1   : > { %v12101_v34 = vpop.f32.mrb[159].mxu0 }
 0x5e2   : > { %v12102_v11 = vadd.f32 %v12101_v34, %v12100_v30  ;;  %v16958_v3 = vadd.f32 %v16692_v43, %v12099_v15  ;;  %v14063_v43 = vld [vmem:[%s18015_s7 + $0xb8] sm:$0xff]  }
 0x5e3   : > { %13029 = vmatprep.subr.bf16.mxu1 %v14063_v43 }
 0x5e4   : > { %v16964_v41 = vadd.f32 %v16698_v55, %v12102_v11  ;;  %13030 = vmatpush3.bf16.msra.mxu1 %v14063_v43 }
 0x5e6   : > { %v12103_v57 = vpop.f32.mrb[160].mxu0 }
 0x5e7   : > { %v12104_v52 = vpop.f32.mrb[161].mxu0 }
 0x5e8   : > { %v12105_v32 = vadd.f32 %v12104_v52, %v12103_v57  ;;  %v12106_v33 = vpop.f32.mrb[162].mxu0 }
 0x5e9   : > { %v12107_v23 = vpop.f32.mrb[163].mxu0 }
 0x5ea   : > { %v12108_v38 = vadd.f32 %v12107_v23, %v12106_v33  ;;  %v16967_v28 = vadd.f32 %v16704_v26, %v12105_v32  ;;  %v16981_v26 = vld [vmem:[%s18015_s7 + $0x140] sm:$0xff]  }
 0x5eb   : > { %13063 = vmatprep.subr.bf16.mxu1 %v16981_v26 }
 0x5ec   : > { %v16973_v45 = vadd.f32 %v16719_v25, %v12108_v38 }
 0x5ee   : > { %v12109_v55 = vpop.f32.mrb[164].mxu0 }
 0x5ef   : > { %v12110_v54 = vpop.f32.mrb[165].mxu0 }
 0x5f0   : > { %v12111_v63 = vadd.f32 %v12110_v54, %v12109_v55  ;;  %v12112_v5 = vpop.f32.mrb[166].mxu0 }
 0x5f1   : > { %v12113_v37 = vpop.f32.mrb[167].mxu0 }
 0x5f2   : > { %v12114_v7 = vadd.f32 %v12113_v37, %v12112_v5  ;;  %v16976_v56 = vadd.f32 %v16728_v22, %v12111_v63 }
 0x5f4   : > { %v16984_v36 = vadd.f32 %v16734_v4, %v12114_v7 }
 0x5f6   : > { %v12115_v25 = vpop.f32.mrb[168].mxu0 }
 0x5f7   : > { %v12116_v29 = vpop.f32.mrb[169].mxu0 }
 0x5f8   : > { %v12117_v31 = vadd.f32 %v12116_v29, %v12115_v25  ;;  %v12118_v49 = vpop.f32.mrb[170].mxu0 }
 0x5f9   : > { %v12119_v62 = vpop.f32.mrb[171].mxu0 }
 0x5fa   : > { %v12120_v10 = vadd.f32 %v12119_v62, %v12118_v49  ;;  %v16988_v35 = vadd.f32 %v16740_v17, %v12117_v31 }
 0x5fc   : > { %v16991_v22 = vadd.f32 %v16744_v14, %v12120_v10 }
 0x5fe   : > { %v12121_v1 = vpop.f32.mrb[172].mxu0 }
 0x5ff   : > { %v12122_v21 = vpop.f32.mrb[173].mxu0 }
 0x600   : > { %v12123_v12 = vadd.f32 %v12122_v21, %v12121_v1  ;;  %v12124_v60 = vpop.f32.mrb[174].mxu0 }
 0x601   : > { %v12125_v4 = vpop.f32.mrb[175].mxu0 }
 0x602   : > { %v12126_v15 = vadd.f32 %v12125_v4, %v12124_v60  ;;  %v16994_v30 = vadd.f32 %v16750_v53, %v12123_v12 }
 0x604   : > { %v16997_v34 = vadd.f32 %v16754_v51, %v12126_v15 }
 0x606   : > { %v12127_v11 = vpop.f32.mrb[176].mxu0 }
 0x607   : > { %v12128_v59 = vpop.f32.mrb[177].mxu0 }
 0x608   : > { %v12129_v57 = vadd.f32 %v12128_v59, %v12127_v11  ;;  %v12130_v17 = vpop.f32.mrb[178].mxu0 }
 0x609   : > { %v12131_v52 = vpop.f32.mrb[179].mxu0 }
 0x60a   : > { %v12132_v32 = vadd.f32 %v12131_v52, %v12130_v17  ;;  %v17000_v14 = vadd.f32 %v16758_v6, %v12129_v57 }
 0x60c   : > { %v17003_v33 = vadd.f32 %v16768_v27, %v12132_v32  ;;  %v7585_v32 = vld [vmem:[%s14347_s21 + $0x10] sm:$0xff] }
 0x60e   : > { %v12133_v23 = vpop.f32.mrb[180].mxu0 }
 0x60f   : > { %v12134_v38 = vpop.f32.mrb[181].mxu0 }
 0x610   : > { %v12135_v43 = vadd.f32 %v12134_v38, %v12133_v23  ;;  %v12136_v53 = vpop.f32.mrb[182].mxu0 }
 0x611   : > { %v12137_v55 = vpop.f32.mrb[183].mxu0 }
 0x612   : > { %v12138_v54 = vadd.f32 %v12137_v55, %v12136_v53  ;;  %v17006_v51 = vadd.f32 %v16775_v20, %v12135_v43 }
 0x614   : > { %v17009_v63 = vadd.f32 %v16778_v47, %v12138_v54 }
 0x616   : > { %v12139_v5 = vpop.f32.mrb[184].mxu0 }
 0x617   : > { %v12140_v37 = vpop.f32.mrb[185].mxu0 }
 0x618   : > { %v12141_v7 = vadd.f32 %v12140_v37, %v12139_v5  ;;  %v12142_v6 = vpop.f32.mrb[186].mxu0  ;;  %v7584_v37 = vld [vmem:[%s14347_s21 + $0x8] sm:$0xff] }
 0x619   : > { %v12143_v25 = vpop.f32.mrb[187].mxu0 }
 0x61a   : > { %v12144_v29 = vadd.f32 %v12143_v25, %v12142_v6  ;;  %v17012_v27 = vadd.f32 %v16785_v46, %v12141_v7  ;;  %v17026_v46 = vld [vmem:[%s18014_s6] ss:$0 sm:$0xff] }
 0x61c   : > { %v17015_v31 = vadd.f32 %v16793_v44, %v12144_v29 }
 0x61e   : > { %v12145_v49 = vpop.f32.mrb[188].mxu0 }
 0x61f   : > { %v12146_v62 = vpop.f32.mrb[189].mxu0 }
 0x620   : > { %v12147_v10 = vadd.f32 %v12146_v62, %v12145_v49  ;;  %v12148_v20 = vpop.f32.mrb[190].mxu0 }
 0x621   : > { %v12149_v1 = vpop.f32.mrb[191].mxu0 }
 0x622   : > { %v12150_v21 = vadd.f32 %v12149_v1, %v12148_v20  ;;  %v17018_v47 = vadd.f32 %v16797_v50, %v12147_v10 }
 0x624   : > { %v17021_v12 = vadd.f32 %v16799_v16, %v12150_v21  ;;  %v17062_v21 = vld [vmem:[#allocation2 + $0xe8] sm:$0xff] }
 0x626   : > { %v12985_v60 = vpop.f32.mrb[96].mxu0 }
 0x627   : > { %v13385_v44 = vadd.f32 %v16907_v8, %v12985_v60  ;;  %v7257_v4 = vpop.f32.mrb[97].mxu0 }
 0x628   : > { %v13388_v15 = vadd.f32 %v16889_v39, %v7257_v4  ;;  %v12986_v11 = vpop.f32.mrb[98].mxu0 }
 0x629   : > { %v7521_v59 = vadd.f32 %v13385_v44, %v17026_v46  ;;  %v13391_v50 = vadd.f32 %v16913_v61, %v12986_v11  ;;  %v7260_v16 = vpop.f32.mrb[99].mxu0  ;;  %v7583_v61 = vld [vmem:[%s14347_s21] sm:$0xff] }
 0x62a   : > { %v7519_v57 = vadd.f32 %v13388_v15, %v17026_v46  ;;  %v13394_v17 = vadd.f32 %v16892_v42, %v7260_v16  ;;  %v7586_v42 = vld [vmem:[%s14347_s21 + $0x18] sm:$0xff] }
 0x62b   : > { %v17034_v52 = vmax.f32 %v7521_v59, 0.0  ;;  %v7522_v8 = vadd.f32 %v13391_v50, %v17026_v46  ;;  %v7587_v50 = vld [vmem:[%s14347_s21 + $0x20] sm:$0xff] }
 0x62c   : > { %v7551_v23 = vmax.f32 %v7519_v57, 0.0  ;;  %v7520_v39 = vadd.f32 %v13394_v17, %v17026_v46  ;;  %v7590_v17 = vld [vmem:[%s14347_s21 + $0x38] sm:$0xff] }
 0x62d   : > { %v7617_v38 = vadd.f32 %v7585_v32, %v17034_v52  ;;  %7681 = vst [vmem:[#allocation2 + $0x128] sm:$0xff] %v17034_v52  ;;  %v17042_v43 = vmax.f32 %v7522_v8, 0.0 }
 0x62e   : > { %v7615_v53 = vadd.f32 %v7583_v61, %v7551_v23  ;;  %7679 = vst [vmem:[#allocation2 + $0x108] sm:$0xff] %v7551_v23  ;;  %v17045_v55 = vmax.f32 %v7520_v39, 0.0  ;;  %v12989_v54 = vpop.f32.mrb[100].mxu0  ;;  %v7783_v60 = vpack.c.bf16 %v7551_v23, %v17062_v21  ;;  %v7588_v39 = vld [vmem:[%s14347_s21 + $0x28] sm:$0xff] }
 0x62f   : > { %7649 = vst [vmem:[%s14347_s21 + $0x10] sm:$0xff] %v7617_v38  ;;  %v7618_v5 = vadd.f32 %v7586_v42, %v17042_v43  ;;  %7682 = vst [vmem:[#allocation2 + $0x130] sm:$0xff] %v17042_v43  ;;  %v13397_v7 = vadd.f32 %v16928_v9, %v12989_v54  ;;  %v7273_v6 = vpop.f32.mrb[101].mxu0  ;;  %v7912_v25 = vpack.c.bf16 %v17042_v43, %v17034_v52 }
 0x630   : > { %7647 = vst [vmem:[%s14347_s21] sm:$0xff] %v7615_v53  ;;  %v7616_v29 = vadd.f32 %v7584_v37, %v17045_v55  ;;  %7680 = vst [vmem:[#allocation2 + $0x110] sm:$0xff] %v17045_v55  ;;  %v13400_v49 = vadd.f32 %v16922_v0, %v7273_v6  ;;  %v12990_v62 = vpop.f32.mrb[102].mxu0  ;;  %v7911_v10 = vpack.c.bf16 %v17045_v55, %v7551_v23 }
 0x631   : > { %7650 = vst [vmem:[%s14347_s21 + $0x18] sm:$0xff] %v7618_v5  ;;  %v7525_v20 = vadd.f32 %v13397_v7, %v17026_v46  ;;  %v13403_v9 = vadd.f32 %v16934_v2, %v12990_v62  ;;  %v7276_v1 = vpop.f32.mrb[103].mxu0  ;;  %v7589_v2 = vld [vmem:[%s14347_s21 + $0x30] sm:$0xff] }
 0x632   : > { %7648 = vst [vmem:[%s14347_s21 + $0x8] sm:$0xff] %v7616_v29  ;;  %v7523_v44 = vadd.f32 %v13400_v49, %v17026_v46  ;;  %v13406_v0 = vadd.f32 %v16925_v58, %v7276_v1  ;;  %8431 = vmatprep.mubr.bf16.mxu1 %v7911_v10  ;;  %8962 = vmatprep.mubr.bf16.mxu0 %v7911_v10  ;;  %v7593_v10 = vld [vmem:[%s14347_s21 + $0x50] sm:$0xff] }
 0x633   : > { %v17068_v4 = vmax.f32 %v7525_v20, 0.0  ;;  %v7526_v15 = vadd.f32 %v13403_v9, %v17026_v46  ;;  %8432 = vmatmul.mubr.bf16.gmra.mrb[32].mxu1 %v7783_v60  ;;  %8963 = vmatmul.mubr.bf16.vlgmr.msra.gmra.mrb[192].mxu0 %v7783_v60  ;;  %v7594_v60 = vld [vmem:[%s14347_s21 + $0x58] sm:$0xff] }
 0x634   : > { %v17072_v11 = vmax.f32 %v7523_v44, 0.0  ;;  %v7524_v59 = vadd.f32 %v13406_v0, %v17026_v46  ;;  %8439 = vmatprep.mubr.bf16.mxu1 %v7912_v25  ;;  %8970 = vmatprep.mubr.bf16.mxu0 %v7912_v25  ;;  %v7784_v25 = vpack.c.bf16 %v17034_v52, %v17062_v21 }
 0x635   : > { %v7621_v58 = vadd.f32 %v7589_v2, %v17068_v4  ;;  %7685 = vst [vmem:[#allocation2 + $0x168] sm:$0xff] %v17068_v4  ;;  %v17078_v16 = vmax.f32 %v7526_v15, 0.0  ;;  %v7592_v2 = vld [vmem:[%s14347_s21 + $0x48] sm:$0xff] }
 0x636   : > { %v7619_v57 = vadd.f32 %v7587_v50, %v17072_v11  ;;  %7683 = vst [vmem:[#allocation2 + $0x148] sm:$0xff] %v17072_v11  ;;  %v17083_v8 = vmax.f32 %v7524_v59, 0.0  ;;  %v12993_v32 = vpop.f32.mrb[104].mxu0 }
 0x637   : > { %7653 = vst [vmem:[%s14347_s21 + $0x30] sm:$0xff] %v7621_v58  ;;  %v7622_v23 = vadd.f32 %v7590_v17, %v17078_v16  ;;  %7686 = vst [vmem:[#allocation2 + $0x170] sm:$0xff] %v17078_v16  ;;  %v13409_v38 = vadd.f32 %v16943_v40, %v12993_v32  ;;  %v7289_v61 = vpop.f32.mrb[105].mxu0  ;;  %v7914_v53 = vpack.c.bf16 %v17078_v16, %v17068_v4 }
 0x638   : > { %7651 = vst [vmem:[%s14347_s21 + $0x20] sm:$0xff] %v7619_v57  ;;  %v7620_v42 = vadd.f32 %v7588_v39, %v17083_v8  ;;  %7684 = vst [vmem:[#allocation2 + $0x150] sm:$0xff] %v17083_v8  ;;  %v13412_v54 = vadd.f32 %v16937_v13, %v7289_v61  ;;  %v12994_v5 = vpop.f32.mrb[106].mxu0  ;;  %v7913_v37 = vpack.c.bf16 %v17083_v8, %v17072_v11 }
 0x639   : > { %7654 = vst [vmem:[%s14347_s21 + $0x38] sm:$0xff] %v7622_v23  ;;  %v7529_v7 = vadd.f32 %v13409_v38, %v17026_v46  ;;  %v13415_v40 = vadd.f32 %v16949_v48, %v12994_v5  ;;  %v7292_v6 = vpop.f32.mrb[107].mxu0  ;;  %v7785_v61 = vpack.c.bf16 %v17072_v11, %v17062_v21 }
 0x63a   : > { %7652 = vst [vmem:[%s14347_s21 + $0x28] sm:$0xff] %v7620_v42  ;;  %v7527_v29 = vadd.f32 %v13412_v54, %v17026_v46  ;;  %v13418_v49 = vadd.f32 %v16940_v24, %v7292_v6  ;;  %v7591_v24 = vld [vmem:[%s14347_s21 + $0x40] sm:$0xff] }
 0x63b   : > { %v17106_v13 = vmax.f32 %v7529_v7, 0.0  ;;  %v7530_v62 = vadd.f32 %v13415_v40, %v17026_v46  ;;  %8440 = vmatmul.mubr.bf16.gmra.mrb[36].mxu1 %v7784_v25  ;;  %8971 = vmatmul.mubr.bf16.gmra.mrb[196].mxu0 %v7784_v25  ;;  %v7597_v7 = vld [vmem:[%s14347_s21 + $0x70] sm:$0xff]  ;;  %v7595_v6 = vld [vmem:[%s14347_s21 + $0x60] sm:$0xff] }
 0x63c   : > { %v17110_v48 = vmax.f32 %v7527_v29, 0.0  ;;  %v7528_v20 = vadd.f32 %v13418_v49, %v17026_v46  ;;  %8447 = vmatprep.mubr.bf16.mxu1 %v7913_v37  ;;  %8978 = vmatprep.mubr.bf16.mxu0 %v7913_v37  ;;  %v12191_v37 = vpop.f32.mrb[0].mxu1 }
 0x63d   : > { %v7625_v52 = vadd.f32 %v7593_v10, %v17106_v13  ;;  %7689 = vst [vmem:[#allocation2 + $0x1a8] sm:$0xff] %v17106_v13  ;;  %v17116_v9 = vmax.f32 %v7530_v62, 0.0  ;;  %v12192_v11 = vpop.f32.mrb[1].mxu1  ;;  %v7598_v10 = vld [vmem:[%s14347_s21 + $0x78] sm:$0xff] }
 0x63e   : > { %v7623_v1 = vadd.f32 %v7591_v24, %v17110_v48  ;;  %7687 = vst [vmem:[#allocation2 + $0x188] sm:$0xff] %v17110_v48  ;;  %v17121_v44 = vmax.f32 %v7528_v20, 0.0  ;;  %v12997_v0 = vpop.f32.mrb[108].mxu0  ;;  %v17158_v29 = vadd.f32 %v12192_v11, %v12191_v37  ;;  %v12194_v49 = vpop.f32.mrb[2].mxu1 }
 0x63f   : > { %7657 = vst [vmem:[%s14347_s21 + $0x50] sm:$0xff] %v7625_v52  ;;  %v7626_v15 = vadd.f32 %v7594_v60, %v17116_v9  ;;  %7690 = vst [vmem:[#allocation2 + $0x1b0] sm:$0xff] %v17116_v9  ;;  %v13421_v59 = vadd.f32 %v16958_v3, %v12997_v0  ;;  %v7305_v58 = vpop.f32.mrb[109].mxu0  ;;  %v17130_v50 = vpack.c.bf16 %v17116_v9, %v17106_v13  ;;  %v12195_v52 = vpop.f32.mrb[3].mxu1 }
 0x640   : > { %7655 = vst [vmem:[%s14347_s21 + $0x40] sm:$0xff] %v7623_v1  ;;  %v7624_v57 = vadd.f32 %v7592_v2, %v17121_v44  ;;  %7688 = vst [vmem:[#allocation2 + $0x190] sm:$0xff] %v17121_v44  ;;  %v13424_v17 = vadd.f32 %v16952_v19, %v7305_v58  ;;  %v12998_v32 = vpop.f32.mrb[110].mxu0  ;;  %v7915_v23 = vpack.c.bf16 %v17121_v44, %v17110_v48  ;;  %v7596_v1 = vld [vmem:[%s14347_s21 + $0x68] sm:$0xff] }
 0x641   : > { %7658 = vst [vmem:[%s14347_s21 + $0x58] sm:$0xff] %v7626_v15  ;;  %v7533_v3 = vadd.f32 %v13421_v59, %v17026_v46  ;;  %v13427_v39 = vadd.f32 %v16964_v41, %v12998_v32  ;;  %v7308_v38 = vpop.f32.mrb[111].mxu0 }
 0x642   : > { %7656 = vst [vmem:[%s14347_s21 + $0x48] sm:$0xff] %v7624_v57  ;;  %v7531_v42 = vadd.f32 %v13424_v17, %v17026_v46  ;;  %v13430_v19 = vadd.f32 %v16955_v18, %v7308_v38 }
 0x643   : > { %v17146_v54 = vmax.f32 %v7533_v3, 0.0  ;;  %v7534_v5 = vadd.f32 %v13427_v39, %v17026_v46  ;;  %8448 = vmatmul.mubr.bf16.gmra.mrb[40].mxu1 %v7785_v61  ;;  %8979 = vmatmul.mubr.bf16.gmra.mrb[200].mxu0 %v7785_v61  ;;  %v7786_v3 = vpack.c.bf16 %v17068_v4, %v17062_v21  ;;  %v17187_v39 = vadd.f32 %v12195_v52, %v12194_v49  ;;  %v7602_v49 = vld [vmem:[%s14347_s21 + $0x98] sm:$0xff]  ;;  %v7600_v52 = vld [vmem:[%s14347_s21 + $0x88] sm:$0xff] }
 0x644   : > { %v17150_v41 = vmax.f32 %v7531_v42, 0.0  ;;  %v7532_v40 = vadd.f32 %v13430_v19, %v17026_v46  ;;  %8455 = vmatprep.mubr.bf16.mxu1 %v7914_v53  ;;  %8986 = vmatprep.mubr.bf16.mxu0 %v7914_v53  ;;  %v7601_v19 = vld [vmem:[%s14347_s21 + $0x90] sm:$0xff] }
 0x645   : > { %v7629_v18 = vadd.f32 %v7597_v7, %v17146_v54  ;;  %7693 = vst [vmem:[#allocation2 + $0x1e8] sm:$0xff] %v17146_v54  ;;  %v17156_v25 = vmax.f32 %v7534_v5, 0.0  ;;  %v7599_v7 = vld [vmem:[%s14347_s21 + $0x80] sm:$0xff] }
 0x646   : > { %v7627_v62 = vadd.f32 %v7595_v6, %v17150_v41  ;;  %7691 = vst [vmem:[#allocation2 + $0x1c8] sm:$0xff] %v17150_v41  ;;  %v17163_v20 = vmax.f32 %v7532_v40, 0.0  ;;  %v13001_v53 = vpop.f32.mrb[112].mxu0 }
 0x647   : > { %7661 = vst [vmem:[%s14347_s21 + $0x70] sm:$0xff] %v7629_v18  ;;  %v7630_v24 = vadd.f32 %v7598_v10, %v17156_v25  ;;  %7694 = vst [vmem:[#allocation2 + $0x1f0] sm:$0xff] %v17156_v25  ;;  %v13433_v60 = vadd.f32 %v16976_v56, %v13001_v53  ;;  %v7321_v0 = vpop.f32.mrb[113].mxu0  ;;  %v17172_v15 = vpack.c.bf16 %v17156_v25, %v17146_v54 }
 0x648   : > { %7659 = vst [vmem:[%s14347_s21 + $0x60] sm:$0xff] %v7627_v62  ;;  %v7628_v2 = vadd.f32 %v7596_v1, %v17163_v20  ;;  %7692 = vst [vmem:[#allocation2 + $0x1d0] sm:$0xff] %v17163_v20  ;;  %v13436_v59 = vadd.f32 %v16967_v28, %v7321_v0  ;;  %v13002_v58 = vpop.f32.mrb[114].mxu0  ;;  %v17180_v57 = vpack.c.bf16 %v17163_v20, %v17150_v41 }
 0x649   : > { %7662 = vst [vmem:[%s14347_s21 + $0x78] sm:$0xff] %v7630_v24  ;;  %v7537_v56 = vadd.f32 %v13433_v60, %v17026_v46  ;;  %v13439_v17 = vadd.f32 %v16984_v36, %v13002_v58  ;;  %v7324_v32 = vpop.f32.mrb[115].mxu0  ;;  %v12197_v36 = vpop.f32.mrb[4].mxu1 }
 0x64a   : > { %7660 = vst [vmem:[%s14347_s21 + $0x68] sm:$0xff] %v7628_v2  ;;  %v7535_v28 = vadd.f32 %v13436_v59, %v17026_v46  ;;  %v13442_v38 = vadd.f32 %v16973_v45, %v7324_v32  ;;  %v12198_v37 = vpop.f32.mrb[5].mxu1 }
 0x64b   : > { %v17192_v61 = vmax.f32 %v7537_v56, 0.0  ;;  %v7538_v42 = vadd.f32 %v13439_v17, %v17026_v46  ;;  %8456 = vmatmul.mubr.bf16.gmra.mrb[44].mxu1 %v7786_v3  ;;  %8987 = vmatmul.mubr.bf16.gmra.mrb[204].mxu0 %v7786_v3  ;;  %v17204_v11 = vadd.f32 %v12198_v37, %v12197_v36  ;;  %v12200_v18 = vpop.f32.mrb[6].mxu1  ;;  %v7787_v3 = vpack.c.bf16 %v17110_v48, %v17062_v21  ;;  %v7603_v37 = vld [vmem:[%s14347_s21 + $0xa0] sm:$0xff] }
 0x64c   : > { %v17196_v5 = vmax.f32 %v7535_v28, 0.0  ;;  %v7536_v4 = vadd.f32 %v13442_v38, %v17026_v46  ;;  %8463 = vmatprep.mubr.bf16.mxu1 %v7915_v23  ;;  %8994 = vmatprep.mubr.bf16.mxu0 %v7915_v23  ;;  %v12201_v10 = vpop.f32.mrb[7].mxu1 }
 0x64d   : > { %v7633_v45 = vadd.f32 %v7601_v19, %v17192_v61  ;;  %7697 = vst [vmem:[#allocation2 + $0x228] sm:$0xff] %v17192_v61  ;;  %v17202_v40 = vmax.f32 %v7538_v42, 0.0  ;;  %v17220_v0 = vadd.f32 %v12201_v10, %v12200_v18  ;;  %v12203_v36 = vpop.f32.mrb[8].mxu1  ;;  %v7605_v19 = vld [vmem:[%s14347_s21 + $0xb0] sm:$0xff] }
 0x64e   : > { %v7631_v6 = vadd.f32 %v7599_v7, %v17196_v5  ;;  %7695 = vst [vmem:[#allocation2 + $0x208] sm:$0xff] %v17196_v5  ;;  %v17209_v62 = vmax.f32 %v7536_v4, 0.0  ;;  %v13005_v23 = vpop.f32.mrb[116].mxu0  ;;  %v12204_v48 = vpop.f32.mrb[9].mxu1 }
 0x64f   : > { %7665 = vst [vmem:[%s14347_s21 + $0x90] sm:$0xff] %v7633_v45  ;;  %v7634_v53 = vadd.f32 %v7602_v49, %v17202_v40  ;;  %7698 = vst [vmem:[#allocation2 + $0x230] sm:$0xff] %v17202_v40  ;;  %v13445_v24 = vadd.f32 %v16994_v30, %v13005_v23  ;;  %v7337_v1 = vpop.f32.mrb[117].mxu0  ;;  %v17218_v60 = vpack.c.bf16 %v17202_v40, %v17192_v61  ;;  %v12206_v18 = vpop.f32.mrb[10].mxu1  ;;  %v7606_v49 = vld [vmem:[%s14347_s21 + $0xb8] sm:$0xff] }
 0x650   : > { %7663 = vst [vmem:[%s14347_s21 + $0x80] sm:$0xff] %v7631_v6  ;;  %v7632_v2 = vadd.f32 %v7600_v52, %v17209_v62  ;;  %7696 = vst [vmem:[#allocation2 + $0x210] sm:$0xff] %v17209_v62  ;;  %v13448_v59 = vadd.f32 %v16988_v35, %v7337_v1  ;;  %v13006_v58 = vpop.f32.mrb[118].mxu0  ;;  %v17228_v56 = vpack.c.bf16 %v17209_v62, %v17196_v5  ;;  %v12207_v10 = vpop.f32.mrb[11].mxu1  ;;  %v7604_v52 = vld [vmem:[%s14347_s21 + $0xa8] sm:$0xff] }
 0x651   : > { %7666 = vst [vmem:[%s14347_s21 + $0x98] sm:$0xff] %v7634_v53  ;;  %v7541_v30 = vadd.f32 %v13445_v24, %v17026_v46  ;;  %v13451_v17 = vadd.f32 %v16997_v34, %v13006_v58  ;;  %v7340_v32 = vpop.f32.mrb[119].mxu0  ;;  %v17252_v7 = vadd.f32 %v12204_v48, %v12203_v36  ;;  %v7609_v48 = vld [vmem:[%s14347_s21 + $0xd0] sm:$0xff] }
 0x652   : > { %7664 = vst [vmem:[%s14347_s21 + $0x88] sm:$0xff] %v7632_v2  ;;  %v7539_v28 = vadd.f32 %v13448_v59, %v17026_v46  ;;  %v13454_v35 = vadd.f32 %v16991_v22, %v7340_v32  ;;  %v17268_v59 = vadd.f32 %v12207_v10, %v12206_v18  ;;  %v7610_v10 = vld [vmem:[%s14347_s21 + $0xd8] sm:$0xff] }
 0x653   : > { %v17238_v38 = vmax.f32 %v7541_v30, 0.0  ;;  %v7542_v42 = vadd.f32 %v13451_v17, %v17026_v46  ;;  %8464 = vmatmul.mubr.bf16.gmra.mrb[48].mxu1 %v7787_v3  ;;  %8995 = vmatmul.mubr.bf16.gmra.mrb[208].mxu0 %v7787_v3 }
 0x654   : > { %v17242_v34 = vmax.f32 %v7539_v28, 0.0  ;;  %v7540_v4 = vadd.f32 %v13454_v35, %v17026_v46  ;;  %8471 = vmatprep.mubr.bf16.mxu1 %v17130_v50  ;;  %9002 = vmatprep.mubr.bf16.mxu0 %v17130_v50  ;;  %v7788_v35 = vpack.c.bf16 %v17106_v13, %v17062_v21 }
 0x655   : > { %v7637_v22 = vadd.f32 %v7605_v19, %v17238_v38  ;;  %7701 = vst [vmem:[#allocation2 + $0x268] sm:$0xff] %v17238_v38  ;;  %v17250_v45 = vmax.f32 %v7542_v42, 0.0 }
 0x656   : > { %v7635_v6 = vadd.f32 %v7603_v37, %v17242_v34  ;;  %7699 = vst [vmem:[#allocation2 + $0x248] sm:$0xff] %v17242_v34  ;;  %v17257_v23 = vmax.f32 %v7540_v4, 0.0  ;;  %v13009_v50 = vpop.f32.mrb[120].mxu0  ;;  %v12209_v4 = vpop.f32.mrb[12].mxu1  ;;  %v7607_v37 = vld [vmem:[%s14347_s21 + $0xc0] sm:$0xff] }
 0x657   : > { %7669 = vst [vmem:[%s14347_s21 + $0xb0] sm:$0xff] %v7637_v22  ;;  %v7638_v53 = vadd.f32 %v7606_v49, %v17250_v45  ;;  %7702 = vst [vmem:[#allocation2 + $0x270] sm:$0xff] %v17250_v45  ;;  %v13457_v24 = vadd.f32 %v17006_v51, %v13009_v50  ;;  %v7353_v1 = vpop.f32.mrb[121].mxu0  ;;  %v17266_v2 = vpack.c.bf16 %v17250_v45, %v17238_v38  ;;  %v12210_v13 = vpop.f32.mrb[13].mxu1 }
 0x658   : > { %7667 = vst [vmem:[%s14347_s21 + $0xa0] sm:$0xff] %v7635_v6  ;;  %v7636_v58 = vadd.f32 %v7604_v52, %v17257_v23  ;;  %7700 = vst [vmem:[#allocation2 + $0x250] sm:$0xff] %v17257_v23  ;;  %v13460_v30 = vadd.f32 %v17000_v14, %v7353_v1  ;;  %v13010_v17 = vpop.f32.mrb[122].mxu0  ;;  %v17276_v32 = vpack.c.bf16 %v17257_v23, %v17242_v34  ;;  %v12212_v49 = vpop.f32.mrb[14].mxu1  ;;  %v7608_v1 = vld [vmem:[%s14347_s21 + $0xc8] sm:$0xff] }
 0x659   : > { %7670 = vst [vmem:[%s14347_s21 + $0xb8] sm:$0xff] %v7638_v53  ;;  %v7545_v51 = vadd.f32 %v13457_v24, %v17026_v46  ;;  %v13463_v3 = vadd.f32 %v17009_v63, %v13010_v17  ;;  %v7356_v28 = vpop.f32.mrb[123].mxu0  ;;  %v17300_v6 = vadd.f32 %v12210_v13, %v12209_v4  ;;  %v12213_v52 = vpop.f32.mrb[15].mxu1  ;;  %v7789_v4 = vpack.c.bf16 %v17150_v41, %v17062_v21 }
 0x65a   : > { %7668 = vst [vmem:[%s14347_s21 + $0xa8] sm:$0xff] %v7636_v58  ;;  %v7543_v42 = vadd.f32 %v13460_v30, %v17026_v46  ;;  %v13466_v14 = vadd.f32 %v17003_v33, %v7356_v28 }
 0x65b   : > { %v17286_v36 = vmax.f32 %v7545_v51, 0.0  ;;  %v7546_v19 = vadd.f32 %v13463_v3, %v17026_v46  ;;  %8472 = vmatmul.mubr.bf16.gmra.mrb[52].mxu1 %v7788_v35  ;;  %9003 = vmatmul.mubr.bf16.gmra.mrb[212].mxu0 %v7788_v35  ;;  %v17316_v51 = vadd.f32 %v12213_v52, %v12212_v49 }
 0x65c   : > { %v17290_v63 = vmax.f32 %v7543_v42, 0.0  ;;  %v7544_v22 = vadd.f32 %v13466_v14, %v17026_v46  ;;  %8479 = vmatprep.mubr.bf16.mxu1 %v17180_v57  ;;  %9010 = vmatprep.mubr.bf16.mxu0 %v17180_v57 }
 0x65d   : > { %v7641_v33 = vadd.f32 %v7609_v48, %v17286_v36  ;;  %7705 = vst [vmem:[#allocation2 + $0x2a8] sm:$0xff] %v17286_v36  ;;  %v17298_v18 = vmax.f32 %v7546_v19, 0.0 }
 0x65e   : > { %v7639_v50 = vadd.f32 %v7607_v37, %v17290_v63  ;;  %7703 = vst [vmem:[#allocation2 + $0x288] sm:$0xff] %v17290_v63  ;;  %v17305_v53 = vmax.f32 %v7544_v22, 0.0  ;;  %v13013_v57 = vpop.f32.mrb[124].mxu0  ;;  %v7613_v37 = vld [vmem:[%s14347_s21 + $0xf0] sm:$0xff] }
 0x65f   : > { %7673 = vst [vmem:[%s14347_s21 + $0xd0] sm:$0xff] %v7641_v33  ;;  %v7642_v24 = vadd.f32 %v7610_v10, %v17298_v18  ;;  %7706 = vst [vmem:[#allocation2 + $0x2b0] sm:$0xff] %v17298_v18  ;;  %v13469_v58 = vadd.f32 %v17018_v47, %v13013_v57  ;;  %v7369_v30 = vpop.f32.mrb[125].mxu0  ;;  %v17314_v17 = vpack.c.bf16 %v17298_v18, %v17286_v36  ;;  %v12215_v33 = vpop.f32.mrb[16].mxu1 }
 0x660   : > { %7671 = vst [vmem:[%s14347_s21 + $0xc0] sm:$0xff] %v7639_v50  ;;  %v7640_v3 = vadd.f32 %v7608_v1, %v17305_v53  ;;  %7704 = vst [vmem:[#allocation2 + $0x290] sm:$0xff] %v17305_v53  ;;  %v13472_v28 = vadd.f32 %v17012_v27, %v7369_v30  ;;  %v13014_v35 = vpop.f32.mrb[126].mxu0  ;;  %v17324_v42 = vpack.c.bf16 %v17305_v53, %v17290_v63  ;;  %v7611_v50 = vld [vmem:[%s14347_s21 + $0xe0] sm:$0xff]  ;;  %v7612_v30 = vld [vmem:[%s14347_s21 + $0xe8] sm:$0xff] }
 0x661   : > { %7674 = vst [vmem:[%s14347_s21 + $0xd8] sm:$0xff] %v7642_v24  ;;  %v7549_v47 = vadd.f32 %v13469_v58, %v17026_v46  ;;  %v13475_v14 = vadd.f32 %v17021_v12, %v13014_v35  ;;  %v7372_v19 = vpop.f32.mrb[127].mxu0 }
 0x662   : > { %7672 = vst [vmem:[%s14347_s21 + $0xc8] sm:$0xff] %v7640_v3  ;;  %v7547_v48 = vadd.f32 %v13472_v28, %v17026_v46  ;;  %v13478_v27 = vadd.f32 %v17015_v31, %v7372_v19  ;;  %v12216_v31 = vpop.f32.mrb[17].mxu1  ;;  %v7790_v19 = vpack.c.bf16 %v17146_v54, %v17062_v21  ;;  %v14065_v54 = vld [vmem:[%s18015_s7 + $0x148] sm:$0xff]  }
 0x663   : > { %v17334_v22 = vmax.f32 %v7549_v47, 0.0  ;;  %v7550_v13 = vadd.f32 %v13475_v14, %v17026_v46  ;;  %8480 = vmatmul.mubr.bf16.gmra.mrb[56].mxu1 %v7789_v4  ;;  %9011 = vmatmul.mubr.bf16.gmra.mrb[216].mxu0 %v7789_v4  ;;  %v17348_v57 = vadd.f32 %v12216_v31, %v12215_v33  ;;  %v12218_v52 = vpop.f32.mrb[18].mxu1  ;;  %v17370_v47 = vpack.c.bf16 %v17062_v21, %v17062_v21 }
 0x664   : > { %v17338_v12 = vmax.f32 %v7547_v48, 0.0  ;;  %v7548_v41 = vadd.f32 %v13478_v27, %v17026_v46  ;;  %8487 = vmatprep.mubr.bf16.mxu1 %v17172_v15  ;;  %9018 = vmatprep.mubr.bf16.mxu0 %v17172_v15  ;;  %v7614_v46 = vld [vmem:[%s14347_s21 + $0xf8] sm:$0xff]  ;;  %v12219_v1 = vpop.f32.mrb[19].mxu1 }
 0x665   : > { %v7645_v49 = vadd.f32 %v7613_v37, %v17334_v22  ;;  %7709 = vst [vmem:[#allocation2 + $0x2e8] sm:$0xff] %v17334_v22  ;;  %v17346_v10 = vmax.f32 %v7550_v13, 0.0  ;;  %v17363_v28 = vadd.f32 %v12219_v1, %v12218_v52  ;;  %v12221_v4 = vpop.f32.mrb[20].mxu1  ;;  %v17407_v1 = vpack.c.bf16 %v17192_v61, %v17062_v21 }
 0x666   : > { %v7643_v24 = vadd.f32 %v7611_v50, %v17338_v12  ;;  %7707 = vst [vmem:[#allocation2 + $0x2c8] sm:$0xff] %v17338_v12  ;;  %v17353_v15 = vmax.f32 %v7548_v41, 0.0  ;;  %v12222_v48 = vpop.f32.mrb[21].mxu1  ;;  %v17388_v41 = vpack.c.bf16 %v17196_v5, %v17062_v21  ;;  %v14066_v5 = vld [vmem:[%s18015_s7 + $0x150] sm:$0xff]  }
 0x667   : > { %7677 = vst [vmem:[%s14347_s21 + $0xf0] sm:$0xff] %v7645_v49  ;;  %v7646_v58 = vadd.f32 %v7614_v46, %v17346_v10  ;;  %7710 = vst [vmem:[#allocation2 + $0x2f0] sm:$0xff] %v17346_v10  ;;  %v17361_v3 = vpack.c.bf16 %v17346_v10, %v17334_v22  ;;  %v17382_v27 = vadd.f32 %v12222_v48, %v12221_v4  ;;  %v12224_v13 = vpop.f32.mrb[22].mxu1 }
 0x668   : > { %7675 = vst [vmem:[%s14347_s21 + $0xe0] sm:$0xff] %v7643_v24  ;;  %v7644_v35 = vadd.f32 %v7612_v30, %v17353_v15  ;;  %7708 = vst [vmem:[#allocation2 + $0x2d0] sm:$0xff] %v17353_v15  ;;  %v17374_v14 = vpack.c.bf16 %v17353_v15, %v17338_v12  ;;  %v12225_v33 = vpop.f32.mrb[23].mxu1 }
 0x669   : > { %7678 = vst [vmem:[%s14347_s21 + $0xf8] sm:$0xff] %v7646_v58  ;;  %v17384_v37 = vadd.f32 %v12225_v33, %v12224_v13  ;;  %v12227_v31 = vpop.f32.mrb[24].mxu1  ;;  %v17425_v13 = vpack.c.bf16 %v17242_v34, %v17062_v21  ;;  %v14069_v33 = vld [vmem:[%s18015_s7 + $0x168] sm:$0xff]   ;;  %v14070_v34 = vld [vmem:[%s18015_s7 + $0x170] sm:$0xff]  }
 0x66a   : > { %7676 = vst [vmem:[%s14347_s21 + $0xe8] sm:$0xff] %v7644_v35  ;;  %v12228_v49 = vpop.f32.mrb[25].mxu1 }
 0x66b   : > { %8488 = vmatmul.mubr.bf16.gmra.mrb[60].mxu1 %v7790_v19  ;;  %9019 = vmatmul.mubr.bf16.gmra.mrb[220].mxu0 %v7790_v19  ;;  %v17401_v50 = vadd.f32 %v12228_v49, %v12227_v31  ;;  %v12230_v52 = vpop.f32.mrb[26].mxu1  ;;  %v14068_v19 = vld [vmem:[%s18015_s7 + $0x160] sm:$0xff]   ;;  %v8039_v31 = vpack.c.bf16 %v17062_v21, %v17045_v55  ;;  %v14071_v49 = vld [vmem:[%s18015_s7 + $0x178] sm:$0xff]   ;;  %v8040_v55 = vpack.c.bf16 %v17062_v21, %v17042_v43 }
 0x66c   : > { %9026 = vmatprep.mubr.bf16.mxu0 %v17228_v56  ;;  %13031 = vmatprep.mubr.bf16.mxu1 %v17370_v47  ;;  %v12231_v24 = vpop.f32.mrb[27].mxu1  ;;  %v17466_v43 = vpack.c.bf16 %v17286_v36, %v17062_v21  ;;  %v17486_v36 = vpack.c.bf16 %v17334_v22, %v17062_v21  ;;  %v14076_v22 = vld [vmem:[%s18015_s7 + $0x1d0] sm:$0xff]  }
 0x66d   : > { %v17403_v46 = vadd.f32 %v12231_v24, %v12230_v52  ;;  %v12233_v58 = vpop.f32.mrb[28].mxu1  ;;  %v8041_v52 = vpack.c.bf16 %v17062_v21, %v17083_v8  ;;  %v8042_v24 = vpack.c.bf16 %v17062_v21, %v17078_v16  ;;  %v8044_v8 = vpack.c.bf16 %v17062_v21, %v17116_v9  ;;  %v14073_v9 = vld [vmem:[%s18015_s7 + $0x180] sm:$0xff]  }
 0x66e   : > { %v12234_v30 = vpop.f32.mrb[29].mxu1  ;;  %v8045_v16 = vpack.c.bf16 %v17062_v21, %v17163_v20  ;;  %v14074_v20 = vld [vmem:[%s18015_s7 + $0x1c8] sm:$0xff]  }
 0x66f   : > { %v17416_v35 = vadd.f32 %v12234_v30, %v12233_v58  ;;  %v12236_v61 = vpop.f32.mrb[30].mxu1  ;;  %v14078_v58 = vld [vmem:[%s18015_s7 + $0x1d8] sm:$0xff]  }
 0x670   : > { %v12237_v4 = vpop.f32.mrb[31].mxu1  ;;  %v14079_v30 = vld [vmem:[%s18015_s7 + $0x198] sm:$0xff]  }
 0x671   : > { %v17421_v48 = vadd.f32 %v12237_v4, %v12236_v61  ;;  %v14080_v61 = vld [vmem:[%s18015_s7 + $0x1e0] sm:$0xff]   ;;  %v14082_v4 = vld [vmem:[%s18015_s7 + $0x1e8] sm:$0xff]  }
 0x673   : > { %13032 = vmatmul.mubr.bf16.vlgmr.msra.gmra.mrb[64].mxu1 %v17370_v47  ;;  %9027 = vmatmul.mubr.bf16.gmra.mrb[224].mxu0 %v17388_v41 }
 0x674   : > { %9034 = vmatprep.mubr.bf16.mxu0 %v17218_v60  ;;  %13064 = vmatpush3.bf16.msra.mxu1 %v16981_v26  ;;  %v14067_v26 = vld [vmem:[%s18015_s7 + $0x158] sm:$0xff]  }
 0x675   : > { %13035 = vmatprep.mubr.bf16.mxu1 %v17370_v47  ;;  %13065 = vmatprep.subr.bf16.mxu1 %v14065_v54 }
 0x678   : > { %13066 = vmatpush3.bf16.msra.mxu1 %v14065_v54  ;;  %v17439_v54 = vpack.c.bf16 %v17238_v38, %v17062_v21  ;;  %v14072_v38 = vld [vmem:[%s18015_s7 + $0x1c0] sm:$0xff]  }
 0x679   : > { %13067 = vmatprep.subr.bf16.mxu1 %v14066_v5 }
 0x67b   : > { %13036 = vmatmul.mubr.bf16.gmra.mrb[68].mxu1 %v17370_v47  ;;  %9035 = vmatmul.mubr.bf16.gmra.mrb[228].mxu0 %v17407_v1 }
 0x67c   : > { %9042 = vmatprep.mubr.bf16.mxu0 %v17276_v32  ;;  %13039 = vmatprep.mubr.bf16.mxu1 %v17370_v47 }
 0x67d   : > { %13068 = vmatpush3.bf16.msra.mxu1 %v14066_v5  ;;  %v17456_v5 = vpack.c.bf16 %v17290_v63, %v17062_v21  ;;  %v8043_v63 = vpack.c.bf16 %v17062_v21, %v17121_v44  ;;  %v8046_v44 = vpack.c.bf16 %v17062_v21, %v17156_v25  ;;  %v14075_v25 = vld [vmem:[%s18015_s7 + $0x188] sm:$0xff]  }
 0x67e   : > { %13069 = vmatprep.subr.bf16.mxu1 %v14067_v26 }
 0x681   : > { %13070 = vmatpush3.bf16.msra.mxu1 %v14067_v26  ;;  %v17476_v26 = vpack.c.bf16 %v17338_v12, %v17062_v21  ;;  %v14077_v12 = vld [vmem:[%s18015_s7 + $0x190] sm:$0xff]  }
 0x682   : > { %13071 = vmatprep.subr.bf16.mxu1 %v14068_v19 }
 0x683   : > { %13040 = vmatmul.mubr.bf16.gmra.mrb[72].mxu1 %v17370_v47  ;;  %9043 = vmatmul.mubr.bf16.gmra.mrb[232].mxu0 %v17425_v13 }
 0x684   : > { %9050 = vmatprep.mubr.bf16.mxu0 %v17266_v2  ;;  %13043 = vmatprep.mubr.bf16.mxu1 %v17370_v47 }
 0x685   : > { %13072 = vmatpush3.bf16.msra.mxu1 %v14068_v19  ;;  %v14081_v19 = vld [vmem:[%s18015_s7 + $0x1a0] sm:$0xff]  }
 0x686   : > { %13073 = vmatprep.subr.bf16.mxu1 %v14069_v33 }
 0x689   : > { %13074 = vmatpush3.bf16.msra.mxu1 %v14069_v33  ;;  %v14083_v33 = vld [vmem:[%s18015_s7 + $0x1a8] sm:$0xff]  }
 0x68a   : > { %13075 = vmatprep.subr.bf16.mxu1 %v14070_v34 }
 0x68b   : > { %13044 = vmatmul.mubr.bf16.gmra.mrb[76].mxu1 %v17370_v47  ;;  %9051 = vmatmul.mubr.bf16.gmra.mrb[236].mxu0 %v17439_v54 }
 0x68c   : > { %13047 = vmatprep.mubr.bf16.mxu1 %v8039_v31  ;;  %9058 = vmatprep.mubr.bf16.mxu0 %v17324_v42 }
 0x68d   : > { %13076 = vmatpush3.bf16.msra.mxu1 %v14070_v34  ;;  %v14084_v34 = vld [vmem:[%s18015_s7 + $0x1f0] sm:$0xff]  }
 0x68e   : > { %13077 = vmatprep.subr.bf16.mxu1 %v14071_v49 }
 0x691   : > { %13078 = vmatpush3.bf16.msra.mxu1 %v14071_v49  ;;  %v14086_v49 = vld [vmem:[%s18015_s7 + $0x1f8] sm:$0xff]  }
 0x692   : > { %12447 = vmatprep.subr.bf16.mxu1 %v14072_v38  ;;  %v17533_v38 = vpack.c.bf16 %v17062_v21, %v17209_v62  ;;  %v17548_v62 = vpack.c.bf16 %v17062_v21, %v17257_v23  ;;  %v17568_v23 = vpack.c.bf16 %v17062_v21, %v17353_v15 }
 0x693   : > { %13048 = vmatmul.mubr.bf16.gmra.mrb[80].mxu1 %v8040_v55  ;;  %9059 = vmatmul.mubr.bf16.gmra.mrb[240].mxu0 %v17456_v5 }
 0x694   : > { %13051 = vmatprep.mubr.bf16.mxu1 %v8041_v52  ;;  %9066 = vmatprep.mubr.bf16.mxu0 %v17314_v17 }
 0x69b   : > { %13052 = vmatmul.mubr.bf16.gmra.mrb[84].mxu1 %v8042_v24  ;;  %9067 = vmatmul.mubr.bf16.gmra.mrb[244].mxu0 %v17466_v43 }
 0x69c   : > { %13055 = vmatprep.mubr.bf16.mxu1 %v8043_v63  ;;  %9074 = vmatprep.mubr.bf16.mxu0 %v17374_v14 }
 0x6a3   : > { %13056 = vmatmul.mubr.bf16.gmra.mrb[88].mxu1 %v8044_v8  ;;  %9075 = vmatmul.mubr.bf16.gmra.mrb[248].mxu0 %v17476_v26 }
 0x6a4   : > { %13059 = vmatprep.mubr.bf16.mxu1 %v8045_v16  ;;  %9082 = vmatprep.mubr.bf16.mxu0 %v17361_v3 }
 0x6ab   : > { %13060 = vmatmul.mubr.bf16.gmra.mrb[92].mxu1 %v8046_v44  ;;  %9083 = vmatmul.mubr.bf16.gmra.mrb[252].mxu0 %v17486_v36 }
 0x6ac   : > { %13079 = vmatprep.mubr.bf16.mxu1 %v8039_v31  ;;  %v14085_v31 = vld [vmem:[%s18015_s7 + $0x1b0] sm:$0xff]  }
 0x6b3   : > { %13080 = vmatmul.mubr.bf16.vlgmr.msra.gmra.mrb[64].mxu1 %v8040_v55  ;;  %v14087_v55 = vld [vmem:[%s18015_s7 + $0x1b8] sm:$0xff]  }
 0x6b4   : > { %13083 = vmatprep.mubr.bf16.mxu1 %v8041_v52  ;;  %12448 = vmatpush3.bf16.msra.mxu1 %v14073_v9  ;;  %v14088_v52 = vld [vmem:[%s18015_s7 + $0x200] sm:$0xff]  }
 0x6b5   : > { %12449 = vmatprep.subr.bf16.mxu1 %v14074_v20 }
 0x6b8   : > { %12450 = vmatpush3.bf16.msra.mxu1 %v14075_v25 }
 0x6b9   : > { %12451 = vmatprep.subr.bf16.mxu1 %v14076_v22 }
 0x6bb   : > { %13084 = vmatmul.mubr.bf16.gmra.mrb[68].mxu1 %v8042_v24  ;;  %v17544_v24 = vpack.c.bf16 %v17062_v21, %v17202_v40  ;;  %v17564_v40 = vpack.c.bf16 %v17062_v21, %v17298_v18  ;;  %v14089_v18 = vld [vmem:[%s18015_s7 + $0x208] sm:$0xff]  }
 0x6bc   : > { %13087 = vmatprep.mubr.bf16.mxu1 %v8043_v63  ;;  %12452 = vmatpush3.bf16.msra.mxu1 %v14077_v12  ;;  %v17554_v63 = vpack.c.bf16 %v17062_v21, %v17250_v45  ;;  %v17574_v45 = vpack.c.bf16 %v17062_v21, %v17346_v10 }
 0x6bd   : > { %12453 = vmatprep.subr.bf16.mxu1 %v14078_v58 }
 0x6c0   : > { %12454 = vmatpush3.bf16.msra.mxu1 %v14079_v30 }
 0x6c1   : > { %12455 = vmatprep.subr.bf16.mxu1 %v14080_v61 }
 0x6c3   : > { %13088 = vmatmul.mubr.bf16.gmra.mrb[72].mxu1 %v8044_v8  ;;  %v17558_v8 = vpack.c.bf16 %v17062_v21, %v17305_v53  ;;  %v14090_v53 = vld [vmem:[%s18015_s7 + $0x210] sm:$0xff]   ;;  %v14091_v21 = vld [vmem:[%s18015_s7 + $0x218] sm:$0xff]  }
 0x6c4   : > { %13091 = vmatprep.mubr.bf16.mxu1 %v8045_v16  ;;  %12456 = vmatpush3.bf16.msra.mxu1 %v14081_v19 }
 0x6c5   : > { %12457 = vmatprep.subr.bf16.mxu1 %v14082_v4 }
 0x6c8   : > { %12458 = vmatpush3.bf16.msra.mxu1 %v14083_v33 }
 0x6c9   : > { %12459 = vmatprep.subr.bf16.mxu1 %v14084_v34 }
 0x6cb   : > { %13092 = vmatmul.mubr.bf16.gmra.mrb[76].mxu1 %v8046_v44 }
 0x6cc   : > { %13095 = vmatprep.mubr.bf16.mxu1 %v17533_v38  ;;  %12460 = vmatpush3.bf16.msra.mxu1 %v14085_v31 }
 0x6cd   : > { %12461 = vmatprep.subr.bf16.mxu1 %v14086_v49 }
 0x6d0   : > { %12462 = vmatpush3.bf16.msra.mxu1 %v14087_v55 }
 0x6d1   : > { %13111 = vmatprep.subr.bf16.mxu1 %v14088_v52 }
 0x6d3   : > { %13096 = vmatmul.mubr.bf16.gmra.mrb[80].mxu1 %v17544_v24 }
 0x6d4   : > { %13099 = vmatprep.mubr.bf16.mxu1 %v17548_v62 }
 0x6db   : > { %13100 = vmatmul.mubr.bf16.gmra.mrb[84].mxu1 %v17554_v63 }
 0x6dc   : > { %13103 = vmatprep.mubr.bf16.mxu1 %v17558_v8 }
 0x6e3   : > { %13104 = vmatmul.mubr.bf16.gmra.mrb[88].mxu1 %v17564_v40 }
 0x6e4   : > { %13107 = vmatprep.mubr.bf16.mxu1 %v17568_v23 }
 0x6eb   : > { %13108 = vmatmul.mubr.bf16.gmra.mrb[92].mxu1 %v17574_v45 }
 0x6ec   : > { %9622 = vmatprep.mubr.bf16.mxu1 %v17228_v56  ;;  %v14093_v56 = vld [vmem:[%s18015_s7 + $0x228] sm:$0xff]  }
 0x6f3   : > { %9623 = vmatmul.mubr.bf16.vlgmr.msra.gmra.mrb[128].mxu1 %v17388_v41 }
 0x6f4   : > { %9630 = vmatprep.mubr.bf16.mxu1 %v17218_v60  ;;  %13112 = vmatpush3.bf16.msra.mxu1 %v14088_v52  ;;  %v14092_v60 = vld [vmem:[%s18015_s7 + $0x220] sm:$0xff]  }
 0x6f5   : > { %13113 = vmatprep.subr.bf16.mxu1 %v14089_v18 }
 0x6f8   : > { %13114 = vmatpush3.bf16.msra.mxu1 %v14089_v18 }
 0x6f9   : > { %13115 = vmatprep.subr.bf16.mxu1 %v14090_v53 }
 0x6fb   : > { %9631 = vmatmul.mubr.bf16.gmra.mrb[132].mxu1 %v17407_v1 }
 0x6fc   : > { %9638 = vmatprep.mubr.bf16.mxu1 %v17276_v32  ;;  %13116 = vmatpush3.bf16.msra.mxu1 %v14090_v53  ;;  %v14094_v32 = vld [vmem:[%s18015_s7 + $0x230] sm:$0xff]  }
 0x6fd   : > { %13117 = vmatprep.subr.bf16.mxu1 %v14091_v21 }
 0x700   : > { %13118 = vmatpush3.bf16.msra.mxu1 %v14091_v21 }
 0x701   : > { %13119 = vmatprep.subr.bf16.mxu1 %v14092_v60 }
 0x703   : > { %9639 = vmatmul.mubr.bf16.gmra.mrb[136].mxu1 %v17425_v13 }
 0x704   : > { %9646 = vmatprep.mubr.bf16.mxu1 %v17266_v2  ;;  %13120 = vmatpush3.bf16.msra.mxu1 %v14092_v60  ;;  %v14095_v2 = vld [vmem:[%s18015_s7 + $0x238] sm:$0xff]  }
 0x705   : > { %13121 = vmatprep.subr.bf16.mxu1 %v14093_v56 }
 0x706   : > { %v12239_v10 = vpop.f32.mrb[32].mxu1  ;;  %v12327_v15 = vpop.f32.mrb[192].mxu0 }
 0x707   : > { %v12240_v41 = vpop.f32.mrb[33].mxu1  ;;  %v12328_v1 = vpop.f32.mrb[193].mxu0 }
 0x708   : > { %v17602_v16 = vadd.f32 %v12240_v41, %v12239_v10  ;;  %v12329_v44 = vadd.f32 %v12328_v1, %v12327_v15  ;;  %v12242_v9 = vpop.f32.mrb[34].mxu1  ;;  %v12330_v20 = vpop.f32.mrb[194].mxu0  ;;  %13122 = vmatpush3.bf16.msra.mxu1 %v14093_v56 }
 0x709   : > { %v12243_v25 = vpop.f32.mrb[35].mxu1  ;;  %v12331_v13 = vpop.f32.mrb[195].mxu0  ;;  %13123 = vmatprep.subr.bf16.mxu1 %v14094_v32 }
 0x70a   : > { %v17608_v22 = vadd.f32 %v12329_v44, %v17158_v29  ;;  %v17610_v12 = vadd.f32 %v12243_v25, %v12242_v9  ;;  %v12332_v58 = vadd.f32 %v12331_v13, %v12330_v20 }
 0x70b   : > { %9647 = vmatmul.mubr.bf16.gmra.mrb[140].mxu1 %v17439_v54 }
 0x70c   : > { %v17614_v30 = vadd.f32 %v12332_v58, %v17187_v39  ;;  %9654 = vmatprep.mubr.bf16.mxu1 %v17324_v42  ;;  %13124 = vmatpush3.bf16.msra.mxu1 %v14094_v32 }
 0x70d   : > { %13125 = vmatprep.subr.bf16.mxu1 %v14095_v2 }
 0x70e   : > { %v12245_v61 = vpop.f32.mrb[36].mxu1  ;;  %v12333_v19 = vpop.f32.mrb[196].mxu0 }
 0x70f   : > { %v12246_v4 = vpop.f32.mrb[37].mxu1  ;;  %v12334_v33 = vpop.f32.mrb[197].mxu0 }
 0x710   : > { %v17617_v34 = vadd.f32 %v12246_v4, %v12245_v61  ;;  %v12335_v29 = vadd.f32 %v12334_v33, %v12333_v19  ;;  %v12248_v31 = vpop.f32.mrb[38].mxu1  ;;  %v12336_v49 = vpop.f32.mrb[198].mxu0  ;;  %13126 = vmatpush3.bf16.msra.mxu1 %v14095_v2 }
 0x711   : > { %v12249_v55 = vpop.f32.mrb[39].mxu1  ;;  %v12337_v52 = vpop.f32.mrb[199].mxu0 }
 0x712   : > { %v17620_v54 = vadd.f32 %v12335_v29, %v17204_v11  ;;  %v17622_v39 = vadd.f32 %v12249_v55, %v12248_v31  ;;  %v12338_v42 = vadd.f32 %v12337_v52, %v12336_v49 }
 0x713   : > { %9655 = vmatmul.mubr.bf16.gmra.mrb[144].mxu1 %v17456_v5 }
 0x714   : > { %v17626_v18 = vadd.f32 %v12338_v42, %v17220_v0  ;;  %9662 = vmatprep.mubr.bf16.mxu1 %v17314_v17 }
 0x716   : > { %v12251_v53 = vpop.f32.mrb[40].mxu1  ;;  %v12339_v21 = vpop.f32.mrb[200].mxu0 }
 0x717   : > { %v12252_v60 = vpop.f32.mrb[41].mxu1  ;;  %v12340_v56 = vpop.f32.mrb[201].mxu0 }
 0x718   : > { %v17629_v32 = vadd.f32 %v12252_v60, %v12251_v53  ;;  %v12341_v10 = vadd.f32 %v12340_v56, %v12339_v21  ;;  %v12254_v15 = vpop.f32.mrb[42].mxu1  ;;  %v12342_v11 = vpop.f32.mrb[202].mxu0 }
 0x719   : > { %v12255_v41 = vpop.f32.mrb[43].mxu1  ;;  %v12343_v1 = vpop.f32.mrb[203].mxu0 }
 0x71a   : > { %v17632_v44 = vadd.f32 %v12341_v10, %v17252_v7  ;;  %v17634_v5 = vadd.f32 %v12255_v41, %v12254_v15  ;;  %v12344_v0 = vadd.f32 %v12343_v1, %v12342_v11 }
 0x71b   : > { %9663 = vmatmul.mubr.bf16.gmra.mrb[148].mxu1 %v17466_v43 }
 0x71c   : > { %v17638_v17 = vadd.f32 %v12344_v0, %v17268_v59  ;;  %9670 = vmatprep.mubr.bf16.mxu1 %v17374_v14 }
 0x71e   : > { %v12257_v9 = vpop.f32.mrb[44].mxu1  ;;  %v12345_v20 = vpop.f32.mrb[204].mxu0 }
 0x71f   : > { %v12258_v25 = vpop.f32.mrb[45].mxu1  ;;  %v12346_v13 = vpop.f32.mrb[205].mxu0 }
 0x720   : > { %v17641_v2 = vadd.f32 %v12258_v25, %v12257_v9  ;;  %v12347_v58 = vadd.f32 %v12346_v13, %v12345_v20  ;;  %v12260_v61 = vpop.f32.mrb[46].mxu1  ;;  %v12348_v7 = vpop.f32.mrb[206].mxu0 }
 0x721   : > { %v12261_v19 = vpop.f32.mrb[47].mxu1  ;;  %v12349_v4 = vpop.f32.mrb[207].mxu0 }
 0x722   : > { %v17644_v33 = vadd.f32 %v12347_v58, %v17300_v6  ;;  %v17646_v43 = vadd.f32 %v12261_v19, %v12260_v61  ;;  %v12350_v59 = vadd.f32 %v12349_v4, %v12348_v7 }
 0x723   : > { %9671 = vmatmul.mubr.bf16.gmra.mrb[152].mxu1 %v17476_v26 }
 0x724   : > { %v17650_v14 = vadd.f32 %v12350_v59, %v17316_v51  ;;  %9678 = vmatprep.mubr.bf16.mxu1 %v17361_v3 }
 0x726   : > { %v12263_v29 = vpop.f32.mrb[48].mxu1  ;;  %v12351_v31 = vpop.f32.mrb[208].mxu0 }
 0x727   : > { %v12264_v49 = vpop.f32.mrb[49].mxu1  ;;  %v12352_v55 = vpop.f32.mrb[209].mxu0 }
 0x728   : > { %v17653_v52 = vadd.f32 %v12264_v49, %v12263_v29  ;;  %v12353_v42 = vadd.f32 %v12352_v55, %v12351_v31  ;;  %v12266_v53 = vpop.f32.mrb[50].mxu1  ;;  %v12354_v6 = vpop.f32.mrb[210].mxu0 }
 0x729   : > { %v12267_v21 = vpop.f32.mrb[51].mxu1  ;;  %v12355_v60 = vpop.f32.mrb[211].mxu0 }
 0x72a   : > { %v17656_v56 = vadd.f32 %v12353_v42, %v17348_v57  ;;  %v17658_v26 = vadd.f32 %v12267_v21, %v12266_v53  ;;  %v12356_v51 = vadd.f32 %v12355_v60, %v12354_v6 }
 0x72b   : > { %9679 = vmatmul.mubr.bf16.gmra.mrb[156].mxu1 %v17486_v36 }
 0x72c   : > { %v17662_v3 = vadd.f32 %v12356_v51, %v17363_v28  ;;  %9686 = vmatprep.mubr.bf16.mxu1 %v17370_v47 }
 0x72e   : > { %v12269_v10 = vpop.f32.mrb[52].mxu1  ;;  %v12357_v15 = vpop.f32.mrb[212].mxu0 }
 0x72f   : > { %v12270_v11 = vpop.f32.mrb[53].mxu1  ;;  %v12358_v41 = vpop.f32.mrb[213].mxu0 }
 0x730   : > { %v17665_v1 = vadd.f32 %v12270_v11, %v12269_v10  ;;  %v12359_v0 = vadd.f32 %v12358_v41, %v12357_v15  ;;  %v12272_v9 = vpop.f32.mrb[54].mxu1  ;;  %v12360_v57 = vpop.f32.mrb[214].mxu0 }
 0x731   : > { %v12273_v20 = vpop.f32.mrb[55].mxu1  ;;  %v12361_v25 = vpop.f32.mrb[215].mxu0 }
 0x732   : > { %v17668_v13 = vadd.f32 %v12359_v0, %v17382_v27  ;;  %v17670_v36 = vadd.f32 %v12273_v20, %v12272_v9  ;;  %v12362_v28 = vadd.f32 %v12361_v25, %v12360_v57 }
 0x733   : > { %9687 = vmatmul.mubr.bf16.gmra.mrb[160].mxu1 %v17370_v47 }
 0x734   : > { %v17674_v58 = vadd.f32 %v12362_v28, %v17384_v37  ;;  %9694 = vmatprep.mubr.bf16.mxu1 %v17370_v47 }
 0x736   : > { %v12275_v61 = vpop.f32.mrb[56].mxu1  ;;  %v12363_v7 = vpop.f32.mrb[216].mxu0 }
 0x737   : > { %v12276_v19 = vpop.f32.mrb[57].mxu1  ;;  %v12364_v4 = vpop.f32.mrb[217].mxu0 }
 0x738   : > { %v17677_v59 = vadd.f32 %v12276_v19, %v12275_v61  ;;  %v12365_v29 = vadd.f32 %v12364_v4, %v12363_v7  ;;  %v12278_v31 = vpop.f32.mrb[58].mxu1  ;;  %v12366_v27 = vpop.f32.mrb[218].mxu0  ;;  %v14103_v4 = vld [vmem:[#allocation2 + $0xe8] sm:$0xff] }
 0x739   : > { %v12279_v49 = vpop.f32.mrb[59].mxu1  ;;  %v12367_v55 = vpop.f32.mrb[219].mxu0 }
 0x73a   : > { %v17680_v42 = vadd.f32 %v12365_v29, %v17401_v50  ;;  %v17682_v53 = vadd.f32 %v12279_v49, %v12278_v31  ;;  %v12368_v37 = vadd.f32 %v12367_v55, %v12366_v27  ;;  %v17701_v29 = vpack.c.bf16 %v14103_v4, %v14103_v4 }
 0x73b   : > { %9695 = vmatmul.mubr.bf16.gmra.mrb[164].mxu1 %v17370_v47 }
 0x73c   : > { %v17686_v6 = vadd.f32 %v12368_v37, %v17403_v46  ;;  %9702 = vmatprep.mubr.bf16.mxu1 %v17370_v47 }
 0x73e   : > { %v12281_v21 = vpop.f32.mrb[60].mxu1  ;;  %v12369_v60 = vpop.f32.mrb[220].mxu0 }
 0x73f   : > { %v12282_v51 = vpop.f32.mrb[61].mxu1  ;;  %v12370_v10 = vpop.f32.mrb[221].mxu0 }
 0x740   : > { %v17689_v15 = vadd.f32 %v12282_v51, %v12281_v21  ;;  %v12371_v11 = vadd.f32 %v12370_v10, %v12369_v60  ;;  %v12284_v41 = vpop.f32.mrb[62].mxu1  ;;  %v12372_v50 = vpop.f32.mrb[222].mxu0 }
 0x741   : > { %v12285_v0 = vpop.f32.mrb[63].mxu1  ;;  %v12373_v9 = vpop.f32.mrb[223].mxu0 }
 0x742   : > { %v17692_v57 = vadd.f32 %v12371_v11, %v17416_v35  ;;  %v17694_v20 = vadd.f32 %v12285_v0, %v12284_v41  ;;  %v12374_v46 = vadd.f32 %v12373_v9, %v12372_v50 }
 0x743   : > { %9703 = vmatmul.mubr.bf16.gmra.mrb[168].mxu1 %v17370_v47 }
 0x744   : > { %v17698_v25 = vadd.f32 %v12374_v46, %v17421_v48  ;;  %9710 = vmatprep.mubr.bf16.mxu1 %v17370_v47 }
 0x746   : > { %v12375_v28 = vpop.f32.mrb[224].mxu0 }
 0x747   : > { %v12376_v61 = vpop.f32.mrb[225].mxu0 }
 0x748   : > { %v12377_v7 = vadd.f32 %v12376_v61, %v12375_v28  ;;  %v12378_v19 = vpop.f32.mrb[226].mxu0 }
 0x749   : > { %v12379_v31 = vpop.f32.mrb[227].mxu0 }
 0x74a   : > { %v17704_v35 = vadd.f32 %v12377_v7, %v17602_v16  ;;  %v12380_v27 = vadd.f32 %v12379_v31, %v12378_v19 }
 0x74b   : > { %9711 = vmatmul.mubr.bf16.gmra.mrb[172].mxu1 %v17370_v47 }
 0x74c   : > { %v17708_v49 = vadd.f32 %v12380_v27, %v17610_v12  ;;  %9718 = vmatprep.mubr.bf16.mxu1 %v17701_v29 }
 0x74e   : > { %v12381_v48 = vpop.f32.mrb[228].mxu0 }
 0x74f   : > { %v12382_v55 = vpop.f32.mrb[229].mxu0 }
 0x750   : > { %v12383_v37 = vadd.f32 %v12382_v55, %v12381_v48  ;;  %v12384_v21 = vpop.f32.mrb[230].mxu0 }
 0x751   : > { %v12385_v60 = vpop.f32.mrb[231].mxu0 }
 0x752   : > { %v17712_v51 = vadd.f32 %v12383_v37, %v17617_v34  ;;  %v12386_v10 = vadd.f32 %v12385_v60, %v12384_v21 }
 0x753   : > { %9719 = vmatmul.mubr.bf16.gmra.mrb[176].mxu1 %v17701_v29 }
 0x754   : > { %v17716_v16 = vadd.f32 %v12386_v10, %v17622_v39  ;;  %9726 = vmatprep.mubr.bf16.mxu1 %v17701_v29 }
 0x756   : > { %v12387_v47 = vpop.f32.mrb[232].mxu0 }
 0x757   : > { %v12388_v12 = vpop.f32.mrb[233].mxu0 }
 0x758   : > { %v12389_v11 = vadd.f32 %v12388_v12, %v12387_v47  ;;  %v12390_v41 = vpop.f32.mrb[234].mxu0 }
 0x759   : > { %v12391_v50 = vpop.f32.mrb[235].mxu0 }
 0x75a   : > { %v17720_v0 = vadd.f32 %v12389_v11, %v17629_v32  ;;  %v12392_v9 = vadd.f32 %v12391_v50, %v12390_v41 }
 0x75b   : > { %9727 = vmatmul.mubr.bf16.gmra.mrb[180].mxu1 %v17701_v29 }
 0x75c   : > { %v17724_v34 = vadd.f32 %v12392_v9, %v17634_v5  ;;  %9734 = vmatprep.mubr.bf16.mxu1 %v17701_v29 }
 0x75e   : > { %v12393_v39 = vpop.f32.mrb[236].mxu0 }
 0x75f   : > { %v12394_v46 = vpop.f32.mrb[237].mxu0 }
 0x760   : > { %v12395_v28 = vadd.f32 %v12394_v46, %v12393_v39  ;;  %v12396_v61 = vpop.f32.mrb[238].mxu0 }
 0x761   : > { %v12397_v7 = vpop.f32.mrb[239].mxu0 }
 0x762   : > { %v17728_v19 = vadd.f32 %v12395_v28, %v17641_v2  ;;  %v12398_v4 = vadd.f32 %v12397_v7, %v12396_v61 }
 0x763   : > { %9735 = vmatmul.mubr.bf16.gmra.mrb[184].mxu1 %v17701_v29 }
 0x764   : > { %v17732_v32 = vadd.f32 %v12398_v4, %v17646_v43  ;;  %9742 = vmatprep.mubr.bf16.mxu1 %v17701_v29 }
 0x766   : > { %v12399_v5 = vpop.f32.mrb[240].mxu0 }
 0x767   : > { %v12400_v31 = vpop.f32.mrb[241].mxu0 }
 0x768   : > { %v12401_v27 = vadd.f32 %v12400_v31, %v12399_v5  ;;  %v12402_v48 = vpop.f32.mrb[242].mxu0 }
 0x769   : > { %v12403_v55 = vpop.f32.mrb[243].mxu0 }
 0x76a   : > { %v17736_v37 = vadd.f32 %v12401_v27, %v17653_v52  ;;  %v12404_v21 = vadd.f32 %v12403_v55, %v12402_v48 }
 0x76b   : > { %9743 = vmatmul.mubr.bf16.gmra.mrb[188].mxu1 %v17701_v29 }
 0x76c   : > { %v17740_v2 = vadd.f32 %v12404_v21, %v17658_v26  ;;  %13127 = vmatprep.mubr.bf16.mxu1 %v17533_v38 }
 0x76e   : > { %v12405_v43 = vpop.f32.mrb[244].mxu0 }
 0x76f   : > { %v12406_v60 = vpop.f32.mrb[245].mxu0 }
 0x770   : > { %v12407_v10 = vadd.f32 %v12406_v60, %v12405_v43  ;;  %v12408_v47 = vpop.f32.mrb[246].mxu0 }
 0x771   : > { %v12409_v12 = vpop.f32.mrb[247].mxu0 }
 0x772   : > { %v17744_v11 = vadd.f32 %v12407_v10, %v17665_v1  ;;  %v12410_v41 = vadd.f32 %v12409_v12, %v12408_v47 }
 0x773   : > { %13128 = vmatmul.mubr.bf16.vlgmr.msra.gmra.mrb[64].mxu1 %v17544_v24 }
 0x774   : > { %v17748_v52 = vadd.f32 %v12410_v41, %v17670_v36  ;;  %13131 = vmatprep.mubr.bf16.mxu1 %v17548_v62 }
 0x776   : > { %v12411_v26 = vpop.f32.mrb[248].mxu0 }
 0x777   : > { %v12412_v50 = vpop.f32.mrb[249].mxu0 }
 0x778   : > { %v12413_v9 = vadd.f32 %v12412_v50, %v12411_v26  ;;  %v12414_v38 = vpop.f32.mrb[250].mxu0 }
 0x779   : > { %v12415_v39 = vpop.f32.mrb[251].mxu0 }
 0x77a   : > { %v17752_v46 = vadd.f32 %v12413_v9, %v17677_v59  ;;  %v12416_v28 = vadd.f32 %v12415_v39, %v12414_v38 }
 0x77b   : > { %13132 = vmatmul.mubr.bf16.gmra.mrb[68].mxu1 %v17554_v63 }
 0x77c   : > { %v17756_v1 = vadd.f32 %v12416_v28, %v17682_v53  ;;  %13135 = vmatprep.mubr.bf16.mxu1 %v17558_v8 }
 0x77e   : > { %v12417_v24 = vpop.f32.mrb[252].mxu0 }
 0x77f   : > { %v12418_v36 = vpop.f32.mrb[253].mxu0 }
 0x780   : > { %v12419_v61 = vadd.f32 %v12418_v36, %v12417_v24  ;;  %v12420_v62 = vpop.f32.mrb[254].mxu0 }
 0x781   : > { %v12421_v7 = vpop.f32.mrb[255].mxu0 }
 0x782   : > { %v17760_v4 = vadd.f32 %v12419_v61, %v17689_v15  ;;  %v12422_v5 = vadd.f32 %v12421_v7, %v12420_v62 }
 0x783   : > { %13136 = vmatmul.mubr.bf16.gmra.mrb[72].mxu1 %v17564_v40 }
 0x784   : > { %v17764_v59 = vadd.f32 %v12422_v5, %v17694_v20  ;;  %13139 = vmatprep.mubr.bf16.mxu1 %v17568_v23 }
 0x78b   : > { %13140 = vmatmul.mubr.bf16.gmra.mrb[76].mxu1 %v17574_v45 }
 0x78c   : > { %13143 = vmatprep.mubr.bf16.mxu1 %v17701_v29 }
 0x793   : > { %13144 = vmatmul.mubr.bf16.gmra.mrb[80].mxu1 %v17701_v29 }
 0x794   : > { %13147 = vmatprep.mubr.bf16.mxu1 %v17701_v29 }
 0x79b   : > { %13148 = vmatmul.mubr.bf16.gmra.mrb[84].mxu1 %v17701_v29 }
 0x79c   : > { %13151 = vmatprep.mubr.bf16.mxu1 %v17701_v29 }
 0x7a3   : > { %13152 = vmatmul.mubr.bf16.gmra.mrb[88].mxu1 %v17701_v29 }
 0x7a4   : > { %13155 = vmatprep.mubr.bf16.mxu1 %v17701_v29 }
 0x7ab   : > { %13156 = vmatmul.mubr.bf16.gmra.mrb[92].mxu1 %v17701_v29 }
 0x7c6   : > { %v12463_v63 = vpop.f32.mrb[128].mxu1 }
 0x7c7   : > { %v12464_v8 = vpop.f32.mrb[129].mxu1 }
 0x7c8   : > { %v12465_v40 = vadd.f32 %v12464_v8, %v12463_v63  ;;  %v12466_v23 = vpop.f32.mrb[130].mxu1 }
 0x7c9   : > { %v12467_v45 = vpop.f32.mrb[131].mxu1 }
 0x7ca   : > { %v12468_v53 = vadd.f32 %v12467_v45, %v12466_v23  ;;  %v17777_v15 = vadd.f32 %v17608_v22, %v12465_v40 }
 0x7cc   : > { %v17780_v20 = vadd.f32 %v17614_v30, %v12468_v53 }
 0x7ce   : > { %v12469_v31 = vpop.f32.mrb[132].mxu1 }
 0x7cf   : > { %v12470_v27 = vpop.f32.mrb[133].mxu1 }
 0x7d0   : > { %v12471_v48 = vadd.f32 %v12470_v27, %v12469_v31  ;;  %v12472_v55 = vpop.f32.mrb[134].mxu1 }
 0x7d1   : > { %v12473_v21 = vpop.f32.mrb[135].mxu1 }
 0x7d2   : > { %v12474_v43 = vadd.f32 %v12473_v21, %v12472_v55  ;;  %v17783_v29 = vadd.f32 %v17620_v54, %v12471_v48 }
 0x7d4   : > { %v17786_v60 = vadd.f32 %v17626_v18, %v12474_v43 }
 0x7d6   : > { %v12475_v10 = vpop.f32.mrb[136].mxu1 }
 0x7d7   : > { %v12476_v47 = vpop.f32.mrb[137].mxu1 }
 0x7d8   : > { %v12477_v12 = vadd.f32 %v12476_v47, %v12475_v10  ;;  %v12478_v22 = vpop.f32.mrb[138].mxu1 }
 0x7d9   : > { %v12479_v41 = vpop.f32.mrb[139].mxu1 }
 0x7da   : > { %v12480_v26 = vadd.f32 %v12479_v41, %v12478_v22  ;;  %v17789_v30 = vadd.f32 %v17632_v44, %v12477_v12 }
 0x7dc   : > { %v17792_v50 = vadd.f32 %v17638_v17, %v12480_v26 }
 0x7de   : > { %v12481_v9 = vpop.f32.mrb[140].mxu1 }
 0x7df   : > { %v12482_v38 = vpop.f32.mrb[141].mxu1 }
 0x7e0   : > { %v12483_v39 = vadd.f32 %v12482_v38, %v12481_v9  ;;  %v12484_v54 = vpop.f32.mrb[142].mxu1 }
 0x7e1   : > { %v12485_v28 = vpop.f32.mrb[143].mxu1 }
 0x7e2   : > { %v12486_v24 = vadd.f32 %v12485_v28, %v12484_v54  ;;  %v17795_v18 = vadd.f32 %v17644_v33, %v12483_v39 }
 0x7e4   : > { %v17798_v36 = vadd.f32 %v17650_v14, %v12486_v24 }
 0x7e6   : > { %v12487_v61 = vpop.f32.mrb[144].mxu1 }
 0x7e7   : > { %v12488_v62 = vpop.f32.mrb[145].mxu1 }
 0x7e8   : > { %v12489_v7 = vadd.f32 %v12488_v62, %v12487_v61  ;;  %v12490_v44 = vpop.f32.mrb[146].mxu1 }
 0x7e9   : > { %v12491_v5 = vpop.f32.mrb[147].mxu1 }
 0x7ea   : > { %v12492_v63 = vadd.f32 %v12491_v5, %v12490_v44  ;;  %v17801_v17 = vadd.f32 %v17656_v56, %v12489_v7 }
 0x7ec   : > { %v17804_v8 = vadd.f32 %v17662_v3, %v12492_v63 }
 0x7ee   : > { %v12493_v40 = vpop.f32.mrb[148].mxu1 }
 0x7ef   : > { %v12494_v23 = vpop.f32.mrb[149].mxu1 }
 0x7f0   : > { %v12495_v45 = vadd.f32 %v12494_v23, %v12493_v40  ;;  %v12496_v33 = vpop.f32.mrb[150].mxu1 }
 0x7f1   : > { %v12497_v53 = vpop.f32.mrb[151].mxu1 }
 0x7f2   : > { %v12498_v31 = vadd.f32 %v12497_v53, %v12496_v33  ;;  %v17807_v14 = vadd.f32 %v17668_v13, %v12495_v45 }
 0x7f4   : > { %v17810_v27 = vadd.f32 %v17674_v58, %v12498_v31 }
 0x7f6   : > { %v12499_v48 = vpop.f32.mrb[152].mxu1 }
 0x7f7   : > { %v12500_v55 = vpop.f32.mrb[153].mxu1 }
 0x7f8   : > { %v12501_v21 = vadd.f32 %v12500_v55, %v12499_v48  ;;  %v12502_v56 = vpop.f32.mrb[154].mxu1 }
 0x7f9   : > { %v12503_v43 = vpop.f32.mrb[155].mxu1 }
 0x7fa   : > { %v12504_v10 = vadd.f32 %v12503_v43, %v12502_v56  ;;  %v17813_v3 = vadd.f32 %v17680_v42, %v12501_v21 }
 0x7fc   : > { %v17816_v47 = vadd.f32 %v17686_v6, %v12504_v10 }
 0x7fe   : > { %v12505_v12 = vpop.f32.mrb[156].mxu1 }
 0x7ff   : > { %v12506_v22 = vpop.f32.mrb[157].mxu1 }
 0x800   : > { %v12507_v41 = vadd.f32 %v12506_v22, %v12505_v12  ;;  %v12508_v13 = vpop.f32.mrb[158].mxu1 }
 0x801   : > { %v12509_v26 = vpop.f32.mrb[159].mxu1 }
 0x802   : > { %v12510_v9 = vadd.f32 %v12509_v26, %v12508_v13  ;;  %v17819_v58 = vadd.f32 %v17692_v57, %v12507_v41 }
 0x804   : > { %v17822_v38 = vadd.f32 %v17698_v25, %v12510_v9 }
 0x806   : > { %v12511_v39 = vpop.f32.mrb[160].mxu1 }
 0x807   : > { %v12512_v54 = vpop.f32.mrb[161].mxu1 }
 0x808   : > { %v12513_v28 = vadd.f32 %v12512_v54, %v12511_v39  ;;  %v12514_v42 = vpop.f32.mrb[162].mxu1 }
 0x809   : > { %v12515_v24 = vpop.f32.mrb[163].mxu1 }
 0x80a   : > { %v12516_v61 = vadd.f32 %v12515_v24, %v12514_v42  ;;  %v17825_v6 = vadd.f32 %v17704_v35, %v12513_v28 }
 0x80c   : > { %v17828_v62 = vadd.f32 %v17708_v49, %v12516_v61 }
 0x80e   : > { %v12517_v7 = vpop.f32.mrb[164].mxu1 }
 0x80f   : > { %v12518_v44 = vpop.f32.mrb[165].mxu1 }
 0x810   : > { %v12519_v5 = vadd.f32 %v12518_v44, %v12517_v7  ;;  %v12520_v57 = vpop.f32.mrb[166].mxu1 }
 0x811   : > { %v12521_v63 = vpop.f32.mrb[167].mxu1 }
 0x812   : > { %v12522_v40 = vadd.f32 %v12521_v63, %v12520_v57  ;;  %v17831_v25 = vadd.f32 %v17712_v51, %v12519_v5 }
 0x814   : > { %v17834_v23 = vadd.f32 %v17716_v16, %v12522_v40 }
 0x816   : > { %v12523_v45 = vpop.f32.mrb[168].mxu1 }
 0x817   : > { %v12524_v33 = vpop.f32.mrb[169].mxu1 }
 0x818   : > { %v12525_v53 = vadd.f32 %v12524_v33, %v12523_v45  ;;  %v12526_v35 = vpop.f32.mrb[170].mxu1 }
 0x819   : > { %v12527_v31 = vpop.f32.mrb[171].mxu1 }
 0x81a   : > { %v12528_v48 = vadd.f32 %v12527_v31, %v12526_v35  ;;  %v17837_v49 = vadd.f32 %v17720_v0, %v12525_v53 }
 0x81c   : > { %v17840_v55 = vadd.f32 %v17724_v34, %v12528_v48 }
 0x81e   : > { %v12529_v21 = vpop.f32.mrb[172].mxu1 }
 0x81f   : > { %v12530_v56 = vpop.f32.mrb[173].mxu1 }
 0x820   : > { %v12531_v43 = vadd.f32 %v12530_v56, %v12529_v21  ;;  %v12532_v51 = vpop.f32.mrb[174].mxu1 }
 0x821   : > { %v12533_v10 = vpop.f32.mrb[175].mxu1 }
 0x822   : > { %v12534_v12 = vadd.f32 %v12533_v10, %v12532_v51  ;;  %v17843_v16 = vadd.f32 %v17728_v19, %v12531_v43 }
 0x824   : > { %v17846_v22 = vadd.f32 %v17732_v32, %v12534_v12 }
 0x826   : > { %v12535_v41 = vpop.f32.mrb[176].mxu1 }
 0x827   : > { %v12536_v13 = vpop.f32.mrb[177].mxu1 }
 0x828   : > { %v12537_v26 = vadd.f32 %v12536_v13, %v12535_v41  ;;  %v12538_v0 = vpop.f32.mrb[178].mxu1 }
 0x829   : > { %v12539_v9 = vpop.f32.mrb[179].mxu1 }
 0x82a   : > { %v12540_v39 = vadd.f32 %v12539_v9, %v12538_v0  ;;  %v17849_v34 = vadd.f32 %v17736_v37, %v12537_v26 }
 0x82c   : > { %v17852_v54 = vadd.f32 %v17740_v2, %v12540_v39 }
 0x82e   : > { %v12541_v28 = vpop.f32.mrb[180].mxu1 }
 0x82f   : > { %v12542_v42 = vpop.f32.mrb[181].mxu1 }
 0x830   : > { %v12543_v24 = vadd.f32 %v12542_v42, %v12541_v28  ;;  %v12544_v19 = vpop.f32.mrb[182].mxu1  ;;  %v10111_v42 = vld [vmem:[%s14347_s21] sm:$0xff] }
 0x831   : > { %v12545_v61 = vpop.f32.mrb[183].mxu1 }
 0x832   : > { %v12546_v7 = vadd.f32 %v12545_v61, %v12544_v19  ;;  %v17855_v32 = vadd.f32 %v17744_v11, %v12543_v24  ;;  %v10114_v19 = vld [vmem:[%s14347_s21 + $0x18] sm:$0xff] }
 0x834   : > { %v17858_v44 = vadd.f32 %v17748_v52, %v12546_v7 }
 0x836   : > { %v12547_v5 = vpop.f32.mrb[184].mxu1 }
 0x837   : > { %v12548_v57 = vpop.f32.mrb[185].mxu1 }
 0x838   : > { %v12549_v63 = vadd.f32 %v12548_v57, %v12547_v5  ;;  %v12550_v37 = vpop.f32.mrb[186].mxu1 }
 0x839   : > { %v12551_v40 = vpop.f32.mrb[187].mxu1 }
 0x83a   : > { %v12552_v45 = vadd.f32 %v12551_v40, %v12550_v37  ;;  %v17861_v2 = vadd.f32 %v17752_v46, %v12549_v63  ;;  %v17875_v46 = vld [vmem:[%s18016_s8] ss:$0 sm:$0xff] }
 0x83c   : > { %v17864_v33 = vadd.f32 %v17756_v1, %v12552_v45 }
 0x83e   : > { %v12553_v53 = vpop.f32.mrb[188].mxu1 }
 0x83f   : > { %v12554_v35 = vpop.f32.mrb[189].mxu1 }
 0x840   : > { %v12555_v31 = vadd.f32 %v12554_v35, %v12553_v53  ;;  %v12556_v11 = vpop.f32.mrb[190].mxu1 }
 0x841   : > { %v12557_v48 = vpop.f32.mrb[191].mxu1 }
 0x842   : > { %v12558_v21 = vadd.f32 %v12557_v48, %v12556_v11  ;;  %v17867_v52 = vadd.f32 %v17760_v4, %v12555_v31 }
 0x844   : > { %v17870_v56 = vadd.f32 %v17764_v59, %v12558_v21 }
 0x846   : > { %v13129_v43 = vpop.f32.mrb[64].mxu1 }
 0x847   : > { %v13481_v1 = vadd.f32 %v17783_v29, %v13129_v43  ;;  %v9785_v51 = vpop.f32.mrb[65].mxu1  ;;  %v10113_v29 = vld [vmem:[%s14347_s21 + $0x10] sm:$0xff] }
 0x848   : > { %v13484_v10 = vadd.f32 %v17777_v15, %v9785_v51  ;;  %v13130_v12 = vpop.f32.mrb[66].mxu1 }
 0x849   : > { %v10049_v4 = vadd.f32 %v13481_v1, %v17875_v46  ;;  %v13487_v41 = vadd.f32 %v17786_v60, %v13130_v12  ;;  %v9788_v59 = vpop.f32.mrb[67].mxu1 }
 0x84a   : > { %v10047_v13 = vadd.f32 %v13484_v10, %v17875_v46  ;;  %v13490_v26 = vadd.f32 %v17780_v20, %v9788_v59  ;;  %v10112_v20 = vld [vmem:[%s14347_s21 + $0x8] sm:$0xff]  ;;  %v10115_v10 = vld [vmem:[%s14347_s21 + $0x20] sm:$0xff] }
 0x84b   : > { %v10081_v0 = vmax.f32 %v10049_v4, 0.0  ;;  %v10050_v9 = vadd.f32 %v13487_v41, %v17875_v46  ;;  %v10118_v4 = vld [vmem:[%s14347_s21 + $0x38] sm:$0xff] }
 0x84c   : > { %v10079_v39 = vmax.f32 %v10047_v13, 0.0  ;;  %v10048_v15 = vadd.f32 %v13490_v26, %v17875_v46 }
 0x84d   : > { %v10145_v28 = vadd.f32 %v10113_v29, %v10081_v0  ;;  %v10082_v24 = vmax.f32 %v10050_v9, 0.0 }
 0x84e   : > { %v10143_v60 = vadd.f32 %v10111_v42, %v10079_v39  ;;  %v10080_v61 = vmax.f32 %v10048_v15, 0.0  ;;  %v13133_v7 = vpop.f32.mrb[68].mxu1 }
 0x84f   : > { %10177 = vst [vmem:[%s14347_s21 + $0x10] sm:$0xff] %v10145_v28  ;;  %v10146_v5 = vadd.f32 %v10114_v19, %v10082_v24  ;;  %v13493_v57 = vadd.f32 %v17795_v18, %v13133_v7  ;;  %v9801_v63 = vpop.f32.mrb[69].mxu1 }
 0x850   : > { %10175 = vst [vmem:[%s14347_s21] sm:$0xff] %v10143_v60  ;;  %v10144_v37 = vadd.f32 %v10112_v20, %v10080_v61  ;;  %v13496_v40 = vadd.f32 %v17789_v30, %v9801_v63  ;;  %v13134_v45 = vpop.f32.mrb[70].mxu1  ;;  %v10117_v30 = vld [vmem:[%s14347_s21 + $0x30] sm:$0xff]  ;;  %v10119_v20 = vld [vmem:[%s14347_s21 + $0x40] sm:$0xff]  ;;  %v10122_v63 = vld [vmem:[%s14347_s21 + $0x58] sm:$0xff] }
 0x851   : > { %10178 = vst [vmem:[%s14347_s21 + $0x18] sm:$0xff] %v10146_v5  ;;  %v10053_v53 = vadd.f32 %v13493_v57, %v17875_v46  ;;  %v13499_v35 = vadd.f32 %v17798_v36, %v13134_v45  ;;  %v9804_v31 = vpop.f32.mrb[71].mxu1 }
 0x852   : > { %10176 = vst [vmem:[%s14347_s21 + $0x8] sm:$0xff] %v10144_v37  ;;  %v10051_v11 = vadd.f32 %v13496_v40, %v17875_v46  ;;  %v13502_v18 = vadd.f32 %v17792_v50, %v9804_v31  ;;  %v10116_v50 = vld [vmem:[%s14347_s21 + $0x28] sm:$0xff] }
 0x853   : > { %v10085_v48 = vmax.f32 %v10053_v53, 0.0  ;;  %v10054_v21 = vadd.f32 %v13499_v35, %v17875_v46 }
 0x854   : > { %v10083_v43 = vmax.f32 %v10051_v11, 0.0  ;;  %v10052_v1 = vadd.f32 %v13502_v18, %v17875_v46 }
 0x855   : > { %v10149_v51 = vadd.f32 %v10117_v30, %v10085_v48  ;;  %v10086_v36 = vmax.f32 %v10054_v21, 0.0 }
 0x856   : > { %v10147_v12 = vadd.f32 %v10115_v10, %v10083_v43  ;;  %v10084_v41 = vmax.f32 %v10052_v1, 0.0  ;;  %v13137_v59 = vpop.f32.mrb[72].mxu1 }
 0x857   : > { %10181 = vst [vmem:[%s14347_s21 + $0x30] sm:$0xff] %v10149_v51  ;;  %v10150_v13 = vadd.f32 %v10118_v4, %v10086_v36  ;;  %v13505_v26 = vadd.f32 %v17807_v14, %v13137_v59  ;;  %v9817_v0 = vpop.f32.mrb[73].mxu1  ;;  %v10123_v4 = vld [vmem:[%s14347_s21 + $0x60] sm:$0xff]  ;;  %v10126_v59 = vld [vmem:[%s14347_s21 + $0x78] sm:$0xff] }
 0x858   : > { %10179 = vst [vmem:[%s14347_s21 + $0x20] sm:$0xff] %v10147_v12  ;;  %v10148_v9 = vadd.f32 %v10116_v50, %v10084_v41  ;;  %v13508_v29 = vadd.f32 %v17801_v17, %v9817_v0  ;;  %v13138_v39 = vpop.f32.mrb[74].mxu1  ;;  %v10121_v17 = vld [vmem:[%s14347_s21 + $0x50] sm:$0xff] }
 0x859   : > { %10182 = vst [vmem:[%s14347_s21 + $0x38] sm:$0xff] %v10150_v13  ;;  %v10057_v15 = vadd.f32 %v13505_v26, %v17875_v46  ;;  %v13511_v28 = vadd.f32 %v17810_v27, %v13138_v39  ;;  %v9820_v42 = vpop.f32.mrb[75].mxu1 }
 0x85a   : > { %10180 = vst [vmem:[%s14347_s21 + $0x28] sm:$0xff] %v10148_v9  ;;  %v10055_v24 = vadd.f32 %v13508_v29, %v17875_v46  ;;  %v13514_v14 = vadd.f32 %v17804_v8, %v9820_v42  ;;  %v10120_v8 = vld [vmem:[%s14347_s21 + $0x48] sm:$0xff] }
 0x85b   : > { %v10089_v60 = vmax.f32 %v10057_v15, 0.0  ;;  %v10058_v19 = vadd.f32 %v13511_v28, %v17875_v46 }
 0x85c   : > { %v10087_v61 = vmax.f32 %v10055_v24, 0.0  ;;  %v10056_v7 = vadd.f32 %v13514_v14, %v17875_v46 }
 0x85d   : > { %v10153_v5 = vadd.f32 %v10121_v17, %v10089_v60  ;;  %v10090_v27 = vmax.f32 %v10058_v19, 0.0 }
 0x85e   : > { %v10151_v57 = vadd.f32 %v10119_v20, %v10087_v61  ;;  %v10088_v37 = vmax.f32 %v10056_v7, 0.0  ;;  %v13141_v40 = vpop.f32.mrb[76].mxu1 }
 0x85f   : > { %10185 = vst [vmem:[%s14347_s21 + $0x50] sm:$0xff] %v10153_v5  ;;  %v10154_v45 = vadd.f32 %v10122_v63, %v10090_v27  ;;  %v13517_v53 = vadd.f32 %v17819_v58, %v13141_v40  ;;  %v9833_v35 = vpop.f32.mrb[77].mxu1  ;;  %v10127_v5 = vld [vmem:[%s14347_s21 + $0x80] sm:$0xff]  ;;  %v10130_v27 = vld [vmem:[%s14347_s21 + $0x98] sm:$0xff] }
 0x860   : > { %10183 = vst [vmem:[%s14347_s21 + $0x40] sm:$0xff] %v10151_v57  ;;  %v10152_v31 = vadd.f32 %v10120_v8, %v10088_v37  ;;  %v13520_v11 = vadd.f32 %v17813_v3, %v9833_v35  ;;  %v13142_v18 = vpop.f32.mrb[78].mxu1  ;;  %v10125_v3 = vld [vmem:[%s14347_s21 + $0x70] sm:$0xff] }
 0x861   : > { %10186 = vst [vmem:[%s14347_s21 + $0x58] sm:$0xff] %v10154_v45  ;;  %v10061_v48 = vadd.f32 %v13517_v53, %v17875_v46  ;;  %v13523_v21 = vadd.f32 %v17822_v38, %v13142_v18  ;;  %v9836_v30 = vpop.f32.mrb[79].mxu1 }
 0x862   : > { %10184 = vst [vmem:[%s14347_s21 + $0x48] sm:$0xff] %v10152_v31  ;;  %v10059_v43 = vadd.f32 %v13520_v11, %v17875_v46  ;;  %v13526_v58 = vadd.f32 %v17816_v47, %v9836_v30  ;;  %v10124_v47 = vld [vmem:[%s14347_s21 + $0x68] sm:$0xff] }
 0x863   : > { %v10093_v1 = vmax.f32 %v10061_v48, 0.0  ;;  %v10062_v51 = vadd.f32 %v13523_v21, %v17875_v46 }
 0x864   : > { %v10091_v10 = vmax.f32 %v10059_v43, 0.0  ;;  %v10060_v36 = vadd.f32 %v13526_v58, %v17875_v46 }
 0x865   : > { %v10157_v12 = vadd.f32 %v10125_v3, %v10093_v1  ;;  %v10094_v38 = vmax.f32 %v10062_v51, 0.0  ;;  %v10131_v51 = vld [vmem:[%s14347_s21 + $0xa0] sm:$0xff] }
 0x866   : > { %v10155_v41 = vadd.f32 %v10123_v4, %v10091_v10  ;;  %v10092_v13 = vmax.f32 %v10060_v36, 0.0  ;;  %v13145_v50 = vpop.f32.mrb[80].mxu1  ;;  %v10134_v10 = vld [vmem:[%s14347_s21 + $0xb8] sm:$0xff] }
 0x867   : > { %10189 = vst [vmem:[%s14347_s21 + $0x70] sm:$0xff] %v10157_v12  ;;  %v10158_v26 = vadd.f32 %v10126_v59, %v10094_v38  ;;  %v13529_v0 = vadd.f32 %v17831_v25, %v13145_v50  ;;  %v9849_v9 = vpop.f32.mrb[81].mxu1 }
 0x868   : > { %10187 = vst [vmem:[%s14347_s21 + $0x60] sm:$0xff] %v10155_v41  ;;  %v10156_v29 = vadd.f32 %v10124_v47, %v10092_v13  ;;  %v13532_v39 = vadd.f32 %v17825_v6, %v9849_v9  ;;  %v13146_v15 = vpop.f32.mrb[82].mxu1  ;;  %v10129_v6 = vld [vmem:[%s14347_s21 + $0x90] sm:$0xff] }
 0x869   : > { %10190 = vst [vmem:[%s14347_s21 + $0x78] sm:$0xff] %v10158_v26  ;;  %v10065_v28 = vadd.f32 %v13529_v0, %v17875_v46  ;;  %v13535_v42 = vadd.f32 %v17834_v23, %v13146_v15  ;;  %v9852_v24 = vpop.f32.mrb[83].mxu1 }
 0x86a   : > { %10188 = vst [vmem:[%s14347_s21 + $0x68] sm:$0xff] %v10156_v29  ;;  %v10063_v14 = vadd.f32 %v13532_v39, %v17875_v46  ;;  %v13538_v25 = vadd.f32 %v17828_v62, %v9852_v24  ;;  %v10128_v62 = vld [vmem:[%s14347_s21 + $0x88] sm:$0xff]  ;;  %v10135_v24 = vld [vmem:[%s14347_s21 + $0xc0] sm:$0xff] }
 0x86b   : > { %v10097_v60 = vmax.f32 %v10065_v28, 0.0  ;;  %v10066_v19 = vadd.f32 %v13535_v42, %v17875_v46 }
 0x86c   : > { %v10095_v17 = vmax.f32 %v10063_v14, 0.0  ;;  %v10064_v61 = vadd.f32 %v13538_v25, %v17875_v46  ;;  %v10138_v25 = vld [vmem:[%s14347_s21 + $0xd8] sm:$0xff] }
 0x86d   : > { %v10161_v7 = vadd.f32 %v10129_v6, %v10097_v60  ;;  %v10098_v23 = vmax.f32 %v10066_v19, 0.0 }
 0x86e   : > { %v10159_v20 = vadd.f32 %v10127_v5, %v10095_v17  ;;  %v10096_v57 = vmax.f32 %v10064_v61, 0.0  ;;  %v13149_v63 = vpop.f32.mrb[84].mxu1 }
 0x86f   : > { %10193 = vst [vmem:[%s14347_s21 + $0x90] sm:$0xff] %v10161_v7  ;;  %v10162_v37 = vadd.f32 %v10130_v27, %v10098_v23  ;;  %v13541_v40 = vadd.f32 %v17843_v16, %v13149_v63  ;;  %v9865_v45 = vpop.f32.mrb[85].mxu1 }
 0x870   : > { %10191 = vst [vmem:[%s14347_s21 + $0x80] sm:$0xff] %v10159_v20  ;;  %v10160_v8 = vadd.f32 %v10128_v62, %v10096_v57  ;;  %v13544_v53 = vadd.f32 %v17837_v49, %v9865_v45  ;;  %v13150_v35 = vpop.f32.mrb[86].mxu1  ;;  %v10133_v49 = vld [vmem:[%s14347_s21 + $0xb0] sm:$0xff] }
 0x871   : > { %10194 = vst [vmem:[%s14347_s21 + $0x98] sm:$0xff] %v10162_v37  ;;  %v10069_v31 = vadd.f32 %v13541_v40, %v17875_v46  ;;  %v13547_v11 = vadd.f32 %v17846_v22, %v13150_v35  ;;  %v9868_v18 = vpop.f32.mrb[87].mxu1  ;;  %v10141_v62 = vld [vmem:[%s14347_s21 + $0xf0] sm:$0xff] }
 0x872   : > { %10192 = vst [vmem:[%s14347_s21 + $0x88] sm:$0xff] %v10160_v8  ;;  %v10067_v48 = vadd.f32 %v13544_v53, %v17875_v46  ;;  %v13550_v16 = vadd.f32 %v17840_v55, %v9868_v18  ;;  %v10132_v55 = vld [vmem:[%s14347_s21 + $0xa8] sm:$0xff] }
 0x873   : > { %v10101_v21 = vmax.f32 %v10069_v31, 0.0  ;;  %v10070_v30 = vadd.f32 %v13547_v11, %v17875_v46  ;;  %v10142_v31 = vld [vmem:[%s14347_s21 + $0xf8] sm:$0xff] }
 0x874   : > { %v10099_v43 = vmax.f32 %v10067_v48, 0.0  ;;  %v10068_v58 = vadd.f32 %v13550_v16, %v17875_v46  ;;  %v10140_v48 = vld [vmem:[%s14347_s21 + $0xe8] sm:$0xff] }
 0x875   : > { %v10165_v1 = vadd.f32 %v10133_v49, %v10101_v21  ;;  %v10102_v22 = vmax.f32 %v10070_v30, 0.0 }
 0x876   : > { %v10163_v3 = vadd.f32 %v10131_v51, %v10099_v43  ;;  %v10100_v36 = vmax.f32 %v10068_v58, 0.0  ;;  %v13153_v12 = vpop.f32.mrb[88].mxu1 }
 0x877   : > { %10197 = vst [vmem:[%s14347_s21 + $0xb0] sm:$0xff] %v10165_v1  ;;  %v10166_v4 = vadd.f32 %v10134_v10, %v10102_v22  ;;  %v13553_v38 = vadd.f32 %v17855_v32, %v13153_v12  ;;  %v9881_v41 = vpop.f32.mrb[89].mxu1 }
 0x878   : > { %10195 = vst [vmem:[%s14347_s21 + $0xa0] sm:$0xff] %v10163_v3  ;;  %v10164_v59 = vadd.f32 %v10132_v55, %v10100_v36  ;;  %v13556_v13 = vadd.f32 %v17849_v34, %v9881_v41  ;;  %v13154_v50 = vpop.f32.mrb[90].mxu1  ;;  %v10137_v34 = vld [vmem:[%s14347_s21 + $0xd0] sm:$0xff] }
 0x879   : > { %10198 = vst [vmem:[%s14347_s21 + $0xb8] sm:$0xff] %v10166_v4  ;;  %v10073_v26 = vadd.f32 %v13553_v38, %v17875_v46  ;;  %v13559_v47 = vadd.f32 %v17858_v44, %v13154_v50  ;;  %v9884_v0 = vpop.f32.mrb[91].mxu1 }
 0x87a   : > { %10196 = vst [vmem:[%s14347_s21 + $0xa8] sm:$0xff] %v10164_v59  ;;  %v10071_v9 = vadd.f32 %v13556_v13, %v17875_v46  ;;  %v13562_v32 = vadd.f32 %v17852_v54, %v9884_v0  ;;  %v10136_v54 = vld [vmem:[%s14347_s21 + $0xc8] sm:$0xff] }
 0x87b   : > { %v10105_v29 = vmax.f32 %v10073_v26, 0.0  ;;  %v10074_v39 = vadd.f32 %v13559_v47, %v17875_v46 }
 0x87c   : > { %v10103_v15 = vmax.f32 %v10071_v9, 0.0  ;;  %v10072_v28 = vadd.f32 %v13562_v32, %v17875_v46 }
 0x87d   : > { %v10169_v42 = vadd.f32 %v10137_v34, %v10105_v29  ;;  %v10106_v44 = vmax.f32 %v10074_v39, 0.0 }
 0x87e   : > { %v10167_v14 = vadd.f32 %v10135_v24, %v10103_v15  ;;  %v10104_v60 = vmax.f32 %v10072_v28, 0.0  ;;  %v13157_v19 = vpop.f32.mrb[92].mxu1 }
 0x87f   : > { %10201 = vst [vmem:[%s14347_s21 + $0xd0] sm:$0xff] %v10169_v42  ;;  %v10170_v6 = vadd.f32 %v10138_v25, %v10106_v44  ;;  %v13565_v17 = vadd.f32 %v17867_v52, %v13157_v19  ;;  %v9897_v61 = vpop.f32.mrb[93].mxu1 }
 0x880   : > { %10199 = vst [vmem:[%s14347_s21 + $0xc0] sm:$0xff] %v10167_v14  ;;  %v10168_v7 = vadd.f32 %v10136_v54, %v10104_v60  ;;  %v13568_v5 = vadd.f32 %v17861_v2, %v9897_v61  ;;  %v13158_v23 = vpop.f32.mrb[94].mxu1 }
 0x881   : > { %10202 = vst [vmem:[%s14347_s21 + $0xd8] sm:$0xff] %v10170_v6  ;;  %v10077_v20 = vadd.f32 %v13565_v17, %v17875_v46  ;;  %v13571_v27 = vadd.f32 %v17870_v56, %v13158_v23  ;;  %v9900_v57 = vpop.f32.mrb[95].mxu1  ;;  %v10139_v56 = vld [vmem:[%s14347_s21 + $0xe0] sm:$0xff] }
 0x882   : > { %10200 = vst [vmem:[%s14347_s21 + $0xc8] sm:$0xff] %v10168_v7  ;;  %v10075_v63 = vadd.f32 %v13568_v5, %v17875_v46  ;;  %v13574_v52 = vadd.f32 %v17864_v33, %v9900_v57 }
 0x883   : > { %v10109_v37 = vmax.f32 %v10077_v20, 0.0  ;;  %v10078_v2 = vadd.f32 %v13571_v27, %v17875_v46 }
 0x884   : > { %v10107_v40 = vmax.f32 %v10075_v63, 0.0  ;;  %v10076_v45 = vadd.f32 %v13574_v52, %v17875_v46 }
 0x885   : > { %v10173_v8 = vadd.f32 %v10141_v62, %v10109_v37  ;;  %v10110_v53 = vmax.f32 %v10078_v2, 0.0 }
 0x886   : > { %v10171_v35 = vadd.f32 %v10139_v56, %v10107_v40  ;;  %v10108_v11 = vmax.f32 %v10076_v45, 0.0 }
 0x887   : > { %10205 = vst [vmem:[%s14347_s21 + $0xf0] sm:$0xff] %v10173_v8  ;;  %v10174_v18 = vadd.f32 %v10142_v31, %v10110_v53 }
 0x888   : > { %10203 = vst [vmem:[%s14347_s21 + $0xe0] sm:$0xff] %v10171_v35  ;;  %v10172_v33 = vadd.f32 %v10140_v48, %v10108_v11 }
 0x889   : > { %10206 = vst [vmem:[%s14347_s21 + $0xf8] sm:$0xff] %v10174_v18 }
 0x88a   : > { %10204 = vst [vmem:[%s14347_s21 + $0xe8] sm:$0xff] %v10172_v33 }
 0x88b PF: > { %s19_s30 = sadd.s32 1, %s14110_s30  }
 0x88c   : > { %p16_p4 = scmp.ge.s32.totalorder %s19_s30, 4  }
 0x88e   :  { %18 = sbr.rel (!%p16_p4) target bundleno = 1 (0x1), region = 107 }

</bundles_post_ra>
